<compile_context>
chip_gen: v5e
topology: v5e:2x2
jax: 0.10.0
libtpu: 0.0.40
codegen_flags: <defaults>
</compile_context>

<pallas_src>
import math
from functools import partial

import jax
import jax.numpy as jnp
from jax.experimental import pallas as pl
from jax.experimental.pallas import tpu as pltpu


def _round_up(x, m):
    return ((x + m - 1) // m) * m


def _gelu_tanh(x):
    # TODO(synk): PyTorch nn.GELU() default is the exact erf form; the tanh
    # approximation (one EUP transcendental per element) is used here for
    # guaranteed Mosaic lowering.
    c = math.sqrt(2.0 / math.pi)
    return 0.5 * x * (1.0 + jnp.tanh(c * x * (1.0 + 0.044715 * (x * x))))


# ---------------------------------------------------------------------------
# One-time static feature probe: single-buffered grid-invariant weight blocks.
# Trace + compile only (no device execution, no host sync), cached forever.
# ---------------------------------------------------------------------------
_BUFFERED_OK = None


def _buffered_weights_supported():
    global _BUFFERED_OK
    if _BUFFERED_OK is not None:
        return _BUFFERED_OK
    ok = False
    if hasattr(pl, "Buffered"):
        try:
            def _probe_kernel(x_ref, w_ref, o_ref):
                o_ref[...] = x_ref[...] + w_ref[...]

            probe = pl.pallas_call(
                _probe_kernel,
                out_shape=jax.ShapeDtypeStruct((16, 128), jnp.float32),
                grid=(2,),
                in_specs=[
                    pl.BlockSpec((8, 128), lambda i: (i, 0)),
                    pl.BlockSpec((8, 128), lambda i: (0, 0),
                                 pipeline_mode=pl.Buffered(1)),
                ],
                out_specs=pl.BlockSpec((8, 128), lambda i: (i, 0)),
            )
            x_t = jax.ShapeDtypeStruct((16, 128), jnp.float32)
            w_t = jax.ShapeDtypeStruct((8, 128), jnp.float32)
            jax.jit(probe).lower(x_t, w_t).compile()
            ok = True
        except Exception:
            ok = False
    _BUFFERED_OK = ok
    return ok


def _tc_count():
    """TensorCores per chip: v7x (and megacore v4/v5p) = 2, v5e/v6e = 1."""
    try:
        kind = jax.devices()[0].device_kind.lower()
    except Exception:
        return 1
    if "v7" in kind or "v4" in kind or "v5p" in kind:
        return 2
    return 1


def _choose_tm(n_rows, tm_max, n_cores):
    """Token-tile rows.

    Single-TC chips (v5e/v6e): as few grid steps as possible (per-step
    overhead ~0.35 us).  Multi-TC chips (v7x): grid_n a multiple of n_cores
    with >= n_cores steps so both TensorCores get balanced work.
    """
    rows8 = _round_up(max(n_rows, 1), 8)
    tm = min(_round_up(max(tm_max, 8), 8), rows8)
    if n_cores <= 1:
        return tm
    grid = pl.cdiv(n_rows, tm)
    if grid < n_cores or grid % n_cores:
        grid = max(n_cores, _round_up(grid, n_cores))
        tm = max(8, _round_up(pl.cdiv(n_rows, grid), 8))
    return tm


# ---------------------------------------------------------------------------
# Kernel: fused 4-layer MLP head (Linear+GELU x3 -> Linear)
# ---------------------------------------------------------------------------
def _make_outmap_kernel(row_block):
    def kernel(x_ref, w1_ref, b1_ref, w2_ref, b2_ref, w3_ref, b3_ref,
               w4_ref, b4_ref, o_ref):
        f32 = jnp.float32
        rows = x_ref.shape[0]
        c_out = o_ref.shape[1]
        # Row sub-tiling bounds the live activation to (row_block, H4p) f32,
        # easing vreg pressure while keeping the full (tm, H) DMA tile.
        for r0 in range(0, rows, row_block):
            r1 = min(r0 + row_block, rows)
            xb = x_ref[r0:r1, :].astype(w1_ref.dtype)          # bf16 MXU operand
            h = jnp.dot(xb, w1_ref[...], preferred_element_type=f32) + b1_ref[...]
            h = _gelu_tanh(h)
            h = jnp.dot(h.astype(w2_ref.dtype), w2_ref[...],
                        preferred_element_type=f32) + b2_ref[...]
            h = _gelu_tanh(h)
            h = jnp.dot(h.astype(w3_ref.dtype), w3_ref[...],
                        preferred_element_type=f32) + b3_ref[...]
            h = _gelu_tanh(h)
            out = jnp.dot(h.astype(w4_ref.dtype), w4_ref[...],
                          preferred_element_type=f32) + b4_ref[...]
            o_ref[r0:r1, :] = out[:, :c_out].astype(o_ref.dtype)
    return kernel


# ---------------------------------------------------------------------------
# One-time parameter preparation (hoisted out of the per-call path)
# ---------------------------------------------------------------------------
def prepare_outmap_params(params):
    """Convert the 4 (W, b) pairs to the kernel layout once: bf16 weights with
    the 4H (and output) feature dims zero-padded to multiples of 128, f32
    biases. Zero padding is mathematically exact. Cache and reuse the result
    across forward calls."""
    (w1, b1), (w2, b2), (w3, b3), (w4, b4) = params
    H, H4 = w1.shape
    C = w4.shape[1]
    H4p = _round_up(H4, 128)
    Cp = _round_up(C, 128)
    bf16, f32 = jnp.bfloat16, jnp.float32

    def pad2(a, r, c, dtype):
        a = a.reshape((1, -1)) if a.ndim == 1 else a
        return jnp.pad(a, ((0, r - a.shape[0]), (0, c - a.shape[1]))).astype(dtype)

    prepped = (
        pad2(w1, H, H4p, bf16),   pad2(b1, 1, H4p, f32),
        pad2(w2, H4p, H4p, bf16), pad2(b2, 1, H4p, f32),
        pad2(w3, H4p, H4p, bf16), pad2(b3, 1, H4p, f32),
        pad2(w4, H4p, Cp, bf16),  pad2(b4, 1, Cp, f32),
    )
    _buffered_weights_supported()   # warm the one-time spec probe (outside jit)
    return prepped, C


def _outmap_pallas(x, prepped, c_out, *, tm, row_block):
    """x: (N, H) float32. prepped: padded bf16 weights / f32 biases."""
    N, H = x.shape
    w1p, b1p, w2p, b2p, w3p, b3p, w4p, b4p = prepped
    H4p = w1p.shape[1]
    Cp = w4p.shape[1]

    n_cores = _tc_count()
    tm_eff = _choose_tm(N, tm, n_cores)
    grid_n = pl.cdiv(N, tm_eff)
    rb = max(8, min(_round_up(row_block, 8), tm_eff))

    single_buf = _buffered_weights_supported()

    def wspec(shape):
        if single_buf:
            # Grid-invariant blocks are never re-fetched: one VMEM buffer is
            # enough (halves their footprint).
            return pl.BlockSpec(shape, lambda i: (0, 0),
                                pipeline_mode=pl.Buffered(1))
        return pl.BlockSpec(shape, lambda i: (0, 0))

    # VMEM budget estimate (bytes); only raise the scoped limit when the
    # estimate approaches v5e's 16 MiB default (v6e/v7x default is 32 MiB).
    lane = lambda c: _round_up(c, 128)
    wbuf = 1 if single_buf else 2
    est = (2 * tm_eff * lane(H) * 4                       # x blocks (dbl-buffered)
           + 2 * tm_eff * lane(c_out) * 4                 # out blocks
           + wbuf * (H * lane(H4p) + 2 * H4p * lane(H4p) + H4p * lane(Cp)) * 2
           + wbuf * (3 * lane(H4p) + lane(Cp)) * 4        # biases
           + 4 * rb * lane(H4p) * 4)                      # live activations / spill
    cp_kwargs = dict(
        dimension_semantics=("parallel",) if grid_n > 1 else ("arbitrary",))
    if est > (12 << 20):
        cp_kwargs["vmem_limit_bytes"] = int(min(max(2 * est, 16 << 20), 48 << 20))

    return pl.pallas_call(
        _make_outmap_kernel(rb),
        out_shape=jax.ShapeDtypeStruct((N, c_out), jnp.float32),
        grid=(grid_n,),
        in_specs=[
            pl.BlockSpec((tm_eff, H), lambda i: (i, 0)),   # token tile (H = full dim)
            wspec((H, H4p)),   wspec((1, H4p)),            # layer 1
            wspec((H4p, H4p)), wspec((1, H4p)),            # layer 2
            wspec((H4p, H4p)), wspec((1, H4p)),            # layer 3
            wspec((H4p, Cp)),  wspec((1, Cp)),             # layer 4 (no act)
        ],
        out_specs=pl.BlockSpec((tm_eff, c_out), lambda i: (i, 0)),
        compiler_params=pltpu.CompilerParams(**cp_kwargs),
    )(x, w1p, b1p, w2p, b2p, w3p, b3p, w4p, b4p)


@partial(jax.jit, static_argnames=("c_out", "tm", "row_block"))
def multi_grid_model_forward(xl, prepped, c_out, tm=1024, row_block=256):
    """Reproduces `self.outmap(xl).squeeze(0)` of multi_grid_model.forward.

    xl: (1, N, final_hidden) — output of the (untranslatable) local_model.
    prepped: first element returned by prepare_outmap_params(params).
    returns: (N, out_channels), float32.
    """
    B, N, H = xl.shape          # B == 1 in the reference forward
    x = xl.reshape(B * N, H)
    return _outmap_pallas(x, prepped, c_out, tm=tm, row_block=row_block)


# ---------------------------------------------------------------------------
# Deterministic parameter init (PyTorch nn.Linear default: U(-1/sqrt(fan_in), +))
# ---------------------------------------------------------------------------
def _init_linear(key, fan_in, fan_out):
    kw, kb = jax.random.split(key)
    bound = 1.0 / math.sqrt(fan_in)
    w = jax.random.uniform(kw, (fan_in, fan_out), jnp.float32, -bound, bound)
    b = jax.random.uniform(kb, (1, fan_out), jnp.float32, -bound, bound)
    return w, b


def init_outmap_params(key, final_hidden, out_channels):
    k1, k2, k3, k4 = jax.random.split(key, 4)
    h4 = 4 * final_hidden
    return [
        _init_linear(k1, final_hidden, h4),
        _init_linear(k2, h4, h4),
        _init_linear(k3, h4, h4),
        _init_linear(k4, h4, out_channels),
    ]


def _outmap_ref(x, params):
    """Pure-JAX reference of the outmap head (same tanh-GELU, same bf16 matmuls).

    TODO(synk): this validates the kernel against its own precision choices
    (bf16 MXU operands, tanh GELU), not against the exact-erf f32 PyTorch head.
    """
    def mm(a, w):
        return jnp.dot(a.astype(jnp.bfloat16), w.astype(jnp.bfloat16),
                       preferred_element_type=jnp.float32)

    (w1, b1), (w2, b2), (w3, b3), (w4, b4) = params
    h = _gelu_tanh(mm(x, w1) + b1)
    h = _gelu_tanh(mm(h, w2) + b2)
    h = _gelu_tanh(mm(h, w3) + b3)
    return mm(h, w4) + b4


if __name__ == "__main__":
    # Small shapes consistent with the module: final_hidden = hidden_dim = 32,
    # out_channels = 4, N = 1024 mesh points, batch B = 1 (graph.x.unsqueeze(0)).
    # On v7x the grid is 2x512 "parallel" steps (both TensorCores busy); on
    # v5e/v6e it is a single 1024-row step (no wasted per-step overhead).
    hidden_dim = 32
    out_channels = 4
    N = 1024

    key = jax.random.PRNGKey(0)
    k_x, k_p = jax.random.split(key)

    # Stand-in for the local_model output xl (1, N, final_hidden).
    xl = jax.random.normal(k_x, (1, N, hidden_dim), dtype=jnp.float32)
    params = init_outmap_params(k_p, hidden_dim, out_channels)

    # One-time weight padding / bf16 cast (cached, reused every forward).
    prepped, c_out = prepare_outmap_params(params)

    out = multi_grid_model_forward(xl, prepped, c_out)
    out = jax.block_until_ready(out)

    ref = _outmap_ref(xl.reshape(N, hidden_dim), params)
    assert out.shape == (N, out_channels), out.shape
    max_err = float(jnp.max(jnp.abs(out - ref)))
    assert max_err < 5e-3, f"Pallas output mismatch vs reference (max abs err {max_err})"

    print("KERNEL_OK")
</pallas_src>

<mosaic_0001>
module attributes {stable_mosaic.version = 11 : i64} {
  func.func @kernel(%arg0: i32, %arg1: memref<1024x32xf32, #tpu.memory_space<vmem>>, %arg2: memref<32x128xbf16, #tpu.memory_space<vmem>>, %arg3: memref<1x128xf32, #tpu.memory_space<vmem>>, %arg4: memref<128x128xbf16, #tpu.memory_space<vmem>>, %arg5: memref<1x128xf32, #tpu.memory_space<vmem>>, %arg6: memref<128x128xbf16, #tpu.memory_space<vmem>>, %arg7: memref<1x128xf32, #tpu.memory_space<vmem>>, %arg8: memref<128x128xbf16, #tpu.memory_space<vmem>>, %arg9: memref<1x128xf32, #tpu.memory_space<vmem>>, %arg10: memref<1024x4xf32, #tpu.memory_space<vmem>>) attributes {dimension_semantics = [#tpu.dimension_semantics<arbitrary>], iteration_bounds = array<i64: 1>, scalar_prefetch = 0 : i64, scratch_operands = 0 : i64, tpu.core_type = #tpu.core_type<tc>, window_params = [{transform_indices = @transform_0, window_bounds = array<i64: 1024, 32>}, {pipeline_mode = #tpu.pipeline_mode<synchronous>, transform_indices = @transform_1, window_bounds = array<i64: 32, 128>}, {pipeline_mode = #tpu.pipeline_mode<synchronous>, transform_indices = @transform_2, window_bounds = array<i64: 1, 128>}, {pipeline_mode = #tpu.pipeline_mode<synchronous>, transform_indices = @transform_3, window_bounds = array<i64: 128, 128>}, {pipeline_mode = #tpu.pipeline_mode<synchronous>, transform_indices = @transform_4, window_bounds = array<i64: 1, 128>}, {pipeline_mode = #tpu.pipeline_mode<synchronous>, transform_indices = @transform_5, window_bounds = array<i64: 128, 128>}, {pipeline_mode = #tpu.pipeline_mode<synchronous>, transform_indices = @transform_6, window_bounds = array<i64: 1, 128>}, {pipeline_mode = #tpu.pipeline_mode<synchronous>, transform_indices = @transform_7, window_bounds = array<i64: 128, 128>}, {pipeline_mode = #tpu.pipeline_mode<synchronous>, transform_indices = @transform_8, window_bounds = array<i64: 1, 128>}, {transform_indices = @transform_9, window_bounds = array<i64: 1024, 4>}]} {
    %c0 = arith.constant 0 : index
    %c0_0 = arith.constant 0 : index
    %0 = vector.load %arg1[%c0, %c0_0] : memref<1024x32xf32, #tpu.memory_space<vmem>>, vector<256x32xf32>
    %1 = arith.truncf %0 : vector<256x32xf32> to vector<256x32xbf16>
    %c0_1 = arith.constant 0 : index
    %c0_2 = arith.constant 0 : index
    %2 = vector.load %arg2[%c0_1, %c0_2] : memref<32x128xbf16, #tpu.memory_space<vmem>>, vector<32x128xbf16>
    %cst = arith.constant dense<0.000000e+00> : vector<256x128xf32>
    %3 = tpu.matmul %1, %2, %cst {dimension_numbers = #tpu.dot_dimension_numbers<[1], [0], [0], [1], [0, 0, 1, 1], [], []>} : vector<256x32xbf16>, vector<32x128xbf16>, vector<256x128xf32> -> vector<256x128xf32>
    %c0_3 = arith.constant 0 : index
    %c0_4 = arith.constant 0 : index
    %4 = vector.load %arg3[%c0_3, %c0_4] : memref<1x128xf32, #tpu.memory_space<vmem>>, vector<1x128xf32>
    %5 = vector.broadcast %4 : vector<1x128xf32> to vector<256x128xf32>
    %6 = arith.addf %3, %5 : vector<256x128xf32>
    %cst_5 = arith.constant 5.000000e-01 : f32
    %7 = vector.broadcast %cst_5 : f32 to vector<256x128xf32>
    %8 = arith.mulf %7, %6 : vector<256x128xf32>
    %cst_6 = arith.constant 0.797884583 : f32
    %9 = vector.broadcast %cst_6 : f32 to vector<256x128xf32>
    %10 = arith.mulf %9, %6 : vector<256x128xf32>
    %11 = arith.mulf %6, %6 : vector<256x128xf32>
    %cst_7 = arith.constant 4.471500e-02 : f32
    %12 = vector.broadcast %cst_7 : f32 to vector<256x128xf32>
    %13 = arith.mulf %12, %11 : vector<256x128xf32>
    %cst_8 = arith.constant 1.000000e+00 : f32
    %14 = vector.broadcast %cst_8 : f32 to vector<256x128xf32>
    %15 = arith.addf %14, %13 : vector<256x128xf32>
    %16 = arith.mulf %10, %15 : vector<256x128xf32>
    %17 = math.tanh %16 : vector<256x128xf32>
    %cst_9 = arith.constant 1.000000e+00 : f32
    %18 = vector.broadcast %cst_9 : f32 to vector<256x128xf32>
    %19 = arith.addf %18, %17 : vector<256x128xf32>
    %20 = arith.mulf %8, %19 : vector<256x128xf32>
    %21 = arith.truncf %20 : vector<256x128xf32> to vector<256x128xbf16>
    %c0_10 = arith.constant 0 : index
    %c0_11 = arith.constant 0 : index
    %22 = vector.load %arg4[%c0_10, %c0_11] : memref<128x128xbf16, #tpu.memory_space<vmem>>, vector<128x128xbf16>
    %cst_12 = arith.constant dense<0.000000e+00> : vector<256x128xf32>
    %23 = tpu.matmul %21, %22, %cst_12 {dimension_numbers = #tpu.dot_dimension_numbers<[1], [0], [0], [1], [0, 0, 1, 1], [], []>} : vector<256x128xbf16>, vector<128x128xbf16>, vector<256x128xf32> -> vector<256x128xf32>
    %c0_13 = arith.constant 0 : index
    %c0_14 = arith.constant 0 : index
    %24 = vector.load %arg5[%c0_13, %c0_14] : memref<1x128xf32, #tpu.memory_space<vmem>>, vector<1x128xf32>
    %25 = vector.broadcast %24 : vector<1x128xf32> to vector<256x128xf32>
    %26 = arith.addf %23, %25 : vector<256x128xf32>
    %cst_15 = arith.constant 5.000000e-01 : f32
    %27 = vector.broadcast %cst_15 : f32 to vector<256x128xf32>
    %28 = arith.mulf %27, %26 : vector<256x128xf32>
    %cst_16 = arith.constant 0.797884583 : f32
    %29 = vector.broadcast %cst_16 : f32 to vector<256x128xf32>
    %30 = arith.mulf %29, %26 : vector<256x128xf32>
    %31 = arith.mulf %26, %26 : vector<256x128xf32>
    %cst_17 = arith.constant 4.471500e-02 : f32
    %32 = vector.broadcast %cst_17 : f32 to vector<256x128xf32>
    %33 = arith.mulf %32, %31 : vector<256x128xf32>
    %cst_18 = arith.constant 1.000000e+00 : f32
    %34 = vector.broadcast %cst_18 : f32 to vector<256x128xf32>
    %35 = arith.addf %34, %33 : vector<256x128xf32>
    %36 = arith.mulf %30, %35 : vector<256x128xf32>
    %37 = math.tanh %36 : vector<256x128xf32>
    %cst_19 = arith.constant 1.000000e+00 : f32
    %38 = vector.broadcast %cst_19 : f32 to vector<256x128xf32>
    %39 = arith.addf %38, %37 : vector<256x128xf32>
    %40 = arith.mulf %28, %39 : vector<256x128xf32>
    %41 = arith.truncf %40 : vector<256x128xf32> to vector<256x128xbf16>
    %c0_20 = arith.constant 0 : index
    %c0_21 = arith.constant 0 : index
    %42 = vector.load %arg6[%c0_20, %c0_21] : memref<128x128xbf16, #tpu.memory_space<vmem>>, vector<128x128xbf16>
    %cst_22 = arith.constant dense<0.000000e+00> : vector<256x128xf32>
    %43 = tpu.matmul %41, %42, %cst_22 {dimension_numbers = #tpu.dot_dimension_numbers<[1], [0], [0], [1], [0, 0, 1, 1], [], []>} : vector<256x128xbf16>, vector<128x128xbf16>, vector<256x128xf32> -> vector<256x128xf32>
    %c0_23 = arith.constant 0 : index
    %c0_24 = arith.constant 0 : index
    %44 = vector.load %arg7[%c0_23, %c0_24] : memref<1x128xf32, #tpu.memory_space<vmem>>, vector<1x128xf32>
    %45 = vector.broadcast %44 : vector<1x128xf32> to vector<256x128xf32>
    %46 = arith.addf %43, %45 : vector<256x128xf32>
    %cst_25 = arith.constant 5.000000e-01 : f32
    %47 = vector.broadcast %cst_25 : f32 to vector<256x128xf32>
    %48 = arith.mulf %47, %46 : vector<256x128xf32>
    %cst_26 = arith.constant 0.797884583 : f32
    %49 = vector.broadcast %cst_26 : f32 to vector<256x128xf32>
    %50 = arith.mulf %49, %46 : vector<256x128xf32>
    %51 = arith.mulf %46, %46 : vector<256x128xf32>
    %cst_27 = arith.constant 4.471500e-02 : f32
    %52 = vector.broadcast %cst_27 : f32 to vector<256x128xf32>
    %53 = arith.mulf %52, %51 : vector<256x128xf32>
    %cst_28 = arith.constant 1.000000e+00 : f32
    %54 = vector.broadcast %cst_28 : f32 to vector<256x128xf32>
    %55 = arith.addf %54, %53 : vector<256x128xf32>
    %56 = arith.mulf %50, %55 : vector<256x128xf32>
    %57 = math.tanh %56 : vector<256x128xf32>
    %cst_29 = arith.constant 1.000000e+00 : f32
    %58 = vector.broadcast %cst_29 : f32 to vector<256x128xf32>
    %59 = arith.addf %58, %57 : vector<256x128xf32>
    %60 = arith.mulf %48, %59 : vector<256x128xf32>
    %61 = arith.truncf %60 : vector<256x128xf32> to vector<256x128xbf16>
    %c0_30 = arith.constant 0 : index
    %c0_31 = arith.constant 0 : index
    %62 = vector.load %arg8[%c0_30, %c0_31] : memref<128x128xbf16, #tpu.memory_space<vmem>>, vector<128x128xbf16>
    %cst_32 = arith.constant dense<0.000000e+00> : vector<256x128xf32>
    %63 = tpu.matmul %61, %62, %cst_32 {dimension_numbers = #tpu.dot_dimension_numbers<[1], [0], [0], [1], [0, 0, 1, 1], [], []>} : vector<256x128xbf16>, vector<128x128xbf16>, vector<256x128xf32> -> vector<256x128xf32>
    %c0_33 = arith.constant 0 : index
    %c0_34 = arith.constant 0 : index
    %64 = vector.load %arg9[%c0_33, %c0_34] : memref<1x128xf32, #tpu.memory_space<vmem>>, vector<1x128xf32>
    %65 = vector.broadcast %64 : vector<1x128xf32> to vector<256x128xf32>
    %66 = arith.addf %63, %65 : vector<256x128xf32>
    %67 = vector.extract_strided_slice %66 {offsets = [0, 0], sizes = [256, 4], strides = [1, 1]} : vector<256x128xf32> to vector<256x4xf32>
    %c0_35 = arith.constant 0 : index
    %c0_36 = arith.constant 0 : index
    %68 = vector.load %arg10[%c0_35, %c0_36] : memref<1024x4xf32, #tpu.memory_space<vmem>>, vector<256x4xf32>
    tpu.vector_store %arg10[%c0_35, %c0_36], %67 {strides = array<i32>} : memref<1024x4xf32, #tpu.memory_space<vmem>>, vector<256x4xf32>,
    %c256 = arith.constant 256 : index
    %c0_37 = arith.constant 0 : index
    %69 = vector.load %arg1[%c256, %c0_37] : memref<1024x32xf32, #tpu.memory_space<vmem>>, vector<256x32xf32>
    %70 = arith.truncf %69 : vector<256x32xf32> to vector<256x32xbf16>
    %c0_38 = arith.constant 0 : index
    %c0_39 = arith.constant 0 : index
    %71 = vector.load %arg2[%c0_38, %c0_39] : memref<32x128xbf16, #tpu.memory_space<vmem>>, vector<32x128xbf16>
    %cst_40 = arith.constant dense<0.000000e+00> : vector<256x128xf32>
    %72 = tpu.matmul %70, %71, %cst_40 {dimension_numbers = #tpu.dot_dimension_numbers<[1], [0], [0], [1], [0, 0, 1, 1], [], []>} : vector<256x32xbf16>, vector<32x128xbf16>, vector<256x128xf32> -> vector<256x128xf32>
    %c0_41 = arith.constant 0 : index
    %c0_42 = arith.constant 0 : index
    %73 = vector.load %arg3[%c0_41, %c0_42] : memref<1x128xf32, #tpu.memory_space<vmem>>, vector<1x128xf32>
    %74 = vector.broadcast %73 : vector<1x128xf32> to vector<256x128xf32>
    %75 = arith.addf %72, %74 : vector<256x128xf32>
    %cst_43 = arith.constant 5.000000e-01 : f32
    %76 = vector.broadcast %cst_43 : f32 to vector<256x128xf32>
    %77 = arith.mulf %76, %75 : vector<256x128xf32>
    %cst_44 = arith.constant 0.797884583 : f32
    %78 = vector.broadcast %cst_44 : f32 to vector<256x128xf32>
    %79 = arith.mulf %78, %75 : vector<256x128xf32>
    %80 = arith.mulf %75, %75 : vector<256x128xf32>
    %cst_45 = arith.constant 4.471500e-02 : f32
    %81 = vector.broadcast %cst_45 : f32 to vector<256x128xf32>
    %82 = arith.mulf %81, %80 : vector<256x128xf32>
    %cst_46 = arith.constant 1.000000e+00 : f32
    %83 = vector.broadcast %cst_46 : f32 to vector<256x128xf32>
    %84 = arith.addf %83, %82 : vector<256x128xf32>
    %85 = arith.mulf %79, %84 : vector<256x128xf32>
    %86 = math.tanh %85 : vector<256x128xf32>
    %cst_47 = arith.constant 1.000000e+00 : f32
    %87 = vector.broadcast %cst_47 : f32 to vector<256x128xf32>
    %88 = arith.addf %87, %86 : vector<256x128xf32>
    %89 = arith.mulf %77, %88 : vector<256x128xf32>
    %90 = arith.truncf %89 : vector<256x128xf32> to vector<256x128xbf16>
    %c0_48 = arith.constant 0 : index
    %c0_49 = arith.constant 0 : index
    %91 = vector.load %arg4[%c0_48, %c0_49] : memref<128x128xbf16, #tpu.memory_space<vmem>>, vector<128x128xbf16>
    %cst_50 = arith.constant dense<0.000000e+00> : vector<256x128xf32>
    %92 = tpu.matmul %90, %91, %cst_50 {dimension_numbers = #tpu.dot_dimension_numbers<[1], [0], [0], [1], [0, 0, 1, 1], [], []>} : vector<256x128xbf16>, vector<128x128xbf16>, vector<256x128xf32> -> vector<256x128xf32>
    %c0_51 = arith.constant 0 : index
    %c0_52 = arith.constant 0 : index
    %93 = vector.load %arg5[%c0_51, %c0_52] : memref<1x128xf32, #tpu.memory_space<vmem>>, vector<1x128xf32>
    %94 = vector.broadcast %93 : vector<1x128xf32> to vector<256x128xf32>
    %95 = arith.addf %92, %94 : vector<256x128xf32>
    %cst_53 = arith.constant 5.000000e-01 : f32
    %96 = vector.broadcast %cst_53 : f32 to vector<256x128xf32>
    %97 = arith.mulf %96, %95 : vector<256x128xf32>
    %cst_54 = arith.constant 0.797884583 : f32
    %98 = vector.broadcast %cst_54 : f32 to vector<256x128xf32>
    %99 = arith.mulf %98, %95 : vector<256x128xf32>
    %100 = arith.mulf %95, %95 : vector<256x128xf32>
    %cst_55 = arith.constant 4.471500e-02 : f32
    %101 = vector.broadcast %cst_55 : f32 to vector<256x128xf32>
    %102 = arith.mulf %101, %100 : vector<256x128xf32>
    %cst_56 = arith.constant 1.000000e+00 : f32
    %103 = vector.broadcast %cst_56 : f32 to vector<256x128xf32>
    %104 = arith.addf %103, %102 : vector<256x128xf32>
    %105 = arith.mulf %99, %104 : vector<256x128xf32>
    %106 = math.tanh %105 : vector<256x128xf32>
    %cst_57 = arith.constant 1.000000e+00 : f32
    %107 = vector.broadcast %cst_57 : f32 to vector<256x128xf32>
    %108 = arith.addf %107, %106 : vector<256x128xf32>
    %109 = arith.mulf %97, %108 : vector<256x128xf32>
    %110 = arith.truncf %109 : vector<256x128xf32> to vector<256x128xbf16>
    %c0_58 = arith.constant 0 : index
    %c0_59 = arith.constant 0 : index
    %111 = vector.load %arg6[%c0_58, %c0_59] : memref<128x128xbf16, #tpu.memory_space<vmem>>, vector<128x128xbf16>
    %cst_60 = arith.constant dense<0.000000e+00> : vector<256x128xf32>
    %112 = tpu.matmul %110, %111, %cst_60 {dimension_numbers = #tpu.dot_dimension_numbers<[1], [0], [0], [1], [0, 0, 1, 1], [], []>} : vector<256x128xbf16>, vector<128x128xbf16>, vector<256x128xf32> -> vector<256x128xf32>
    %c0_61 = arith.constant 0 : index
    %c0_62 = arith.constant 0 : index
    %113 = vector.load %arg7[%c0_61, %c0_62] : memref<1x128xf32, #tpu.memory_space<vmem>>, vector<1x128xf32>
    %114 = vector.broadcast %113 : vector<1x128xf32> to vector<256x128xf32>
    %115 = arith.addf %112, %114 : vector<256x128xf32>
    %cst_63 = arith.constant 5.000000e-01 : f32
    %116 = vector.broadcast %cst_63 : f32 to vector<256x128xf32>
    %117 = arith.mulf %116, %115 : vector<256x128xf32>
    %cst_64 = arith.constant 0.797884583 : f32
    %118 = vector.broadcast %cst_64 : f32 to vector<256x128xf32>
    %119 = arith.mulf %118, %115 : vector<256x128xf32>
    %120 = arith.mulf %115, %115 : vector<256x128xf32>
    %cst_65 = arith.constant 4.471500e-02 : f32
    %121 = vector.broadcast %cst_65 : f32 to vector<256x128xf32>
    %122 = arith.mulf %121, %120 : vector<256x128xf32>
    %cst_66 = arith.constant 1.000000e+00 : f32
    %123 = vector.broadcast %cst_66 : f32 to vector<256x128xf32>
    %124 = arith.addf %123, %122 : vector<256x128xf32>
    %125 = arith.mulf %119, %124 : vector<256x128xf32>
    %126 = math.tanh %125 : vector<256x128xf32>
    %cst_67 = arith.constant 1.000000e+00 : f32
    %127 = vector.broadcast %cst_67 : f32 to vector<256x128xf32>
    %128 = arith.addf %127, %126 : vector<256x128xf32>
    %129 = arith.mulf %117, %128 : vector<256x128xf32>
    %130 = arith.truncf %129 : vector<256x128xf32> to vector<256x128xbf16>
    %c0_68 = arith.constant 0 : index
    %c0_69 = arith.constant 0 : index
    %131 = vector.load %arg8[%c0_68, %c0_69] : memref<128x128xbf16, #tpu.memory_space<vmem>>, vector<128x128xbf16>
    %cst_70 = arith.constant dense<0.000000e+00> : vector<256x128xf32>
    %132 = tpu.matmul %130, %131, %cst_70 {dimension_numbers = #tpu.dot_dimension_numbers<[1], [0], [0], [1], [0, 0, 1, 1], [], []>} : vector<256x128xbf16>, vector<128x128xbf16>, vector<256x128xf32> -> vector<256x128xf32>
    %c0_71 = arith.constant 0 : index
    %c0_72 = arith.constant 0 : index
    %133 = vector.load %arg9[%c0_71, %c0_72] : memref<1x128xf32, #tpu.memory_space<vmem>>, vector<1x128xf32>
    %134 = vector.broadcast %133 : vector<1x128xf32> to vector<256x128xf32>
    %135 = arith.addf %132, %134 : vector<256x128xf32>
    %136 = vector.extract_strided_slice %135 {offsets = [0, 0], sizes = [256, 4], strides = [1, 1]} : vector<256x128xf32> to vector<256x4xf32>
    %c256_73 = arith.constant 256 : index
    %c0_74 = arith.constant 0 : index
    %137 = vector.load %arg10[%c256_73, %c0_74] : memref<1024x4xf32, #tpu.memory_space<vmem>>, vector<256x4xf32>
    tpu.vector_store %arg10[%c256_73, %c0_74], %136 {strides = array<i32>} : memref<1024x4xf32, #tpu.memory_space<vmem>>, vector<256x4xf32>,
    %c512 = arith.constant 512 : index
    %c0_75 = arith.constant 0 : index
    %138 = vector.load %arg1[%c512, %c0_75] : memref<1024x32xf32, #tpu.memory_space<vmem>>, vector<256x32xf32>
    %139 = arith.truncf %138 : vector<256x32xf32> to vector<256x32xbf16>
    %c0_76 = arith.constant 0 : index
    %c0_77 = arith.constant 0 : index
    %140 = vector.load %arg2[%c0_76, %c0_77] : memref<32x128xbf16, #tpu.memory_space<vmem>>, vector<32x128xbf16>
    %cst_78 = arith.constant dense<0.000000e+00> : vector<256x128xf32>
    %141 = tpu.matmul %139, %140, %cst_78 {dimension_numbers = #tpu.dot_dimension_numbers<[1], [0], [0], [1], [0, 0, 1, 1], [], []>} : vector<256x32xbf16>, vector<32x128xbf16>, vector<256x128xf32> -> vector<256x128xf32>
    %c0_79 = arith.constant 0 : index
    %c0_80 = arith.constant 0 : index
    %142 = vector.load %arg3[%c0_79, %c0_80] : memref<1x128xf32, #tpu.memory_space<vmem>>, vector<1x128xf32>
    %143 = vector.broadcast %142 : vector<1x128xf32> to vector<256x128xf32>
    %144 = arith.addf %141, %143 : vector<256x128xf32>
    %cst_81 = arith.constant 5.000000e-01 : f32
    %145 = vector.broadcast %cst_81 : f32 to vector<256x128xf32>
    %146 = arith.mulf %145, %144 : vector<256x128xf32>
    %cst_82 = arith.constant 0.797884583 : f32
    %147 = vector.broadcast %cst_82 : f32 to vector<256x128xf32>
    %148 = arith.mulf %147, %144 : vector<256x128xf32>
    %149 = arith.mulf %144, %144 : vector<256x128xf32>
    %cst_83 = arith.constant 4.471500e-02 : f32
    %150 = vector.broadcast %cst_83 : f32 to vector<256x128xf32>
    %151 = arith.mulf %150, %149 : vector<256x128xf32>
    %cst_84 = arith.constant 1.000000e+00 : f32
    %152 = vector.broadcast %cst_84 : f32 to vector<256x128xf32>
    %153 = arith.addf %152, %151 : vector<256x128xf32>
    %154 = arith.mulf %148, %153 : vector<256x128xf32>
    %155 = math.tanh %154 : vector<256x128xf32>
    %cst_85 = arith.constant 1.000000e+00 : f32
    %156 = vector.broadcast %cst_85 : f32 to vector<256x128xf32>
    %157 = arith.addf %156, %155 : vector<256x128xf32>
    %158 = arith.mulf %146, %157 : vector<256x128xf32>
    %159 = arith.truncf %158 : vector<256x128xf32> to vector<256x128xbf16>
    %c0_86 = arith.constant 0 : index
    %c0_87 = arith.constant 0 : index
    %160 = vector.load %arg4[%c0_86, %c0_87] : memref<128x128xbf16, #tpu.memory_space<vmem>>, vector<128x128xbf16>
    %cst_88 = arith.constant dense<0.000000e+00> : vector<256x128xf32>
    %161 = tpu.matmul %159, %160, %cst_88 {dimension_numbers = #tpu.dot_dimension_numbers<[1], [0], [0], [1], [0, 0, 1, 1], [], []>} : vector<256x128xbf16>, vector<128x128xbf16>, vector<256x128xf32> -> vector<256x128xf32>
    %c0_89 = arith.constant 0 : index
    %c0_90 = arith.constant 0 : index
    %162 = vector.load %arg5[%c0_89, %c0_90] : memref<1x128xf32, #tpu.memory_space<vmem>>, vector<1x128xf32>
    %163 = vector.broadcast %162 : vector<1x128xf32> to vector<256x128xf32>
    %164 = arith.addf %161, %163 : vector<256x128xf32>
    %cst_91 = arith.constant 5.000000e-01 : f32
    %165 = vector.broadcast %cst_91 : f32 to vector<256x128xf32>
    %166 = arith.mulf %165, %164 : vector<256x128xf32>
    %cst_92 = arith.constant 0.797884583 : f32
    %167 = vector.broadcast %cst_92 : f32 to vector<256x128xf32>
    %168 = arith.mulf %167, %164 : vector<256x128xf32>
    %169 = arith.mulf %164, %164 : vector<256x128xf32>
    %cst_93 = arith.constant 4.471500e-02 : f32
    %170 = vector.broadcast %cst_93 : f32 to vector<256x128xf32>
    %171 = arith.mulf %170, %169 : vector<256x128xf32>
    %cst_94 = arith.constant 1.000000e+00 : f32
    %172 = vector.broadcast %cst_94 : f32 to vector<256x128xf32>
    %173 = arith.addf %172, %171 : vector<256x128xf32>
    %174 = arith.mulf %168, %173 : vector<256x128xf32>
    %175 = math.tanh %174 : vector<256x128xf32>
    %cst_95 = arith.constant 1.000000e+00 : f32
    %176 = vector.broadcast %cst_95 : f32 to vector<256x128xf32>
    %177 = arith.addf %176, %175 : vector<256x128xf32>
    %178 = arith.mulf %166, %177 : vector<256x128xf32>
    %179 = arith.truncf %178 : vector<256x128xf32> to vector<256x128xbf16>
    %c0_96 = arith.constant 0 : index
    %c0_97 = arith.constant 0 : index
    %180 = vector.load %arg6[%c0_96, %c0_97] : memref<128x128xbf16, #tpu.memory_space<vmem>>, vector<128x128xbf16>
    %cst_98 = arith.constant dense<0.000000e+00> : vector<256x128xf32>
    %181 = tpu.matmul %179, %180, %cst_98 {dimension_numbers = #tpu.dot_dimension_numbers<[1], [0], [0], [1], [0, 0, 1, 1], [], []>} : vector<256x128xbf16>, vector<128x128xbf16>, vector<256x128xf32> -> vector<256x128xf32>
    %c0_99 = arith.constant 0 : index
    %c0_100 = arith.constant 0 : index
    %182 = vector.load %arg7[%c0_99, %c0_100] : memref<1x128xf32, #tpu.memory_space<vmem>>, vector<1x128xf32>
    %183 = vector.broadcast %182 : vector<1x128xf32> to vector<256x128xf32>
    %184 = arith.addf %181, %183 : vector<256x128xf32>
    %cst_101 = arith.constant 5.000000e-01 : f32
    %185 = vector.broadcast %cst_101 : f32 to vector<256x128xf32>
    %186 = arith.mulf %185, %184 : vector<256x128xf32>
    %cst_102 = arith.constant 0.797884583 : f32
    %187 = vector.broadcast %cst_102 : f32 to vector<256x128xf32>
    %188 = arith.mulf %187, %184 : vector<256x128xf32>
    %189 = arith.mulf %184, %184 : vector<256x128xf32>
    %cst_103 = arith.constant 4.471500e-02 : f32
    %190 = vector.broadcast %cst_103 : f32 to vector<256x128xf32>
    %191 = arith.mulf %190, %189 : vector<256x128xf32>
    %cst_104 = arith.constant 1.000000e+00 : f32
    %192 = vector.broadcast %cst_104 : f32 to vector<256x128xf32>
    %193 = arith.addf %192, %191 : vector<256x128xf32>
    %194 = arith.mulf %188, %193 : vector<256x128xf32>
    %195 = math.tanh %194 : vector<256x128xf32>
    %cst_105 = arith.constant 1.000000e+00 : f32
    %196 = vector.broadcast %cst_105 : f32 to vector<256x128xf32>
    %197 = arith.addf %196, %195 : vector<256x128xf32>
    %198 = arith.mulf %186, %197 : vector<256x128xf32>
    %199 = arith.truncf %198 : vector<256x128xf32> to vector<256x128xbf16>
    %c0_106 = arith.constant 0 : index
    %c0_107 = arith.constant 0 : index
    %200 = vector.load %arg8[%c0_106, %c0_107] : memref<128x128xbf16, #tpu.memory_space<vmem>>, vector<128x128xbf16>
    %cst_108 = arith.constant dense<0.000000e+00> : vector<256x128xf32>
    %201 = tpu.matmul %199, %200, %cst_108 {dimension_numbers = #tpu.dot_dimension_numbers<[1], [0], [0], [1], [0, 0, 1, 1], [], []>} : vector<256x128xbf16>, vector<128x128xbf16>, vector<256x128xf32> -> vector<256x128xf32>
    %c0_109 = arith.constant 0 : index
    %c0_110 = arith.constant 0 : index
    %202 = vector.load %arg9[%c0_109, %c0_110] : memref<1x128xf32, #tpu.memory_space<vmem>>, vector<1x128xf32>
    %203 = vector.broadcast %202 : vector<1x128xf32> to vector<256x128xf32>
    %204 = arith.addf %201, %203 : vector<256x128xf32>
    %205 = vector.extract_strided_slice %204 {offsets = [0, 0], sizes = [256, 4], strides = [1, 1]} : vector<256x128xf32> to vector<256x4xf32>
    %c512_111 = arith.constant 512 : index
    %c0_112 = arith.constant 0 : index
    %206 = vector.load %arg10[%c512_111, %c0_112] : memref<1024x4xf32, #tpu.memory_space<vmem>>, vector<256x4xf32>
    tpu.vector_store %arg10[%c512_111, %c0_112], %205 {strides = array<i32>} : memref<1024x4xf32, #tpu.memory_space<vmem>>, vector<256x4xf32>,
    %c768 = arith.constant 768 : index
    %c0_113 = arith.constant 0 : index
    %207 = vector.load %arg1[%c768, %c0_113] : memref<1024x32xf32, #tpu.memory_space<vmem>>, vector<256x32xf32>
    %208 = arith.truncf %207 : vector<256x32xf32> to vector<256x32xbf16>
    %c0_114 = arith.constant 0 : index
    %c0_115 = arith.constant 0 : index
    %209 = vector.load %arg2[%c0_114, %c0_115] : memref<32x128xbf16, #tpu.memory_space<vmem>>, vector<32x128xbf16>
    %cst_116 = arith.constant dense<0.000000e+00> : vector<256x128xf32>
    %210 = tpu.matmul %208, %209, %cst_116 {dimension_numbers = #tpu.dot_dimension_numbers<[1], [0], [0], [1], [0, 0, 1, 1], [], []>} : vector<256x32xbf16>, vector<32x128xbf16>, vector<256x128xf32> -> vector<256x128xf32>
    %c0_117 = arith.constant 0 : index
    %c0_118 = arith.constant 0 : index
    %211 = vector.load %arg3[%c0_117, %c0_118] : memref<1x128xf32, #tpu.memory_space<vmem>>, vector<1x128xf32>
    %212 = vector.broadcast %211 : vector<1x128xf32> to vector<256x128xf32>
    %213 = arith.addf %210, %212 : vector<256x128xf32>
    %cst_119 = arith.constant 5.000000e-01 : f32
    %214 = vector.broadcast %cst_119 : f32 to vector<256x128xf32>
    %215 = arith.mulf %214, %213 : vector<256x128xf32>
    %cst_120 = arith.constant 0.797884583 : f32
    %216 = vector.broadcast %cst_120 : f32 to vector<256x128xf32>
    %217 = arith.mulf %216, %213 : vector<256x128xf32>
    %218 = arith.mulf %213, %213 : vector<256x128xf32>
    %cst_121 = arith.constant 4.471500e-02 : f32
    %219 = vector.broadcast %cst_121 : f32 to vector<256x128xf32>
    %220 = arith.mulf %219, %218 : vector<256x128xf32>
    %cst_122 = arith.constant 1.000000e+00 : f32
    %221 = vector.broadcast %cst_122 : f32 to vector<256x128xf32>
    %222 = arith.addf %221, %220 : vector<256x128xf32>
    %223 = arith.mulf %217, %222 : vector<256x128xf32>
    %224 = math.tanh %223 : vector<256x128xf32>
    %cst_123 = arith.constant 1.000000e+00 : f32
    %225 = vector.broadcast %cst_123 : f32 to vector<256x128xf32>
    %226 = arith.addf %225, %224 : vector<256x128xf32>
    %227 = arith.mulf %215, %226 : vector<256x128xf32>
    %228 = arith.truncf %227 : vector<256x128xf32> to vector<256x128xbf16>
    %c0_124 = arith.constant 0 : index
    %c0_125 = arith.constant 0 : index
    %229 = vector.load %arg4[%c0_124, %c0_125] : memref<128x128xbf16, #tpu.memory_space<vmem>>, vector<128x128xbf16>
    %cst_126 = arith.constant dense<0.000000e+00> : vector<256x128xf32>
    %230 = tpu.matmul %228, %229, %cst_126 {dimension_numbers = #tpu.dot_dimension_numbers<[1], [0], [0], [1], [0, 0, 1, 1], [], []>} : vector<256x128xbf16>, vector<128x128xbf16>, vector<256x128xf32> -> vector<256x128xf32>
    %c0_127 = arith.constant 0 : index
    %c0_128 = arith.constant 0 : index
    %231 = vector.load %arg5[%c0_127, %c0_128] : memref<1x128xf32, #tpu.memory_space<vmem>>, vector<1x128xf32>
    %232 = vector.broadcast %231 : vector<1x128xf32> to vector<256x128xf32>
    %233 = arith.addf %230, %232 : vector<256x128xf32>
    %cst_129 = arith.constant 5.000000e-01 : f32
    %234 = vector.broadcast %cst_129 : f32 to vector<256x128xf32>
    %235 = arith.mulf %234, %233 : vector<256x128xf32>
    %cst_130 = arith.constant 0.797884583 : f32
    %236 = vector.broadcast %cst_130 : f32 to vector<256x128xf32>
    %237 = arith.mulf %236, %233 : vector<256x128xf32>
    %238 = arith.mulf %233, %233 : vector<256x128xf32>
    %cst_131 = arith.constant 4.471500e-02 : f32
    %239 = vector.broadcast %cst_131 : f32 to vector<256x128xf32>
    %240 = arith.mulf %239, %238 : vector<256x128xf32>
    %cst_132 = arith.constant 1.000000e+00 : f32
    %241 = vector.broadcast %cst_132 : f32 to vector<256x128xf32>
    %242 = arith.addf %241, %240 : vector<256x128xf32>
    %243 = arith.mulf %237, %242 : vector<256x128xf32>
    %244 = math.tanh %243 : vector<256x128xf32>
    %cst_133 = arith.constant 1.000000e+00 : f32
    %245 = vector.broadcast %cst_133 : f32 to vector<256x128xf32>
    %246 = arith.addf %245, %244 : vector<256x128xf32>
    %247 = arith.mulf %235, %246 : vector<256x128xf32>
    %248 = arith.truncf %247 : vector<256x128xf32> to vector<256x128xbf16>
    %c0_134 = arith.constant 0 : index
    %c0_135 = arith.constant 0 : index
    %249 = vector.load %arg6[%c0_134, %c0_135] : memref<128x128xbf16, #tpu.memory_space<vmem>>, vector<128x128xbf16>
    %cst_136 = arith.constant dense<0.000000e+00> : vector<256x128xf32>
    %250 = tpu.matmul %248, %249, %cst_136 {dimension_numbers = #tpu.dot_dimension_numbers<[1], [0], [0], [1], [0, 0, 1, 1], [], []>} : vector<256x128xbf16>, vector<128x128xbf16>, vector<256x128xf32> -> vector<256x128xf32>
    %c0_137 = arith.constant 0 : index
    %c0_138 = arith.constant 0 : index
    %251 = vector.load %arg7[%c0_137, %c0_138] : memref<1x128xf32, #tpu.memory_space<vmem>>, vector<1x128xf32>
    %252 = vector.broadcast %251 : vector<1x128xf32> to vector<256x128xf32>
    %253 = arith.addf %250, %252 : vector<256x128xf32>
    %cst_139 = arith.constant 5.000000e-01 : f32
    %254 = vector.broadcast %cst_139 : f32 to vector<256x128xf32>
    %255 = arith.mulf %254, %253 : vector<256x128xf32>
    %cst_140 = arith.constant 0.797884583 : f32
    %256 = vector.broadcast %cst_140 : f32 to vector<256x128xf32>
    %257 = arith.mulf %256, %253 : vector<256x128xf32>
    %258 = arith.mulf %253, %253 : vector<256x128xf32>
    %cst_141 = arith.constant 4.471500e-02 : f32
    %259 = vector.broadcast %cst_141 : f32 to vector<256x128xf32>
    %260 = arith.mulf %259, %258 : vector<256x128xf32>
    %cst_142 = arith.constant 1.000000e+00 : f32
    %261 = vector.broadcast %cst_142 : f32 to vector<256x128xf32>
    %262 = arith.addf %261, %260 : vector<256x128xf32>
    %263 = arith.mulf %257, %262 : vector<256x128xf32>
    %264 = math.tanh %263 : vector<256x128xf32>
    %cst_143 = arith.constant 1.000000e+00 : f32
    %265 = vector.broadcast %cst_143 : f32 to vector<256x128xf32>
    %266 = arith.addf %265, %264 : vector<256x128xf32>
    %267 = arith.mulf %255, %266 : vector<256x128xf32>
    %268 = arith.truncf %267 : vector<256x128xf32> to vector<256x128xbf16>
    %c0_144 = arith.constant 0 : index
    %c0_145 = arith.constant 0 : index
    %269 = vector.load %arg8[%c0_144, %c0_145] : memref<128x128xbf16, #tpu.memory_space<vmem>>, vector<128x128xbf16>
    %cst_146 = arith.constant dense<0.000000e+00> : vector<256x128xf32>
    %270 = tpu.matmul %268, %269, %cst_146 {dimension_numbers = #tpu.dot_dimension_numbers<[1], [0], [0], [1], [0, 0, 1, 1], [], []>} : vector<256x128xbf16>, vector<128x128xbf16>, vector<256x128xf32> -> vector<256x128xf32>
    %c0_147 = arith.constant 0 : index
    %c0_148 = arith.constant 0 : index
    %271 = vector.load %arg9[%c0_147, %c0_148] : memref<1x128xf32, #tpu.memory_space<vmem>>, vector<1x128xf32>
    %272 = vector.broadcast %271 : vector<1x128xf32> to vector<256x128xf32>
    %273 = arith.addf %270, %272 : vector<256x128xf32>
    %274 = vector.extract_strided_slice %273 {offsets = [0, 0], sizes = [256, 4], strides = [1, 1]} : vector<256x128xf32> to vector<256x4xf32>
    %c768_149 = arith.constant 768 : index
    %c0_150 = arith.constant 0 : index
    %275 = vector.load %arg10[%c768_149, %c0_150] : memref<1024x4xf32, #tpu.memory_space<vmem>>, vector<256x4xf32>
    tpu.vector_store %arg10[%c768_149, %c0_150], %274 {strides = array<i32>} : memref<1024x4xf32, #tpu.memory_space<vmem>>, vector<256x4xf32>,
    return
  }
  func.func @transform_0(%arg0: i32) -> (i32, i32) {
    %c0_i32 = arith.constant 0 : i32
    %c0_i32_0 = arith.constant 0 : i32
    return %arg0, %c0_i32 : i32, i32
  }
  func.func @transform_1(%arg0: i32) -> (i32, i32) {
    %c0_i32 = arith.constant 0 : i32
    %c0_i32_0 = arith.constant 0 : i32
    %c0_i32_1 = arith.constant 0 : i32
    return %c0_i32, %c0_i32_0 : i32, i32
  }
  func.func @transform_2(%arg0: i32) -> (i32, i32) {
    %c0_i32 = arith.constant 0 : i32
    %c0_i32_0 = arith.constant 0 : i32
    %c0_i32_1 = arith.constant 0 : i32
    return %c0_i32, %c0_i32_0 : i32, i32
  }
  func.func @transform_3(%arg0: i32) -> (i32, i32) {
    %c0_i32 = arith.constant 0 : i32
    %c0_i32_0 = arith.constant 0 : i32
    %c0_i32_1 = arith.constant 0 : i32
    return %c0_i32, %c0_i32_0 : i32, i32
  }
  func.func @transform_4(%arg0: i32) -> (i32, i32) {
    %c0_i32 = arith.constant 0 : i32
    %c0_i32_0 = arith.constant 0 : i32
    %c0_i32_1 = arith.constant 0 : i32
    return %c0_i32, %c0_i32_0 : i32, i32
  }
  func.func @transform_5(%arg0: i32) -> (i32, i32) {
    %c0_i32 = arith.constant 0 : i32
    %c0_i32_0 = arith.constant 0 : i32
    %c0_i32_1 = arith.constant 0 : i32
    return %c0_i32, %c0_i32_0 : i32, i32
  }
  func.func @transform_6(%arg0: i32) -> (i32, i32) {
    %c0_i32 = arith.constant 0 : i32
    %c0_i32_0 = arith.constant 0 : i32
    %c0_i32_1 = arith.constant 0 : i32
    return %c0_i32, %c0_i32_0 : i32, i32
  }
  func.func @transform_7(%arg0: i32) -> (i32, i32) {
    %c0_i32 = arith.constant 0 : i32
    %c0_i32_0 = arith.constant 0 : i32
    %c0_i32_1 = arith.constant 0 : i32
    return %c0_i32, %c0_i32_0 : i32, i32
  }
  func.func @transform_8(%arg0: i32) -> (i32, i32) {
    %c0_i32 = arith.constant 0 : i32
    %c0_i32_0 = arith.constant 0 : i32
    %c0_i32_1 = arith.constant 0 : i32
    return %c0_i32, %c0_i32_0 : i32, i32
  }
  func.func @transform_9(%arg0: i32) -> (i32, i32) {
    %c0_i32 = arith.constant 0 : i32
    %c0_i32_0 = arith.constant 0 : i32
    return %arg0, %c0_i32 : i32, i32
  }
}

</mosaic_0001>

<bundles_post_ra>
// kernel: multi_grid_model_forward.1
= control target key start
LH: loop header
LB: loop body
LE: loop exit
PB: predicated region body
PF: predicated region fallthrough
CT: control target
= control target key end

     0   :  { %vm101_vm0 = vcmask 261120   ;;  %vm1622_vm1 = vcmask 31744   ;;  %s11889_s1 = inlined_call_operand.vmem [shape: bf16[32,128], index: 1, kind: input, shape index: {}]   ;;  %s11890_s0 = inlined_call_operand.vmem [shape: f32[1024,32], index: 0, kind: input, shape index: {}]   ;;  %s11891_s2 = inlined_call_operand.vmem [shape: f32[1,128], index: 2, kind: input, shape index: {}]   ;;  %s11892_s3 = inlined_call_operand.vmem [shape: bf16[128,128], index: 3, kind: input, shape index: {}]   ;;  %s11893_s4 = inlined_call_operand.vmem [shape: f32[1,128], index: 4, kind: input, shape index: {}]   ;;  %s11894_s5 = inlined_call_operand.vmem [shape: bf16[128,128], index: 5, kind: input, shape index: {}]   ;;  %s11895_s6 = inlined_call_operand.vmem [shape: f32[1,128], index: 6, kind: input, shape index: {}]   ;;  %s11896_s7 = inlined_call_operand.vmem [shape: bf16[128,128], index: 7, kind: input, shape index: {}]   ;;  %s11897_s8 = inlined_call_operand.vmem [shape: f32[1,128], index: 8, kind: input, shape index: {}]   ;;  %s11898_s9 = inlined_call_operand.vmem [shape: f32[1024,4], index: 9, kind: output, shape index: {}]  }
   0x1   :  { %v7000_v0 = vld [vmem:[%s11889_s1 + $0x8] sm:$0xff]  ;;  %v6999_v1 = vld [vmem:[%s11889_s1] sm:$0xff]  ;;  %v35_v6 = vld [vmem:[%s11890_s0 + $0x10] sm:$0xff] }
   0x2   :  { %156 = vmatpush.bf16.msra.mxu0 %v7000_v0  ;;  %v33_v2 = vld [vmem:[%s11890_s0] sm:$0xff]  ;;  %v34_v3 = vld [vmem:[%s11890_s0 + $0x8] sm:$0xff]  ;;  %v36_v7 = vld [vmem:[%s11890_s0 + $0x18] sm:$0xff] }
   0x3   :  { %v7026_v4 = vld [vmem:[%s11889_s1 + $0x8] sm:$0xff]  ;;  %v65_v5 = vpack.c.bf16 %v34_v3, %v33_v2  ;;  %v66_v8 = vpack.c.bf16 %v36_v7, %v35_v6  ;;  %v37_v9 = vld [vmem:[%s11890_s0 + $0x20] sm:$0xff]  ;;  %v39_v12 = vld [vmem:[%s11890_s0 + $0x30] sm:$0xff] }
   0x4   :  { %v38_v10 = vld [vmem:[%s11890_s0 + $0x28] sm:$0xff]  ;;  %v40_v13 = vld [vmem:[%s11890_s0 + $0x38] sm:$0xff]  ;;  %v41_v15 = vld [vmem:[%s11890_s0 + $0x40] sm:$0xff] }
   0x5   :  { %v67_v11 = vpack.c.bf16 %v38_v10, %v37_v9  ;;  %v68_v14 = vpack.c.bf16 %v40_v13, %v39_v12  ;;  %v42_v16 = vld [vmem:[%s11890_s0 + $0x48] sm:$0xff]  ;;  %v43_v18 = vld [vmem:[%s11890_s0 + $0x50] sm:$0xff]  ;;  %v44_v19 = vld [vmem:[%s11890_s0 + $0x58] sm:$0xff] }
   0x6   :  { %157 = vmatpush.bf16.msra.mxu0 %v6999_v1  ;;  %v69_v17 = vpack.c.bf16 %v42_v16, %v41_v15  ;;  %v70_v20 = vpack.c.bf16 %v44_v19, %v43_v18  ;;  %v45_v21 = vld [vmem:[%s11890_s0 + $0x60] sm:$0xff]  ;;  %v46_v22 = vld [vmem:[%s11890_s0 + $0x68] sm:$0xff]  ;;  %v7008_v24 = vld [vmem:[%s11892_s3 + $0x38] sm:$0xff] }
   0x7   :  { %v71_v23 = vpack.c.bf16 %v46_v22, %v45_v21  ;;  %611 = vmatpush.bf16.msra.mxu1 %v7008_v24  ;;  %v7007_v25 = vld [vmem:[%s11892_s3 + $0x30] sm:$0xff]  ;;  %v7006_v26 = vld [vmem:[%s11892_s3 + $0x28] sm:$0xff]  ;;  %v7025_v27 = vld [vmem:[%s11889_s1] sm:$0xff] }
   0x8   :  { %v7005_v28 = vld [vmem:[%s11892_s3 + $0x20] sm:$0xff]  ;;  %v47_v29 = vld [vmem:[%s11890_s0 + $0x70] sm:$0xff]  ;;  %v48_v30 = vld [vmem:[%s11890_s0 + $0x78] sm:$0xff] }
   0x9   :  { %6527 = vmatmul.msk.bf16.vlgmr.msra.gmra.mxu0 %vm101_vm0, %v65_v5  ;;  %v72_v31 = vpack.c.bf16 %v48_v30, %v47_v29  ;;  %v7004_v32 = vld [vmem:[%s11892_s3 + $0x18] sm:$0xff]  ;;  %v7003_v33 = vld [vmem:[%s11892_s3 + $0x10] sm:$0xff]  ;;  %v7002_v34 = vld [vmem:[%s11892_s3 + $0x8] sm:$0xff] }
   0xa   :  { %1777 = vmatpush.bf16.msrb.mxu0 %v7026_v4  ;;  %v7001_v35 = vld [vmem:[%s11892_s3] sm:$0xff]  ;;  %v50_v37 = vld [vmem:[%s11890_s0 + $0x88] sm:$0xff]  ;;  %v7034_v48 = vld [vmem:[%s11892_s3 + $0x38] sm:$0xff] }
   0xb   :  { %612 = vmatpush.bf16.msra.mxu1 %v7007_v25  ;;  %v49_v36 = vld [vmem:[%s11890_s0 + $0x80] sm:$0xff]  ;;  %v51_v51 = vld [vmem:[%s11890_s0 + $0x90] sm:$0xff]  ;;  %v52_v52 = vld [vmem:[%s11890_s0 + $0x98] sm:$0xff] }
   0xc   :  { %v8048_v38 = vld [vmem:[%s11891_s2] ss:$0 sm:$0xff]  ;;  %v73_v39 = vpack.c.bf16 %v50_v37, %v49_v36  ;;  %v74_v56 = vpack.c.bf16 %v52_v52, %v51_v51  ;;  %v54_v13 = vld [vmem:[%s11890_s0 + $0xa8] sm:$0xff] }
   0xd   :  { %v53_v10 = vld [vmem:[%s11890_s0 + $0xa0] sm:$0xff] }
   0xe   :  { %1778 = vmatpush.bf16.msrb.mxu0 %v7025_v27  ;;  %v75_v18 = vpack.c.bf16 %v54_v13, %v53_v10 }
   0xf   :  { %613 = vmatpush.bf16.msra.mxu1 %v7006_v26 }
  0x13   :  { %614 = vmatpush.bf16.msra.mxu1 %v7005_v28 }
  0x17   :  { %615 = vmatpush.bf16.msra.mxu1 %v7004_v32 }
  0x19   :  { %6528 = vmatmul.msk.bf16.gmra.mxu0 %vm101_vm0, %v66_v8 }
  0x1b   :  { %616 = vmatpush.bf16.msra.mxu1 %v7003_v33 }
  0x1f   :  { %617 = vmatpush.bf16.msra.mxu1 %v7002_v34 }
  0x23   :  { %618 = vmatpush.bf16.msra.mxu1 %v7001_v35 }
  0x27   :  { %2232 = vmatpush.bf16.msrb.mxu1 %v7034_v48 }
  0x29   :  { %6529 = vmatmul.msk.bf16.gmra.mxu0 %vm101_vm0, %v67_v11 }
  0x39   :  { %6530 = vmatmul.msk.bf16.gmra.mxu0 %vm101_vm0, %v68_v14 }
  0x49   :  { %6531 = vmatmul.msk.bf16.gmra.mxu0 %vm101_vm0, %v69_v17 }
  0x59   :  { %6532 = vmatmul.msk.bf16.gmra.mxu0 %vm101_vm0, %v70_v20 }
  0x69   :  { %6533 = vmatmul.msk.bf16.gmra.mxu0 %vm101_vm0, %v71_v23 }
  0x79   :  { %6534 = vmatmul.msk.bf16.gmra.mxu0 %vm101_vm0, %v72_v31  ;;  %v7033_v31 = vld [vmem:[%s11892_s3 + $0x30] sm:$0xff] }
  0x7a   :  { %2233 = vmatpush.bf16.msrb.mxu1 %v7033_v31 }
  0x86   :  { %v159_v40 = vpop.f32.mrf.mxu0 }
  0x87   :  { %v160_v41 = vadd.f32 %v8048_v38, %v159_v40  ;;  %v55_v40 = vld [vmem:[%s11890_s0 + $0xb0] sm:$0xff] }
  0x89   :  { %v303_v42 = vmul.f32 %v160_v41, %v160_v41  ;;  %6535 = vmatmul.msk.bf16.gmra.mxu0 %vm101_vm0, %v73_v39  ;;  %v271_v46 = vmul.f32 0.7978846, %v160_v41  ;;  %v239_v5 = vmul.f32 0.5, %v160_v41  ;;  %v56_v41 = vld [vmem:[%s11890_s0 + $0xb8] sm:$0xff] }
  0x8b   :  { %v335_v43 = vmul.f32 0.044715, %v303_v42 }
  0x8d   :  { %v367_v44 = vadd.f32 1.0, %v335_v43 }
  0x8e   :  { %v161_v45 = vpop.f32.mrf.mxu0 }
  0x8f   :  { %v162_v47 = vadd.f32 %v8048_v38, %v161_v45  ;;  %v399_v49 = vmul.f32 %v367_v44, %v271_v46  ;;  %v76_v46 = vpack.c.bf16 %v56_v41, %v55_v40 }
  0x91   :  { %v304_v50 = vmul.f32 %v162_v47, %v162_v47  ;;  %v272_v54 = vmul.f32 0.7978846, %v162_v47  ;;  %7113 = vtanh.f32 %v399_v49  ;;  %v240_v6 = vmul.f32 0.5, %v162_v47 }
  0x93   :  { %v336_v53 = vmul.f32 0.044715, %v304_v50 }
  0x95   :  { %v368_v55 = vadd.f32 1.0, %v336_v53 }
  0x96   :  { %v164_v57 = vpop.f32.mrf.mxu0 }
  0x97   :  { %v165_v58 = vadd.f32 %v8048_v38, %v164_v57  ;;  %v400_v59 = vmul.f32 %v368_v55, %v272_v54  ;;  %v7114_v61 = vpop.eup %7113 }
  0x98   :  { %v463_v1 = vadd.f32 1.0, %v7114_v61 }
  0x99   :  { %v305_v60 = vmul.f32 %v165_v58, %v165_v58  ;;  %6536 = vmatmul.msk.bf16.gmra.mxu0 %vm101_vm0, %v74_v56  ;;  %7115 = vtanh.f32 %v400_v59  ;;  %v273_v3 = vmul.f32 0.7978846, %v165_v58  ;;  %v241_v32 = vmul.f32 0.5, %v165_v58 }
  0x9a   :  { %v495_v11 = vmul.f32 %v463_v1, %v239_v5 }
  0x9b   :  { %v337_v62 = vmul.f32 0.044715, %v305_v60 }
  0x9d   :  { %v369_v63 = vadd.f32 1.0, %v337_v62 }
  0x9e   :  { %v166_v0 = vpop.f32.mrf.mxu0 }
  0x9f   :  { %v7116_v2 = vpop.eup %7115  ;;  %v167_v4 = vadd.f32 %v8048_v38, %v166_v0  ;;  %v401_v8 = vmul.f32 %v369_v63, %v273_v3  ;;  %v58_v3 = vld [vmem:[%s11890_s0 + $0xc8] sm:$0xff] }
  0xa0   :  { %v464_v7 = vadd.f32 1.0, %v7116_v2  ;;  %v57_v2 = vld [vmem:[%s11890_s0 + $0xc0] sm:$0xff] }
  0xa1   :  { %v306_v9 = vmul.f32 %v167_v4, %v167_v4  ;;  %v274_v16 = vmul.f32 0.7978846, %v167_v4  ;;  %7117 = vtanh.f32 %v401_v8  ;;  %v242_v33 = vmul.f32 0.5, %v167_v4 }
  0xa2   :  { %v496_v12 = vmul.f32 %v464_v7, %v240_v6  ;;  %v77_v8 = vpack.c.bf16 %v58_v3, %v57_v2 }
  0xa3   :  { %v338_v14 = vmul.f32 0.044715, %v306_v9 }
  0xa4   :  { %v527_v15 = vpack.c.bf16 %v496_v12, %v495_v11 }
  0xa5   :  { %v370_v17 = vadd.f32 1.0, %v338_v14 }
  0xa6   :  { %v169_v19 = vpop.f32.mrf.mxu0  ;;  %619 = vmatmul.bf16.vlgmr.msra.gmra.mxu1 %v527_v15 }
  0xa7   :  { %v170_v20 = vadd.f32 %v8048_v38, %v169_v19  ;;  %v402_v21 = vmul.f32 %v370_v17, %v274_v16  ;;  %v7118_v23 = vpop.eup %7117 }
  0xa8   :  { %v465_v27 = vadd.f32 1.0, %v7118_v23 }
  0xa9   :  { %v307_v22 = vmul.f32 %v170_v20, %v170_v20  ;;  %6537 = vmatmul.msk.bf16.gmra.mxu0 %vm101_vm0, %v75_v18  ;;  %7119 = vtanh.f32 %v402_v21  ;;  %v275_v29 = vmul.f32 0.7978846, %v170_v20  ;;  %v243_v59 = vmul.f32 0.5, %v170_v20  ;;  %v7032_v21 = vld [vmem:[%s11892_s3 + $0x28] sm:$0xff] }
  0xaa   :  { %v497_v37 = vmul.f32 %v465_v27, %v241_v32  ;;  %2234 = vmatpush.bf16.msrb.mxu1 %v7032_v21  ;;  %v64_v21 = vld [vmem:[%s11890_s0 + $0xf8] sm:$0xff] }
  0xab   :  { %v339_v24 = vmul.f32 0.044715, %v307_v22 }
  0xad   :  { %v371_v25 = vadd.f32 1.0, %v339_v24 }
  0xae   :  { %v171_v26 = vpop.f32.mrf.mxu0 }
  0xaf   :  { %v7120_v28 = vpop.eup %7119  ;;  %v172_v30 = vadd.f32 %v8048_v38, %v171_v26  ;;  %v403_v35 = vmul.f32 %v371_v25, %v275_v29  ;;  %v59_v29 = vld [vmem:[%s11890_s0 + $0xd0] sm:$0xff] }
  0xb0   :  { %v466_v34 = vadd.f32 1.0, %v7120_v28 }
  0xb1   :  { %v308_v36 = vmul.f32 %v172_v30, %v172_v30  ;;  %v276_v44 = vmul.f32 0.7978846, %v172_v30  ;;  %7121 = vtanh.f32 %v403_v35  ;;  %v244_v60 = vmul.f32 0.5, %v172_v30  ;;  %v60_v30 = vld [vmem:[%s11890_s0 + $0xd8] sm:$0xff] }
  0xb2   :  { %v498_v39 = vmul.f32 %v466_v34, %v242_v33  ;;  %v78_v35 = vpack.c.bf16 %v60_v30, %v59_v29 }
  0xb3   :  { %v340_v42 = vmul.f32 0.044715, %v308_v36 }
  0xb4   :  { %v528_v43 = vpack.c.bf16 %v498_v39, %v497_v37 }
  0xb5   :  { %v372_v45 = vadd.f32 1.0, %v340_v42 }
  0xb6   :  { %v174_v47 = vpop.f32.mrf.mxu0  ;;  %624 = vmatmul.bf16.gmra.mxu1 %v528_v43 }
  0xb7   :  { %v175_v48 = vadd.f32 %v8048_v38, %v174_v47  ;;  %v404_v49 = vmul.f32 %v372_v45, %v276_v44  ;;  %v7122_v51 = vpop.eup %7121 }
  0xb8   :  { %v467_v55 = vadd.f32 1.0, %v7122_v51 }
  0xb9   :  { %v309_v50 = vmul.f32 %v175_v48, %v175_v48  ;;  %6538 = vmatmul.msk.bf16.gmra.mxu0 %vm101_vm0, %v76_v46  ;;  %7123 = vtanh.f32 %v404_v49  ;;  %v277_v57 = vmul.f32 0.7978846, %v175_v48  ;;  %v245_v22 = vmul.f32 0.5, %v175_v48 }
  0xba   :  { %v499_v0 = vmul.f32 %v467_v55, %v243_v59 }
  0xbb   :  { %v341_v52 = vmul.f32 0.044715, %v309_v50 }
  0xbd   :  { %v373_v53 = vadd.f32 1.0, %v341_v52 }
  0xbe   :  { %v176_v54 = vpop.f32.mrf.mxu0 }
  0xbf   :  { %v7124_v56 = vpop.eup %7123  ;;  %v177_v58 = vadd.f32 %v8048_v38, %v176_v54  ;;  %v405_v62 = vmul.f32 %v373_v53, %v277_v57  ;;  %v62_v57 = vld [vmem:[%s11890_s0 + $0xe8] sm:$0xff] }
  0xc0   :  { %v468_v61 = vadd.f32 1.0, %v7124_v56  ;;  %v61_v56 = vld [vmem:[%s11890_s0 + $0xe0] sm:$0xff] }
  0xc1   :  { %v310_v63 = vmul.f32 %v177_v58, %v177_v58  ;;  %v278_v6 = vmul.f32 0.7978846, %v177_v58  ;;  %7125 = vtanh.f32 %v405_v62  ;;  %v246_v23 = vmul.f32 0.5, %v177_v58 }
  0xc2   :  { %v500_v1 = vmul.f32 %v468_v61, %v244_v60  ;;  %v79_v62 = vpack.c.bf16 %v62_v57, %v61_v56  ;;  %v7015_v56 = vld [vmem:[%s11894_s5 + $0x30] sm:$0xff] }
  0xc3   :  { %v342_v4 = vmul.f32 0.044715, %v310_v63 }
  0xc4   :  { %v529_v5 = vpack.c.bf16 %v500_v1, %v499_v0 }
  0xc5   :  { %v374_v7 = vadd.f32 1.0, %v342_v4 }
  0xc6   :  { %v179_v9 = vpop.f32.mrf.mxu0  ;;  %629 = vmatmul.bf16.gmra.mxu1 %v529_v5 }
  0xc7   :  { %v180_v10 = vadd.f32 %v8048_v38, %v179_v9  ;;  %v406_v11 = vmul.f32 %v374_v7, %v278_v6  ;;  %v7126_v13 = vpop.eup %7125 }
  0xc8   :  { %v469_v17 = vadd.f32 1.0, %v7126_v13 }
  0xc9   :  { %v311_v12 = vmul.f32 %v180_v10, %v180_v10  ;;  %6539 = vmatmul.msk.bf16.gmra.mxu0 %vm101_vm0, %v77_v8  ;;  %7127 = vtanh.f32 %v406_v11  ;;  %v279_v19 = vmul.f32 0.7978846, %v180_v10  ;;  %v247_v49 = vmul.f32 0.5, %v180_v10  ;;  %v7031_v11 = vld [vmem:[%s11892_s3 + $0x20] sm:$0xff] }
  0xca   :  { %v501_v27 = vmul.f32 %v469_v17, %v245_v22  ;;  %2235 = vmatpush.bf16.msrb.mxu1 %v7031_v11 }
  0xcb   :  { %v343_v14 = vmul.f32 0.044715, %v311_v12  ;;  %v7052_v12 = vld [vmem:[%s11889_s1 + $0x8] sm:$0xff] }
  0xcc   :  { %3397 = vmatpush.bf16.msra.mxu0 %v7052_v12 }
  0xcd   :  { %v375_v15 = vadd.f32 1.0, %v343_v14 }
  0xce   :  { %v181_v16 = vpop.f32.mrf.mxu0 }
  0xcf   :  { %v7128_v18 = vpop.eup %7127  ;;  %v182_v20 = vadd.f32 %v8048_v38, %v181_v16  ;;  %v407_v25 = vmul.f32 %v375_v15, %v279_v19 }
  0xd0   :  { %v470_v24 = vadd.f32 1.0, %v7128_v18 }
  0xd1   :  { %v312_v26 = vmul.f32 %v182_v20, %v182_v20  ;;  %v280_v33 = vmul.f32 0.7978846, %v182_v20  ;;  %7129 = vtanh.f32 %v407_v25  ;;  %v248_v50 = vmul.f32 0.5, %v182_v20  ;;  %v63_v20 = vld [vmem:[%s11890_s0 + $0xf0] sm:$0xff] }
  0xd2   :  { %v502_v28 = vmul.f32 %v470_v24, %v246_v23 }
  0xd3   :  { %v344_v31 = vmul.f32 0.044715, %v312_v26  ;;  %v80_v26 = vpack.c.bf16 %v64_v21, %v63_v20 }
  0xd4   :  { %v530_v32 = vpack.c.bf16 %v502_v28, %v501_v27 }
  0xd5   :  { %v376_v34 = vadd.f32 1.0, %v344_v31 }
  0xd6   :  { %v184_v36 = vpop.f32.mrf.mxu0  ;;  %634 = vmatmul.bf16.gmra.mxu1 %v530_v32 }
  0xd7   :  { %v185_v37 = vadd.f32 %v8048_v38, %v184_v36  ;;  %v408_v39 = vmul.f32 %v376_v34, %v280_v33  ;;  %v7130_v41 = vpop.eup %7129 }
  0xd8   :  { %v471_v45 = vadd.f32 1.0, %v7130_v41 }
  0xd9   :  { %v313_v40 = vmul.f32 %v185_v37, %v185_v37  ;;  %6540 = vmatmul.msk.bf16.gmra.mxu0 %vm101_vm0, %v78_v35  ;;  %7131 = vtanh.f32 %v408_v39  ;;  %v281_v47 = vmul.f32 0.7978846, %v185_v37  ;;  %v249_v13 = vmul.f32 0.5, %v185_v37 }
  0xda   :  { %v503_v54 = vmul.f32 %v471_v45, %v247_v49  ;;  %v7016_v49 = vld [vmem:[%s11894_s5 + $0x38] sm:$0xff] }
  0xdb   :  { %v345_v42 = vmul.f32 0.044715, %v313_v40  ;;  %1072 = vmatpush.bf16.msra.mxu2 %v7016_v49 }
  0xdd   :  { %v377_v43 = vadd.f32 1.0, %v345_v42 }
  0xde   :  { %v186_v44 = vpop.f32.mrf.mxu0 }
  0xdf   :  { %v7132_v46 = vpop.eup %7131  ;;  %v187_v48 = vadd.f32 %v8048_v38, %v186_v44  ;;  %v409_v52 = vmul.f32 %v377_v43, %v281_v47  ;;  %v1655_v47 = vld [vmem:[%s11890_s0 + $0x100] sm:$0xff]  ;;  %1073 = vmatpush.bf16.msra.mxu2 %v7015_v56 }
  0xe0   :  { %v472_v51 = vadd.f32 1.0, %v7132_v46 }
  0xe1   :  { %v314_v53 = vmul.f32 %v187_v48, %v187_v48  ;;  %v282_v60 = vmul.f32 0.7978846, %v187_v48  ;;  %7133 = vtanh.f32 %v409_v52  ;;  %v250_v14 = vmul.f32 0.5, %v187_v48  ;;  %v1656_v48 = vld [vmem:[%s11890_s0 + $0x108] sm:$0xff] }
  0xe2   :  { %v504_v55 = vmul.f32 %v472_v51, %v248_v50 }
  0xe3   :  { %v346_v58 = vmul.f32 0.044715, %v314_v53 }
  0xe4   :  { %v531_v59 = vpack.c.bf16 %v504_v55, %v503_v54  ;;  %v1687_v54 = vpack.c.bf16 %v1656_v48, %v1655_v47  ;;  %v1660_v47 = vld [vmem:[%s11890_s0 + $0x128] sm:$0xff] }
  0xe5   :  { %v378_v61 = vadd.f32 1.0, %v346_v58 }
  0xe6   :  { %v189_v63 = vpop.f32.mrf.mxu0  ;;  %639 = vmatmul.bf16.gmra.mxu1 %v531_v59 }
  0xe7   :  { %v190_v0 = vadd.f32 %v8048_v38, %v189_v63  ;;  %v410_v1 = vmul.f32 %v378_v61, %v282_v60  ;;  %v7134_v3 = vpop.eup %7133  ;;  %v7014_v60 = vld [vmem:[%s11894_s5 + $0x28] sm:$0xff] }
  0xe8   :  { %v473_v7 = vadd.f32 1.0, %v7134_v3  ;;  %1074 = vmatpush.bf16.msra.mxu2 %v7014_v60 }
  0xe9   :  { %v315_v2 = vmul.f32 %v190_v0, %v190_v0  ;;  %6541 = vmatmul.msk.bf16.gmra.mxu0 %vm101_vm0, %v79_v62  ;;  %7135 = vtanh.f32 %v410_v1  ;;  %v283_v9 = vmul.f32 0.7978846, %v190_v0  ;;  %v251_v40 = vmul.f32 0.5, %v190_v0 }
  0xea   :  { %v505_v18 = vmul.f32 %v473_v7, %v249_v13 }
  0xeb   :  { %v347_v4 = vmul.f32 0.044715, %v315_v2  ;;  %v7013_v2 = vld [vmem:[%s11894_s5 + $0x20] sm:$0xff] }
  0xec   :  { %1075 = vmatpush.bf16.msra.mxu2 %v7013_v2 }
  0xed   :  { %v379_v5 = vadd.f32 1.0, %v347_v4 }
  0xee   :  { %v191_v6 = vpop.f32.mrf.mxu0 }
  0xef   :  { %v7136_v8 = vpop.eup %7135  ;;  %v192_v10 = vadd.f32 %v8048_v38, %v191_v6  ;;  %v411_v16 = vmul.f32 %v379_v5, %v283_v9  ;;  %v7030_v6 = vld [vmem:[%s11892_s3 + $0x18] sm:$0xff] }
  0xf0   :  { %v474_v15 = vadd.f32 1.0, %v7136_v8  ;;  %2236 = vmatpush.bf16.msrb.mxu1 %v7030_v6 }
  0xf1   :  { %v316_v17 = vmul.f32 %v192_v10, %v192_v10  ;;  %v284_v24 = vmul.f32 0.7978846, %v192_v10  ;;  %7137 = vtanh.f32 %v411_v16  ;;  %v252_v41 = vmul.f32 0.5, %v192_v10  ;;  %v7012_v16 = vld [vmem:[%s11894_s5 + $0x18] sm:$0xff] }
  0xf2   :  { %v506_v19 = vmul.f32 %v474_v15, %v250_v14  ;;  %v1657_v14 = vld [vmem:[%s11890_s0 + $0x110] sm:$0xff]  ;;  %v1658_v15 = vld [vmem:[%s11890_s0 + $0x118] sm:$0xff]  ;;  %1076 = vmatpush.bf16.msra.mxu2 %v7012_v16 }
  0xf3   :  { %v348_v22 = vmul.f32 0.044715, %v316_v17  ;;  %v1688_v21 = vpack.c.bf16 %v1658_v15, %v1657_v14 }
  0xf4   :  { %v532_v23 = vpack.c.bf16 %v506_v19, %v505_v18 }
  0xf5   :  { %v380_v25 = vadd.f32 1.0, %v348_v22 }
  0xf6   :  { %v194_v27 = vpop.f32.mrf.mxu0  ;;  %644 = vmatmul.bf16.gmra.mxu1 %v532_v23  ;;  %v7011_v23 = vld [vmem:[%s11894_s5 + $0x10] sm:$0xff] }
  0xf7   :  { %v195_v28 = vadd.f32 %v8048_v38, %v194_v27  ;;  %v412_v29 = vmul.f32 %v380_v25, %v284_v24  ;;  %v7138_v31 = vpop.eup %7137  ;;  %1077 = vmatpush.bf16.msra.mxu2 %v7011_v23  ;;  %v7010_v27 = vld [vmem:[%s11894_s5 + $0x8] sm:$0xff]  ;;  %v1661_v23 = vld [vmem:[%s11890_s0 + $0x130] sm:$0xff] }
  0xf8   :  { %v475_v35 = vadd.f32 1.0, %v7138_v31 }
  0xf9   :  { %v317_v30 = vmul.f32 %v195_v28, %v195_v28  ;;  %6542 = vmatmul.msk.bf16.gmra.mxu0 %vm101_vm0, %v80_v26  ;;  %7139 = vtanh.f32 %v412_v29  ;;  %v285_v37 = vmul.f32 0.7978846, %v195_v28  ;;  %v253_v7 = vmul.f32 0.5, %v195_v28 }
  0xfa   :  { %v507_v45 = vmul.f32 %v475_v35, %v251_v40  ;;  %v8179_v40 = vld [vmem:[%s11893_s4] ss:$0 sm:$0xff] }
  0xfb   :  { %v349_v32 = vmul.f32 0.044715, %v317_v30  ;;  %1078 = vmatpush.bf16.msra.mxu2 %v7010_v27 }
  0xfd   :  { %v381_v33 = vadd.f32 1.0, %v349_v32 }
  0xfe   :  { %v196_v34 = vpop.f32.mrf.mxu0 }
  0xff   :  { %v7140_v36 = vpop.eup %7139  ;;  %v197_v39 = vadd.f32 %v8048_v38, %v196_v34  ;;  %v413_v43 = vmul.f32 %v381_v33, %v285_v37  ;;  %v7009_v34 = vld [vmem:[%s11894_s5] sm:$0xff] }
 0x100   :  { %v476_v42 = vadd.f32 1.0, %v7140_v36  ;;  %1079 = vmatpush.bf16.msra.mxu2 %v7009_v34 }
 0x101   :  { %v318_v44 = vmul.f32 %v197_v39, %v197_v39  ;;  %v286_v52 = vmul.f32 0.7978846, %v197_v39  ;;  %7141 = vtanh.f32 %v413_v43  ;;  %v254_v8 = vmul.f32 0.5, %v197_v39 }
 0x102   :  { %v508_v46 = vmul.f32 %v476_v42, %v252_v41 }
 0x103   :  { %v350_v50 = vmul.f32 0.044715, %v318_v44 }
 0x104   :  { %v533_v51 = vpack.c.bf16 %v508_v46, %v507_v45  ;;  %v1659_v46 = vld [vmem:[%s11890_s0 + $0x120] sm:$0xff] }
 0x105   :  { %v382_v53 = vadd.f32 1.0, %v350_v50 }
 0x106   :  { %v199_v55 = vpop.f32.mrf.mxu0  ;;  %649 = vmatmul.bf16.gmra.mxu1 %v533_v51 }
 0x107   :  { %v200_v57 = vadd.f32 %v8048_v38, %v199_v55  ;;  %v414_v58 = vmul.f32 %v382_v53, %v286_v52  ;;  %v7142_v61 = vpop.eup %7141 }
 0x108   :  { %v477_v1 = vadd.f32 1.0, %v7142_v61 }
 0x109   :  { %v319_v59 = vmul.f32 %v200_v57, %v200_v57  ;;  %6647 = vmatmul.msk.bf16.vlgmr.msrb.gmra.mxu0 %vm101_vm0, %v1687_v54  ;;  %7143 = vtanh.f32 %v414_v58  ;;  %v287_v4 = vmul.f32 0.7978846, %v200_v57  ;;  %v255_v37 = vmul.f32 0.5, %v200_v57 }
 0x10a   :  { %v509_v12 = vmul.f32 %v477_v1, %v253_v7  ;;  %v1689_v54 = vpack.c.bf16 %v1660_v47, %v1659_v46 }
 0x10b   :  { %v351_v62 = vmul.f32 0.044715, %v319_v59 }
 0x10d   :  { %v383_v63 = vadd.f32 1.0, %v351_v62 }
 0x10e   :  { %v201_v0 = vpop.f32.mrf.mxu0 }
 0x10f   :  { %v7144_v3 = vpop.eup %7143  ;;  %v202_v5 = vadd.f32 %v8048_v38, %v201_v0  ;;  %v415_v10 = vmul.f32 %v383_v63, %v287_v4 }
 0x110   :  { %v478_v9 = vadd.f32 1.0, %v7144_v3  ;;  %v7042_v3 = vld [vmem:[%s11894_s5 + $0x38] sm:$0xff] }
 0x111   :  { %v320_v11 = vmul.f32 %v202_v5, %v202_v5  ;;  %v288_v19 = vmul.f32 0.7978846, %v202_v5  ;;  %7145 = vtanh.f32 %v415_v10  ;;  %v256_v41 = vmul.f32 0.5, %v202_v5  ;;  %2693 = vmatpush.bf16.msrb.mxu2 %v7042_v3 }
 0x112   :  { %v510_v13 = vmul.f32 %v478_v9, %v254_v8 }
 0x113   :  { %v352_v17 = vmul.f32 0.044715, %v320_v11 }
 0x114   :  { %v534_v18 = vpack.c.bf16 %v510_v13, %v509_v12 }
 0x115   :  { %v384_v20 = vadd.f32 1.0, %v352_v17 }
 0x116   :  { %v204_v22 = vpop.f32.mrf.mxu0  ;;  %654 = vmatmul.bf16.gmra.mxu1 %v534_v18 }
 0x117   :  { %v205_v24 = vadd.f32 %v8048_v38, %v204_v22  ;;  %v416_v25 = vmul.f32 %v384_v20, %v288_v19  ;;  %v7146_v28 = vpop.eup %7145  ;;  %v7029_v19 = vld [vmem:[%s11892_s3 + $0x10] sm:$0xff] }
 0x118   :  { %v479_v33 = vadd.f32 1.0, %v7146_v28  ;;  %2237 = vmatpush.bf16.msrb.mxu1 %v7029_v19 }
 0x119   :  { %v321_v26 = vmul.f32 %v205_v24, %v205_v24  ;;  %6648 = vmatmul.msk.bf16.gmra.mxu0 %vm101_vm0, %v1688_v21  ;;  %7147 = vtanh.f32 %v416_v25  ;;  %v289_v31 = vmul.f32 0.7978846, %v205_v24  ;;  %v257_v10 = vmul.f32 0.5, %v205_v24  ;;  %v1662_v24 = vld [vmem:[%s11890_s0 + $0x138] sm:$0xff] }
 0x11a   :  { %v511_v44 = vmul.f32 %v479_v33, %v255_v37 }
 0x11b   :  { %v353_v29 = vmul.f32 0.044715, %v321_v26 }
 0x11d   :  { %v385_v30 = vadd.f32 1.0, %v353_v29 }
 0x11e   :  { %v206_v32 = vpop.f32.mrf.mxu0 }
 0x11f   :  { %v7148_v35 = vpop.eup %7147  ;;  %v207_v36 = vadd.f32 %v8048_v38, %v206_v32  ;;  %v417_v39 = vmul.f32 %v385_v30, %v289_v31  ;;  %v1690_v32 = vpack.c.bf16 %v1662_v24, %v1661_v23 }
 0x120   :  { %v480_v42 = vadd.f32 1.0, %v7148_v35 }
 0x121   :  { %v322_v43 = vmul.f32 %v207_v36, %v207_v36  ;;  %7149 = vtanh.f32 %v417_v39  ;;  %v290_v52 = vmul.f32 0.7978846, %v207_v36  ;;  %v258_v14 = vmul.f32 0.5, %v207_v36 }
 0x122   :  { %v512_v45 = vmul.f32 %v480_v42, %v256_v41 }
 0x123   :  { %v354_v48 = vmul.f32 0.044715, %v322_v43  ;;  %v620_v49 = vpop.f32.mrf.mxu1 }
 0x124   :  { %v8188_v50 = vadd.f32 %v8179_v40, %v620_v49  ;;  %v535_v51 = vpack.c.bf16 %v512_v45, %v511_v44 }
 0x125   :  { %v386_v53 = vadd.f32 1.0, %v354_v48 }
 0x126   :  { %v764_v55 = vmul.f32 %v8188_v50, %v8188_v50  ;;  %v209_v56 = vpop.f32.mrf.mxu0  ;;  %659 = vmatmul.bf16.gmra.mxu1 %v535_v51  ;;  %v732_v1 = vmul.f32 0.7978846, %v8188_v50  ;;  %v700_v48 = vmul.f32 0.5, %v8188_v50 }
 0x127   :  { %v8193_v57 = vadd.f32 %v8048_v38, %v209_v56  ;;  %v418_v58 = vmul.f32 %v386_v53, %v290_v52  ;;  %v7150_v61 = vpop.eup %7149 }
 0x128   :  { %v796_v59 = vmul.f32 0.044715, %v764_v55  ;;  %v481_v5 = vadd.f32 1.0, %v7150_v61 }
 0x129   :  { %v323_v60 = vmul.f32 %v8193_v57, %v8193_v57  ;;  %6649 = vmatmul.msk.bf16.gmra.mxu0 %vm101_vm0, %v1689_v54  ;;  %7151 = vtanh.f32 %v418_v58  ;;  %v291_v11 = vmul.f32 0.7978846, %v8193_v57  ;;  %v259_v55 = vmul.f32 0.5, %v8193_v57 }
 0x12a   :  { %v828_v62 = vadd.f32 1.0, %v796_v59  ;;  %v513_v18 = vmul.f32 %v481_v5, %v257_v10  ;;  %v1663_v10 = vld [vmem:[%s11890_s0 + $0x140] sm:$0xff] }
 0x12b   :  { %v355_v63 = vmul.f32 0.044715, %v323_v60  ;;  %v622_v0 = vpop.f32.mrf.mxu1 }
 0x12c   :  { %v623_v2 = vadd.f32 %v8179_v40, %v622_v0  ;;  %v860_v6 = vmul.f32 %v828_v62, %v732_v1 }
 0x12d   :  { %v387_v4 = vadd.f32 1.0, %v355_v63 }
 0x12e   :  { %v765_v7 = vmul.f32 %v623_v2, %v623_v2  ;;  %v211_v8 = vpop.f32.mrf.mxu0  ;;  %v733_v20 = vmul.f32 0.7978846, %v623_v2  ;;  %7153 = vtanh.f32 %v860_v6  ;;  %v701_v53 = vmul.f32 0.5, %v623_v2 }
 0x12f   :  { %v7152_v9 = vpop.eup %7151  ;;  %v212_v12 = vadd.f32 %v8048_v38, %v211_v8  ;;  %v419_v16 = vmul.f32 %v387_v4, %v291_v11  ;;  %v1664_v11 = vld [vmem:[%s11890_s0 + $0x148] sm:$0xff] }
 0x130   :  { %v797_v13 = vmul.f32 0.044715, %v765_v7  ;;  %v482_v15 = vadd.f32 1.0, %v7152_v9  ;;  %v1691_v19 = vpack.c.bf16 %v1664_v11, %v1663_v10 }
 0x131   :  { %v324_v17 = vmul.f32 %v212_v12, %v212_v12  ;;  %v292_v30 = vmul.f32 0.7978846, %v212_v12  ;;  %7155 = vtanh.f32 %v419_v16  ;;  %v260_v4 = vmul.f32 0.5, %v212_v12 }
 0x132   :  { %v829_v21 = vadd.f32 1.0, %v797_v13  ;;  %v514_v22 = vmul.f32 %v482_v15, %v258_v14 }
 0x133   :  { %v356_v25 = vmul.f32 0.044715, %v324_v17  ;;  %v625_v26 = vpop.f32.mrf.mxu1 }
 0x134   :  { %v8215_v27 = vadd.f32 %v8179_v40, %v625_v26  ;;  %v536_v28 = vpack.c.bf16 %v514_v22, %v513_v18  ;;  %v861_v29 = vmul.f32 %v829_v21, %v733_v20  ;;  %v7154_v37 = vpop.eup %7153 }
 0x135   :  { %v388_v31 = vadd.f32 1.0, %v356_v25  ;;  %v924_v46 = vadd.f32 1.0, %v7154_v37  ;;  %v7041_v37 = vld [vmem:[%s11894_s5 + $0x30] sm:$0xff] }
 0x136   :  { %v766_v33 = vmul.f32 %v8215_v27, %v8215_v27  ;;  %v214_v34 = vpop.f32.mrf.mxu0  ;;  %664 = vmatmul.bf16.gmra.mxu1 %v536_v28  ;;  %7157 = vtanh.f32 %v861_v29  ;;  %v734_v51 = vmul.f32 0.7978846, %v8215_v27  ;;  %2694 = vmatpush.bf16.msrb.mxu2 %v7041_v37 }
 0x137   :  { %v8220_v35 = vadd.f32 %v8048_v38, %v214_v34  ;;  %v420_v36 = vmul.f32 %v388_v31, %v292_v30  ;;  %v7156_v42 = vpop.eup %7155  ;;  %v956_v0 = vmul.f32 %v924_v46, %v700_v48 }
 0x138   :  { %v798_v39 = vmul.f32 0.044715, %v766_v33  ;;  %v483_v60 = vadd.f32 1.0, %v7156_v42 }
 0x139   :  { %v325_v41 = vmul.f32 %v8220_v35, %v8220_v35  ;;  %6650 = vmatmul.msk.bf16.gmra.mxu0 %vm101_vm0, %v1690_v32  ;;  %7159 = vtanh.f32 %v420_v36  ;;  %v293_v56 = vmul.f32 0.7978846, %v8220_v35 }
 0x13a   :  { %v830_v43 = vadd.f32 1.0, %v798_v39  ;;  %v515_v57 = vmul.f32 %v483_v60, %v259_v55 }
 0x13b   :  { %v357_v44 = vmul.f32 0.044715, %v325_v41  ;;  %v627_v45 = vpop.f32.mrf.mxu1 }
 0x13c   :  { %v7158_v47 = vpop.eup %7157  ;;  %v628_v49 = vadd.f32 %v8179_v40, %v627_v45  ;;  %v862_v62 = vmul.f32 %v830_v43, %v734_v51  ;;  %v261_v45 = vmul.f32 0.5, %v8220_v35 }
 0x13d   :  { %v389_v52 = vadd.f32 1.0, %v357_v44  ;;  %v925_v54 = vadd.f32 1.0, %v7158_v47  ;;  %v702_v44 = vmul.f32 0.5, %v8215_v27  ;;  %v7028_v27 = vld [vmem:[%s11892_s3 + $0x8] sm:$0xff] }
 0x13e   :  { %v767_v58 = vmul.f32 %v628_v49, %v628_v49  ;;  %v216_v59 = vpop.f32.mrf.mxu0  ;;  %v735_v7 = vmul.f32 0.7978846, %v628_v49  ;;  %7161 = vtanh.f32 %v862_v62  ;;  %v703_v34 = vmul.f32 0.5, %v628_v49  ;;  %2238 = vmatpush.bf16.msrb.mxu1 %v7028_v27 }
 0x13f   :  { %v7160_v61 = vpop.eup %7159  ;;  %v217_v63 = vadd.f32 %v8048_v38, %v216_v59  ;;  %v957_v50 = vmul.f32 %v925_v54, %v701_v53  ;;  %v421_v1 = vmul.f32 %v389_v52, %v293_v56 }
 0x140   :  { %v799_v3 = vmul.f32 0.044715, %v767_v58  ;;  %v484_v5 = vadd.f32 1.0, %v7160_v61 }
 0x141   :  { %v326_v6 = vmul.f32 %v217_v63, %v217_v63  ;;  %v988_v2 = vpack.c.bf16 %v957_v50, %v956_v0  ;;  %7163 = vtanh.f32 %v421_v1  ;;  %v294_v17 = vmul.f32 0.7978846, %v217_v63  ;;  %v1665_v1 = vld [vmem:[%s11890_s0 + $0x150] sm:$0xff] }
 0x142   :  { %v831_v8 = vadd.f32 1.0, %v799_v3  ;;  %v516_v9 = vmul.f32 %v484_v5, %v260_v4  ;;  %v262_v54 = vmul.f32 0.5, %v217_v63  ;;  %v1666_v63 = vld [vmem:[%s11890_s0 + $0x158] sm:$0xff] }
 0x143   :  { %v358_v13 = vmul.f32 0.044715, %v326_v6  ;;  %v630_v14 = vpop.f32.mrf.mxu1  ;;  %1080 = vmatmul.bf16.vlgmr.msra.gmra.mxu2 %v988_v2 }
 0x144   :  { %v8238_v12 = vadd.f32 %v8179_v40, %v630_v14  ;;  %v537_v15 = vpack.c.bf16 %v516_v9, %v515_v57  ;;  %v863_v16 = vmul.f32 %v831_v8, %v735_v7  ;;  %v7162_v25 = vpop.eup %7161  ;;  %v1692_v57 = vpack.c.bf16 %v1666_v63, %v1665_v1 }
 0x145   :  { %v390_v18 = vadd.f32 1.0, %v358_v13  ;;  %v926_v36 = vadd.f32 1.0, %v7162_v25 }
 0x146   :  { %v768_v20 = vmul.f32 %v8238_v12, %v8238_v12  ;;  %v219_v21 = vpop.f32.mrf.mxu0  ;;  %669 = vmatmul.bf16.gmra.mxu1 %v537_v15  ;;  %7165 = vtanh.f32 %v863_v16  ;;  %v736_v39 = vmul.f32 0.7978846, %v8238_v12 }
 0x147   :  { %v8243_v22 = vadd.f32 %v8048_v38, %v219_v21  ;;  %v422_v23 = vmul.f32 %v390_v18, %v294_v17  ;;  %v7164_v28 = vpop.eup %7163  ;;  %v958_v58 = vmul.f32 %v926_v36, %v702_v44 }
 0x148   :  { %v800_v24 = vmul.f32 0.044715, %v768_v20  ;;  %v485_v43 = vadd.f32 1.0, %v7164_v28 }
 0x149   :  { %v327_v26 = vmul.f32 %v8243_v22, %v8243_v22  ;;  %6651 = vmatmul.msk.bf16.gmra.mxu0 %vm101_vm0, %v1691_v19  ;;  %7167 = vtanh.f32 %v422_v23  ;;  %v295_v46 = vmul.f32 0.7978846, %v8243_v22 }
 0x14a   :  { %v832_v29 = vadd.f32 1.0, %v800_v24  ;;  %v517_v61 = vmul.f32 %v485_v43, %v261_v45 }
 0x14b   :  { %v359_v30 = vmul.f32 0.044715, %v327_v26  ;;  %v632_v31 = vpop.f32.mrf.mxu1 }
 0x14c   :  { %v7166_v32 = vpop.eup %7165  ;;  %v633_v33 = vadd.f32 %v8179_v40, %v632_v31  ;;  %v864_v51 = vmul.f32 %v832_v29, %v736_v39  ;;  %v263_v31 = vmul.f32 0.5, %v8243_v22 }
 0x14d   :  { %v391_v41 = vadd.f32 1.0, %v359_v30  ;;  %v927_v42 = vadd.f32 1.0, %v7166_v32  ;;  %v704_v30 = vmul.f32 0.5, %v8238_v12 }
 0x14e   :  { %v769_v47 = vmul.f32 %v633_v33, %v633_v33  ;;  %v221_v48 = vpop.f32.mrf.mxu0  ;;  %v737_v35 = vmul.f32 0.7978846, %v633_v33  ;;  %7169 = vtanh.f32 %v864_v51  ;;  %v705_v24 = vmul.f32 0.5, %v633_v33  ;;  %v8285_v33 = vld [vmem:[%s11891_s2] ss:$0 sm:$0xff] }
 0x14f   :  { %v7168_v49 = vpop.eup %7167  ;;  %v222_v52 = vadd.f32 %v8048_v38, %v221_v48  ;;  %v959_v53 = vmul.f32 %v927_v42, %v703_v34  ;;  %v423_v55 = vmul.f32 %v391_v41, %v295_v46 }
 0x150   :  { %v801_v56 = vmul.f32 0.044715, %v769_v47  ;;  %v486_v59 = vadd.f32 1.0, %v7168_v49 }
 0x151   :  { %v328_v60 = vmul.f32 %v222_v52, %v222_v52  ;;  %v989_v0 = vpack.c.bf16 %v959_v53, %v958_v58  ;;  %7171 = vtanh.f32 %v423_v55  ;;  %v296_v7 = vmul.f32 0.7978846, %v222_v52 }
 0x152   :  { %v833_v62 = vadd.f32 1.0, %v801_v56  ;;  %v518_v50 = vmul.f32 %v486_v59, %v262_v54  ;;  %v264_v39 = vmul.f32 0.5, %v222_v52  ;;  %v1667_v52 = vld [vmem:[%s11890_s0 + $0x160] sm:$0xff]  ;;  %v1668_v54 = vld [vmem:[%s11890_s0 + $0x168] sm:$0xff] }
 0x153   :  { %v360_v3 = vmul.f32 0.044715, %v328_v60  ;;  %v635_v4 = vpop.f32.mrf.mxu1  ;;  %1085 = vmatmul.bf16.gmra.mxu2 %v989_v0 }
 0x154   :  { %v8267_v5 = vadd.f32 %v8179_v40, %v635_v4  ;;  %v538_v6 = vpack.c.bf16 %v518_v50, %v517_v61  ;;  %v865_v2 = vmul.f32 %v833_v62, %v737_v35  ;;  %v7170_v15 = vpop.eup %7169  ;;  %v1693_v35 = vpack.c.bf16 %v1668_v54, %v1667_v52 }
 0x155   :  { %v392_v8 = vadd.f32 1.0, %v360_v3  ;;  %v928_v25 = vadd.f32 1.0, %v7170_v15 }
 0x156   :  { %v770_v9 = vmul.f32 %v8267_v5, %v8267_v5  ;;  %v224_v10 = vpop.f32.mrf.mxu0  ;;  %674 = vmatmul.bf16.gmra.mxu1 %v538_v6  ;;  %7173 = vtanh.f32 %v865_v2 }
 0x157   :  { %v424_v11 = vmul.f32 %v392_v8, %v296_v7  ;;  %v8272_v13 = vadd.f32 %v8048_v38, %v224_v10  ;;  %v7172_v17 = vpop.eup %7171  ;;  %v738_v38 = vmul.f32 0.7978846, %v8267_v5  ;;  %v960_v12 = vmul.f32 %v928_v25, %v704_v30 }
 0x158   :  { %v802_v14 = vmul.f32 0.044715, %v770_v9  ;;  %v487_v29 = vadd.f32 1.0, %v7172_v17 }
 0x159   :  { %7175 = vtanh.f32 %v424_v11  ;;  %v329_v16 = vmul.f32 %v8272_v13, %v8272_v13  ;;  %6652 = vmatmul.msk.bf16.gmra.mxu0 %vm101_vm0, %v1692_v57  ;;  %v297_v32 = vmul.f32 0.7978846, %v8272_v13 }
 0x15a   :  { %v834_v18 = vadd.f32 1.0, %v802_v14  ;;  %v519_v47 = vmul.f32 %v487_v29, %v263_v31  ;;  %v7040_v14 = vld [vmem:[%s11894_s5 + $0x28] sm:$0xff] }
 0x15b   :  { %v361_v19 = vmul.f32 0.044715, %v329_v16  ;;  %v637_v20 = vpop.f32.mrf.mxu1  ;;  %2695 = vmatpush.bf16.msrb.mxu2 %v7040_v14 }
 0x15c   :  { %v7174_v21 = vpop.eup %7173  ;;  %v638_v23 = vadd.f32 %v8179_v40, %v637_v20  ;;  %v866_v41 = vmul.f32 %v834_v18, %v738_v38  ;;  %v265_v20 = vmul.f32 0.5, %v8272_v13 }
 0x15d   :  { %v393_v26 = vadd.f32 1.0, %v361_v19  ;;  %v929_v28 = vadd.f32 1.0, %v7174_v21  ;;  %v706_v19 = vmul.f32 0.5, %v8267_v5 }
 0x15e   :  { %v771_v34 = vmul.f32 %v638_v23, %v638_v23  ;;  %v226_v36 = vpop.f32.mrf.mxu0  ;;  %v739_v48 = vmul.f32 0.7978846, %v638_v23  ;;  %7177 = vtanh.f32 %v866_v41  ;;  %v707_v10 = vmul.f32 0.5, %v638_v23 }
 0x15f   :  { %v7176_v37 = vpop.eup %7175  ;;  %v227_v42 = vadd.f32 %v8285_v33, %v226_v36  ;;  %v961_v43 = vmul.f32 %v929_v28, %v705_v24  ;;  %v425_v44 = vmul.f32 %v393_v26, %v297_v32 }
 0x160   :  { %v803_v45 = vmul.f32 0.044715, %v771_v34  ;;  %v488_v46 = vadd.f32 1.0, %v7176_v37 }
 0x161   :  { %v330_v22 = vmul.f32 %v227_v42, %v227_v42  ;;  %v990_v51 = vpack.c.bf16 %v961_v43, %v960_v12  ;;  %7179 = vtanh.f32 %v425_v44  ;;  %v298_v61 = vmul.f32 0.7978846, %v227_v42  ;;  %v1669_v43 = vld [vmem:[%s11890_s0 + $0x170] sm:$0xff] }
 0x162   :  { %v835_v49 = vadd.f32 1.0, %v803_v45  ;;  %v520_v53 = vmul.f32 %v488_v46, %v264_v39  ;;  %v266_v38 = vmul.f32 0.5, %v227_v42  ;;  %v1670_v42 = vld [vmem:[%s11890_s0 + $0x178] sm:$0xff] }
 0x163   :  { %v362_v55 = vmul.f32 0.044715, %v330_v22  ;;  %v640_v56 = vpop.f32.mrf.mxu1  ;;  %1090 = vmatmul.bf16.gmra.mxu2 %v990_v51 }
 0x164   :  { %v8295_v58 = vadd.f32 %v8179_v40, %v640_v56  ;;  %v539_v59 = vpack.c.bf16 %v520_v53, %v519_v47  ;;  %v867_v60 = vmul.f32 %v835_v49, %v739_v48  ;;  %v7178_v3 = vpop.eup %7177  ;;  %v1694_v49 = vpack.c.bf16 %v1670_v42, %v1669_v43 }
 0x165   :  { %v394_v27 = vadd.f32 1.0, %v362_v55  ;;  %v930_v11 = vadd.f32 1.0, %v7178_v3 }
 0x166   :  { %v772_v62 = vmul.f32 %v8295_v58, %v8295_v58  ;;  %v229_v0 = vpop.f32.mrf.mxu0  ;;  %679 = vmatmul.bf16.gmra.mxu1 %v539_v59  ;;  %7181 = vtanh.f32 %v867_v60  ;;  %v740_v15 = vmul.f32 0.7978846, %v8295_v58 }
 0x167   :  { %v426_v50 = vmul.f32 %v394_v27, %v298_v61  ;;  %v8300_v1 = vadd.f32 %v8285_v33, %v229_v0  ;;  %v7180_v6 = vpop.eup %7179  ;;  %v962_v32 = vmul.f32 %v930_v11, %v706_v19  ;;  %v7027_v61 = vld [vmem:[%s11892_s3] sm:$0xff] }
 0x168   :  { %v804_v63 = vmul.f32 0.044715, %v772_v62  ;;  %v489_v18 = vadd.f32 1.0, %v7180_v6  ;;  %v7051_v27 = vld [vmem:[%s11889_s1] sm:$0xff]  ;;  %2239 = vmatpush.bf16.msrb.mxu1 %v7027_v61 }
 0x169   :  { %7183 = vtanh.f32 %v426_v50  ;;  %v331_v4 = vmul.f32 %v8300_v1, %v8300_v1  ;;  %6653 = vmatmul.msk.bf16.gmra.mxu0 %vm101_vm0, %v1693_v35  ;;  %v299_v21 = vmul.f32 0.7978846, %v8300_v1 }
 0x16a   :  { %v836_v2 = vadd.f32 1.0, %v804_v63  ;;  %v521_v37 = vmul.f32 %v489_v18, %v265_v20  ;;  %3398 = vmatpush.bf16.msra.mxu0 %v7051_v27 }
 0x16b   :  { %v363_v7 = vmul.f32 0.044715, %v331_v4  ;;  %v642_v8 = vpop.f32.mrf.mxu1 }
 0x16c   :  { %v7182_v57 = vpop.eup %7181  ;;  %v643_v9 = vadd.f32 %v8179_v40, %v642_v8  ;;  %v868_v26 = vmul.f32 %v836_v2, %v740_v15 }
 0x16d   :  { %v395_v16 = vadd.f32 1.0, %v363_v7  ;;  %v931_v17 = vadd.f32 1.0, %v7182_v57  ;;  %v708_v57 = vmul.f32 0.5, %v8295_v58 }
 0x16e   :  { %v773_v24 = vmul.f32 %v643_v9, %v643_v9  ;;  %v231_v25 = vpop.f32.mrf.mxu0  ;;  %v741_v5 = vmul.f32 0.7978846, %v643_v9  ;;  %7185 = vtanh.f32 %v868_v26  ;;  %v709_v3 = vmul.f32 0.5, %v643_v9 }
 0x16f   :  { %v7184_v23 = vpop.eup %7183  ;;  %v232_v28 = vadd.f32 %v8285_v33, %v231_v25  ;;  %v963_v29 = vmul.f32 %v931_v17, %v707_v10  ;;  %v427_v30 = vmul.f32 %v395_v16, %v299_v21  ;;  %v267_v10 = vmul.f32 0.5, %v8300_v1 }
 0x170   :  { %v805_v31 = vmul.f32 0.044715, %v773_v24  ;;  %v490_v34 = vadd.f32 1.0, %v7184_v23 }
 0x171   :  { %v332_v36 = vmul.f32 %v232_v28, %v232_v28  ;;  %v991_v13 = vpack.c.bf16 %v963_v29, %v962_v32  ;;  %7187 = vtanh.f32 %v427_v30  ;;  %v300_v47 = vmul.f32 0.7978846, %v232_v28  ;;  %v1671_v30 = vld [vmem:[%s11890_s0 + $0x180] sm:$0xff] }
 0x172   :  { %v837_v39 = vadd.f32 1.0, %v805_v31  ;;  %v522_v41 = vmul.f32 %v490_v34, %v266_v38  ;;  %v268_v17 = vmul.f32 0.5, %v232_v28  ;;  %v1672_v28 = vld [vmem:[%s11890_s0 + $0x188] sm:$0xff]  ;;  %v8352_v32 = vld [vmem:[%s11891_s2] ss:$0 sm:$0xff] }
 0x173   :  { %v364_v44 = vmul.f32 0.044715, %v332_v36  ;;  %v645_v45 = vpop.f32.mrf.mxu1  ;;  %1095 = vmatmul.bf16.gmra.mxu2 %v991_v13  ;;  %v1695_v13 = vpack.c.bf16 %v1672_v28, %v1671_v30 }
 0x174   :  { %v8321_v12 = vadd.f32 %v8179_v40, %v645_v45  ;;  %v540_v46 = vpack.c.bf16 %v522_v41, %v521_v37  ;;  %v869_v22 = vmul.f32 %v837_v39, %v741_v5  ;;  %v7186_v56 = vpop.eup %7185 }
 0x175   :  { %v396_v48 = vadd.f32 1.0, %v364_v44  ;;  %v932_v4 = vadd.f32 1.0, %v7186_v56 }
 0x176   :  { %v774_v51 = vmul.f32 %v8321_v12, %v8321_v12  ;;  %v234_v53 = vpop.f32.mrf.mxu0  ;;  %684 = vmatmul.bf16.gmra.mxu1 %v540_v46  ;;  %7189 = vtanh.f32 %v869_v22  ;;  %v742_v6 = vmul.f32 0.7978846, %v8321_v12 }
 0x177   :  { %v428_v52 = vmul.f32 %v396_v48, %v300_v47  ;;  %v8326_v54 = vadd.f32 %v8285_v33, %v234_v53  ;;  %v7188_v60 = vpop.eup %7187  ;;  %v964_v24 = vmul.f32 %v932_v4, %v708_v57 }
 0x178   :  { %v806_v55 = vmul.f32 0.044715, %v774_v51  ;;  %v491_v8 = vadd.f32 1.0, %v7188_v60 }
 0x179   :  { %7191 = vtanh.f32 %v428_v52  ;;  %v333_v59 = vmul.f32 %v8326_v54, %v8326_v54  ;;  %6654 = vmatmul.msk.bf16.gmra.mxu0 %vm101_vm0, %v1694_v49  ;;  %v301_v11 = vmul.f32 0.7978846, %v8326_v54 }
 0x17a   :  { %v838_v35 = vadd.f32 1.0, %v806_v55  ;;  %v523_v38 = vmul.f32 %v491_v8, %v267_v10 }
 0x17b   :  { %v365_v62 = vmul.f32 0.044715, %v333_v59  ;;  %v647_v0 = vpop.f32.mrf.mxu1  ;;  %v7039_v59 = vld [vmem:[%s11894_s5 + $0x20] sm:$0xff] }
 0x17c   :  { %v7190_v50 = vpop.eup %7189  ;;  %v648_v63 = vadd.f32 %v8179_v40, %v647_v0  ;;  %v870_v18 = vmul.f32 %v838_v35, %v742_v6  ;;  %v269_v0 = vmul.f32 0.5, %v8326_v54  ;;  %2696 = vmatpush.bf16.msrb.mxu2 %v7039_v59 }
 0x17d   :  { %v397_v2 = vadd.f32 1.0, %v365_v62  ;;  %v933_v7 = vadd.f32 1.0, %v7190_v50  ;;  %v710_v62 = vmul.f32 0.5, %v8321_v12  ;;  %v7060_v12 = vld [vmem:[%s11892_s3 + $0x38] sm:$0xff] }
 0x17e   :  { %v775_v14 = vmul.f32 %v648_v63, %v648_v63  ;;  %v236_v15 = vpop.f32.mrf.mxu0  ;;  %v743_v26 = vmul.f32 0.7978846, %v648_v63  ;;  %7193 = vtanh.f32 %v870_v18  ;;  %v711_v55 = vmul.f32 0.5, %v648_v63  ;;  %3852 = vmatpush.bf16.msra.mxu1 %v7060_v12 }
 0x17f   :  { %v7192_v16 = vpop.eup %7191  ;;  %v237_v9 = vadd.f32 %v8285_v33, %v236_v15  ;;  %v965_v19 = vmul.f32 %v933_v7, %v709_v3  ;;  %v429_v20 = vmul.f32 %v397_v2, %v301_v11 }
 0x180   :  { %v807_v21 = vmul.f32 0.044715, %v775_v14  ;;  %v492_v25 = vadd.f32 1.0, %v7192_v16 }
 0x181   :  { %v334_v23 = vmul.f32 %v237_v9, %v237_v9  ;;  %v992_v29 = vpack.c.bf16 %v965_v19, %v964_v24  ;;  %7195 = vtanh.f32 %v429_v20  ;;  %v302_v5 = vmul.f32 0.7978846, %v237_v9  ;;  %v1674_v20 = vld [vmem:[%s11890_s0 + $0x198] sm:$0xff] }
 0x182   :  { %v839_v58 = vadd.f32 1.0, %v807_v21  ;;  %v524_v1 = vmul.f32 %v492_v25, %v268_v17  ;;  %v270_v6 = vmul.f32 0.5, %v237_v9  ;;  %v1673_v9 = vld [vmem:[%s11890_s0 + $0x190] sm:$0xff] }
 0x183   :  { %v366_v33 = vmul.f32 0.044715, %v334_v23  ;;  %v650_v31 = vpop.f32.mrf.mxu1  ;;  %1100 = vmatmul.bf16.gmra.mxu2 %v992_v29  ;;  %v1696_v29 = vpack.c.bf16 %v1674_v20, %v1673_v9  ;;  %v7024_v20 = vld [vmem:[%s11896_s7 + $0x38] sm:$0xff] }
 0x184   :  { %v8355_v34 = vadd.f32 %v8179_v40, %v650_v31  ;;  %v541_v36 = vpack.c.bf16 %v524_v1, %v523_v38  ;;  %v871_v37 = vmul.f32 %v839_v58, %v743_v26  ;;  %v7194_v46 = vpop.eup %7193  ;;  %1533 = vmatpush.bf16.msra.mxu3 %v7024_v20 }
 0x185   :  { %v398_v39 = vadd.f32 1.0, %v366_v33  ;;  %v934_v56 = vadd.f32 1.0, %v7194_v46 }
 0x186   :  { %v776_v41 = vmul.f32 %v8355_v34, %v8355_v34  ;;  %689 = vmatmul.bf16.gmra.mxu1 %v541_v36  ;;  %v1780_v43 = vpop.f32.mrf.mxu0  ;;  %7197 = vtanh.f32 %v871_v37  ;;  %v744_v60 = vmul.f32 0.7978846, %v8355_v34 }
 0x187   :  { %v430_v42 = vmul.f32 %v398_v39, %v302_v5  ;;  %v8360_v44 = vadd.f32 %v8352_v32, %v1780_v43  ;;  %v7196_v47 = vpop.eup %7195  ;;  %v966_v11 = vmul.f32 %v934_v56, %v710_v62 }
 0x188   :  { %v808_v45 = vmul.f32 0.044715, %v776_v41  ;;  %v493_v35 = vadd.f32 1.0, %v7196_v47 }
 0x189   :  { %7199 = vtanh.f32 %v430_v42  ;;  %v1924_v22 = vmul.f32 %v8360_v44, %v8360_v44  ;;  %6655 = vmatmul.msk.bf16.gmra.mxu0 %vm101_vm0, %v1695_v13  ;;  %v1892_v50 = vmul.f32 0.7978846, %v8360_v44 }
 0x18a   :  { %v840_v48 = vadd.f32 1.0, %v808_v45  ;;  %v525_v16 = vmul.f32 %v493_v35, %v269_v0 }
 0x18b   :  { %v1956_v49 = vmul.f32 0.044715, %v1924_v22  ;;  %v652_v51 = vpop.f32.mrf.mxu1 }
 0x18c   :  { %v7198_v53 = vpop.eup %7197  ;;  %v653_v52 = vadd.f32 %v8179_v40, %v652_v51  ;;  %v872_v2 = vmul.f32 %v840_v48, %v744_v60  ;;  %v712_v51 = vmul.f32 0.5, %v8355_v34 }
 0x18d   :  { %v1988_v61 = vadd.f32 1.0, %v1956_v49  ;;  %v935_v27 = vadd.f32 1.0, %v7198_v53  ;;  %v1860_v53 = vmul.f32 0.5, %v8360_v44 }
 0x18e   :  { %v777_v3 = vmul.f32 %v653_v52, %v653_v52  ;;  %v1782_v4 = vpop.f32.mrf.mxu0  ;;  %v745_v54 = vmul.f32 0.7978846, %v653_v52  ;;  %7201 = vtanh.f32 %v872_v2  ;;  %v713_v45 = vmul.f32 0.5, %v653_v52 }
 0x18f   :  { %v7200_v63 = vpop.eup %7199  ;;  %v1783_v7 = vadd.f32 %v8352_v32, %v1782_v4  ;;  %v967_v8 = vmul.f32 %v935_v27, %v711_v55  ;;  %v2020_v57 = vmul.f32 %v1988_v61, %v1892_v50 }
 0x190   :  { %v809_v10 = vmul.f32 0.044715, %v777_v3  ;;  %v494_v14 = vadd.f32 1.0, %v7200_v63 }
 0x191   :  { %v1925_v15 = vmul.f32 %v1783_v7, %v1783_v7  ;;  %v993_v18 = vpack.c.bf16 %v967_v8, %v966_v11  ;;  %7203 = vtanh.f32 %v2020_v57  ;;  %v1893_v26 = vmul.f32 0.7978846, %v1783_v7  ;;  %v1675_v8 = vld [vmem:[%s11890_s0 + $0x1a0] sm:$0xff] }
 0x192   :  { %v841_v17 = vadd.f32 1.0, %v809_v10  ;;  %v526_v19 = vmul.f32 %v494_v14, %v270_v6  ;;  %v1861_v61 = vmul.f32 0.5, %v1783_v7  ;;  %v1676_v7 = vld [vmem:[%s11890_s0 + $0x1a8] sm:$0xff] }
 0x193   :  { %v1957_v21 = vmul.f32 0.044715, %v1925_v15  ;;  %v655_v24 = vpop.f32.mrf.mxu1  ;;  %1105 = vmatmul.bf16.gmra.mxu2 %v993_v18 }
 0x194   :  { %v8384_v25 = vadd.f32 %v8179_v40, %v655_v24  ;;  %v542_v23 = vpack.c.bf16 %v526_v19, %v525_v16  ;;  %v873_v38 = vmul.f32 %v841_v17, %v745_v54  ;;  %v7202_v36 = vpop.eup %7201  ;;  %v1697_v54 = vpack.c.bf16 %v1676_v7, %v1675_v8 }
 0x195   :  { %v1989_v58 = vadd.f32 1.0, %v1957_v21  ;;  %v936_v46 = vadd.f32 1.0, %v7202_v36 }
 0x196   :  { %v778_v1 = vmul.f32 %v8384_v25, %v8384_v25  ;;  %694 = vmatmul.bf16.gmra.mxu1 %v542_v23  ;;  %v1785_v30 = vpop.f32.mrf.mxu0  ;;  %7205 = vtanh.f32 %v873_v38  ;;  %v746_v47 = vmul.f32 0.7978846, %v8384_v25 }
 0x197   :  { %v2021_v28 = vmul.f32 %v1989_v58, %v1893_v26  ;;  %v8389_v33 = vadd.f32 %v8352_v32, %v1785_v30  ;;  %v7204_v5 = vpop.eup %7203  ;;  %v968_v3 = vmul.f32 %v936_v46, %v712_v51 }
 0x198   :  { %v810_v31 = vmul.f32 0.044715, %v778_v1  ;;  %v2084_v22 = vadd.f32 1.0, %v7204_v5  ;;  %v7023_v1 = vld [vmem:[%s11896_s7 + $0x30] sm:$0xff] }
 0x199   :  { %7207 = vtanh.f32 %v2021_v28  ;;  %v1926_v37 = vmul.f32 %v8389_v33, %v8389_v33  ;;  %6656 = vmatmul.msk.bf16.gmra.mxu0 %vm101_vm0, %v1696_v29  ;;  %v1894_v55 = vmul.f32 0.7978846, %v8389_v33  ;;  %1534 = vmatpush.bf16.msra.mxu3 %v7023_v1 }
 0x19a   :  { %v842_v39 = vadd.f32 1.0, %v810_v31  ;;  %v2116_v4 = vmul.f32 %v2084_v22, %v1860_v53 }
 0x19b   :  { %v1958_v13 = vmul.f32 0.044715, %v1926_v37  ;;  %v657_v41 = vpop.f32.mrf.mxu1  ;;  %v7038_v37 = vld [vmem:[%s11894_s5 + $0x18] sm:$0xff] }
 0x19c   :  { %v7206_v43 = vpop.eup %7205  ;;  %v658_v42 = vadd.f32 %v8179_v40, %v657_v41  ;;  %v874_v27 = vmul.f32 %v842_v39, %v746_v47  ;;  %2697 = vmatpush.bf16.msrb.mxu2 %v7038_v37 }
 0x19d   :  { %v1990_v48 = vadd.f32 1.0, %v1958_v13  ;;  %v937_v49 = vadd.f32 1.0, %v7206_v43  ;;  %v714_v43 = vmul.f32 0.5, %v8384_v25  ;;  %v7022_v25 = vld [vmem:[%s11896_s7 + $0x28] sm:$0xff] }
 0x19e   :  { %v779_v56 = vmul.f32 %v658_v42, %v658_v42  ;;  %v1787_v59 = vpop.f32.mrf.mxu0  ;;  %v747_v34 = vmul.f32 0.7978846, %v658_v42  ;;  %7209 = vtanh.f32 %v874_v27  ;;  %v715_v31 = vmul.f32 0.5, %v658_v42  ;;  %1535 = vmatpush.bf16.msra.mxu3 %v7022_v25 }
 0x19f   :  { %v7208_v60 = vpop.eup %7207  ;;  %v1788_v35 = vadd.f32 %v8352_v32, %v1787_v59  ;;  %v969_v52 = vmul.f32 %v937_v49, %v713_v45  ;;  %v2022_v0 = vmul.f32 %v1990_v48, %v1894_v55  ;;  %v1862_v45 = vmul.f32 0.5, %v8389_v33 }
 0x1a0   :  { %v2085_v62 = vadd.f32 1.0, %v7208_v60  ;;  %v811_v50 = vmul.f32 0.044715, %v779_v56 }
 0x1a1   :  { %v1927_v63 = vmul.f32 %v1788_v35, %v1788_v35  ;;  %v994_v44 = vpack.c.bf16 %v969_v52, %v968_v3  ;;  %7211 = vtanh.f32 %v2022_v0  ;;  %v1895_v16 = vmul.f32 0.7978846, %v1788_v35  ;;  %v1678_v0 = vld [vmem:[%s11890_s0 + $0x1b8] sm:$0xff] }
 0x1a2   :  { %v2117_v6 = vmul.f32 %v2085_v62, %v1861_v61  ;;  %v843_v2 = vadd.f32 1.0, %v811_v50  ;;  %v1863_v47 = vmul.f32 0.5, %v1788_v35  ;;  %v1677_v62 = vld [vmem:[%s11890_s0 + $0x1b0] sm:$0xff] }
 0x1a3   :  { %v1959_v57 = vmul.f32 0.044715, %v1927_v63  ;;  %v660_v10 = vpop.f32.mrf.mxu1  ;;  %1110 = vmatmul.bf16.gmra.mxu2 %v994_v44  ;;  %v7059_v50 = vld [vmem:[%s11892_s3 + $0x30] sm:$0xff]  ;;  %v7021_v63 = vld [vmem:[%s11896_s7 + $0x20] sm:$0xff] }
 0x1a4   :  { %v8407_v11 = vadd.f32 %v8179_v40, %v660_v10  ;;  %v2148_v14 = vpack.c.bf16 %v2117_v6, %v2116_v4  ;;  %v875_v15 = vmul.f32 %v843_v2, %v747_v34  ;;  %v7210_v24 = vpop.eup %7209  ;;  %v8459_v6 = vld [vmem:[%s11893_s4] ss:$0 sm:$0xff]  ;;  %3853 = vmatpush.bf16.msra.mxu1 %v7059_v50  ;;  %1536 = vmatpush.bf16.msra.mxu3 %v7021_v63 }
 0x1a5   :  { %v1991_v12 = vadd.f32 1.0, %v1959_v57  ;;  %v938_v36 = vadd.f32 1.0, %v7210_v24  ;;  %v1698_v57 = vpack.c.bf16 %v1678_v0, %v1677_v62 }
 0x1a6   :  { %v780_v17 = vmul.f32 %v8407_v11, %v8407_v11  ;;  %v1790_v18 = vpop.f32.mrf.mxu0  ;;  %2240 = vmatmul.bf16.vlgmr.msrb.gmra.mxu1 %v2148_v14  ;;  %7213 = vtanh.f32 %v875_v15  ;;  %v748_v5 = vmul.f32 0.7978846, %v8407_v11  ;;  %v716_v37 = vmul.f32 0.5, %v8407_v11  ;;  %v7018_v11 = vld [vmem:[%s11896_s7 + $0x8] sm:$0xff] }
 0x1a7   :  { %v2023_v19 = vmul.f32 %v1991_v12, %v1895_v16  ;;  %v8412_v9 = vadd.f32 %v8352_v32, %v1790_v18  ;;  %v7212_v38 = vpop.eup %7211  ;;  %v970_v55 = vmul.f32 %v938_v36, %v714_v43  ;;  %v7020_v12 = vld [vmem:[%s11896_s7 + $0x18] sm:$0xff] }
 0x1a8   :  { %v812_v21 = vmul.f32 0.044715, %v780_v17  ;;  %v2086_v41 = vadd.f32 1.0, %v7212_v38  ;;  %1537 = vmatpush.bf16.msra.mxu3 %v7020_v12 }
 0x1a9   :  { %7215 = vtanh.f32 %v2023_v19  ;;  %v1928_v23 = vmul.f32 %v8412_v9, %v8412_v9  ;;  %6657 = vmatmul.msk.bf16.gmra.mxu0 %vm101_vm0, %v1697_v54  ;;  %v1896_v46 = vmul.f32 0.7978846, %v8412_v9 }
 0x1aa   :  { %v844_v26 = vadd.f32 1.0, %v812_v21  ;;  %v2118_v60 = vmul.f32 %v2086_v41, %v1862_v45 }
 0x1ab   :  { %v1960_v58 = vmul.f32 0.044715, %v1928_v23  ;;  %v662_v29 = vpop.f32.mrf.mxu1  ;;  %v7019_v23 = vld [vmem:[%s11896_s7 + $0x10] sm:$0xff] }
 0x1ac   :  { %v7214_v30 = vpop.eup %7213  ;;  %v8424_v28 = vadd.f32 %v8179_v40, %v662_v29  ;;  %v876_v48 = vmul.f32 %v844_v26, %v748_v5  ;;  %1538 = vmatpush.bf16.msra.mxu3 %v7019_v23  ;;  %v1864_v5 = vmul.f32 0.5, %v8412_v9 }
 0x1ad   :  { %v1992_v39 = vadd.f32 1.0, %v1960_v58  ;;  %v939_v13 = vadd.f32 1.0, %v7214_v30 }
 0x1ae   :  { %v781_v40 = vmul.f32 %v8424_v28, %v8424_v28  ;;  %v1792_v42 = vpop.f32.mrf.mxu0  ;;  %v749_v61 = vmul.f32 0.7978846, %v8424_v28  ;;  %7217 = vtanh.f32 %v876_v48  ;;  %v717_v58 = vmul.f32 0.5, %v8424_v28 }
 0x1af   :  { %v7216_v22 = vpop.eup %7215  ;;  %v8436_v49 = vadd.f32 %v8352_v32, %v1792_v42  ;;  %v971_v51 = vmul.f32 %v939_v13, %v715_v31  ;;  %v2024_v53 = vmul.f32 %v1992_v39, %v1896_v46 }
 0x1b0   :  { %v813_v33 = vmul.f32 0.044715, %v781_v40  ;;  %v2087_v56 = vadd.f32 1.0, %v7216_v22  ;;  %1539 = vmatpush.bf16.msra.mxu3 %v7018_v11 }
 0x1b1   :  { %v1929_v59 = vmul.f32 %v8436_v49, %v8436_v49  ;;  %v995_v35 = vpack.c.bf16 %v971_v51, %v970_v55  ;;  %7219 = vtanh.f32 %v2024_v53  ;;  %v1897_v8 = vmul.f32 0.7978846, %v8436_v49  ;;  %v1679_v55 = vld [vmem:[%s11890_s0 + $0x1c0] sm:$0xff] }
 0x1b2   :  { %v845_v27 = vadd.f32 1.0, %v813_v33  ;;  %v2119_v52 = vmul.f32 %v2087_v56, %v1863_v47  ;;  %v1865_v28 = vmul.f32 0.5, %v8436_v49  ;;  %v1680_v56 = vld [vmem:[%s11890_s0 + $0x1c8] sm:$0xff] }
 0x1b3   :  { %v1961_v3 = vmul.f32 0.044715, %v1929_v59  ;;  %v665_v4 = vpop.f32.mrf.mxu1  ;;  %1115 = vmatmul.bf16.gmra.mxu2 %v995_v35 }
 0x1b4   :  { %v8462_v34 = vadd.f32 %v8459_v6, %v665_v4  ;;  %v2149_v2 = vpack.c.bf16 %v2119_v52, %v2118_v60  ;;  %v877_v44 = vmul.f32 %v845_v27, %v749_v61  ;;  %v7218_v17 = vpop.eup %7217  ;;  %v8508_v61 = vld [vmem:[%s11895_s6] ss:$0 sm:$0xff] }
 0x1b5   :  { %v1993_v7 = vadd.f32 1.0, %v1961_v3  ;;  %v940_v29 = vadd.f32 1.0, %v7218_v17  ;;  %v7017_v27 = vld [vmem:[%s11896_s7] sm:$0xff]  ;;  %v1699_v3 = vpack.c.bf16 %v1680_v56, %v1679_v55  ;;  %v1682_v55 = vld [vmem:[%s11890_s0 + $0x1d8] sm:$0xff]  ;;  %v7058_v56 = vld [vmem:[%s11892_s3 + $0x28] sm:$0xff] }
 0x1b6   :  { %v782_v10 = vmul.f32 %v8462_v34, %v8462_v34  ;;  %v1795_v14 = vpop.f32.mrf.mxu0  ;;  %2245 = vmatmul.bf16.gmra.mxu1 %v2149_v2  ;;  %7221 = vtanh.f32 %v877_v44  ;;  %v750_v1 = vmul.f32 0.7978846, %v8462_v34  ;;  %1540 = vmatpush.bf16.msra.mxu3 %v7017_v27  ;;  %v718_v17 = vmul.f32 0.5, %v8462_v34 }
 0x1b7   :  { %v2025_v15 = vmul.f32 %v1993_v7, %v1897_v8  ;;  %v8468_v16 = vadd.f32 %v8352_v32, %v1795_v14  ;;  %v7220_v19 = vpop.eup %7219  ;;  %v972_v22 = vmul.f32 %v940_v29, %v716_v37  ;;  %3854 = vmatpush.bf16.msra.mxu1 %v7058_v56 }
 0x1b8   :  { %v814_v54 = vmul.f32 0.044715, %v782_v10  ;;  %v2088_v36 = vadd.f32 1.0, %v7220_v19 }
 0x1b9   :  { %7223 = vtanh.f32 %v2025_v15  ;;  %v1930_v18 = vmul.f32 %v8468_v16, %v8468_v16  ;;  %6658 = vmatmul.msk.bf16.gmra.mxu0 %vm101_vm0, %v1698_v57  ;;  %v1898_v39 = vmul.f32 0.7978846, %v8468_v16 }
 0x1ba   :  { %v846_v20 = vadd.f32 1.0, %v814_v54  ;;  %v2120_v51 = vmul.f32 %v2088_v36, %v1864_v5 }
 0x1bb   :  { %v1962_v21 = vmul.f32 0.044715, %v1930_v18  ;;  %v667_v24 = vpop.f32.mrf.mxu1 }
 0x1bc   :  { %v7222_v38 = vpop.eup %7221  ;;  %v8480_v26 = vadd.f32 %v8459_v6, %v667_v24  ;;  %v878_v45 = vmul.f32 %v846_v20, %v750_v1 }
 0x1bd   :  { %v1994_v30 = vadd.f32 1.0, %v1962_v21  ;;  %v941_v31 = vadd.f32 1.0, %v7222_v38 }
 0x1be   :  { %v783_v13 = vmul.f32 %v8480_v26, %v8480_v26  ;;  %v1797_v41 = vpop.f32.mrf.mxu0  ;;  %v751_v49 = vmul.f32 0.7978846, %v8480_v26  ;;  %7225 = vtanh.f32 %v878_v45  ;;  %v719_v29 = vmul.f32 0.5, %v8480_v26 }
 0x1bf   :  { %v7224_v43 = vpop.eup %7223  ;;  %v8491_v46 = vadd.f32 %v8352_v32, %v1797_v41  ;;  %v973_v40 = vmul.f32 %v941_v31, %v717_v58  ;;  %v2026_v42 = vmul.f32 %v1994_v30, %v1898_v39  ;;  %v1866_v31 = vmul.f32 0.5, %v8468_v16  ;;  %v7037_v16 = vld [vmem:[%s11894_s5 + $0x10] sm:$0xff] }
 0x1c0   :  { %v815_v9 = vmul.f32 0.044715, %v783_v13  ;;  %v2089_v47 = vadd.f32 1.0, %v7224_v43  ;;  %2698 = vmatpush.bf16.msrb.mxu2 %v7037_v16 }
 0x1c1   :  { %v1931_v48 = vmul.f32 %v8491_v46, %v8491_v46  ;;  %v996_v53 = vpack.c.bf16 %v973_v40, %v972_v22  ;;  %7227 = vtanh.f32 %v2026_v42  ;;  %v1899_v0 = vmul.f32 0.7978846, %v8491_v46 }
 0x1c2   :  { %v847_v25 = vadd.f32 1.0, %v815_v9  ;;  %v2121_v33 = vmul.f32 %v2089_v47, %v1865_v28  ;;  %v1867_v9 = vmul.f32 0.5, %v8491_v46  ;;  %v1681_v46 = vld [vmem:[%s11890_s0 + $0x1d0] sm:$0xff] }
 0x1c3   :  { %v1963_v59 = vmul.f32 0.044715, %v1931_v48  ;;  %v670_v60 = vpop.f32.mrf.mxu1  ;;  %1120 = vmatmul.bf16.gmra.mxu2 %v996_v53 }
 0x1c4   :  { %v8514_v35 = vadd.f32 %v8459_v6, %v670_v60  ;;  %v2150_v52 = vpack.c.bf16 %v2121_v33, %v2120_v51  ;;  %v879_v62 = vmul.f32 %v847_v25, %v751_v49  ;;  %v7226_v10 = vpop.eup %7225  ;;  %v7050_v51 = vld [vmem:[%s11896_s7 + $0x38] sm:$0xff] }
 0x1c5   :  { %v1995_v50 = vadd.f32 1.0, %v1963_v59  ;;  %v942_v38 = vadd.f32 1.0, %v7226_v10  ;;  %3154 = vmatpush.bf16.msrb.mxu3 %v7050_v51 }
 0x1c6   :  { %v784_v4 = vmul.f32 %v8514_v35, %v8514_v35  ;;  %v1081_v63 = vpop.f32.mrf.mxu2  ;;  %v1800_v2 = vpop.f32.mrf.mxu0  ;;  %2250 = vmatmul.bf16.gmra.mxu1 %v2150_v52  ;;  %7229 = vtanh.f32 %v879_v62  ;;  %v752_v21 = vmul.f32 0.7978846, %v8514_v35 }
 0x1c7   :  { %v2027_v44 = vmul.f32 %v1995_v50, %v1899_v0  ;;  %v8520_v8 = vadd.f32 %v8508_v61, %v1081_v63  ;;  %v8523_v7 = vadd.f32 %v8352_v32, %v1800_v2  ;;  %v7228_v15 = vpop.eup %7227  ;;  %v974_v11 = vmul.f32 %v942_v38, %v718_v17  ;;  %v8577_v17 = vld [vmem:[%s11890_s0 + $0x1e0] sm:$0xff] }
 0x1c8   :  { %v816_v57 = vmul.f32 0.044715, %v784_v4  ;;  %v2090_v30 = vadd.f32 1.0, %v7228_v15  ;;  %v1700_v2 = vpack.c.bf16 %v1682_v55, %v1681_v46  ;;  %v720_v38 = vmul.f32 0.5, %v8514_v35 }
 0x1c9   :  { %7231 = vtanh.f32 %v2027_v44  ;;  %v1225_v14 = vmul.f32 %v8520_v8, %v8520_v8  ;;  %6659 = vmatmul.msk.bf16.gmra.mxu0 %vm101_vm0, %v1699_v3  ;;  %v1932_v54 = vmul.f32 %v8523_v7, %v8523_v7  ;;  %v1193_v34 = vmul.f32 0.7978846, %v8520_v8 }
 0x1ca   :  { %v848_v12 = vadd.f32 1.0, %v816_v57  ;;  %v1900_v22 = vmul.f32 0.7978846, %v8523_v7  ;;  %v2122_v48 = vmul.f32 %v2090_v30, %v1866_v31  ;;  %v1868_v30 = vmul.f32 0.5, %v8523_v7 }
 0x1cb   :  { %v1257_v18 = vmul.f32 0.044715, %v1225_v14  ;;  %v672_v19 = vpop.f32.mrf.mxu1  ;;  %v1964_v24 = vmul.f32 0.044715, %v1932_v54 }
 0x1cc   :  { %v7230_v20 = vpop.eup %7229  ;;  %v8533_v23 = vadd.f32 %v8459_v6, %v672_v19  ;;  %v880_v36 = vmul.f32 %v848_v12, %v752_v21 }
 0x1cd   :  { %v1289_v58 = vadd.f32 1.0, %v1257_v18  ;;  %v943_v1 = vadd.f32 1.0, %v7230_v20  ;;  %v1996_v41 = vadd.f32 1.0, %v1964_v24  ;;  %v8582_v18 = vld [vmem:[%s11890_s0 + $0x1e8] sm:$0xff] }
 0x1ce   :  { %v785_v37 = vmul.f32 %v8533_v23, %v8533_v23  ;;  %v1083_v5 = vpop.f32.mrf.mxu2  ;;  %v1802_v39 = vpop.f32.mrf.mxu0  ;;  %v753_v49 = vmul.f32 0.7978846, %v8533_v23  ;;  %7233 = vtanh.f32 %v880_v36  ;;  %v721_v31 = vmul.f32 0.5, %v8533_v23 }
 0x1cf   :  { %v7232_v13 = vpop.eup %7231  ;;  %v8541_v43 = vadd.f32 %v8508_v61, %v1083_v5  ;;  %v8544_v28 = vadd.f32 %v8352_v32, %v1802_v39  ;;  %v975_v26 = vmul.f32 %v943_v1, %v719_v29  ;;  %v1321_v45 = vmul.f32 %v1289_v58, %v1193_v34 }
 0x1d0   :  { %v817_v40 = vmul.f32 0.044715, %v785_v37  ;;  %v2091_v42 = vadd.f32 1.0, %v7232_v13  ;;  %v2028_v59 = vmul.f32 %v1996_v41, %v1900_v22  ;;  %v1161_v58 = vmul.f32 0.5, %v8520_v8 }
 0x1d1   :  { %v1226_v47 = vmul.f32 %v8541_v43, %v8541_v43  ;;  %v1933_v53 = vmul.f32 %v8544_v28, %v8544_v28  ;;  %v997_v33 = vpack.c.bf16 %v975_v26, %v974_v11  ;;  %7235 = vtanh.f32 %v1321_v45 }
 0x1d2   :  { %v849_v25 = vadd.f32 1.0, %v817_v40  ;;  %v2123_v52 = vmul.f32 %v2091_v42, %v1867_v9  ;;  %v1194_v3 = vmul.f32 0.7978846, %v8541_v43  ;;  %v1901_v44 = vmul.f32 0.7978846, %v8544_v28 }
 0x1d3   :  { %v1258_v60 = vmul.f32 0.044715, %v1226_v47  ;;  %v675_v27 = vpop.f32.mrf.mxu1  ;;  %v1965_v62 = vmul.f32 0.044715, %v1933_v53  ;;  %1125 = vmatmul.bf16.gmra.mxu2 %v997_v33  ;;  %v1701_v36 = vpack.c.bf16 %v8582_v18, %v8577_v17  ;;  %v1869_v5 = vmul.f32 0.5, %v8544_v28  ;;  %v8652_v17 = vld [vmem:[%s11890_s0 + $0x1f8] sm:$0xff] }
 0x1d4   :  { %v676_v0 = vadd.f32 %v8459_v6, %v675_v27  ;;  %v881_v50 = vmul.f32 %v849_v25, %v753_v49  ;;  %v2151_v63 = vpack.c.bf16 %v2123_v52, %v2122_v48  ;;  %v7234_v24 = vpop.eup %7233  ;;  %v1162_v7 = vmul.f32 0.5, %v8541_v43 }
 0x1d5   :  { %v1290_v4 = vadd.f32 1.0, %v1258_v60  ;;  %v1997_v57 = vadd.f32 1.0, %v1965_v62  ;;  %v944_v13 = vadd.f32 1.0, %v7234_v24 }
 0x1d6   :  { %v786_v10 = vmul.f32 %v676_v0, %v676_v0  ;;  %v1805_v14 = vpop.f32.mrf.mxu0  ;;  %v1086_v15 = vpop.f32.mrf.mxu2  ;;  %2255 = vmatmul.bf16.gmra.mxu1 %v2151_v63  ;;  %7237 = vtanh.f32 %v881_v50  ;;  %v8603_v23 = vmul.f32 0.5, %v676_v0  ;;  %v754_v26 = vmul.f32 0.7978846, %v676_v0 }
 0x1d7   :  { %v8572_v12 = vadd.f32 %v8352_v32, %v1805_v14  ;;  %v1322_v54 = vmul.f32 %v1290_v4, %v1194_v3  ;;  %7239 = vtanh.f32 %v2028_v59  ;;  %v2029_v19 = vmul.f32 %v1997_v57, %v1901_v44  ;;  %v7236_v1 = vpop.eup %7235 }
 0x1d8   :  { %v818_v20 = vmul.f32 0.044715, %v786_v10  ;;  %v8585_v21 = vadd.f32 %v8508_v61, %v1086_v15  ;;  %v1385_v45 = vadd.f32 1.0, %v7236_v1  ;;  %v976_v46 = vmul.f32 %v944_v13, %v720_v38 }
 0x1d9   :  { %v1934_v29 = vmul.f32 %v8572_v12, %v8572_v12  ;;  %6660 = vmatmul.msk.bf16.gmra.mxu0 %vm101_vm0, %v1700_v2  ;;  %7241 = vtanh.f32 %v2029_v19  ;;  %v1902_v11 = vmul.f32 0.7978846, %v8572_v12 }
 0x1da   :  { %v850_v34 = vadd.f32 1.0, %v818_v20  ;;  %v1227_v35 = vmul.f32 %v8585_v21, %v8585_v21  ;;  %7243 = vtanh.f32 %v1322_v54  ;;  %v1195_v48 = vmul.f32 0.7978846, %v8585_v21 }
 0x1db   :  { %v1966_v37 = vmul.f32 0.044715, %v1934_v29  ;;  %v677_v8 = vpop.f32.mrf.mxu1  ;;  %v1417_v27 = vmul.f32 %v1385_v45, %v1161_v58 }
 0x1dc   :  { %v8600_v39 = vadd.f32 %v8459_v6, %v677_v8  ;;  %v7238_v41 = vpop.eup %7237  ;;  %v1259_v16 = vmul.f32 0.044715, %v1227_v35  ;;  %v882_v47 = vmul.f32 %v850_v34, %v754_v26  ;;  %v8625_v8 = vmul.f32 0.5, %v8572_v12 }
 0x1dd   :  { %v7240_v40 = vpop.eup %7239  ;;  %v1998_v42 = vadd.f32 1.0, %v1966_v37  ;;  %v945_v22 = vadd.f32 1.0, %v7238_v41 }
 0x1de   :  { %v787_v9 = vmul.f32 %v8600_v39, %v8600_v39  ;;  %v1807_v28 = vpop.f32.mrf.mxu0  ;;  %v1291_v51 = vadd.f32 1.0, %v1259_v16  ;;  %v1088_v43 = vpop.f32.mrf.mxu2  ;;  %v755_v60 = vmul.f32 0.7978846, %v8600_v39  ;;  %v2092_v52 = vadd.f32 1.0, %v7240_v40  ;;  %v8646_v40 = vld [vmem:[%s11890_s0 + $0x1f0] sm:$0xff] }
 0x1df   :  { %v1808_v49 = vadd.f32 %v8352_v32, %v1807_v28  ;;  %v7242_v25 = vpop.eup %7241  ;;  %v8611_v33 = vadd.f32 %v8508_v61, %v1088_v43  ;;  %v977_v55 = vmul.f32 %v945_v22, %v721_v31  ;;  %v2030_v62 = vmul.f32 %v1998_v42, %v1902_v11 }
 0x1e0   :  { %v819_v53 = vmul.f32 0.044715, %v787_v9  ;;  %v7244_v56 = vpop.eup %7243  ;;  %v1323_v59 = vmul.f32 %v1291_v51, %v1195_v48  ;;  %v2093_v44 = vadd.f32 1.0, %v7242_v25  ;;  %7245 = vtanh.f32 %v882_v47 }
 0x1e1   :  { %v1228_v50 = vmul.f32 %v8611_v33, %v8611_v33  ;;  %v1935_v3 = vmul.f32 %v1808_v49, %v1808_v49  ;;  %v998_v63 = vpack.c.bf16 %v977_v55, %v976_v46  ;;  %v1386_v2 = vadd.f32 1.0, %v7244_v56 }
 0x1e2   :  { %v851_v0 = vadd.f32 1.0, %v819_v53  ;;  %v2124_v19 = vmul.f32 %v2092_v52, %v1868_v30  ;;  %v2125_v20 = vmul.f32 %v2093_v44, %v1869_v5  ;;  %7247 = vtanh.f32 %v1323_v59 }
 0x1e3   :  { %v680_v4 = vpop.f32.mrf.mxu1  ;;  %v1260_v57 = vmul.f32 0.044715, %v1228_v50  ;;  %v1967_v10 = vmul.f32 0.044715, %v1935_v3  ;;  %1130 = vmatmul.bf16.gmra.mxu2 %v998_v63  ;;  %v1418_v54 = vmul.f32 %v1386_v2, %v1162_v7  ;;  %7249 = vtanh.f32 %v2030_v62  ;;  %v7036_v50 = vld [vmem:[%s11894_s5 + $0x8] sm:$0xff] }
 0x1e4   :  { %v8617_v14 = vadd.f32 %v8459_v6, %v680_v4  ;;  %v883_v15 = vmul.f32 %v851_v0, %v755_v60  ;;  %v1903_v38 = vmul.f32 0.7978846, %v1808_v49  ;;  %v2152_v37 = vpack.c.bf16 %v2125_v20, %v2124_v19  ;;  %2699 = vmatpush.bf16.msrb.mxu2 %v7036_v50 }
 0x1e5   :  { %v1292_v24 = vadd.f32 1.0, %v1260_v57  ;;  %v1999_v58 = vadd.f32 1.0, %v1967_v10  ;;  %v1449_v34 = vpack.c.bf16 %v1418_v54, %v1417_v27  ;;  %v1163_v7 = vmul.f32 0.5, %v8585_v21 }
 0x1e6   :  { %v1810_v29 = vpop.f32.mrf.mxu0  ;;  %v788_v1 = vmul.f32 %v8617_v14, %v8617_v14  ;;  %v1091_v31 = vpop.f32.mrf.mxu2  ;;  %7251 = vtanh.f32 %v883_v15  ;;  %v1196_v41 = vmul.f32 0.7978846, %v8611_v33  ;;  %2260 = vmatmul.bf16.gmra.mxu1 %v2152_v37  ;;  %v8634_v45 = vmul.f32 0.5, %v1808_v49 }
 0x1e7   :  { %v8622_v35 = vadd.f32 %v8352_v32, %v1810_v29  ;;  %v2031_v30 = vmul.f32 %v1999_v58, %v1903_v38  ;;  %v8628_v5 = vadd.f32 %v8508_v61, %v1091_v31  ;;  %v7246_v13 = vpop.eup %7245  ;;  %1541 = vmatmul.bf16.vlgmr.msra.gmra.mxu3 %v1449_v34  ;;  %v723_v21 = vmul.f32 0.5, %v8600_v39  ;;  %v7078_v38 = vld [vmem:[%s11889_s1 + $0x8] sm:$0xff] }
 0x1e8   :  { %v820_v26 = vmul.f32 0.044715, %v788_v1  ;;  %v7248_v11 = vpop.eup %7247  ;;  %v756_v42 = vmul.f32 0.7978846, %v8617_v14  ;;  %v1324_v47 = vmul.f32 %v1292_v24, %v1196_v41  ;;  %v946_v48 = vadd.f32 1.0, %v7246_v13  ;;  %v7049_v24 = vld [vmem:[%s11896_s7 + $0x30] sm:$0xff]  ;;  %5017 = vmatpush.bf16.msrb.mxu0 %v7078_v38 }
 0x1e9   :  { %v1936_v16 = vmul.f32 %v8622_v35, %v8622_v35  ;;  %7253 = vtanh.f32 %v2031_v30  ;;  %v1229_v12 = vmul.f32 %v8628_v5, %v8628_v5  ;;  %6661 = vmatmul.msk.bf16.gmra.mxu0 %vm101_vm0, %v1701_v36  ;;  %v7250_v18 = vpop.eup %7249  ;;  %v1164_v51 = vmul.f32 0.5, %v8611_v33  ;;  %3155 = vmatpush.bf16.msrb.mxu3 %v7049_v24 }
 0x1ea   :  { %v852_v9 = vadd.f32 1.0, %v820_v26  ;;  %v1904_v49 = vmul.f32 0.7978846, %v8622_v35  ;;  %7255 = vtanh.f32 %v1324_v47  ;;  %v1387_v59 = vadd.f32 1.0, %v7248_v11 }
 0x1eb   :  { %v1968_v28 = vmul.f32 0.044715, %v1936_v16  ;;  %v682_v22 = vpop.f32.mrf.mxu1  ;;  %v1261_v36 = vmul.f32 0.044715, %v1229_v12  ;;  %v1702_v60 = vpack.c.bf16 %v8652_v17, %v8646_v40  ;;  %v1197_v27 = vmul.f32 0.7978846, %v8628_v5 }
 0x1ec   :  { %v8655_v39 = vadd.f32 %v8459_v6, %v682_v22  ;;  %v884_v43 = vmul.f32 %v852_v9, %v756_v42  ;;  %v7252_v53 = vpop.eup %7251  ;;  %v978_v2 = vmul.f32 %v946_v48, %v8603_v23  ;;  %v2094_v44 = vadd.f32 1.0, %v7250_v18  ;;  %v7057_v23 = vld [vmem:[%s11892_s3 + $0x20] sm:$0xff] }
 0x1ed   :  { %v2000_v25 = vadd.f32 1.0, %v1968_v28  ;;  %v1293_v46 = vadd.f32 1.0, %v1261_v36  ;;  %v947_v0 = vadd.f32 1.0, %v7252_v53  ;;  %v1419_v20 = vmul.f32 %v1387_v59, %v1163_v7  ;;  %3855 = vmatpush.bf16.msra.mxu1 %v7057_v23  ;;  %v8731_v17 = vld [vmem:[%s11890_s0 + $0x200] sm:$0xff] }
 0x1ee   :  { %v789_v55 = vmul.f32 %v8655_v39, %v8655_v39  ;;  %v1812_v56 = vpop.f32.mrf.mxu0  ;;  %v1093_v62 = vpop.f32.mrf.mxu2  ;;  %7257 = vtanh.f32 %v884_v43  ;;  %v757_v10 = vmul.f32 0.7978846, %v8655_v39  ;;  %v2126_v42 = vmul.f32 %v2094_v44, %v8625_v8 }
 0x1ef   :  { %v2032_v52 = vmul.f32 %v2000_v25, %v1904_v49  ;;  %v8665_v33 = vadd.f32 %v8352_v32, %v1812_v56  ;;  %v7254_v3 = vpop.eup %7253  ;;  %v8671_v63 = vadd.f32 %v8508_v61, %v1093_v62  ;;  %v1325_v57 = vmul.f32 %v1293_v46, %v1197_v27 }
 0x1f0   :  { %v821_v4 = vmul.f32 0.044715, %v789_v55  ;;  %v979_v19 = vmul.f32 %v947_v0, %v723_v21  ;;  %v7256_v58 = vpop.eup %7255  ;;  %v2095_v34 = vadd.f32 1.0, %v7254_v3  ;;  %v724_v48 = vmul.f32 0.5, %v8617_v14 }
 0x1f1   :  { %v1937_v32 = vmul.f32 %v8665_v33, %v8665_v33  ;;  %v1230_v54 = vmul.f32 %v8671_v63, %v8671_v63  ;;  %7259 = vtanh.f32 %v2032_v52  ;;  %v1905_v29 = vmul.f32 0.7978846, %v8665_v33 }
 0x1f2   :  { %v853_v15 = vadd.f32 1.0, %v821_v4  ;;  %v999_v7 = vpack.c.bf16 %v979_v19, %v978_v2  ;;  %v1388_v26 = vadd.f32 1.0, %v7256_v58  ;;  %v2127_v16 = vmul.f32 %v2095_v34, %v8634_v45  ;;  %v8700_v45 = vld [vmem:[%s11891_s2] ss:$0 sm:$0xff] }
 0x1f3   :  { %v1969_v1 = vmul.f32 0.044715, %v1937_v32  ;;  %v685_v31 = vpop.f32.mrf.mxu1  ;;  %v1262_v30 = vmul.f32 0.044715, %v1230_v54  ;;  %7261 = vtanh.f32 %v1325_v57  ;;  %v1198_v12 = vmul.f32 0.7978846, %v8671_v63 }
 0x1f4   :  { %v885_v37 = vmul.f32 %v853_v15, %v757_v10  ;;  %v8690_v13 = vadd.f32 %v8459_v6, %v685_v31  ;;  %1135 = vmatmul.bf16.gmra.mxu2 %v999_v7  ;;  %v7258_v9 = vpop.eup %7257  ;;  %v1420_v18 = vmul.f32 %v1388_v26, %v1164_v51  ;;  %v2153_v8 = vpack.c.bf16 %v2127_v16, %v2126_v42 }
 0x1f5   :  { %v2001_v41 = vadd.f32 1.0, %v1969_v1  ;;  %v1294_v21 = vadd.f32 1.0, %v1262_v30  ;;  %v1165_v53 = vmul.f32 0.5, %v8628_v5  ;;  %v8711_v51 = vmul.f32 0.5, %v8622_v35 }
 0x1f6   :  { %7263 = vtanh.f32 %v885_v37  ;;  %v1815_v11 = vpop.f32.mrf.mxu0  ;;  %v790_v22 = vmul.f32 %v8690_v13, %v8690_v13  ;;  %v1096_v47 = vpop.f32.mrf.mxu2  ;;  %v1450_v55 = vpack.c.bf16 %v1420_v18, %v1419_v20  ;;  %v725_v56 = vmul.f32 0.5, %v8655_v39  ;;  %2265 = vmatmul.bf16.gmra.mxu1 %v2153_v8 }
 0x1f7   :  { %v2033_v28 = vmul.f32 %v2001_v41, %v1905_v29  ;;  %v8703_v36 = vadd.f32 %v8700_v45, %v1815_v11  ;;  %v8707_v43 = vadd.f32 %v8508_v61, %v1096_v47  ;;  %v1326_v49 = vmul.f32 %v1294_v21, %v1198_v12  ;;  %v7260_v25 = vpop.eup %7259 }
 0x1f8   :  { %v822_v46 = vmul.f32 0.044715, %v790_v22  ;;  %v948_v14 = vadd.f32 1.0, %v7258_v9  ;;  %v758_v5 = vmul.f32 0.7978846, %v8690_v13  ;;  %1546 = vmatmul.bf16.gmra.mxu3 %v1450_v55  ;;  %v1873_v0 = vmul.f32 0.5, %v8665_v33 }
 0x1f9   :  { %7265 = vtanh.f32 %v2033_v28  ;;  %v1231_v59 = vmul.f32 %v8707_v43, %v8707_v43  ;;  %6662 = vmatmul.msk.bf16.gmra.mxu0 %vm101_vm0, %v1702_v60  ;;  %v7262_v27 = vpop.eup %7261  ;;  %v1938_v52 = vmul.f32 %v8703_v36, %v8703_v36  ;;  %v1166_v40 = vmul.f32 0.5, %v8671_v63  ;;  %v8737_v33 = vld [vmem:[%s11890_s0 + $0x208] sm:$0xff] }
 0x1fa   :  { %v854_v35 = vadd.f32 1.0, %v822_v46  ;;  %7267 = vtanh.f32 %v1326_v49  ;;  %v1199_v4 = vmul.f32 0.7978846, %v8707_v43  ;;  %v1906_v10 = vmul.f32 0.7978846, %v8703_v36 }
 0x1fb   :  { %v687_v39 = vpop.f32.mrf.mxu1  ;;  %v1263_v50 = vmul.f32 0.044715, %v1231_v59  ;;  %v1970_v2 = vmul.f32 0.044715, %v1938_v52  ;;  %v980_v15 = vmul.f32 %v948_v14, %v724_v48  ;;  %v1389_v23 = vadd.f32 1.0, %v7262_v27 }
 0x1fc   :  { %v7264_v62 = vpop.eup %7263  ;;  %v8725_v3 = vadd.f32 %v8459_v6, %v687_v39  ;;  %v886_v60 = vmul.f32 %v854_v35, %v758_v5  ;;  %v2096_v1 = vadd.f32 1.0, %v7260_v25  ;;  %v3307_v31 = vpack.c.bf16 %v8737_v33, %v8731_v17 }
 0x1fd   :  { %v949_v44 = vadd.f32 1.0, %v7264_v62  ;;  %v1295_v57 = vadd.f32 1.0, %v1263_v50  ;;  %v2002_v54 = vadd.f32 1.0, %v1970_v2  ;;  %v1421_v18 = vmul.f32 %v1389_v23, %v1165_v53 }
 0x1fe   :  { %v791_v63 = vmul.f32 %v8725_v3, %v8725_v3  ;;  %v1817_v32 = vpop.f32.mrf.mxu0  ;;  %v1098_v19 = vpop.f32.mrf.mxu2  ;;  %7269 = vtanh.f32 %v886_v60  ;;  %v759_v30 = vmul.f32 0.7978846, %v8725_v3  ;;  %v2128_v59 = vmul.f32 %v2096_v1, %v8711_v51 }
 0x1ff   :  { %v8743_v20 = vadd.f32 %v8700_v45, %v1817_v32  ;;  %v981_v24 = vmul.f32 %v949_v44, %v725_v56  ;;  %v7266_v38 = vpop.eup %7265  ;;  %v8746_v29 = vadd.f32 %v8508_v61, %v1098_v19  ;;  %v2034_v37 = vmul.f32 %v2002_v54, %v1906_v10 }
 0x200   :  { %v823_v58 = vmul.f32 0.044715, %v791_v63  ;;  %v7268_v34 = vpop.eup %7267  ;;  %v1327_v41 = vmul.f32 %v1295_v57, %v1199_v4  ;;  %v2097_v9 = vadd.f32 1.0, %v7266_v38  ;;  %v1874_v51 = vmul.f32 0.5, %v8703_v36 }
 0x201   :  { %v1939_v7 = vmul.f32 %v8743_v20, %v8743_v20  ;;  %v1232_v16 = vmul.f32 %v8746_v29, %v8746_v29  ;;  %v1000_v12 = vpack.c.bf16 %v981_v24, %v980_v15  ;;  %7271 = vtanh.f32 %v2034_v37 }
 0x202   :  { %v855_v26 = vadd.f32 1.0, %v823_v58  ;;  %v1390_v42 = vadd.f32 1.0, %v7268_v34  ;;  %v1907_v48 = vmul.f32 0.7978846, %v8743_v20  ;;  %v2129_v25 = vmul.f32 %v2097_v9, %v1873_v0 }
 0x203   :  { %v1971_v21 = vmul.f32 0.044715, %v1939_v7  ;;  %v690_v11 = vpop.f32.mrf.mxu1  ;;  %v1264_v22 = vmul.f32 0.044715, %v1232_v16  ;;  %v1200_v46 = vmul.f32 0.7978846, %v8746_v29 }
 0x204   :  { %v887_v28 = vmul.f32 %v855_v26, %v759_v30  ;;  %v8756_v47 = vadd.f32 %v8459_v6, %v690_v11  ;;  %v1422_v49 = vmul.f32 %v1390_v42, %v1166_v40  ;;  %1140 = vmatmul.bf16.gmra.mxu2 %v1000_v12  ;;  %v7270_v14 = vpop.eup %7269  ;;  %v2154_v62 = vpack.c.bf16 %v2129_v25, %v2128_v59  ;;  %v3278_v59 = vld [vmem:[%s11890_s0 + $0x218] sm:$0xff] }
 0x205   :  { %v2003_v8 = vadd.f32 1.0, %v1971_v21  ;;  %v1296_v55 = vadd.f32 1.0, %v1264_v22  ;;  %v726_v40 = vmul.f32 0.5, %v8690_v13  ;;  %v1167_v60 = vmul.f32 0.5, %v8707_v43 }
 0x206   :  { %7273 = vtanh.f32 %v887_v28  ;;  %v1820_v56 = vpop.f32.mrf.mxu0  ;;  %v792_v5 = vmul.f32 %v8756_v47, %v8756_v47  ;;  %v1101_v35 = vpop.f32.mrf.mxu2  ;;  %v1451_v53 = vpack.c.bf16 %v1422_v49, %v1421_v18  ;;  %v727_v4 = vmul.f32 0.5, %v8725_v3  ;;  %2270 = vmatmul.bf16.gmra.mxu1 %v2154_v62 }
 0x207   :  { %v2035_v27 = vmul.f32 %v2003_v8, %v1907_v48  ;;  %v8764_v52 = vadd.f32 %v8700_v45, %v1820_v56  ;;  %v8767_v39 = vadd.f32 %v8508_v61, %v1101_v35  ;;  %v1328_v0 = vmul.f32 %v1296_v55, %v1200_v46  ;;  %v7272_v50 = vpop.eup %7271  ;;  %v3277_v8 = vld [vmem:[%s11890_s0 + $0x210] sm:$0xff] }
 0x208   :  { %v824_v17 = vmul.f32 0.044715, %v792_v5  ;;  %v760_v33 = vmul.f32 0.7978846, %v8756_v47  ;;  %1551 = vmatmul.bf16.gmra.mxu3 %v1451_v53  ;;  %v950_v57 = vadd.f32 1.0, %v7270_v14  ;;  %v2098_v63 = vadd.f32 1.0, %v7272_v50 }
 0x209   :  { %7275 = vtanh.f32 %v2035_v27  ;;  %v1233_v2 = vmul.f32 %v8767_v39, %v8767_v39  ;;  %v1940_v44 = vmul.f32 %v8764_v52, %v8764_v52  ;;  %6767 = vmatmul.msk.bf16.vlgmr.msra.gmra.mxu0 %vm101_vm0, %v3307_v31  ;;  %v1875_v32 = vmul.f32 0.5, %v8743_v20 }
 0x20a   :  { %v856_v13 = vadd.f32 1.0, %v824_v17  ;;  %7277 = vtanh.f32 %v1327_v41  ;;  %v1168_v19 = vmul.f32 0.5, %v8746_v29  ;;  %v1201_v23 = vmul.f32 0.7978846, %v8767_v39 }
 0x20b   :  { %v692_v36 = vpop.f32.mrf.mxu1  ;;  %v1972_v43 = vmul.f32 0.044715, %v1940_v44  ;;  %7279 = vtanh.f32 %v1328_v0  ;;  %v1265_v15 = vmul.f32 0.044715, %v1233_v2  ;;  %v1908_v38 = vmul.f32 0.7978846, %v8764_v52 }
 0x20c   :  { %v7274_v10 = vpop.eup %7273  ;;  %v8780_v3 = vadd.f32 %v8459_v6, %v692_v36  ;;  %v888_v24 = vmul.f32 %v856_v13, %v760_v33  ;;  %v982_v20 = vmul.f32 %v950_v57, %v726_v40  ;;  %v2130_v16 = vmul.f32 %v2098_v63, %v1874_v51  ;;  %v7048_v63 = vld [vmem:[%s11896_s7 + $0x28] sm:$0xff] }
 0x20d   :  { %v951_v54 = vadd.f32 1.0, %v7274_v10  ;;  %v2004_v58 = vadd.f32 1.0, %v1972_v43  ;;  %v1297_v21 = vadd.f32 1.0, %v1265_v15  ;;  %v728_v36 = vmul.f32 0.5, %v8756_v47  ;;  %v7035_v43 = vld [vmem:[%s11894_s5] sm:$0xff]  ;;  %3156 = vmatpush.bf16.msrb.mxu3 %v7048_v63 }
 0x20e   :  { %v1822_v1 = vpop.f32.mrf.mxu0  ;;  %v793_v34 = vmul.f32 %v8780_v3, %v8780_v3  ;;  %v1103_v37 = vpop.f32.mrf.mxu2  ;;  %v761_v11 = vmul.f32 0.7978846, %v8780_v3  ;;  %7281 = vtanh.f32 %v888_v24  ;;  %v1876_v15 = vmul.f32 0.5, %v8764_v52  ;;  %2700 = vmatpush.bf16.msrb.mxu2 %v7035_v43 }
 0x20f   :  { %v7276_v31 = vpop.eup %7275  ;;  %v8789_v30 = vadd.f32 %v8700_v45, %v1822_v1  ;;  %v983_v7 = vmul.f32 %v951_v54, %v727_v4  ;;  %v2036_v41 = vmul.f32 %v2004_v58, %v1908_v38  ;;  %v8792_v29 = vadd.f32 %v8508_v61, %v1103_v37 }
 0x210   :  { %v2099_v26 = vadd.f32 1.0, %v7276_v31  ;;  %v7278_v12 = vpop.eup %7277  ;;  %v825_v42 = vmul.f32 0.044715, %v793_v34  ;;  %v1329_v50 = vmul.f32 %v1297_v21, %v1201_v23  ;;  %v3308_v4 = vpack.c.bf16 %v3278_v59, %v3277_v8  ;;  %v8854_v21 = vld [vmem:[%s11890_s0 + $0x228] sm:$0xff]  ;;  %v8869_v59 = vld [vmem:[%s11893_s4] ss:$0 sm:$0xff] }
 0x211   :  { %v1941_v9 = vmul.f32 %v8789_v30, %v8789_v30  ;;  %v7280_v28 = vpop.eup %7279  ;;  %v1234_v22 = vmul.f32 %v8792_v29, %v8792_v29  ;;  %v1909_v18 = vmul.f32 0.7978846, %v8789_v30  ;;  %v1001_v48 = vpack.c.bf16 %v983_v7, %v982_v20 }
 0x212   :  { %v857_v49 = vadd.f32 1.0, %v825_v42  ;;  %v1391_v55 = vadd.f32 1.0, %v7278_v12  ;;  %v1392_v56 = vadd.f32 1.0, %v7280_v28  ;;  %7283 = vtanh.f32 %v2036_v41 }
 0x213   :  { %v1973_v25 = vmul.f32 0.044715, %v1941_v9  ;;  %v695_v46 = vpop.f32.mrf.mxu1  ;;  %v1266_v14 = vmul.f32 0.044715, %v1234_v22  ;;  %v2131_v5 = vmul.f32 %v2099_v26, %v1875_v32  ;;  %v7056_v32 = vld [vmem:[%s11892_s3 + $0x18] sm:$0xff]  ;;  %v8832_v24 = vmul.f32 0.5, %v8767_v39 }
 0x214   :  { %v8807_v27 = vadd.f32 %v8459_v6, %v695_v46  ;;  %v889_v35 = vmul.f32 %v857_v49, %v761_v11  ;;  %v1423_v62 = vmul.f32 %v1391_v55, %v1167_v60  ;;  %v1424_v0 = vmul.f32 %v1392_v56, %v1168_v19  ;;  %1145 = vmatmul.bf16.gmra.mxu2 %v1001_v48  ;;  %v7282_v13 = vpop.eup %7281 }
 0x215   :  { %v2005_v53 = vadd.f32 1.0, %v1973_v25  ;;  %v1298_v40 = vadd.f32 1.0, %v1266_v14  ;;  %v2155_v10 = vpack.c.bf16 %v2131_v5, %v2130_v16  ;;  %v1202_v47 = vmul.f32 0.7978846, %v8792_v29  ;;  %3856 = vmatpush.bf16.msra.mxu1 %v7056_v32 }
 0x216   :  { %v794_v51 = vmul.f32 %v8807_v27, %v8807_v27  ;;  %v1825_v17 = vpop.f32.mrf.mxu0  ;;  %7285 = vtanh.f32 %v889_v35  ;;  %v1106_v44 = vpop.f32.mrf.mxu2  ;;  %v1452_v33 = vpack.c.bf16 %v1424_v0, %v1423_v62  ;;  %v729_v23 = vmul.f32 0.5, %v8780_v3  ;;  %v7884_v3 = vld [vmem:[%s11893_s4] ss:$0 sm:$0xff] }
 0x217   :  { %v2037_v2 = vmul.f32 %v2005_v53, %v1909_v18  ;;  %v8812_v6 = vadd.f32 %v8700_v45, %v1825_v17  ;;  %v8816_v57 = vadd.f32 %v8508_v61, %v1106_v44  ;;  %2275 = vmatmul.bf16.gmra.mxu1 %v2155_v10  ;;  %v762_v52 = vmul.f32 0.7978846, %v8807_v27 }
 0x218   :  { %v826_v60 = vmul.f32 0.044715, %v794_v51  ;;  %v7284_v19 = vpop.eup %7283  ;;  %1556 = vmatmul.bf16.gmra.mxu3 %v1452_v33  ;;  %v1330_v34 = vmul.f32 %v1298_v40, %v1202_v47  ;;  %v1877_v39 = vmul.f32 0.5, %v8789_v30  ;;  %v952_v7 = vadd.f32 1.0, %v7282_v13  ;;  %v8849_v30 = vld [vmem:[%s11890_s0 + $0x220] sm:$0xff] }
 0x219   :  { %7287 = vtanh.f32 %v2037_v2  ;;  %v1942_v54 = vmul.f32 %v8812_v6, %v8812_v6  ;;  %v1235_v58 = vmul.f32 %v8816_v57, %v8816_v57  ;;  %6768 = vmatmul.msk.bf16.gmra.mxu0 %vm101_vm0, %v3308_v4  ;;  %v1910_v16 = vmul.f32 0.7978846, %v8812_v6 }
 0x21a   :  { %v858_v38 = vadd.f32 1.0, %v826_v60  ;;  %7289 = vtanh.f32 %v1329_v50  ;;  %v1203_v11 = vmul.f32 0.7978846, %v8816_v57  ;;  %v1170_v28 = vmul.f32 0.5, %v8792_v29 }
 0x21b   :  { %v1974_v1 = vmul.f32 0.044715, %v1942_v54  ;;  %v697_v31 = vpop.f32.mrf.mxu1  ;;  %v1267_v37 = vmul.f32 0.044715, %v1235_v58  ;;  %7291 = vtanh.f32 %v1330_v34  ;;  %v2100_v22 = vadd.f32 1.0, %v7284_v19 }
 0x21c   :  { %v8843_v20 = vadd.f32 %v7884_v3, %v697_v31  ;;  %v7286_v41 = vpop.eup %7285  ;;  %v890_v26 = vmul.f32 %v858_v38, %v762_v52  ;;  %v984_v56 = vmul.f32 %v952_v7, %v728_v36  ;;  %v3309_v14 = vpack.c.bf16 %v8854_v21, %v8849_v30 }
 0x21d   :  { %v2006_v12 = vadd.f32 1.0, %v1974_v1  ;;  %v1299_v42 = vadd.f32 1.0, %v1267_v37  ;;  %v953_v46 = vadd.f32 1.0, %v7286_v41  ;;  %v2132_v40 = vmul.f32 %v2100_v22, %v1876_v15 }
 0x21e   :  { %v1827_v9 = vpop.f32.mrf.mxu0  ;;  %v795_v8 = vmul.f32 %v8843_v20, %v8843_v20  ;;  %v1108_v49 = vpop.f32.mrf.mxu2  ;;  %7293 = vtanh.f32 %v890_v26  ;;  %v763_v53 = vmul.f32 0.7978846, %v8843_v20  ;;  %v730_v7 = vmul.f32 0.5, %v8807_v27 }
 0x21f   :  { %v7288_v18 = vpop.eup %7287  ;;  %v2038_v48 = vmul.f32 %v2006_v12, %v1910_v16  ;;  %v8861_v25 = vadd.f32 %v8700_v45, %v1827_v9  ;;  %v8864_v55 = vadd.f32 %v8508_v61, %v1108_v49  ;;  %v1331_v35 = vmul.f32 %v1299_v42, %v1203_v11 }
 0x220   :  { %v2101_v29 = vadd.f32 1.0, %v7288_v18  ;;  %v7290_v5 = vpop.eup %7289  ;;  %v827_v62 = vmul.f32 0.044715, %v795_v8  ;;  %v985_v50 = vmul.f32 %v953_v46, %v729_v23  ;;  %v1171_v16 = vmul.f32 0.5, %v8816_v57 }
 0x221   :  { %v1236_v61 = vmul.f32 %v8864_v55, %v8864_v55  ;;  %v1943_v0 = vmul.f32 %v8861_v25, %v8861_v25  ;;  %v7292_v51 = vpop.eup %7291  ;;  %7295 = vtanh.f32 %v2038_v48  ;;  %v1393_v2 = vadd.f32 1.0, %v7290_v5 }
 0x222   :  { %v859_v17 = vadd.f32 1.0, %v827_v62  ;;  %v2133_v44 = vmul.f32 %v2101_v29, %v1877_v39  ;;  %v1002_v36 = vpack.c.bf16 %v985_v50, %v984_v56  ;;  %v1204_v43 = vmul.f32 0.7978846, %v8864_v55  ;;  %v8888_v39 = vld [vmem:[%s11895_s6] ss:$0 sm:$0xff]  ;;  %v7068_v62 = vld [vmem:[%s11894_s5 + $0x38] sm:$0xff] }
 0x223   :  { %v2241_v4 = vpop.f32.mrf.mxu1  ;;  %v1268_v33 = vmul.f32 0.044715, %v1236_v61  ;;  %v1975_v13 = vmul.f32 0.044715, %v1943_v0  ;;  %v1911_v63 = vmul.f32 0.7978846, %v8861_v25  ;;  %v1425_v15 = vmul.f32 %v1393_v2, %v8832_v24  ;;  %4313 = vmatpush.bf16.msra.mxu2 %v7068_v62 }
 0x224   :  { %v2242_v60 = vadd.f32 %v8869_v59, %v2241_v4  ;;  %v891_v10 = vmul.f32 %v859_v17, %v763_v53  ;;  %v1394_v32 = vadd.f32 1.0, %v7292_v51  ;;  %1150 = vmatmul.bf16.gmra.mxu2 %v1002_v36  ;;  %v2156_v23 = vpack.c.bf16 %v2133_v44, %v2132_v40  ;;  %v7294_v38 = vpop.eup %7293 }
 0x225   :  { %v1300_v47 = vadd.f32 1.0, %v1268_v33  ;;  %v2007_v54 = vadd.f32 1.0, %v1975_v13  ;;  %v8896_v12 = vmul.f32 0.5, %v8812_v6  ;;  %v731_v57 = vmul.f32 0.5, %v8843_v20 }
 0x226   :  { %v1830_v19 = vpop.f32.mrf.mxu0  ;;  %7297 = vtanh.f32 %v891_v10  ;;  %v2385_v58 = vmul.f32 %v2242_v60, %v2242_v60  ;;  %v1111_v52 = vpop.f32.mrf.mxu2  ;;  %v1426_v1 = vmul.f32 %v1394_v32, %v1170_v28  ;;  %v2353_v21 = vmul.f32 0.7978846, %v2242_v60  ;;  %v3281_v10 = vld [vmem:[%s11890_s0 + $0x230] sm:$0xff] }
 0x227   :  { %v8883_v31 = vadd.f32 %v8700_v45, %v1830_v19  ;;  %v2039_v34 = vmul.f32 %v2007_v54, %v1911_v63  ;;  %v8891_v37 = vadd.f32 %v8888_v39, %v1111_v52  ;;  %v1332_v24 = vmul.f32 %v1300_v47, %v1204_v43  ;;  %v7296_v3 = vpop.eup %7295  ;;  %2280 = vmatmul.bf16.gmra.mxu1 %v2156_v23  ;;  %v3282_v43 = vld [vmem:[%s11890_s0 + $0x238] sm:$0xff]  ;;  %v7047_v19 = vld [vmem:[%s11896_s7 + $0x20] sm:$0xff]  ;;  %v7055_v23 = vld [vmem:[%s11892_s3 + $0x10] sm:$0xff] }
 0x228   :  { %v2417_v41 = vmul.f32 0.044715, %v2385_v58  ;;  %v1453_v26 = vpack.c.bf16 %v1426_v1, %v1425_v15  ;;  %v954_v9 = vadd.f32 1.0, %v7294_v38  ;;  %v8908_v22 = vmul.f32 0.5, %v8861_v25  ;;  %3157 = vmatpush.bf16.msrb.mxu3 %v7047_v19  ;;  %3857 = vmatpush.bf16.msra.mxu1 %v7055_v23 }
 0x229   :  { %7299 = vtanh.f32 %v2039_v34  ;;  %v1237_v30 = vmul.f32 %v8891_v37, %v8891_v37  ;;  %6769 = vmatmul.msk.bf16.gmra.mxu0 %vm101_vm0, %v3309_v14  ;;  %v1944_v27 = vmul.f32 %v8883_v31, %v8883_v31  ;;  %v8910_v49 = vmul.f32 0.5, %v2242_v60 }
 0x22a   :  { %v2449_v11 = vadd.f32 1.0, %v2417_v41  ;;  %1561 = vmatmul.bf16.gmra.mxu3 %v1453_v26  ;;  %7301 = vtanh.f32 %v1331_v35  ;;  %v1912_v46 = vmul.f32 0.7978846, %v8883_v31  ;;  %v1172_v29 = vmul.f32 0.5, %v8864_v55 }
 0x22b   :  { %v2243_v42 = vpop.f32.mrf.mxu1  ;;  %7303 = vtanh.f32 %v1332_v24  ;;  %v1269_v48 = vmul.f32 0.044715, %v1237_v30  ;;  %v1976_v8 = vmul.f32 0.044715, %v1944_v27  ;;  %v1205_v14 = vmul.f32 0.7978846, %v8891_v37 }
 0x22c   :  { %v8905_v6 = vadd.f32 %v8869_v59, %v2243_v42  ;;  %v7298_v28 = vpop.eup %7297  ;;  %v2481_v18 = vmul.f32 %v2449_v11, %v2353_v21  ;;  %v986_v40 = vmul.f32 %v954_v9, %v730_v7  ;;  %v2102_v51 = vadd.f32 1.0, %v7296_v3 }
 0x22d   :  { %v2008_v5 = vadd.f32 1.0, %v1976_v8  ;;  %v955_v53 = vadd.f32 1.0, %v7298_v28  ;;  %v1301_v17 = vadd.f32 1.0, %v1269_v48  ;;  %v3310_v21 = vpack.c.bf16 %v3282_v43, %v3281_v10 }
 0x22e   :  { %v2386_v56 = vmul.f32 %v8905_v6, %v8905_v6  ;;  %v1832_v20 = vpop.f32.mrf.mxu0  ;;  %v1113_v35 = vpop.f32.mrf.mxu2  ;;  %7305 = vtanh.f32 %v2481_v18  ;;  %v2354_v4 = vmul.f32 0.7978846, %v8905_v6 }
 0x22f   :  { %v8918_v25 = vadd.f32 %v8700_v45, %v1832_v20  ;;  %v7300_v61 = vpop.eup %7299  ;;  %v8924_v50 = vadd.f32 %v8888_v39, %v1113_v35  ;;  %v987_v60 = vmul.f32 %v955_v53, %v731_v57  ;;  %v2040_v63 = vmul.f32 %v2008_v5, %v1912_v46 }
 0x230   :  { %v2418_v0 = vmul.f32 0.044715, %v2386_v56  ;;  %v7302_v55 = vpop.eup %7301  ;;  %v2103_v7 = vadd.f32 1.0, %v7300_v61  ;;  %v2134_v46 = vmul.f32 %v2102_v51, %v8896_v12  ;;  %v1880_v5 = vmul.f32 0.5, %v8883_v31 }
 0x231   :  { %v1945_v2 = vmul.f32 %v8918_v25, %v8918_v25  ;;  %v7304_v44 = vpop.eup %7303  ;;  %v1238_v13 = vmul.f32 %v8924_v50, %v8924_v50  ;;  %v1913_v36 = vmul.f32 0.7978846, %v8918_v25  ;;  %v1395_v54 = vadd.f32 1.0, %v7302_v55 }
 0x232   :  { %v2450_v33 = vadd.f32 1.0, %v2418_v0  ;;  %v1396_v15 = vadd.f32 1.0, %v7304_v44  ;;  %v1003_v52 = vpack.c.bf16 %v987_v60, %v986_v40  ;;  %v1206_v41 = vmul.f32 0.7978846, %v8924_v50 }
 0x233   :  { %v1977_v32 = vmul.f32 0.044715, %v1945_v2  ;;  %v2246_v47 = vpop.f32.mrf.mxu1  ;;  %v1270_v58 = vmul.f32 0.044715, %v1238_v13  ;;  %v1427_v24 = vmul.f32 %v1395_v54, %v1171_v16  ;;  %v1333_v16 = vmul.f32 %v1301_v17, %v1205_v14 }
 0x234   :  { %v2482_v38 = vmul.f32 %v2450_v33, %v2354_v4  ;;  %v8945_v1 = vadd.f32 %v8869_v59, %v2246_v47  ;;  %v1428_v3 = vmul.f32 %v1396_v15, %v1172_v29  ;;  %1155 = vmatmul.bf16.gmra.mxu2 %v1003_v52  ;;  %v7306_v11 = vpop.eup %7305  ;;  %v2135_v48 = vmul.f32 %v2103_v7, %v8908_v22 }
 0x235   :  { %v2009_v34 = vadd.f32 1.0, %v1977_v32  ;;  %v1302_v26 = vadd.f32 1.0, %v1270_v58  ;;  %v2545_v20 = vadd.f32 1.0, %v7306_v11  ;;  %v8959_v29 = vmul.f32 0.5, %v8891_v37 }
 0x236   :  { %7307 = vtanh.f32 %v2482_v38  ;;  %v1835_v30 = vpop.f32.mrf.mxu0  ;;  %v2387_v42 = vmul.f32 %v8945_v1, %v8945_v1  ;;  %v1116_v57 = vpop.f32.mrf.mxu2  ;;  %v1454_v9 = vpack.c.bf16 %v1428_v3, %v1427_v24  ;;  %v2322_v35 = vmul.f32 0.5, %v8905_v6  ;;  %v3283_v24 = vld [vmem:[%s11890_s0 + $0x240] sm:$0xff] }
 0x237   :  { %7309 = vtanh.f32 %v2040_v63  ;;  %v2041_v27 = vmul.f32 %v2009_v34, %v1913_v36  ;;  %v8951_v28 = vadd.f32 %v8888_v39, %v1116_v57  ;;  %v8954_v18 = vadd.f32 %v8700_v45, %v1835_v30 }
 0x238   :  { %v2419_v8 = vmul.f32 0.044715, %v2387_v42  ;;  %v1334_v56 = vmul.f32 %v1302_v26, %v1206_v41  ;;  %v2157_v12 = vpack.c.bf16 %v2135_v48, %v2134_v46  ;;  %v1881_v37 = vmul.f32 0.5, %v8918_v25 }
 0x239   :  { %7311 = vtanh.f32 %v2041_v27  ;;  %v1239_v14 = vmul.f32 %v8951_v28, %v8951_v28  ;;  %6770 = vmatmul.msk.bf16.gmra.mxu0 %vm101_vm0, %v3310_v21  ;;  %v1946_v22 = vmul.f32 %v8954_v18, %v8954_v18  ;;  %v2355_v0 = vmul.f32 0.7978846, %v8945_v1  ;;  %v3284_v21 = vld [vmem:[%s11890_s0 + $0x248] sm:$0xff] }
 0x23a   :  { %v2451_v53 = vadd.f32 1.0, %v2419_v8  ;;  %1566 = vmatmul.bf16.gmra.mxu3 %v1454_v9  ;;  %7313 = vtanh.f32 %v1333_v16  ;;  %2285 = vmatmul.bf16.gmra.mxu1 %v2157_v12  ;;  %v2577_v17 = vmul.f32 %v2545_v20, %v8910_v49  ;;  %v1914_v4 = vmul.f32 0.7978846, %v8954_v18 }
 0x23b   :  { %v2248_v62 = vpop.f32.mrf.mxu1  ;;  %v1271_v55 = vmul.f32 0.044715, %v1239_v14  ;;  %v1978_v6 = vmul.f32 0.044715, %v1946_v22  ;;  %7315 = vtanh.f32 %v1334_v56  ;;  %v1174_v44 = vmul.f32 0.5, %v8924_v50 }
 0x23c   :  { %v7308_v61 = vpop.eup %7307  ;;  %v8971_v31 = vadd.f32 %v8869_v59, %v2248_v62  ;;  %v2483_v36 = vmul.f32 %v2451_v53, %v2355_v0  ;;  %v1207_v63 = vmul.f32 0.7978846, %v8951_v28  ;;  %v3311_v20 = vpack.c.bf16 %v3284_v21, %v3283_v24  ;;  %v7067_v21 = vld [vmem:[%s11894_s5 + $0x30] sm:$0xff] }
 0x23d   :  { %v7310_v40 = vpop.eup %7309  ;;  %v2546_v51 = vadd.f32 1.0, %v7308_v61  ;;  %v2010_v60 = vadd.f32 1.0, %v1978_v6  ;;  %v1303_v54 = vadd.f32 1.0, %v1271_v55  ;;  %v2323_v62 = vmul.f32 0.5, %v8945_v1  ;;  %4314 = vmatpush.bf16.msra.mxu2 %v7067_v21 }
 0x23e   :  { %v2388_v2 = vmul.f32 %v8971_v31, %v8971_v31  ;;  %v1837_v25 = vpop.f32.mrf.mxu0  ;;  %v1118_v10 = vpop.f32.mrf.mxu2  ;;  %v2104_v47 = vadd.f32 1.0, %v7310_v40  ;;  %v2356_v50 = vmul.f32 0.7978846, %v8971_v31  ;;  %7317 = vtanh.f32 %v2483_v36 }
 0x23f   :  { %v7312_v33 = vpop.eup %7311  ;;  %v2578_v13 = vmul.f32 %v2546_v51, %v2322_v35  ;;  %v1838_v43 = vadd.f32 %v8700_v45, %v1837_v25  ;;  %v8981_v49 = vadd.f32 %v8888_v39, %v1118_v10  ;;  %v2042_v15 = vmul.f32 %v2010_v60, %v1914_v4 }
 0x240   :  { %v2420_v32 = vmul.f32 0.044715, %v2388_v2  ;;  %v2105_v23 = vadd.f32 1.0, %v7312_v33  ;;  %v7314_v38 = vpop.eup %7313  ;;  %v2136_v16 = vmul.f32 %v2104_v47, %v1880_v5  ;;  %v1335_v5 = vmul.f32 %v1303_v54, %v1207_v63 }
 0x241   :  { %v1947_v19 = vmul.f32 %v1838_v43, %v1838_v43  ;;  %v1240_v52 = vmul.f32 %v8981_v49, %v8981_v49  ;;  %v2609_v34 = vpack.c.bf16 %v2578_v13, %v2577_v17  ;;  %v7316_v3 = vpop.eup %7315  ;;  %v1915_v7 = vmul.f32 0.7978846, %v1838_v43 }
 0x242   :  { %v2452_v58 = vadd.f32 1.0, %v2420_v32  ;;  %v1397_v30 = vadd.f32 1.0, %v7314_v38  ;;  %v1398_v57 = vadd.f32 1.0, %v7316_v3  ;;  %7319 = vtanh.f32 %v2042_v15 }
 0x243   :  { %v1979_v41 = vmul.f32 0.044715, %v1947_v19  ;;  %v2251_v26 = vpop.f32.mrf.mxu1  ;;  %v1272_v27 = vmul.f32 0.044715, %v1240_v52  ;;  %v2137_v48 = vmul.f32 %v2105_v23, %v1881_v37  ;;  %v1208_v61 = vmul.f32 0.7978846, %v8981_v49 }
 0x244   :  { %v2484_v11 = vmul.f32 %v2452_v58, %v2356_v50  ;;  %v8993_v42 = vadd.f32 %v8869_v59, %v2251_v26  ;;  %2701 = vmatmul.bf16.vlgmr.msrb.gmra.mxu2 %v2609_v34  ;;  %v1429_v46 = vmul.f32 %v1397_v30, %v8959_v29  ;;  %v1430_v22 = vmul.f32 %v1398_v57, %v1174_v44  ;;  %v7318_v29 = vpop.eup %7317 }
 0x245   :  { %v2011_v9 = vadd.f32 1.0, %v1979_v41  ;;  %v1304_v8 = vadd.f32 1.0, %v1272_v27  ;;  %v2158_v51 = vpack.c.bf16 %v2137_v48, %v2136_v16  ;;  %v9007_v55 = vmul.f32 0.5, %v8951_v28  ;;  %v3285_v48 = vld [vmem:[%s11890_s0 + $0x250] sm:$0xff] }
 0x246   :  { %7321 = vtanh.f32 %v2484_v11  ;;  %v1840_v56 = vpop.f32.mrf.mxu0  ;;  %v2389_v35 = vmul.f32 %v8993_v42, %v8993_v42  ;;  %v1121_v53 = vpop.f32.mrf.mxu2  ;;  %v1455_v40 = vpack.c.bf16 %v1430_v22, %v1429_v46  ;;  %v9010_v6 = vmul.f32 0.5, %v8954_v18 }
 0x247   :  { %v2043_v14 = vmul.f32 %v2011_v9, %v1915_v7  ;;  %v8999_v12 = vadd.f32 %v8700_v45, %v1840_v56  ;;  %v9004_v37 = vadd.f32 %v8888_v39, %v1121_v53  ;;  %v2324_v17 = vmul.f32 0.5, %v8971_v31  ;;  %v7054_v53 = vld [vmem:[%s11892_s3 + $0x8] sm:$0xff] }
 0x248   :  { %v2421_v0 = vmul.f32 0.044715, %v2389_v35  ;;  %v7320_v4 = vpop.eup %7319  ;;  %v1883_v2 = vmul.f32 0.5, %v1838_v43  ;;  %v1336_v28 = vmul.f32 %v1304_v8, %v1208_v61  ;;  %v2357_v18 = vmul.f32 0.7978846, %v8993_v42  ;;  %v3286_v8 = vld [vmem:[%s11890_s0 + $0x258] sm:$0xff]  ;;  %3858 = vmatpush.bf16.msra.mxu1 %v7054_v53 }
 0x249   :  { %7323 = vtanh.f32 %v2043_v14  ;;  %v1241_v1 = vmul.f32 %v9004_v37, %v9004_v37  ;;  %6771 = vmatmul.msk.bf16.gmra.mxu0 %vm101_vm0, %v3311_v20  ;;  %v1948_v44 = vmul.f32 %v8999_v12, %v8999_v12  ;;  %v2547_v31 = vadd.f32 1.0, %v7318_v29  ;;  %v7046_v35 = vld [vmem:[%s11896_s7 + $0x18] sm:$0xff] }
 0x24a   :  { %v2453_v25 = vadd.f32 1.0, %v2421_v0  ;;  %1571 = vmatmul.bf16.gmra.mxu3 %v1455_v40  ;;  %7325 = vtanh.f32 %v1335_v5  ;;  %2290 = vmatmul.bf16.gmra.mxu1 %v2158_v51  ;;  %v1176_v43 = vmul.f32 0.5, %v8981_v49  ;;  %v1209_v63 = vmul.f32 0.7978846, %v9004_v37 }
 0x24b   :  { %v2253_v33 = vpop.f32.mrf.mxu1  ;;  %v1980_v60 = vmul.f32 0.044715, %v1948_v44  ;;  %7327 = vtanh.f32 %v1336_v28  ;;  %v1273_v32 = vmul.f32 0.044715, %v1241_v1  ;;  %v1916_v47 = vmul.f32 0.7978846, %v8999_v12  ;;  %3158 = vmatpush.bf16.msrb.mxu3 %v7046_v35 }
 0x24c   :  { %v7322_v13 = vpop.eup %7321  ;;  %v9020_v36 = vadd.f32 %v8869_v59, %v2253_v33  ;;  %v2485_v23 = vmul.f32 %v2453_v25, %v2357_v18  ;;  %v2579_v24 = vmul.f32 %v2547_v31, %v2323_v62  ;;  %v2106_v3 = vadd.f32 1.0, %v7320_v4 }
 0x24d   :  { %v2548_v10 = vadd.f32 1.0, %v7322_v13  ;;  %v2012_v38 = vadd.f32 1.0, %v1980_v60  ;;  %v1305_v56 = vadd.f32 1.0, %v1273_v32  ;;  %v3312_v25 = vpack.c.bf16 %v3286_v8, %v3285_v48 }
 0x24e   :  { %v2390_v54 = vmul.f32 %v9020_v36, %v9020_v36  ;;  %v1842_v15 = vpop.f32.mrf.mxu0  ;;  %v1123_v50 = vpop.f32.mrf.mxu2  ;;  %v2358_v41 = vmul.f32 0.7978846, %v9020_v36  ;;  %7329 = vtanh.f32 %v2485_v23  ;;  %v2138_v18 = vmul.f32 %v2106_v3, %v9010_v6 }
 0x24f   :  { %v7324_v19 = vpop.eup %7323  ;;  %v9028_v58 = vadd.f32 %v8700_v45, %v1842_v15  ;;  %v2580_v52 = vmul.f32 %v2548_v10, %v2324_v17  ;;  %v9031_v49 = vadd.f32 %v8888_v39, %v1123_v50  ;;  %v2044_v7 = vmul.f32 %v2012_v38, %v1916_v47 }
 0x250   :  { %v2422_v34 = vmul.f32 0.044715, %v2390_v54  ;;  %v2107_v30 = vadd.f32 1.0, %v7324_v19  ;;  %v7326_v11 = vpop.eup %7325  ;;  %v1337_v44 = vmul.f32 %v1305_v56, %v1209_v63  ;;  %v2325_v47 = vmul.f32 0.5, %v8993_v42 }
 0x251   :  { %v1949_v26 = vmul.f32 %v9028_v58, %v9028_v58  ;;  %v1242_v57 = vmul.f32 %v9031_v49, %v9031_v49  ;;  %v1917_v9 = vmul.f32 0.7978846, %v9028_v58  ;;  %v2610_v16 = vpack.c.bf16 %v2580_v52, %v2579_v24  ;;  %v7328_v46 = vpop.eup %7327 }
 0x252   :  { %v2454_v27 = vadd.f32 1.0, %v2422_v34  ;;  %v1399_v14 = vadd.f32 1.0, %v7326_v11  ;;  %7331 = vtanh.f32 %v2044_v7  ;;  %v1400_v61 = vadd.f32 1.0, %v7328_v46 }
 0x253   :  { %v1981_v20 = vmul.f32 0.044715, %v1949_v26  ;;  %v1274_v62 = vmul.f32 0.044715, %v1242_v57  ;;  %v2256_v5 = vpop.f32.mrf.mxu1  ;;  %v2139_v51 = vmul.f32 %v2107_v30, %v1883_v2  ;;  %v1210_v31 = vmul.f32 0.7978846, %v9031_v49 }
 0x254   :  { %v2486_v22 = vmul.f32 %v2454_v27, %v2358_v41  ;;  %v9055_v0 = vadd.f32 %v8869_v59, %v2256_v5  ;;  %v1431_v40 = vmul.f32 %v1399_v14, %v9007_v55  ;;  %2706 = vmatmul.bf16.gmra.mxu2 %v2610_v16  ;;  %v1432_v1 = vmul.f32 %v1400_v61, %v1176_v43  ;;  %v7330_v10 = vpop.eup %7329 }
 0x255   :  { %v2013_v29 = vadd.f32 1.0, %v1981_v20  ;;  %v1306_v17 = vadd.f32 1.0, %v1274_v62  ;;  %v2159_v63 = vpack.c.bf16 %v2139_v51, %v2138_v18  ;;  %v9073_v15 = vmul.f32 0.5, %v9004_v37 }
 0x256   :  { %7333 = vtanh.f32 %v2486_v22  ;;  %v1845_v4 = vpop.f32.mrf.mxu0  ;;  %v2391_v28 = vmul.f32 %v9055_v0, %v9055_v0  ;;  %v1126_v13 = vpop.f32.mrf.mxu2  ;;  %v1456_v2 = vpack.c.bf16 %v1432_v1, %v1431_v40  ;;  %v1884_v19 = vmul.f32 0.5, %v8999_v12  ;;  %v3288_v1 = vld [vmem:[%s11890_s0 + $0x268] sm:$0xff] }
 0x257   :  { %v2045_v33 = vmul.f32 %v2013_v29, %v1917_v9  ;;  %v9063_v55 = vadd.f32 %v8888_v39, %v1126_v13  ;;  %v9066_v60 = vadd.f32 %v8700_v45, %v1845_v4  ;;  %v1338_v6 = vmul.f32 %v1306_v17, %v1210_v31  ;;  %v3287_v17 = vld [vmem:[%s11890_s0 + $0x260] sm:$0xff] }
 0x258   :  { %v2423_v43 = vmul.f32 0.044715, %v2391_v28  ;;  %v7332_v32 = vpop.eup %7331  ;;  %v2326_v50 = vmul.f32 0.5, %v9020_v36  ;;  %v2549_v34 = vadd.f32 1.0, %v7330_v10  ;;  %v2359_v24 = vmul.f32 0.7978846, %v9055_v0 }
 0x259   :  { %7335 = vtanh.f32 %v2045_v33  ;;  %v1243_v54 = vmul.f32 %v9063_v55, %v9063_v55  ;;  %6772 = vmatmul.msk.bf16.gmra.mxu0 %vm101_vm0, %v3312_v25  ;;  %v1950_v23 = vmul.f32 %v9066_v60, %v9066_v60  ;;  %v1885_v7 = vmul.f32 0.5, %v9028_v58  ;;  %v9094_v58 = vld [vmem:[%s11891_s2] ss:$0 sm:$0xff] }
 0x25a   :  { %v2455_v45 = vadd.f32 1.0, %v2423_v43  ;;  %1576 = vmatmul.bf16.gmra.mxu3 %v1456_v2  ;;  %7337 = vtanh.f32 %v1337_v44  ;;  %2295 = vmatmul.bf16.gmra.mxu1 %v2159_v63  ;;  %v2108_v30 = vadd.f32 1.0, %v7332_v32  ;;  %v1211_v11 = vmul.f32 0.7978846, %v9063_v55 }
 0x25b   :  { %v1275_v42 = vmul.f32 0.044715, %v1243_v54  ;;  %v2258_v52 = vpop.f32.mrf.mxu1  ;;  %v1982_v3 = vmul.f32 0.044715, %v1950_v23  ;;  %7339 = vtanh.f32 %v1338_v6  ;;  %v1918_v27 = vmul.f32 0.7978846, %v9066_v60 }
 0x25c   :  { %v7334_v38 = vpop.eup %7333  ;;  %v9081_v37 = vadd.f32 %v8869_v59, %v2258_v52  ;;  %v2487_v36 = vmul.f32 %v2455_v45, %v2359_v24  ;;  %v2581_v46 = vmul.f32 %v2549_v34, %v2325_v47  ;;  %v1178_v5 = vmul.f32 0.5, %v9031_v49 }
 0x25d   :  { %v2550_v12 = vadd.f32 1.0, %v7334_v38  ;;  %v1307_v41 = vadd.f32 1.0, %v1275_v42  ;;  %v2014_v57 = vadd.f32 1.0, %v1982_v3  ;;  %v2140_v61 = vmul.f32 %v2108_v30, %v1884_v19  ;;  %v9126_v3 = vld [vmem:[%s11897_s8] ss:$0 sm:$0xff] }
 0x25e   :  { %v1847_v26 = vpop.f32.mrf.mxu0  ;;  %v1128_v9 = vpop.f32.mrf.mxu2  ;;  %v2392_v16 = vmul.f32 %v9081_v37, %v9081_v37  ;;  %7341 = vtanh.f32 %v2487_v36  ;;  %v2360_v29 = vmul.f32 0.7978846, %v9081_v37  ;;  %v3313_v43 = vpack.c.bf16 %v3288_v1, %v3287_v17 }
 0x25f   :  { %v7336_v21 = vpop.eup %7335  ;;  %v9089_v48 = vadd.f32 %v8888_v39, %v1128_v9  ;;  %v9097_v8 = vadd.f32 %v9094_v58, %v1847_v26  ;;  %v1339_v56 = vmul.f32 %v1307_v41, %v1211_v11  ;;  %v2046_v20 = vmul.f32 %v2014_v57, %v1918_v27 }
 0x260   :  { %v2582_v14 = vmul.f32 %v2550_v12, %v2326_v50  ;;  %v2109_v35 = vadd.f32 1.0, %v7336_v21  ;;  %v7338_v53 = vpop.eup %7337  ;;  %v2424_v22 = vmul.f32 0.044715, %v2392_v16  ;;  %v2327_v42 = vmul.f32 0.5, %v9055_v0 }
 0x261   :  { %v1244_v62 = vmul.f32 %v9089_v48, %v9089_v48  ;;  %v1951_v40 = vmul.f32 %v9097_v8, %v9097_v8  ;;  %v7340_v4 = vpop.eup %7339  ;;  %7343 = vtanh.f32 %v2046_v20  ;;  %v1401_v44 = vadd.f32 1.0, %v7338_v53  ;;  %v9149_v53 = vld [vmem:[%s11890_s0 + $0x278] sm:$0xff] }
 0x262   :  { %v2611_v51 = vpack.c.bf16 %v2582_v14, %v2581_v46  ;;  %v2456_v25 = vadd.f32 1.0, %v2424_v22  ;;  %v1402_v28 = vadd.f32 1.0, %v7340_v4  ;;  %v2141_v13 = vmul.f32 %v2109_v35, %v1885_v7 }
 0x263   :  { %v1276_v49 = vmul.f32 0.044715, %v1244_v62  ;;  %v1983_v33 = vmul.f32 0.044715, %v1951_v40  ;;  %7345 = vtanh.f32 %v1339_v56  ;;  %v1212_v31 = vmul.f32 0.7978846, %v9089_v48  ;;  %v2261_v10 = vpop.f32.mrf.mxu1 }
 0x264   :  { %v2488_v18 = vmul.f32 %v2456_v25, %v2360_v29  ;;  %2711 = vmatmul.bf16.gmra.mxu2 %v2611_v51  ;;  %v1919_v63 = vmul.f32 0.7978846, %v9097_v8  ;;  %v9114_v47 = vadd.f32 %v8869_v59, %v2261_v10  ;;  %v1434_v54 = vmul.f32 %v1402_v28, %v1178_v5  ;;  %v7342_v50 = vpop.eup %7341 }
 0x265   :  { %v1308_v2 = vadd.f32 1.0, %v1276_v49  ;;  %v2015_v32 = vadd.f32 1.0, %v1983_v33  ;;  %v1433_v45 = vmul.f32 %v1401_v44, %v9073_v15  ;;  %v2160_v24 = vpack.c.bf16 %v2141_v13, %v2140_v61 }
 0x266   :  { %v1850_v6 = vpop.f32.mrf.mxu0  ;;  %7347 = vtanh.f32 %v2488_v18  ;;  %v1131_v19 = vpop.f32.mrf.mxu2  ;;  %v2393_v34 = vmul.f32 %v9114_v47, %v9114_v47  ;;  %v1179_v15 = vmul.f32 0.5, %v9063_v55  ;;  %v1886_v7 = vmul.f32 0.5, %v9066_v60 }
 0x267   :  { %v9118_v23 = vadd.f32 %v9094_v58, %v1850_v6  ;;  %v1340_v38 = vmul.f32 %v1308_v2, %v1212_v31  ;;  %v2047_v52 = vmul.f32 %v2015_v32, %v1919_v63  ;;  %v7344_v12 = vpop.eup %7343  ;;  %v9131_v41 = vadd.f32 %v8888_v39, %v1131_v19 }
 0x268   :  { %v1457_v26 = vpack.c.bf16 %v1434_v54, %v1433_v45  ;;  %v2425_v30 = vmul.f32 0.044715, %v2393_v34  ;;  %v2328_v36 = vmul.f32 0.5, %v9081_v37  ;;  %v2551_v11 = vadd.f32 1.0, %v7342_v50  ;;  %v9144_v37 = vld [vmem:[%s11890_s0 + $0x270] sm:$0xff] }
 0x269   :  { %6773 = vmatmul.msk.bf16.gmra.mxu0 %vm101_vm0, %v3313_v43  ;;  %v7346_v0 = vpop.eup %7345  ;;  %7349 = vtanh.f32 %v2047_v52  ;;  %v1952_v21 = vmul.f32 %v9118_v23, %v9118_v23  ;;  %v1245_v55 = vmul.f32 %v9131_v41, %v9131_v41  ;;  %v2361_v27 = vmul.f32 0.7978846, %v9114_v47  ;;  %v7045_v34 = vld [vmem:[%s11896_s7 + $0x10] sm:$0xff] }
 0x26a   :  { %1581 = vmatmul.bf16.gmra.mxu3 %v1457_v26  ;;  %v1542_v60 = vpop.f32.mrf.mxu3  ;;  %7351 = vtanh.f32 %v1340_v38  ;;  %v2457_v57 = vadd.f32 1.0, %v2425_v30  ;;  %2300 = vmatmul.bf16.gmra.mxu1 %v2160_v24  ;;  %v1403_v14 = vadd.f32 1.0, %v7346_v0  ;;  %v2110_v35 = vadd.f32 1.0, %v7344_v12 }
 0x26b   :  { %v1984_v9 = vmul.f32 0.044715, %v1952_v21  ;;  %v1543_v16 = vadd.f32 %v9126_v3, %v1542_v60  ;;  %v1277_v56 = vmul.f32 0.044715, %v1245_v55  ;;  %v2263_v20 = vpop.f32.mrf.mxu1  ;;  %v1887_v22 = vmul.f32 0.5, %v9097_v8  ;;  %3159 = vmatpush.bf16.msrb.mxu3 %v7045_v34 }
 0x26c   :  { %v7348_v46 = vpop.eup %7347  ;;  %v2489_v62 = vmul.f32 %v2457_v57, %v2361_v27  ;;  %v9157_v5 = vadd.f32 %v8869_v59, %v2263_v20  ;;  %v1180_v4 = vmul.f32 0.5, %v9089_v48  ;;  %v1213_v25 = vmul.f32 0.7978846, %v9131_v41  ;;  %v7066_v48 = vld [vmem:[%s11894_s5 + $0x28] sm:$0xff] }
 0x26d   :  { %1623 = vst.msk [vmem:[%s11898_s9] sm:$0xff] %vm1622_vm1, %v1543_v16  ;;  %v2552_v29 = vadd.f32 1.0, %v7348_v46  ;;  %v1309_v40 = vadd.f32 1.0, %v1277_v56  ;;  %v2016_v51 = vadd.f32 1.0, %v1984_v9  ;;  %v1920_v49 = vmul.f32 0.7978846, %v9118_v23  ;;  %4315 = vmatpush.bf16.msra.mxu2 %v7066_v48 }
 0x26e   :  { %v1852_v61 = vpop.f32.mrf.mxu0  ;;  %v1133_v17 = vpop.f32.mrf.mxu2  ;;  %v2583_v44 = vmul.f32 %v2551_v11, %v2327_v42  ;;  %v3314_v33 = vpack.c.bf16 %v9149_v53, %v9144_v37  ;;  %v2394_v13 = vmul.f32 %v9157_v5, %v9157_v5  ;;  %v1435_v31 = vmul.f32 %v1403_v14, %v1179_v15  ;;  %v3291_v48 = vld [vmem:[%s11890_s0 + $0x280] sm:$0xff] }
 0x26f   :  { %v9160_v1 = vadd.f32 %v9094_v58, %v1852_v61  ;;  %v7350_v8 = vpop.eup %7349  ;;  %v9170_v18 = vadd.f32 %v8888_v39, %v1133_v17  ;;  %v2142_v2 = vmul.f32 %v2110_v35, %v1886_v7  ;;  %7353 = vtanh.f32 %v2489_v62  ;;  %v7077_v17 = vld [vmem:[%s11889_s1] sm:$0xff] }
 0x270   :  { %v7352_v28 = vpop.eup %7351  ;;  %v1341_v10 = vmul.f32 %v1309_v40, %v1213_v25  ;;  %v2584_v63 = vmul.f32 %v2552_v29, %v2328_v36  ;;  %v2048_v32 = vmul.f32 %v2016_v51, %v1920_v49  ;;  %v2426_v54 = vmul.f32 0.044715, %v2394_v13  ;;  %v3327_v40 = vld [vmem:[%s11891_s2] sm:$0x1]  ;;  %5018 = vmatpush.bf16.msrb.mxu0 %v7077_v17 }
 0x271   :  { %v1953_v43 = vmul.f32 %v9160_v1, %v9160_v1  ;;  %v1246_v6 = vmul.f32 %v9170_v18, %v9170_v18  ;;  %v1404_v45 = vadd.f32 1.0, %v7352_v28  ;;  %v2111_v52 = vadd.f32 1.0, %v7350_v8 }
 0x272   :  { %v1544_v19 = vpop.f32.mrf.mxu3  ;;  %v2612_v42 = vpack.c.bf16 %v2584_v63, %v2583_v44  ;;  %v2362_v24 = vmul.f32 0.7978846, %v9157_v5  ;;  %v2458_v12 = vadd.f32 1.0, %v2426_v54  ;;  %v1921_v26 = vmul.f32 0.7978846, %v9160_v1 }
 0x273   :  { %v1985_v38 = vmul.f32 0.044715, %v1953_v43  ;;  %v1545_v50 = vadd.f32 %v9126_v3, %v1544_v19  ;;  %v1278_v15 = vmul.f32 0.044715, %v1246_v6  ;;  %v1436_v7 = vmul.f32 %v1404_v45, %v1180_v4  ;;  %v2266_v30 = vpop.f32.mrf.mxu1 }
 0x274   :  { %2716 = vmatmul.bf16.gmra.mxu2 %v2612_v42  ;;  %v2143_v36 = vmul.f32 %v2111_v52, %v1887_v22  ;;  %7355 = vtanh.f32 %v1341_v10  ;;  %v2490_v55 = vmul.f32 %v2458_v12, %v2362_v24  ;;  %v9190_v11 = vadd.f32 %v8869_v59, %v2266_v30  ;;  %v3292_v10 = vld [vmem:[%s11890_s0 + $0x288] sm:$0xff] }
 0x275   :  { %v2017_v0 = vadd.f32 1.0, %v1985_v38  ;;  %1624 = vst.msk [vmem:[%s11898_s9 + $0x8] sm:$0xff] %vm1622_vm1, %v1545_v50  ;;  %v1310_v60 = vadd.f32 1.0, %v1278_v15  ;;  %v1458_v27 = vpack.c.bf16 %v1436_v7, %v1435_v31  ;;  %v7354_v57 = vpop.eup %7353  ;;  %7357 = vtanh.f32 %v2048_v32 }
 0x276   :  { %v1855_v21 = vpop.f32.mrf.mxu0  ;;  %v2161_v56 = vpack.c.bf16 %v2143_v36, %v2142_v2  ;;  %7359 = vtanh.f32 %v2490_v55  ;;  %v1214_v20 = vmul.f32 0.7978846, %v9170_v18  ;;  %v2395_v14 = vmul.f32 %v9190_v11, %v9190_v11 }
 0x277   :  { %v2049_v9 = vmul.f32 %v2017_v0, %v1921_v26  ;;  %v1136_v16 = vpop.f32.mrf.mxu2  ;;  %v9193_v46 = vadd.f32 %v9094_v58, %v1855_v21  ;;  %v2329_v59 = vmul.f32 0.5, %v9114_v47  ;;  %v9201_v35 = vmul.f32 0.5, %v9118_v23 }
 0x278   :  { %v9204_v37 = vadd.f32 %v8888_v39, %v1136_v16  ;;  %v1181_v53 = vmul.f32 0.5, %v9131_v41  ;;  %v2427_v22 = vmul.f32 0.044715, %v2395_v14  ;;  %v1342_v61 = vmul.f32 %v1310_v60, %v1214_v20  ;;  %v7053_v41 = vld [vmem:[%s11892_s3] sm:$0xff] }
 0x279   :  { %6774 = vmatmul.msk.bf16.gmra.mxu0 %vm101_vm0, %v3314_v33  ;;  %v1954_v62 = vmul.f32 %v9193_v46, %v9193_v46  ;;  %v2330_v47 = vmul.f32 0.5, %v9157_v5  ;;  %7361 = vtanh.f32 %v2049_v9  ;;  %v2553_v51 = vadd.f32 1.0, %v7354_v57  ;;  %3859 = vmatpush.bf16.msra.mxu1 %v7053_v41 }
 0x27a   :  { %1586 = vmatmul.bf16.gmra.mxu3 %v1458_v27  ;;  %v7356_v29 = vpop.eup %7355  ;;  %v1247_v23 = vmul.f32 %v9204_v37, %v9204_v37  ;;  %2305 = vmatmul.bf16.gmra.mxu1 %v2161_v56  ;;  %v2363_v4 = vmul.f32 0.7978846, %v9190_v11  ;;  %v2459_v8 = vadd.f32 1.0, %v2427_v22  ;;  %7363 = vtanh.f32 %v1342_v61 }
 0x27b   :  { %v1986_v25 = vmul.f32 0.044715, %v1954_v62  ;;  %v1547_v49 = vpop.f32.mrf.mxu3  ;;  %v7358_v5 = vpop.eup %7357  ;;  %v1889_v44 = vmul.f32 0.5, %v9160_v1  ;;  %v1405_v2 = vadd.f32 1.0, %v7356_v29  ;;  %v9233_v1 = vld [vmem:[%s11893_s4] ss:$0 sm:$0xff]  ;;  %v2585_v34 = vmul.f32 %v2553_v51, %v2329_v59 }
 0x27c   :  { %v1279_v33 = vmul.f32 0.044715, %v1247_v23  ;;  %v1548_v28 = vadd.f32 %v9126_v3, %v1547_v49  ;;  %v2268_v13 = vpop.f32.mrf.mxu1  ;;  %v7360_v43 = vpop.eup %7359  ;;  %v2491_v63 = vmul.f32 %v2459_v8, %v2363_v4  ;;  %v1922_v19 = vmul.f32 0.7978846, %v9193_v46 }
 0x27d   :  { %v2018_v32 = vadd.f32 1.0, %v1986_v25  ;;  %v9236_v54 = vadd.f32 %v9233_v1, %v2268_v13  ;;  %v2554_v38 = vadd.f32 1.0, %v7360_v43  ;;  %v1182_v50 = vmul.f32 0.5, %v9170_v18 }
 0x27e   :  { %v1857_v31 = vpop.f32.mrf.mxu0  ;;  %1625 = vst.msk [vmem:[%s11898_s9 + $0x10] sm:$0xff] %vm1622_vm1, %v1548_v28  ;;  %v9247_v42 = vperm.slane %v3327_v40, 0  ;;  %v1215_v52 = vmul.f32 0.7978846, %v9204_v37  ;;  %v2112_v24 = vadd.f32 1.0, %v7358_v5  ;;  %v3315_v12 = vpack.c.bf16 %v3292_v10, %v3291_v48 }
 0x27f   :  { %v9239_v6 = vadd.f32 %v9094_v58, %v1857_v31  ;;  %v1138_v45 = vpop.f32.mrf.mxu2  ;;  %v7362_v58 = vpop.eup %7361  ;;  %v1311_v15 = vadd.f32 1.0, %v1279_v33  ;;  %v2396_v7 = vmul.f32 %v9236_v54, %v9236_v54  ;;  %v1437_v0 = vmul.f32 %v1405_v2, %v1181_v53  ;;  %v9276_v28 = vld [vmem:[%s11895_s6] ss:$0 sm:$0xff] }
 0x280   :  { %v9253_v26 = vadd.f32 %v8888_v39, %v1138_v45  ;;  %v7364_v30 = vpop.eup %7363  ;;  %7365 = vtanh.f32 %v2491_v63  ;;  %v2050_v21 = vmul.f32 %v2018_v32, %v1922_v19  ;;  %v2586_v36 = vmul.f32 %v2554_v38, %v2330_v47 }
 0x281   :  { %v1955_v18 = vmul.f32 %v9239_v6, %v9239_v6  ;;  %v2364_v55 = vmul.f32 0.7978846, %v9236_v54  ;;  %v2428_v60 = vmul.f32 0.044715, %v2396_v7  ;;  %v1406_v57 = vadd.f32 1.0, %v7364_v30 }
 0x282   :  { %v1248_v27 = vmul.f32 %v9253_v26, %v9253_v26  ;;  %v1923_v9 = vmul.f32 0.7978846, %v9239_v6  ;;  %v2613_v56 = vpack.c.bf16 %v2586_v36, %v2585_v34  ;;  %v2113_v20 = vadd.f32 1.0, %v7362_v58 }
 0x283   :  { %v1987_v16 = vmul.f32 0.044715, %v1955_v18  ;;  %v1549_v39 = vpop.f32.mrf.mxu3  ;;  %v2460_v14 = vadd.f32 1.0, %v2428_v60  ;;  %v1438_v62 = vmul.f32 %v1406_v57, %v1182_v50  ;;  %v1343_v51 = vmul.f32 %v1311_v15, %v1215_v52  ;;  %v3293_v60 = vld [vmem:[%s11890_s0 + $0x290] sm:$0xff] }
 0x284   :  { %v1280_v59 = vmul.f32 0.044715, %v1248_v27  ;;  %v1550_v53 = vadd.f32 %v9126_v3, %v1549_v39  ;;  %v2271_v22 = vpop.f32.mrf.mxu1  ;;  %2721 = vmatmul.bf16.gmra.mxu2 %v2613_v56  ;;  %v2145_v47 = vmul.f32 %v2113_v20, %v1889_v44  ;;  %v2144_v8 = vmul.f32 %v2112_v24, %v9201_v35  ;;  %v3294_v27 = vld [vmem:[%s11890_s0 + $0x298] sm:$0xff] }
 0x285   :  { %v2019_v29 = vadd.f32 1.0, %v1987_v16  ;;  %v2272_v40 = vadd.f32 %v9233_v1, %v2271_v22  ;;  %v2492_v41 = vmul.f32 %v2460_v14, %v2364_v55  ;;  %v1459_v4 = vpack.c.bf16 %v1438_v62, %v1437_v0  ;;  %v7065_v16 = vld [vmem:[%s11894_s5 + $0x20] sm:$0xff] }
 0x286   :  { %v3400_v61 = vpop.f32.mrf.mxu0  ;;  %1626 = vst.msk [vmem:[%s11898_s9 + $0x18] sm:$0xff] %vm1622_vm1, %v1550_v53  ;;  %v7366_v25 = vpop.eup %7365  ;;  %7367 = vtanh.f32 %v2050_v21  ;;  %v1312_v49 = vadd.f32 1.0, %v1280_v59  ;;  %v2331_v44 = vmul.f32 0.5, %v9190_v11  ;;  %v2162_v31 = vpack.c.bf16 %v2145_v47, %v2144_v8  ;;  %4316 = vmatpush.bf16.msra.mxu2 %v7065_v16  ;;  %v7044_v8 = vld [vmem:[%s11896_s7 + $0x8] sm:$0xff] }
 0x287   :  { %v9264_v23 = vadd.f32 %v3400_v61, %v9247_v42  ;;  %v1141_v17 = vpop.f32.mrf.mxu2  ;;  %v2051_v5 = vmul.f32 %v2019_v29, %v1923_v9  ;;  %v2397_v33 = vmul.f32 %v2272_v40, %v2272_v40  ;;  %7369 = vtanh.f32 %v2492_v41  ;;  %3160 = vmatpush.bf16.msrb.mxu3 %v7044_v8 }
 0x288   :  { %v9279_v13 = vadd.f32 %v9276_v28, %v1141_v17  ;;  %v9282_v35 = vmul.f32 0.5, %v9193_v46  ;;  %v1216_v2 = vmul.f32 0.7978846, %v9253_v26  ;;  %v9288_v10 = vmul.f32 0.5, %v9204_v37 }
 0x289   :  { %6775 = vmatmul.msk.bf16.gmra.mxu0 %vm101_vm0, %v3315_v12  ;;  %v2429_v48 = vmul.f32 0.044715, %v2397_v33  ;;  %v3544_v11 = vmul.f32 %v9264_v23, %v9264_v23  ;;  %7371 = vtanh.f32 %v2051_v5  ;;  %v2365_v43 = vmul.f32 0.7978846, %v2272_v40 }
 0x28a   :  { %1591 = vmatmul.bf16.gmra.mxu3 %v1459_v4  ;;  %v1249_v63 = vmul.f32 %v9279_v13, %v9279_v13  ;;  %2310 = vmatmul.bf16.gmra.mxu1 %v2162_v31  ;;  %v1344_v45 = vmul.f32 %v1312_v49, %v1216_v2  ;;  %7373 = vtanh.f32 %v1343_v51  ;;  %v3512_v50 = vmul.f32 0.7978846, %v9264_v23 }
 0x28b   :  { %v2461_v32 = vadd.f32 1.0, %v2429_v48  ;;  %v3576_v19 = vmul.f32 0.044715, %v3544_v11  ;;  %v1552_v46 = vpop.f32.mrf.mxu3  ;;  %v2555_v37 = vadd.f32 1.0, %v7366_v25  ;;  %v2332_v21 = vmul.f32 0.5, %v9236_v54  ;;  %v7086_v48 = vld [vmem:[%s11892_s3 + $0x38] sm:$0xff] }
 0x28c   :  { %v1281_v38 = vmul.f32 0.044715, %v1249_v63  ;;  %v1553_v52 = vadd.f32 %v9126_v3, %v1552_v46  ;;  %v2273_v34 = vpop.f32.mrf.mxu1  ;;  %v7368_v12 = vpop.eup %7367  ;;  %v1891_v18 = vmul.f32 0.5, %v9239_v6  ;;  %7375 = vtanh.f32 %v1344_v45  ;;  %5472 = vmatpush.bf16.msrb.mxu1 %v7086_v48 }
 0x28d   :  { %v2493_v58 = vmul.f32 %v2461_v32, %v2365_v43  ;;  %v3608_v15 = vadd.f32 1.0, %v3576_v19  ;;  %v9295_v7 = vadd.f32 %v9233_v1, %v2273_v34  ;;  %v7370_v30 = vpop.eup %7369  ;;  %v9312_v57 = vmul.f32 0.5, %v2272_v40 }
 0x28e   :  { %v3402_v24 = vpop.f32.mrf.mxu0  ;;  %v1313_v36 = vadd.f32 1.0, %v1281_v38  ;;  %1627 = vst.msk [vmem:[%s11898_s9 + $0x20] sm:$0xff] %vm1622_vm1, %v1553_v52  ;;  %v1217_v54 = vmul.f32 0.7978846, %v9279_v13  ;;  %v1184_v9 = vmul.f32 0.5, %v9253_v26  ;;  %v2587_v14 = vmul.f32 %v2555_v37, %v2331_v44 }
 0x28f   :  { %v9298_v0 = vadd.f32 %v3402_v24, %v9247_v42  ;;  %v1143_v55 = vpop.f32.mrf.mxu2  ;;  %v3640_v6 = vmul.f32 %v3608_v15, %v3512_v50  ;;  %v7372_v39 = vpop.eup %7371  ;;  %v2398_v56 = vmul.f32 %v9295_v7, %v9295_v7  ;;  %v2114_v59 = vadd.f32 1.0, %v7368_v12 }
 0x290   :  { %v9322_v20 = vadd.f32 %v9276_v28, %v1143_v55  ;;  %v7374_v53 = vpop.eup %7373  ;;  %7377 = vtanh.f32 %v2493_v58  ;;  %v2556_v62 = vadd.f32 1.0, %v7370_v30  ;;  %v3316_v26 = vpack.c.bf16 %v3294_v27, %v3293_v60 }
 0x291   :  { %v3545_v22 = vmul.f32 %v9298_v0, %v9298_v0  ;;  %v1345_v61 = vmul.f32 %v1313_v36, %v1217_v54  ;;  %7379 = vtanh.f32 %v3640_v6  ;;  %v2366_v29 = vmul.f32 0.7978846, %v9295_v7 }
 0x292   :  { %v2430_v40 = vmul.f32 0.044715, %v2398_v56  ;;  %v1250_v47 = vmul.f32 %v9322_v20, %v9322_v20  ;;  %v3513_v51 = vmul.f32 0.7978846, %v9298_v0  ;;  %v2588_v4 = vmul.f32 %v2556_v62, %v2332_v21  ;;  %v7376_v25 = vpop.eup %7375 }
 0x293   :  { %v3577_v41 = vmul.f32 0.044715, %v3545_v22  ;;  %v1554_v17 = vpop.f32.mrf.mxu3  ;;  %v1407_v44 = vadd.f32 1.0, %v7374_v53  ;;  %v2115_v31 = vadd.f32 1.0, %v7372_v39  ;;  %v1408_v45 = vadd.f32 1.0, %v7376_v25 }
 0x294   :  { %v2462_v49 = vadd.f32 1.0, %v2430_v40  ;;  %v1555_v5 = vadd.f32 %v9126_v3, %v1554_v17  ;;  %v2276_v33 = vpop.f32.mrf.mxu1  ;;  %v1282_v11 = vmul.f32 0.044715, %v1250_v47  ;;  %v2614_v32 = vpack.c.bf16 %v2588_v4, %v2587_v14 }
 0x295   :  { %v3609_v43 = vadd.f32 1.0, %v3577_v41  ;;  %v9338_v63 = vadd.f32 %v9233_v1, %v2276_v33  ;;  %v2146_v38 = vmul.f32 %v2114_v59, %v9282_v35  ;;  %v2147_v50 = vmul.f32 %v2115_v31, %v1891_v18 }
 0x296   :  { %v3405_v2 = vpop.f32.mrf.mxu0  ;;  %v2494_v19 = vmul.f32 %v2462_v49, %v2366_v29  ;;  %1628 = vst.msk [vmem:[%s11898_s9 + $0x28] sm:$0xff] %vm1622_vm1, %v1555_v5  ;;  %v7378_v52 = vpop.eup %7377  ;;  %7381 = vtanh.f32 %v1345_v61  ;;  %v1218_v34 = vmul.f32 0.7978846, %v9322_v20  ;;  %v1314_v24 = vadd.f32 1.0, %v1282_v11  ;;  %2726 = vmatmul.bf16.gmra.mxu2 %v2614_v32 }
 0x297   :  { %v1146_v46 = vpop.f32.mrf.mxu2  ;;  %v3641_v37 = vmul.f32 %v3609_v43, %v3513_v51  ;;  %v7380_v12 = vpop.eup %7379  ;;  %v2399_v58 = vmul.f32 %v9338_v63, %v9338_v63  ;;  %v1439_v35 = vmul.f32 %v1407_v44, %v9288_v10  ;;  %v1440_v21 = vmul.f32 %v1408_v45, %v1184_v9 }
 0x298   :  { %7383 = vtanh.f32 %v2494_v19  ;;  %v9350_v15 = vadd.f32 %v9276_v28, %v1146_v46  ;;  %v1346_v30 = vmul.f32 %v1314_v24, %v1218_v34  ;;  %v2163_v18 = vpack.c.bf16 %v2147_v50, %v2146_v38 }
 0x299   :  { %6776 = vmatmul.msk.bf16.gmra.mxu0 %vm101_vm0, %v3316_v26  ;;  %7385 = vtanh.f32 %v3641_v37  ;;  %v9354_v36 = vmul.f32 0.5, %v9279_v13  ;;  %v3480_v55 = vmul.f32 0.5, %v9264_v23  ;;  %v2334_v60 = vmul.f32 0.5, %v9295_v7  ;;  %v9367_v13 = vld [vmem:[%s11890_s0 + $0x2a0] sm:$0xff]  ;;  %v9372_v23 = vld [vmem:[%s11890_s0 + $0x2a8] sm:$0xff] }
 0x29a   :  { %v2431_v27 = vmul.f32 0.044715, %v2399_v58  ;;  %v3481_v54 = vmul.f32 0.5, %v9298_v0  ;;  %v1251_v6 = vmul.f32 %v9350_v15, %v9350_v15  ;;  %v1460_v16 = vpack.c.bf16 %v1440_v21, %v1439_v35  ;;  %2315 = vmatmul.bf16.gmra.mxu1 %v2163_v18 }
 0x29b   :  { %v9362_v10 = vadd.f32 %v3405_v2, %v9247_v42  ;;  %v1557_v9 = vpop.f32.mrf.mxu3  ;;  %v3704_v7 = vadd.f32 1.0, %v7380_v12  ;;  %v2367_v0 = vmul.f32 0.7978846, %v9338_v63  ;;  %v9377_v22 = vmul.f32 0.5, %v9322_v20 }
 0x29c   :  { %v2463_v39 = vadd.f32 1.0, %v2431_v27  ;;  %v1558_v56 = vadd.f32 %v9126_v3, %v1557_v9  ;;  %v2278_v14 = vpop.f32.mrf.mxu1  ;;  %v7382_v53 = vpop.eup %7381  ;;  %7387 = vtanh.f32 %v1346_v30  ;;  %v1283_v62 = vmul.f32 0.044715, %v1251_v6  ;;  %1596 = vmatmul.bf16.gmra.mxu3 %v1460_v16 }
 0x29d   :  { %v3546_v26 = vmul.f32 %v9362_v10, %v9362_v10  ;;  %v9386_v40 = vadd.f32 %v9233_v1, %v2278_v14  ;;  %v2557_v51 = vadd.f32 1.0, %v7378_v52  ;;  %v3317_v20 = vpack.c.bf16 %v9372_v23, %v9367_v13 }
 0x29e   :  { %v3407_v59 = vpop.f32.mrf.mxu0  ;;  %v7384_v61 = vpop.eup %7383  ;;  %v2495_v29 = vmul.f32 %v2463_v39, %v2367_v0  ;;  %1629 = vst.msk [vmem:[%s11898_s9 + $0x30] sm:$0xff] %vm1622_vm1, %v1558_v56  ;;  %v1219_v17 = vmul.f32 0.7978846, %v9350_v15  ;;  %v1315_v4 = vadd.f32 1.0, %v1283_v62  ;;  %v3736_v49 = vmul.f32 %v3704_v7, %v3480_v55 }
 0x29f   :  { %v1148_v47 = vpop.f32.mrf.mxu2  ;;  %v7386_v41 = vpop.eup %7385  ;;  %v3578_v8 = vmul.f32 0.044715, %v3546_v26  ;;  %v9395_v33 = vadd.f32 %v3407_v59, %v9247_v42  ;;  %v1409_v44 = vadd.f32 1.0, %v7382_v53  ;;  %v3514_v2 = vmul.f32 0.7978846, %v9362_v10 }
 0x2a0   :  { %v9392_v25 = vadd.f32 %v9276_v28, %v1148_v47  ;;  %v3705_v5 = vadd.f32 1.0, %v7386_v41  ;;  %v1347_v31 = vmul.f32 %v1315_v4, %v1219_v17  ;;  %v2400_v48 = vmul.f32 %v9386_v40, %v9386_v40 }
 0x2a1   :  { %v2558_v11 = vadd.f32 1.0, %v7384_v61  ;;  %7389 = vtanh.f32 %v2495_v29  ;;  %v3610_v43 = vadd.f32 1.0, %v3578_v8  ;;  %v2589_v19 = vmul.f32 %v2557_v51, %v9312_v57 }
 0x2a2   :  { %v1252_v32 = vmul.f32 %v9392_v25, %v9392_v25  ;;  %v7388_v46 = vpop.eup %7387  ;;  %v3737_v45 = vmul.f32 %v3705_v5, %v3481_v54  ;;  %v2368_v38 = vmul.f32 0.7978846, %v9386_v40  ;;  %v2432_v50 = vmul.f32 0.044715, %v2400_v48 }
 0x2a3   :  { %v1220_v52 = vmul.f32 0.7978846, %v9392_v25  ;;  %v1559_v34 = vpop.f32.mrf.mxu3  ;;  %7391 = vtanh.f32 %v1347_v31  ;;  %v3547_v37 = vmul.f32 %v9395_v33, %v9395_v33  ;;  %v3515_v57 = vmul.f32 0.7978846, %v9395_v33 }
 0x2a4   :  { %v1284_v24 = vmul.f32 0.044715, %v1252_v32  ;;  %v1560_v12 = vadd.f32 %v9126_v3, %v1559_v34  ;;  %v2281_v58 = vpop.f32.mrf.mxu1  ;;  %v2464_v30 = vadd.f32 1.0, %v2432_v50  ;;  %v2590_v18 = vmul.f32 %v2558_v11, %v2334_v60 }
 0x2a5   :  { %v2282_v21 = vadd.f32 %v9233_v1, %v2281_v58  ;;  %v3642_v55 = vmul.f32 %v3610_v43, %v3514_v2  ;;  %v3579_v54 = vmul.f32 0.044715, %v3547_v37  ;;  %v1410_v16 = vadd.f32 1.0, %v7388_v46 }
 0x2a6   :  { %v3410_v35 = vpop.f32.mrf.mxu0  ;;  %v1316_v27 = vadd.f32 1.0, %v1284_v24  ;;  %1630 = vst.msk [vmem:[%s11898_s9 + $0x38] sm:$0xff] %vm1622_vm1, %v1560_v12  ;;  %v3768_v9 = vpack.c.bf16 %v3737_v45, %v3736_v49  ;;  %v2496_v13 = vmul.f32 %v2464_v30, %v2368_v38  ;;  %v1441_v7 = vmul.f32 %v1409_v44, %v9354_v36  ;;  %v7064_v30 = vld [vmem:[%s11894_s5 + $0x18] sm:$0xff] }
 0x2a7   :  { %v1151_v6 = vpop.f32.mrf.mxu2  ;;  %v2401_v23 = vmul.f32 %v2282_v21, %v2282_v21  ;;  %v7390_v0 = vpop.eup %7389  ;;  %v3611_v60 = vadd.f32 1.0, %v3579_v54  ;;  %v2615_v56 = vpack.c.bf16 %v2590_v18, %v2589_v19  ;;  %v1442_v53 = vmul.f32 %v1410_v16, %v9377_v22  ;;  %4317 = vmatpush.bf16.msra.mxu2 %v7064_v30 }
 0x2a8   :  { %v1348_v39 = vmul.f32 %v1316_v27, %v1220_v52  ;;  %v1152_v14 = vadd.f32 %v9276_v28, %v1151_v6  ;;  %7393 = vtanh.f32 %v2496_v13  ;;  %v3411_v62 = vadd.f32 %v3410_v35, %v9247_v42 }
 0x2a9   :  { %6777 = vmatmul.msk.bf16.gmra.mxu0 %vm101_vm0, %v3317_v20  ;;  %v2433_v59 = vmul.f32 0.044715, %v2401_v23  ;;  %v7392_v26 = vpop.eup %7391  ;;  %v2335_v61 = vmul.f32 0.5, %v9338_v63  ;;  %7395 = vtanh.f32 %v3642_v55  ;;  %2731 = vmatmul.bf16.gmra.mxu2 %v2615_v56  ;;  %v3643_v36 = vmul.f32 %v3611_v60, %v3515_v57 }
 0x2aa   :  { %v1253_v47 = vmul.f32 %v1152_v14, %v1152_v14  ;;  %v1461_v51 = vpack.c.bf16 %v1442_v53, %v1441_v7  ;;  %3860 = vmatmul.bf16.vlgmr.msra.gmra.mxu1 %v3768_v9  ;;  %v9421_v41 = vmul.f32 0.5, %v9350_v15  ;;  %v9424_v17 = vmul.f32 0.5, %v9362_v10 }
 0x2ab   :  { %v2465_v29 = vadd.f32 1.0, %v2433_v59  ;;  %7397 = vtanh.f32 %v1348_v39  ;;  %v2369_v63 = vmul.f32 0.7978846, %v2282_v21  ;;  %v3548_v5 = vmul.f32 %v3411_v62, %v3411_v62 }
 0x2ac   :  { %v2283_v4 = vpop.f32.mrf.mxu1  ;;  %v1285_v49 = vmul.f32 0.044715, %v1253_v47  ;;  %1601 = vmatmul.bf16.gmra.mxu3 %v1461_v51  ;;  %v2336_v31 = vmul.f32 0.5, %v9386_v40  ;;  %v1188_v2 = vmul.f32 0.5, %v9392_v25  ;;  %v9431_v15 = vmul.f32 0.5, %v9395_v33 }
 0x2ad   :  { %v1562_v20 = vpop.f32.mrf.mxu3  ;;  %v2284_v44 = vadd.f32 %v9233_v1, %v2283_v4  ;;  %7399 = vtanh.f32 %v3643_v36  ;;  %v9440_v43 = vmul.f32 0.5, %v2282_v21  ;;  %v2497_v32 = vmul.f32 %v2465_v29, %v2369_v63 }
 0x2ae   :  { %v1563_v22 = vadd.f32 %v9126_v3, %v1562_v20  ;;  %v3412_v8 = vpop.f32.mrf.mxu0  ;;  %v7394_v11 = vpop.eup %7393  ;;  %v9442_v40 = vmul.f32 0.5, %v1152_v14  ;;  %v1221_v19 = vmul.f32 0.7978846, %v1152_v14  ;;  %v2559_v45 = vadd.f32 1.0, %v7390_v0 }
 0x2af   :  { %v1153_v10 = vpop.f32.mrf.mxu2  ;;  %v9438_v48 = vadd.f32 %v3412_v8, %v9247_v42  ;;  %v7396_v25 = vpop.eup %7395  ;;  %v2402_v33 = vmul.f32 %v2284_v44, %v2284_v44  ;;  %v1317_v38 = vadd.f32 1.0, %v1285_v49  ;;  %v9447_v50 = vmul.f32 0.5, %v3411_v62 }
 0x2b0   :  { %1631 = vst.msk [vmem:[%s11898_s9 + $0x40] sm:$0xff] %vm1622_vm1, %v1563_v22  ;;  %v9445_v46 = vadd.f32 %v9276_v28, %v1153_v10  ;;  %v3580_v52 = vmul.f32 0.044715, %v3548_v5  ;;  %v2560_v34 = vadd.f32 1.0, %v7394_v11  ;;  %v3516_v37 = vmul.f32 0.7978846, %v3411_v62 }
 0x2b1   :  { %v7398_v24 = vpop.eup %7397  ;;  %v2434_v12 = vmul.f32 0.044715, %v2402_v33  ;;  %v3549_v58 = vmul.f32 %v9438_v48, %v9438_v48  ;;  %v1411_v35 = vadd.f32 1.0, %v7392_v26  ;;  %7401 = vtanh.f32 %v2497_v32  ;;  %v3298_v10 = vld [vmem:[%s11890_s0 + $0x2b8] sm:$0xff] }
 0x2b2   :  { %v2370_v57 = vmul.f32 0.7978846, %v2284_v44  ;;  %v1254_v21 = vmul.f32 %v9445_v46, %v9445_v46  ;;  %v3706_v55 = vadd.f32 1.0, %v7396_v25  ;;  %v2591_v6 = vmul.f32 %v2559_v45, %v2335_v61 }
 0x2b3   :  { %v2466_v27 = vadd.f32 1.0, %v2434_v12  ;;  %v2592_v16 = vmul.f32 %v2560_v34, %v2336_v31  ;;  %v7400_v13 = vpop.eup %7399  ;;  %v1349_v23 = vmul.f32 %v1317_v38, %v1221_v19  ;;  %v3612_v7 = vadd.f32 1.0, %v3580_v52  ;;  %v7043_v34 = vld [vmem:[%s11896_s7] sm:$0xff] }
 0x2b4   :  { %v1286_v0 = vmul.f32 0.044715, %v1254_v21  ;;  %v1412_v39 = vadd.f32 1.0, %v7398_v24  ;;  %v1222_v56 = vmul.f32 0.7978846, %v9445_v46  ;;  %v9466_v47 = vmul.f32 0.5, %v2284_v44  ;;  %3161 = vmatpush.bf16.msrb.mxu3 %v7043_v34 }
 0x2b5   :  { %v1564_v18 = vpop.f32.mrf.mxu3  ;;  %v2498_v60 = vmul.f32 %v2466_v27, %v2370_v57  ;;  %v3581_v14 = vmul.f32 0.044715, %v3549_v58  ;;  %v2616_v59 = vpack.c.bf16 %v2592_v16, %v2591_v6  ;;  %v3517_v51 = vmul.f32 0.7978846, %v9438_v48  ;;  %v7085_v24 = vld [vmem:[%s11892_s3 + $0x30] sm:$0xff] }
 0x2b6   :  { %v1565_v54 = vadd.f32 %v9126_v3, %v1564_v18  ;;  %v3415_v9 = vpop.f32.mrf.mxu0  ;;  %v1318_v62 = vadd.f32 1.0, %v1286_v0  ;;  %v1444_v36 = vmul.f32 %v1412_v39, %v1188_v2  ;;  %v3707_v22 = vadd.f32 1.0, %v7400_v13  ;;  %v3297_v2 = vld [vmem:[%s11890_s0 + $0x2b0] sm:$0xff]  ;;  %5473 = vmatpush.bf16.msrb.mxu1 %v7085_v24 }
 0x2b7   :  { %v1156_v53 = vpop.f32.mrf.mxu2  ;;  %v2286_v26 = vpop.f32.mrf.mxu1  ;;  %v3416_v29 = vadd.f32 %v3415_v9, %v9247_v42  ;;  %7403 = vtanh.f32 %v1349_v23  ;;  %v3644_v8 = vmul.f32 %v3612_v7, %v3516_v37  ;;  %v1443_v49 = vmul.f32 %v1411_v35, %v9421_v41 }
 0x2b8   :  { %1632 = vst.msk [vmem:[%s11898_s9 + $0x48] sm:$0xff] %vm1622_vm1, %v1565_v54  ;;  %v9463_v61 = vadd.f32 %v9276_v28, %v1156_v53  ;;  %v9470_v20 = vadd.f32 %v9233_v1, %v2286_v26  ;;  %v7402_v4 = vpop.eup %7401  ;;  %v1350_v63 = vmul.f32 %v1318_v62, %v1222_v56  ;;  %7405 = vtanh.f32 %v2498_v60 }
 0x2b9   :  { %v3613_v5 = vadd.f32 1.0, %v3581_v14  ;;  %2736 = vmatmul.bf16.gmra.mxu2 %v2616_v59  ;;  %v1462_v11 = vpack.c.bf16 %v1444_v36, %v1443_v49  ;;  %v3550_v41 = vmul.f32 %v3416_v29, %v3416_v29  ;;  %v3738_v32 = vmul.f32 %v3706_v55, %v9424_v17 }
 0x2ba   :  { %v2403_v31 = vmul.f32 %v9470_v20, %v9470_v20  ;;  %v1255_v44 = vmul.f32 %v9463_v61, %v9463_v61  ;;  %7407 = vtanh.f32 %v1350_v63  ;;  %v3739_v45 = vmul.f32 %v3707_v22, %v9431_v15 }
 0x2bb   :  { %v9493_v37 = vmul.f32 0.5, %v9438_v48  ;;  %v3582_v17 = vmul.f32 0.044715, %v3550_v41  ;;  %v3318_v12 = vpack.c.bf16 %v3298_v10, %v3297_v2  ;;  %v3645_v15 = vmul.f32 %v3613_v5, %v3517_v51 }
 0x2bc   :  { %v2435_v19 = vmul.f32 0.044715, %v2403_v31  ;;  %v1287_v33 = vmul.f32 0.044715, %v1255_v44  ;;  %1606 = vmatmul.bf16.gmra.mxu3 %v1462_v11  ;;  %v3769_v30 = vpack.c.bf16 %v3739_v45, %v3738_v32  ;;  %7409 = vtanh.f32 %v3644_v8 }
 0x2bd   :  { %v1567_v25 = vpop.f32.mrf.mxu3  ;;  %v7404_v48 = vpop.eup %7403  ;;  %v9503_v18 = vmul.f32 0.5, %v3416_v29  ;;  %6778 = vmatmul.msk.bf16.gmra.mxu0 %vm101_vm0, %v3318_v12  ;;  %v2371_v54 = vmul.f32 0.7978846, %v9470_v20  ;;  %v3614_v6 = vadd.f32 1.0, %v3582_v17  ;;  %v1223_v23 = vmul.f32 0.7978846, %v9463_v61 }
 0x2be   :  { %v1568_v38 = vadd.f32 %v9126_v3, %v1567_v25  ;;  %v3417_v52 = vpop.f32.mrf.mxu0  ;;  %v1190_v3 = vmul.f32 0.5, %v9445_v46  ;;  %v2467_v35 = vadd.f32 1.0, %v2435_v19  ;;  %v1319_v21 = vadd.f32 1.0, %v1287_v33  ;;  %v7406_v27 = vpop.eup %7405  ;;  %3865 = vmatmul.bf16.gmra.mxu1 %v3769_v30  ;;  %v3299_v30 = vld [vmem:[%s11890_s0 + $0x2c0] sm:$0xff] }
 0x2bf   :  { %v9496_v58 = vadd.f32 %v3417_v52, %v9247_v42  ;;  %v1158_v57 = vpop.f32.mrf.mxu2  ;;  %v2288_v55 = vpop.f32.mrf.mxu1  ;;  %v3518_v7 = vmul.f32 0.7978846, %v3416_v29  ;;  %v2561_v39 = vadd.f32 1.0, %v7402_v4  ;;  %7411 = vtanh.f32 %v3645_v15  ;;  %v9518_v29 = vld [vmem:[%s11897_s8] ss:$0 sm:$0xff] }
 0x2c0   :  { %1633 = vst.msk [vmem:[%s11898_s9 + $0x50] sm:$0xff] %vm1622_vm1, %v1568_v38  ;;  %v1159_v46 = vadd.f32 %v9276_v28, %v1158_v57  ;;  %v2289_v16 = vadd.f32 %v9233_v1, %v2288_v55  ;;  %v7408_v13 = vpop.eup %7407  ;;  %v2499_v60 = vmul.f32 %v2467_v35, %v2371_v54  ;;  %v9513_v28 = vmul.f32 0.5, %v9463_v61  ;;  %v9524_v61 = vld [vmem:[%s11895_s6] ss:$0 sm:$0xff] }
 0x2c1   :  { %v3551_v9 = vmul.f32 %v9496_v58, %v9496_v58  ;;  %v1351_v14 = vmul.f32 %v1319_v21, %v1223_v23  ;;  %v2562_v62 = vadd.f32 1.0, %v7406_v27  ;;  %v1413_v26 = vadd.f32 1.0, %v7404_v48 }
 0x2c2   :  { %v1256_v0 = vmul.f32 %v1159_v46, %v1159_v46  ;;  %v2404_v56 = vmul.f32 %v2289_v16, %v2289_v16  ;;  %v3646_v36 = vmul.f32 %v3614_v6, %v3518_v7  ;;  %v7410_v63 = vpop.eup %7409  ;;  %v2593_v5 = vmul.f32 %v2561_v39, %v9440_v43 }
 0x2c3   :  { %v3583_v22 = vmul.f32 0.044715, %v3551_v9  ;;  %v2594_v31 = vmul.f32 %v2562_v62, %v9466_v47  ;;  %v1414_v44 = vadd.f32 1.0, %v7408_v13  ;;  %7413 = vtanh.f32 %v2499_v60 }
 0x2c4   :  { %v1288_v59 = vmul.f32 0.044715, %v1256_v0  ;;  %v2436_v51 = vmul.f32 0.044715, %v2404_v56  ;;  %v2372_v2 = vmul.f32 0.7978846, %v2289_v16  ;;  %v1445_v19 = vmul.f32 %v1413_v26, %v9442_v40 }
 0x2c5   :  { %v1569_v53 = vpop.f32.mrf.mxu3  ;;  %v1224_v11 = vmul.f32 0.7978846, %v1159_v46  ;;  %v2617_v25 = vpack.c.bf16 %v2594_v31, %v2593_v5  ;;  %v1446_v33 = vmul.f32 %v1414_v44, %v1190_v3  ;;  %v7412_v45 = vpop.eup %7411  ;;  %v3615_v38 = vadd.f32 1.0, %v3583_v22 }
 0x2c6   :  { %v1570_v4 = vadd.f32 %v9518_v29, %v1569_v53  ;;  %v3420_v8 = vpop.f32.mrf.mxu0  ;;  %v1320_v49 = vadd.f32 1.0, %v1288_v59  ;;  %v2468_v10 = vadd.f32 1.0, %v2436_v51  ;;  %v9539_v24 = vmul.f32 0.5, %v9470_v20  ;;  %v3300_v20 = vld [vmem:[%s11890_s0 + $0x2c8] sm:$0xff] }
 0x2c7   :  { %v2702_v41 = vpop.f32.mrf.mxu2  ;;  %v2291_v32 = vpop.f32.mrf.mxu1  ;;  %v3421_v43 = vadd.f32 %v3420_v8, %v9247_v42  ;;  %v9542_v12 = vmul.f32 0.5, %v9496_v58  ;;  %v1463_v15 = vpack.c.bf16 %v1446_v33, %v1445_v19  ;;  %v3519_v40 = vmul.f32 0.7978846, %v9496_v58 }
 0x2c8   :  { %1634 = vst.msk [vmem:[%s11898_s9 + $0x58] sm:$0xff] %vm1622_vm1, %v1570_v4  ;;  %v2500_v47 = vmul.f32 %v2468_v10, %v2372_v2  ;;  %v2292_v52 = vadd.f32 %v9233_v1, %v2291_v32  ;;  %v9536_v34 = vadd.f32 %v9524_v61, %v2702_v41  ;;  %v1352_v17 = vmul.f32 %v1320_v49, %v1224_v11  ;;  %v7063_v10 = vld [vmem:[%s11894_s5 + $0x10] sm:$0xff] }
 0x2c9   :  { %2741 = vmatmul.bf16.gmra.mxu2 %v2617_v25  ;;  %v3708_v35 = vadd.f32 1.0, %v7410_v63  ;;  %v9551_v57 = vmul.f32 0.5, %v1159_v46  ;;  %v3552_v21 = vmul.f32 %v3421_v43, %v3421_v43  ;;  %v7414_v58 = vpop.eup %7413  ;;  %v2340_v27 = vmul.f32 0.5, %v2289_v16 }
 0x2ca   :  { %7415 = vtanh.f32 %v2500_v47  ;;  %v2405_v3 = vmul.f32 %v2292_v52, %v2292_v52  ;;  %v2846_v48 = vmul.f32 %v9536_v34, %v9536_v34  ;;  %v3647_v54 = vmul.f32 %v3615_v38, %v3519_v40  ;;  %4318 = vmatpush.bf16.msra.mxu2 %v7063_v10 }
 0x2cb   :  { %7417 = vtanh.f32 %v1351_v14  ;;  %v3709_v6 = vadd.f32 1.0, %v7412_v45  ;;  %v3319_v7 = vpack.c.bf16 %v3300_v20, %v3299_v30  ;;  %v2814_v46 = vmul.f32 0.7978846, %v9536_v34 }
 0x2cc   :  { %7419 = vtanh.f32 %v3646_v36  ;;  %1611 = vmatmul.bf16.gmra.mxu3 %v1463_v15  ;;  %v2878_v13 = vmul.f32 0.044715, %v2846_v48  ;;  %v2437_v0 = vmul.f32 0.044715, %v2405_v3  ;;  %v3740_v39 = vmul.f32 %v3708_v35, %v9447_v50 }
 0x2cd   :  { %v1572_v55 = vpop.f32.mrf.mxu3  ;;  %7421 = vtanh.f32 %v1352_v17  ;;  %v3741_v60 = vmul.f32 %v3709_v6, %v9493_v37  ;;  %v3584_v59 = vmul.f32 0.044715, %v3552_v21  ;;  %6779 = vmatmul.msk.bf16.gmra.mxu0 %vm101_vm0, %v3319_v7  ;;  %v9568_v50 = vmul.f32 0.5, %v3421_v43  ;;  %v7084_v17 = vld [vmem:[%s11892_s3 + $0x28] sm:$0xff] }
 0x2ce   :  { %v3422_v9 = vpop.f32.mrf.mxu0  ;;  %v1573_v23 = vadd.f32 %v9518_v29, %v1572_v55  ;;  %v2910_v14 = vadd.f32 1.0, %v2878_v13  ;;  %v3520_v37 = vmul.f32 0.7978846, %v3421_v43  ;;  %v9573_v4 = vmul.f32 0.5, %v2292_v52  ;;  %5474 = vmatpush.bf16.msrb.mxu1 %v7084_v17 }
 0x2cf   :  { %v2704_v56 = vpop.f32.mrf.mxu2  ;;  %v2293_v16 = vpop.f32.mrf.mxu1  ;;  %v3423_v62 = vadd.f32 %v3422_v9, %v9247_v42  ;;  %v3770_v36 = vpack.c.bf16 %v3741_v60, %v3740_v39  ;;  %v2563_v49 = vadd.f32 1.0, %v7414_v58  ;;  %7423 = vtanh.f32 %v3647_v54 }
 0x2d0   :  { %1635 = vst.msk [vmem:[%s11898_s9 + $0x60] sm:$0xff] %vm1622_vm1, %v1573_v23  ;;  %v9565_v53 = vadd.f32 %v9524_v61, %v2704_v56  ;;  %v7416_v26 = vpop.eup %7415  ;;  %v9571_v51 = vadd.f32 %v9233_v1, %v2293_v16  ;;  %v2942_v8 = vmul.f32 %v2910_v14, %v2814_v46  ;;  %v2373_v31 = vmul.f32 0.7978846, %v2292_v52  ;;  %v7076_v52 = vld [vmem:[%s11896_s7 + $0x38] sm:$0xff] }
 0x2d1   :  { %v7418_v22 = vpop.eup %7417  ;;  %v2469_v44 = vadd.f32 1.0, %v2437_v0  ;;  %3870 = vmatmul.bf16.gmra.mxu1 %v3770_v36  ;;  %v3616_v41 = vadd.f32 1.0, %v3584_v59  ;;  %v3553_v25 = vmul.f32 %v3423_v62, %v3423_v62  ;;  %v2564_v33 = vadd.f32 1.0, %v7416_v26  ;;  %4774 = vmatpush.bf16.msra.mxu3 %v7076_v52 }
 0x2d2   :  { %v2847_v63 = vmul.f32 %v9565_v53, %v9565_v53  ;;  %v7420_v5 = vpop.eup %7419  ;;  %v2406_v2 = vmul.f32 %v9571_v51, %v9571_v51  ;;  %7425 = vtanh.f32 %v2942_v8  ;;  %v2815_v45 = vmul.f32 0.7978846, %v9565_v53 }
 0x2d3   :  { %v7422_v11 = vpop.eup %7421  ;;  %v2595_v40 = vmul.f32 %v2563_v49, %v9539_v24  ;;  %v2596_v3 = vmul.f32 %v2564_v33, %v2340_v27  ;;  %v1415_v35 = vadd.f32 1.0, %v7418_v22  ;;  %v2501_v30 = vmul.f32 %v2469_v44, %v2373_v31 }
 0x2d4   :  { %v2879_v32 = vmul.f32 0.044715, %v2847_v63  ;;  %v2438_v43 = vmul.f32 0.044715, %v2406_v2  ;;  %v3585_v48 = vmul.f32 0.044715, %v3553_v25  ;;  %v3648_v58 = vmul.f32 %v3616_v41, %v3520_v37 }
 0x2d5   :  { %v1574_v19 = vpop.f32.mrf.mxu3  ;;  %v1416_v21 = vadd.f32 1.0, %v7422_v11  ;;  %v2374_v54 = vmul.f32 0.7978846, %v9571_v51  ;;  %v2618_v24 = vpack.c.bf16 %v2596_v3, %v2595_v40  ;;  %v7424_v27 = vpop.eup %7423  ;;  %v2782_v46 = vmul.f32 0.5, %v9536_v34  ;;  %v3301_v34 = vld [vmem:[%s11890_s0 + $0x2d0] sm:$0xff] }
 0x2d6   :  { %v1575_v47 = vadd.f32 %v9518_v29, %v1574_v19  ;;  %v3425_v38 = vpop.f32.mrf.mxu0  ;;  %v2911_v15 = vadd.f32 1.0, %v2879_v32  ;;  %v2470_v20 = vadd.f32 1.0, %v2438_v43  ;;  %v1447_v60 = vmul.f32 %v1415_v35, %v9513_v28  ;;  %v3302_v28 = vld [vmem:[%s11890_s0 + $0x2d8] sm:$0xff] }
 0x2d7   :  { %v2707_v55 = vpop.f32.mrf.mxu2  ;;  %v2296_v9 = vpop.f32.mrf.mxu1  ;;  %v1448_v23 = vmul.f32 %v1416_v21, %v9551_v57  ;;  %v3426_v0 = vadd.f32 %v3425_v38, %v9247_v42  ;;  %v9602_v14 = vmul.f32 0.5, %v3423_v62  ;;  %v3521_v59 = vmul.f32 0.7978846, %v3423_v62  ;;  %v9628_v38 = vld [vmem:[%s11893_s4] ss:$0 sm:$0xff] }
 0x2d8   :  { %1636 = vst.msk [vmem:[%s11898_s9 + $0x68] sm:$0xff] %vm1622_vm1, %v1575_v47  ;;  %v2943_v6 = vmul.f32 %v2911_v15, %v2815_v45  ;;  %v2297_v13 = vadd.f32 %v9233_v1, %v2296_v9  ;;  %v2708_v7 = vadd.f32 %v9524_v61, %v2707_v55  ;;  %v2502_v39 = vmul.f32 %v2470_v20, %v2374_v54  ;;  %v7426_v56 = vpop.eup %7425 }
 0x2d9   :  { %v3617_v16 = vadd.f32 1.0, %v3585_v48  ;;  %2746 = vmatmul.bf16.gmra.mxu2 %v2618_v24  ;;  %v2783_v1 = vmul.f32 0.5, %v9565_v53  ;;  %v1464_v26 = vpack.c.bf16 %v1448_v23, %v1447_v60  ;;  %v3710_v37 = vadd.f32 1.0, %v7420_v5 }
 0x2da   :  { %7427 = vtanh.f32 %v2943_v6  ;;  %v2407_v57 = vmul.f32 %v2297_v13, %v2297_v13  ;;  %v9612_v22 = vmul.f32 0.5, %v9571_v51  ;;  %v2848_v62 = vmul.f32 %v2708_v7, %v2708_v7 }
 0x2db   :  { %7429 = vtanh.f32 %v2501_v30  ;;  %v3554_v8 = vmul.f32 %v3426_v0, %v3426_v0  ;;  %v3711_v49 = vadd.f32 1.0, %v7424_v27  ;;  %v3006_v31 = vadd.f32 1.0, %v7426_v56 }
 0x2dc   :  { %7431 = vtanh.f32 %v3648_v58  ;;  %v2439_v53 = vmul.f32 0.044715, %v2407_v57  ;;  %1616 = vmatmul.bf16.gmra.mxu3 %v1464_v26  ;;  %v3649_v44 = vmul.f32 %v3617_v16, %v3521_v59  ;;  %v9615_v2 = vmul.f32 0.5, %v3426_v0 }
 0x2dd   :  { %v1577_v36 = vpop.f32.mrf.mxu3  ;;  %7433 = vtanh.f32 %v2502_v39  ;;  %v3320_v10 = vpack.c.bf16 %v3302_v28, %v3301_v34  ;;  %v2880_v32 = vmul.f32 0.044715, %v2848_v62  ;;  %v3742_v51 = vmul.f32 %v3710_v37, %v9503_v18 }
 0x2de   :  { %v3427_v63 = vpop.f32.mrf.mxu0  ;;  %v1578_v5 = vadd.f32 %v9518_v29, %v1577_v36  ;;  %v3743_v25 = vmul.f32 %v3711_v49, %v9542_v12  ;;  %v2471_v45 = vadd.f32 1.0, %v2439_v53  ;;  %v3586_v47 = vmul.f32 0.044715, %v3554_v8 }
 0x2df   :  { %v2709_v11 = vpop.f32.mrf.mxu2  ;;  %v2298_v19 = vpop.f32.mrf.mxu1  ;;  %6780 = vmatmul.msk.bf16.gmra.mxu0 %vm101_vm0, %v3320_v10  ;;  %v9632_v12 = vadd.f32 %v3427_v63, %v9247_v42  ;;  %v9634_v17 = vmul.f32 0.5, %v2297_v13  ;;  %v3522_v15 = vmul.f32 0.7978846, %v3426_v0  ;;  %v3038_v35 = vmul.f32 %v3006_v31, %v2782_v46 }
 0x2e0   :  { %v7428_v41 = vpop.eup %7427  ;;  %1637 = vst.msk [vmem:[%s11898_s9 + $0x70] sm:$0xff] %vm1622_vm1, %v1578_v5  ;;  %v2710_v33 = vadd.f32 %v9524_v61, %v2709_v11  ;;  %v2299_v18 = vadd.f32 %v9628_v38, %v2298_v19  ;;  %v3771_v40 = vpack.c.bf16 %v3743_v25, %v3742_v51  ;;  %7435 = vtanh.f32 %v3649_v44  ;;  %v3303_v19 = vld [vmem:[%s11890_s0 + $0x2e0] sm:$0xff] }
 0x2e1   :  { %v7430_v43 = vpop.eup %7429  ;;  %v3007_v52 = vadd.f32 1.0, %v7428_v41  ;;  %v2375_v30 = vmul.f32 0.7978846, %v2297_v13  ;;  %v9636_v20 = vmul.f32 0.5, %v2708_v7  ;;  %v2816_v21 = vmul.f32 0.7978846, %v2708_v7 }
 0x2e2   :  { %v7432_v3 = vpop.eup %7431  ;;  %3875 = vmatmul.bf16.gmra.mxu1 %v3771_v40  ;;  %v2408_v55 = vmul.f32 %v2299_v18, %v2299_v18  ;;  %v2849_v58 = vmul.f32 %v2710_v33, %v2710_v33  ;;  %v2565_v6 = vadd.f32 1.0, %v7430_v43  ;;  %v2912_v24 = vadd.f32 1.0, %v2880_v32 }
 0x2e3   :  { %v7434_v48 = vpop.eup %7433  ;;  %v2503_v9 = vmul.f32 %v2471_v45, %v2375_v30  ;;  %v3618_v27 = vadd.f32 1.0, %v3586_v47  ;;  %v3555_v23 = vmul.f32 %v9632_v12, %v9632_v12  ;;  %v3039_v39 = vmul.f32 %v3007_v52, %v2783_v1 }
 0x2e4   :  { %v2440_v46 = vmul.f32 0.044715, %v2408_v55  ;;  %v2881_v60 = vmul.f32 0.044715, %v2849_v58  ;;  %v9641_v56 = vmul.f32 0.5, %v2710_v33  ;;  %v2566_v16 = vadd.f32 1.0, %v7434_v48 }
 0x2e5   :  { %v1579_v54 = vpop.f32.mrf.mxu3  ;;  %v2817_v7 = vmul.f32 0.7978846, %v2710_v33  ;;  %v3587_v59 = vmul.f32 0.044715, %v3555_v23  ;;  %v2376_v26 = vmul.f32 0.7978846, %v2299_v18  ;;  %v2944_v62 = vmul.f32 %v2912_v24, %v2816_v21 }
 0x2e6   :  { %v3430_v0 = vpop.f32.mrf.mxu0  ;;  %v1580_v13 = vadd.f32 %v9518_v29, %v1579_v54  ;;  %v2472_v37 = vadd.f32 1.0, %v2440_v46  ;;  %v2913_v36 = vadd.f32 1.0, %v2881_v60  ;;  %v7436_v28 = vpop.eup %7435  ;;  %v2598_v63 = vmul.f32 %v2566_v16, %v9612_v22  ;;  %v3304_v22 = vld [vmem:[%s11890_s0 + $0x2e8] sm:$0xff] }
 0x2e7   :  { %v2712_v57 = vpop.f32.mrf.mxu2  ;;  %v2301_v34 = vpop.f32.mrf.mxu1  ;;  %v3431_v53 = vadd.f32 %v3430_v0, %v9247_v42  ;;  %v2597_v31 = vmul.f32 %v2565_v6, %v9573_v4  ;;  %v3070_v44 = vpack.c.bf16 %v3039_v39, %v3038_v35  ;;  %7437 = vtanh.f32 %v2503_v9 }
 0x2e8   :  { %1638 = vst.msk [vmem:[%s11898_s9 + $0x78] sm:$0xff] %vm1622_vm1, %v1580_v13  ;;  %v2713_v1 = vadd.f32 %v9524_v61, %v2712_v57  ;;  %v2302_v8 = vadd.f32 %v9628_v38, %v2301_v34  ;;  %v2504_v49 = vmul.f32 %v2472_v37, %v2376_v26  ;;  %v2945_v5 = vmul.f32 %v2913_v36, %v2817_v7  ;;  %v7062_v36 = vld [vmem:[%s11894_s5 + $0x8] sm:$0xff] }
 0x2e9   :  { %v3650_v10 = vmul.f32 %v3618_v27, %v3522_v15  ;;  %v3619_v11 = vadd.f32 1.0, %v3587_v59  ;;  %v2619_v32 = vpack.c.bf16 %v2598_v63, %v2597_v31  ;;  %v3712_v25 = vadd.f32 1.0, %v7432_v3  ;;  %4319 = vmatpush.bf16.msra.mxu2 %v7062_v36 }
 0x2ea   :  { %v2409_v41 = vmul.f32 %v2302_v8, %v2302_v8  ;;  %7439 = vtanh.f32 %v2504_v49  ;;  %v2850_v51 = vmul.f32 %v2713_v1, %v2713_v1  ;;  %v2344_v33 = vmul.f32 0.5, %v2299_v18 }
 0x2eb   :  { %7441 = vtanh.f32 %v2944_v62  ;;  %v3556_v43 = vmul.f32 %v3431_v53, %v3431_v53  ;;  %v3523_v52 = vmul.f32 0.7978846, %v9632_v12  ;;  %2751 = vmatmul.bf16.gmra.mxu2 %v2619_v32  ;;  %v3713_v40 = vadd.f32 1.0, %v7436_v28 }
 0x2ec   :  { %v2441_v4 = vmul.f32 0.044715, %v2409_v41  ;;  %7443 = vtanh.f32 %v2945_v5  ;;  %v2882_v15 = vmul.f32 0.044715, %v2850_v51  ;;  %3162 = vmatmul.bf16.vlgmr.msrb.gmra.mxu3 %v3070_v44  ;;  %v9660_v3 = vmul.f32 0.5, %v9632_v12 }
 0x2ed   :  { %v1582_v45 = vpop.f32.mrf.mxu3  ;;  %7445 = vtanh.f32 %v3650_v10  ;;  %v3321_v30 = vpack.c.bf16 %v3304_v22, %v3303_v19  ;;  %v3651_v18 = vmul.f32 %v3619_v11, %v3523_v52  ;;  %v3744_v21 = vmul.f32 %v3712_v25, %v9568_v50  ;;  %v7438_v6 = vpop.eup %7437  ;;  %v7075_v10 = vld [vmem:[%s11896_s7 + $0x30] sm:$0xff]  ;;  %v7083_v11 = vld [vmem:[%s11892_s3 + $0x20] sm:$0xff] }
 0x2ee   :  { %v3432_v47 = vpop.f32.mrf.mxu0  ;;  %v1583_v35 = vadd.f32 %v9518_v29, %v1582_v45  ;;  %v3745_v55 = vmul.f32 %v3713_v40, %v9602_v14  ;;  %v2473_v9 = vadd.f32 1.0, %v2441_v4  ;;  %v3588_v24 = vmul.f32 0.044715, %v3556_v43  ;;  %4775 = vmatpush.bf16.msra.mxu3 %v7075_v10  ;;  %5475 = vmatpush.bf16.msrb.mxu1 %v7083_v11 }
 0x2ef   :  { %v2714_v48 = vpop.f32.mrf.mxu2  ;;  %v2303_v58 = vpop.f32.mrf.mxu1  ;;  %6781 = vmatmul.msk.bf16.gmra.mxu0 %vm101_vm0, %v3321_v30  ;;  %v9675_v50 = vadd.f32 %v3432_v47, %v9247_v42  ;;  %v9677_v27 = vmul.f32 0.5, %v2713_v1  ;;  %v2818_v23 = vmul.f32 0.7978846, %v2713_v1  ;;  %v2914_v0 = vadd.f32 1.0, %v2882_v15 }
 0x2f0   :  { %v2715_v54 = vadd.f32 %v9524_v61, %v2714_v48  ;;  %1639 = vst.msk [vmem:[%s11898_s9 + $0x80] sm:$0xff] %vm1622_vm1, %v1583_v35  ;;  %v9672_v12 = vadd.f32 %v9628_v38, %v2303_v58  ;;  %v7440_v14 = vpop.eup %7439  ;;  %v3772_v39 = vpack.c.bf16 %v3745_v55, %v3744_v21  ;;  %v9679_v60 = vmul.f32 0.5, %v2302_v8 }
 0x2f1   :  { %v7442_v46 = vpop.eup %7441  ;;  %v2377_v13 = vmul.f32 0.7978846, %v2302_v8  ;;  %v9681_v7 = vmul.f32 0.5, %v3431_v53  ;;  %v3524_v59 = vmul.f32 0.7978846, %v3431_v53  ;;  %7447 = vtanh.f32 %v3651_v18 }
 0x2f2   :  { %v7444_v16 = vpop.eup %7443  ;;  %3880 = vmatmul.bf16.gmra.mxu1 %v3772_v39  ;;  %v2410_v57 = vmul.f32 %v9672_v12, %v9672_v12  ;;  %v2851_v26 = vmul.f32 %v2715_v54, %v2715_v54  ;;  %v2567_v37 = vadd.f32 1.0, %v7438_v6  ;;  %v3620_v28 = vadd.f32 1.0, %v3588_v24 }
 0x2f3   :  { %v7446_v34 = vpop.eup %7445  ;;  %v2505_v1 = vmul.f32 %v2473_v9, %v2377_v13  ;;  %v3557_v62 = vmul.f32 %v9675_v50, %v9675_v50  ;;  %v2568_v63 = vadd.f32 1.0, %v7440_v14  ;;  %v2946_v49 = vmul.f32 %v2914_v0, %v2818_v23 }
 0x2f4   :  { %v2442_v5 = vmul.f32 0.044715, %v2410_v57  ;;  %v2883_v31 = vmul.f32 0.044715, %v2851_v26  ;;  %v3008_v51 = vadd.f32 1.0, %v7442_v46  ;;  %v3009_v25 = vadd.f32 1.0, %v7444_v16 }
 0x2f5   :  { %v1584_v8 = vpop.f32.mrf.mxu3  ;;  %v3589_v41 = vmul.f32 0.044715, %v3557_v62  ;;  %v2600_v32 = vmul.f32 %v2568_v63, %v2344_v33  ;;  %v2378_v19 = vmul.f32 0.7978846, %v9672_v12  ;;  %v2599_v45 = vmul.f32 %v2567_v37, %v9634_v17 }
 0x2f6   :  { %v3435_v53 = vpop.f32.mrf.mxu0  ;;  %v1585_v44 = vadd.f32 %v9518_v29, %v1584_v8  ;;  %v2474_v22 = vadd.f32 1.0, %v2442_v5  ;;  %v2915_v4 = vadd.f32 1.0, %v2883_v31  ;;  %v9703_v52 = vmul.f32 0.5, %v2715_v54 }
 0x2f7   :  { %v2306_v43 = vpop.f32.mrf.mxu1  ;;  %v2717_v47 = vpop.f32.mrf.mxu2  ;;  %v2819_v33 = vmul.f32 0.7978846, %v2715_v54  ;;  %v3621_v48 = vadd.f32 1.0, %v3589_v41  ;;  %v2620_v18 = vpack.c.bf16 %v2600_v32, %v2599_v45  ;;  %v3041_v21 = vmul.f32 %v3009_v25, %v9641_v56  ;;  %v3305_v56 = vld [vmem:[%s11890_s0 + $0x2f0] sm:$0xff] }
 0x2f8   :  { %1640 = vst.msk [vmem:[%s11898_s9 + $0x88] sm:$0xff] %vm1622_vm1, %v1585_v44  ;;  %v2307_v15 = vadd.f32 %v9628_v38, %v2306_v43  ;;  %v2718_v40 = vadd.f32 %v9524_v61, %v2717_v47  ;;  %v7448_v35 = vpop.eup %7447  ;;  %v2506_v30 = vmul.f32 %v2474_v22, %v2378_v19  ;;  %v3040_v17 = vmul.f32 %v3008_v51, %v9636_v20  ;;  %v3306_v20 = vld [vmem:[%s11890_s0 + $0x2f8] sm:$0xff] }
 0x2f9   :  { %v2947_v55 = vmul.f32 %v2915_v4, %v2819_v33  ;;  %v9710_v6 = vadd.f32 %v3435_v53, %v9247_v42  ;;  %7449 = vtanh.f32 %v2505_v1  ;;  %v3525_v54 = vmul.f32 0.7978846, %v9675_v50 }
 0x2fa   :  { %v2411_v58 = vmul.f32 %v2307_v15, %v2307_v15  ;;  %v2852_v9 = vmul.f32 %v2718_v40, %v2718_v40  ;;  %v3714_v24 = vadd.f32 1.0, %v7446_v34  ;;  %v3652_v14 = vmul.f32 %v3620_v28, %v3524_v59 }
 0x2fb   :  { %7451 = vtanh.f32 %v2506_v30  ;;  %v3071_v0 = vpack.c.bf16 %v3041_v21, %v3040_v17  ;;  %v2346_v13 = vmul.f32 0.5, %v9672_v12  ;;  %v3653_v16 = vmul.f32 %v3621_v48, %v3525_v54  ;;  %2756 = vmatmul.bf16.gmra.mxu2 %v2620_v18 }
 0x2fc   :  { %v2443_v23 = vmul.f32 0.044715, %v2411_v58  ;;  %7453 = vtanh.f32 %v2946_v49  ;;  %v2884_v57 = vmul.f32 0.044715, %v2852_v9  ;;  %v3558_v59 = vmul.f32 %v9710_v6, %v9710_v6 }
 0x2fd   :  { %v1587_v39 = vpop.f32.mrf.mxu3  ;;  %7455 = vtanh.f32 %v2947_v55  ;;  %3167 = vmatmul.bf16.gmra.mxu3 %v3071_v0  ;;  %v3715_v26 = vadd.f32 1.0, %v7448_v35  ;;  %v3746_v1 = vmul.f32 %v3714_v24, %v9615_v2  ;;  %v3322_v28 = vpack.c.bf16 %v3306_v20, %v3305_v56 }
 0x2fe   :  { %v3437_v46 = vpop.f32.mrf.mxu0  ;;  %v1588_v37 = vadd.f32 %v9518_v29, %v1587_v39  ;;  %v2475_v36 = vadd.f32 1.0, %v2443_v23  ;;  %v2916_v34 = vadd.f32 1.0, %v2884_v57  ;;  %7457 = vtanh.f32 %v3652_v14 }
 0x2ff   :  { %v2308_v62 = vpop.f32.mrf.mxu1  ;;  %v2719_v8 = vpop.f32.mrf.mxu2  ;;  %v3747_v12 = vmul.f32 %v3715_v26, %v9660_v3  ;;  %v3438_v49 = vadd.f32 %v3437_v46, %v9247_v42  ;;  %v9735_v2 = vmul.f32 0.5, %v9675_v50  ;;  %v9737_v31 = vmul.f32 0.5, %v2307_v15  ;;  %6782 = vmatmul.msk.bf16.gmra.mxu0 %vm101_vm0, %v3322_v28 }
 0x300   :  { %1641 = vst.msk [vmem:[%s11898_s9 + $0x90] sm:$0xff] %vm1622_vm1, %v1588_v37  ;;  %v2309_v63 = vadd.f32 %v9628_v38, %v2308_v62  ;;  %v9731_v53 = vadd.f32 %v9524_v61, %v2719_v8  ;;  %v7450_v5 = vpop.eup %7449  ;;  %v2379_v3 = vmul.f32 0.7978846, %v2307_v15  ;;  %v9740_v10 = vmul.f32 0.5, %v2718_v40 }
 0x301   :  { %v7452_v44 = vpop.eup %7451  ;;  %v2820_v11 = vmul.f32 0.7978846, %v2718_v40  ;;  %v3590_v41 = vmul.f32 0.044715, %v3558_v59  ;;  %v3773_v32 = vpack.c.bf16 %v3747_v12, %v3746_v1  ;;  %7459 = vtanh.f32 %v3653_v16 }
 0x302   :  { %v7454_v51 = vpop.eup %7453  ;;  %v2507_v25 = vmul.f32 %v2475_v36, %v2379_v3  ;;  %v9743_v19 = vmul.f32 0.5, %v9710_v6  ;;  %v2412_v22 = vmul.f32 %v2309_v63, %v2309_v63  ;;  %v2853_v43 = vmul.f32 %v9731_v53, %v9731_v53 }
 0x303   :  { %v7456_v50 = vpop.eup %7455  ;;  %v2948_v4 = vmul.f32 %v2916_v34, %v2820_v11  ;;  %3885 = vmatmul.bf16.gmra.mxu1 %v3773_v32  ;;  %v3559_v45 = vmul.f32 %v3438_v49, %v3438_v49  ;;  %v2569_v33 = vadd.f32 1.0, %v7450_v5  ;;  %v2380_v40 = vmul.f32 0.7978846, %v2309_v63 }
 0x304   :  { %v2444_v35 = vmul.f32 0.044715, %v2412_v22  ;;  %v2570_v48 = vadd.f32 1.0, %v7452_v44  ;;  %v3622_v18 = vadd.f32 1.0, %v3590_v41  ;;  %v2885_v21 = vmul.f32 0.044715, %v2853_v43  ;;  %v7458_v17 = vpop.eup %7457 }
 0x305   :  { %v1589_v47 = vpop.f32.mrf.mxu3  ;;  %v3591_v55 = vmul.f32 0.044715, %v3559_v45  ;;  %v3010_v58 = vadd.f32 1.0, %v7454_v51  ;;  %v2601_v24 = vmul.f32 %v2569_v33, %v9679_v60  ;;  %v3011_v23 = vadd.f32 1.0, %v7456_v50 }
 0x306   :  { %v3440_v15 = vpop.f32.mrf.mxu0  ;;  %v1590_v30 = vadd.f32 %v9518_v29, %v1589_v47  ;;  %v2476_v54 = vadd.f32 1.0, %v2444_v35  ;;  %v2602_v14 = vmul.f32 %v2570_v48, %v2346_v13  ;;  %v2821_v0 = vmul.f32 0.7978846, %v9731_v53 }
 0x307   :  { %v2311_v9 = vpop.f32.mrf.mxu1  ;;  %v2917_v39 = vadd.f32 1.0, %v2885_v21  ;;  %v2722_v20 = vpop.f32.mrf.mxu2  ;;  %v9756_v46 = vadd.f32 %v3440_v15, %v9247_v42  ;;  %v3043_v37 = vmul.f32 %v3011_v23, %v9703_v52  ;;  %v3526_v60 = vmul.f32 0.7978846, %v9710_v6  ;;  %v4895_v52 = vld [vmem:[%s11890_s0 + $0x300] sm:$0xff]  ;;  %v4896_v6 = vld [vmem:[%s11890_s0 + $0x308] sm:$0xff] }
 0x308   :  { %1642 = vst.msk [vmem:[%s11898_s9 + $0x98] sm:$0xff] %vm1622_vm1, %v1590_v30  ;;  %v2312_v56 = vadd.f32 %v9628_v38, %v2311_v9  ;;  %v7460_v16 = vpop.eup %7459  ;;  %v2508_v57 = vmul.f32 %v2476_v54, %v2380_v40  ;;  %v2621_v59 = vpack.c.bf16 %v2602_v14, %v2601_v24  ;;  %v2723_v26 = vadd.f32 %v9524_v61, %v2722_v20 }
 0x309   :  { %v2949_v13 = vmul.f32 %v2917_v39, %v2821_v0  ;;  %v9761_v36 = vmul.f32 0.5, %v3438_v49  ;;  %v3042_v34 = vmul.f32 %v3010_v58, %v9677_v27  ;;  %7461 = vtanh.f32 %v2507_v25 }
 0x30a   :  { %v3527_v1 = vmul.f32 0.7978846, %v3438_v49  ;;  %v3623_v28 = vadd.f32 1.0, %v3591_v55  ;;  %v2413_v62 = vmul.f32 %v2312_v56, %v2312_v56  ;;  %7463 = vtanh.f32 %v2948_v4 }
 0x30b   :  { %v9764_v8 = vmul.f32 0.5, %v2309_v63  ;;  %v2854_v12 = vmul.f32 %v2723_v26, %v2723_v26  ;;  %v3072_v5 = vpack.c.bf16 %v3043_v37, %v3042_v34  ;;  %v3654_v27 = vmul.f32 %v3622_v18, %v3526_v60  ;;  %2761 = vmatmul.bf16.gmra.mxu2 %v2621_v59 }
 0x30c   :  { %7465 = vtanh.f32 %v2508_v57  ;;  %v2445_v49 = vmul.f32 0.044715, %v2413_v62  ;;  %v3560_v63 = vmul.f32 %v9756_v46, %v9756_v46  ;;  %v3716_v11 = vadd.f32 1.0, %v7458_v17 }
 0x30d   :  { %v1592_v3 = vpop.f32.mrf.mxu3  ;;  %7467 = vtanh.f32 %v2949_v13  ;;  %3172 = vmatmul.bf16.gmra.mxu3 %v3072_v5  ;;  %v3717_v41 = vadd.f32 1.0, %v7460_v16  ;;  %v3655_v51 = vmul.f32 %v3623_v28, %v3527_v1  ;;  %v2886_v22 = vmul.f32 0.044715, %v2854_v12 }
 0x30e   :  { %v3442_v44 = vpop.f32.mrf.mxu0  ;;  %v1593_v32 = vadd.f32 %v9518_v29, %v1592_v3  ;;  %v2477_v25 = vadd.f32 1.0, %v2445_v49  ;;  %v4927_v50 = vpack.c.bf16 %v4896_v6, %v4895_v52  ;;  %v3592_v43 = vmul.f32 0.044715, %v3560_v63 }
 0x30f   :  { %v2313_v4 = vpop.f32.mrf.mxu1  ;;  %v3748_v45 = vmul.f32 %v3716_v11, %v9681_v7  ;;  %v3749_v47 = vmul.f32 %v3717_v41, %v9735_v2  ;;  %v2724_v15 = vpop.f32.mrf.mxu2  ;;  %v2789_v35 = vmul.f32 0.5, %v9731_v53  ;;  %v2381_v30 = vmul.f32 0.7978846, %v2312_v56 }
 0x310   :  { %1643 = vst.msk [vmem:[%s11898_s9 + $0xa0] sm:$0xff] %vm1622_vm1, %v1593_v32  ;;  %v9782_v33 = vadd.f32 %v9628_v38, %v2313_v4  ;;  %v7462_v40 = vpop.eup %7461  ;;  %6887 = vmatmul.msk.bf16.vlgmr.msrb.gmra.mxu0 %vm101_vm0, %v4927_v50  ;;  %v9787_v48 = vadd.f32 %v9524_v61, %v2724_v15  ;;  %v3443_v7 = vadd.f32 %v3442_v44, %v9247_v42  ;;  %7469 = vtanh.f32 %v3654_v27 }
 0x311   :  { %v7464_v2 = vpop.eup %7463  ;;  %v9790_v18 = vmul.f32 0.5, %v2312_v56  ;;  %v9792_v21 = vmul.f32 0.5, %v2723_v26  ;;  %v3774_v55 = vpack.c.bf16 %v3749_v47, %v3748_v45  ;;  %v2509_v17 = vmul.f32 %v2477_v25, %v2381_v30  ;;  %v4897_v47 = vld [vmem:[%s11890_s0 + $0x310] sm:$0xff] }
 0x312   :  { %v7466_v58 = vpop.eup %7465  ;;  %v2822_v54 = vmul.f32 0.7978846, %v2723_v26  ;;  %v9795_v53 = vmul.f32 0.5, %v9756_v46  ;;  %v2414_v9 = vmul.f32 %v9782_v33, %v9782_v33  ;;  %7471 = vtanh.f32 %v3655_v51 }
 0x313   :  { %v7468_v24 = vpop.eup %7467  ;;  %v2918_v14 = vadd.f32 1.0, %v2886_v22  ;;  %v3624_v23 = vadd.f32 1.0, %v3592_v43  ;;  %3890 = vmatmul.bf16.gmra.mxu1 %v3774_v55  ;;  %v2855_v0 = vmul.f32 %v9787_v48, %v9787_v48  ;;  %v2382_v20 = vmul.f32 0.7978846, %v9782_v33  ;;  %v7082_v55 = vld [vmem:[%s11892_s3 + $0x18] sm:$0xff] }
 0x314   :  { %v2446_v16 = vmul.f32 0.044715, %v2414_v9  ;;  %v3561_v57 = vmul.f32 %v3443_v7, %v3443_v7  ;;  %v2571_v37 = vadd.f32 1.0, %v7462_v40  ;;  %v2572_v60 = vadd.f32 1.0, %v7466_v58  ;;  %5476 = vmatpush.bf16.msrb.mxu1 %v7082_v55 }
 0x315   :  { %v1594_v39 = vpop.f32.mrf.mxu3  ;;  %v2887_v26 = vmul.f32 0.044715, %v2855_v0  ;;  %v3012_v13 = vadd.f32 1.0, %v7464_v2  ;;  %7473 = vtanh.f32 %v2509_v17  ;;  %v3013_v28 = vadd.f32 1.0, %v7468_v24  ;;  %v7074_v2 = vld [vmem:[%s11896_s7 + $0x28] sm:$0xff] }
 0x316   :  { %v3445_v56 = vpop.f32.mrf.mxu0  ;;  %v1595_v59 = vadd.f32 %v9518_v29, %v1594_v39  ;;  %v2478_v34 = vadd.f32 1.0, %v2446_v16  ;;  %v3593_v1 = vmul.f32 0.044715, %v3561_v57  ;;  %v7470_v62 = vpop.eup %7469  ;;  %v2823_v12 = vmul.f32 0.7978846, %v9787_v48  ;;  %4776 = vmatpush.bf16.msra.mxu3 %v7074_v2 }
 0x317   :  { %v2919_v5 = vadd.f32 1.0, %v2887_v26  ;;  %v2316_v3 = vpop.f32.mrf.mxu1  ;;  %v2603_v29 = vmul.f32 %v2571_v37, %v9737_v31  ;;  %v2604_v52 = vmul.f32 %v2572_v60, %v9764_v8  ;;  %v3045_v27 = vmul.f32 %v3013_v28, %v2789_v35 }
 0x318   :  { %1644 = vst.msk [vmem:[%s11898_s9 + $0xa8] sm:$0xff] %vm1622_vm1, %v1595_v59  ;;  %v2510_v6 = vmul.f32 %v2478_v34, %v2382_v20  ;;  %v9811_v44 = vadd.f32 %v9628_v38, %v2316_v3  ;;  %v9814_v49 = vadd.f32 %v3445_v56, %v9247_v42  ;;  %v7472_v63 = vpop.eup %7471  ;;  %v2950_v11 = vmul.f32 %v2918_v14, %v2822_v54  ;;  %v9876_v3 = vld [vmem:[%s11895_s6] ss:$0 sm:$0xff] }
 0x319   :  { %v3625_v41 = vadd.f32 1.0, %v3593_v1  ;;  %v2622_v32 = vpack.c.bf16 %v2604_v52, %v2603_v29  ;;  %v2727_v51 = vpop.f32.mrf.mxu2  ;;  %v3044_v25 = vmul.f32 %v3012_v13, %v9740_v10  ;;  %v3528_v22 = vmul.f32 0.7978846, %v9756_v46  ;;  %v4898_v10 = vld [vmem:[%s11890_s0 + $0x318] sm:$0xff] }
 0x31a   :  { %v2951_v31 = vmul.f32 %v2919_v5, %v2823_v12  ;;  %v9818_v50 = vmul.f32 0.5, %v3443_v7  ;;  %v3529_v8 = vmul.f32 0.7978846, %v3443_v7  ;;  %7475 = vtanh.f32 %v2510_v6 }
 0x31b   :  { %v2415_v4 = vmul.f32 %v9811_v44, %v9811_v44  ;;  %v9823_v43 = vadd.f32 %v9524_v61, %v2727_v51  ;;  %v3073_v45 = vpack.c.bf16 %v3045_v27, %v3044_v25  ;;  %v7474_v15 = vpop.eup %7473  ;;  %v3656_v40 = vmul.f32 %v3624_v23, %v3528_v22  ;;  %2766 = vmatmul.bf16.gmra.mxu2 %v2622_v32  ;;  %v7061_v61 = vld [vmem:[%s11894_s5] sm:$0xff] }
 0x31c   :  { %v3562_v35 = vmul.f32 %v9814_v49, %v9814_v49  ;;  %v3718_v30 = vadd.f32 1.0, %v7470_v62  ;;  %v3719_v7 = vadd.f32 1.0, %v7472_v63  ;;  %7477 = vtanh.f32 %v2950_v11  ;;  %4320 = vmatpush.bf16.msra.mxu2 %v7061_v61 }
 0x31d   :  { %v3657_v58 = vmul.f32 %v3625_v41, %v3529_v8  ;;  %v2447_v17 = vmul.f32 0.044715, %v2415_v4  ;;  %v2856_v54 = vmul.f32 %v9823_v43, %v9823_v43  ;;  %3177 = vmatmul.bf16.gmra.mxu3 %v3073_v45  ;;  %7479 = vtanh.f32 %v2951_v31 }
 0x31e   :  { %v3447_v46 = vpop.f32.mrf.mxu0  ;;  %v3750_v9 = vmul.f32 %v3718_v30, %v9743_v19  ;;  %v3751_v24 = vmul.f32 %v3719_v7, %v9761_v36  ;;  %v4928_v14 = vpack.c.bf16 %v4898_v10, %v4897_v47  ;;  %v2350_v23 = vmul.f32 0.5, %v9782_v33  ;;  %v9853_v19 = vld [vmem:[%s11897_s8] ss:$0 sm:$0xff] }
 0x31f   :  { %v2888_v0 = vmul.f32 0.044715, %v2856_v54  ;;  %v3594_v39 = vmul.f32 0.044715, %v3562_v35  ;;  %v1597_v56 = vpop.f32.mrf.mxu3  ;;  %v2318_v20 = vpop.f32.mrf.mxu1  ;;  %v9848_v16 = vadd.f32 %v3447_v46, %v9247_v42  ;;  %v2479_v57 = vadd.f32 1.0, %v2447_v17 }
 0x320   :  { %v3775_v59 = vpack.c.bf16 %v3751_v24, %v3750_v9  ;;  %v1598_v36 = vadd.f32 %v9853_v19, %v1597_v56  ;;  %6888 = vmatmul.msk.bf16.gmra.mxu0 %vm101_vm0, %v4928_v14  ;;  %v9858_v33 = vadd.f32 %v9628_v38, %v2318_v20  ;;  %v7476_v26 = vpop.eup %7475  ;;  %7481 = vtanh.f32 %v3656_v40 }
 0x321   :  { %v2791_v37 = vmul.f32 0.5, %v9787_v48  ;;  %v2920_v60 = vadd.f32 1.0, %v2888_v0  ;;  %v2729_v13 = vpop.f32.mrf.mxu2  ;;  %v2573_v34 = vadd.f32 1.0, %v7474_v15  ;;  %7483 = vtanh.f32 %v3657_v58  ;;  %v3800_v48 = vld [vmem:[%s11893_s4] sm:$0x1] }
 0x322   :  { %v2383_v1 = vmul.f32 0.7978846, %v9811_v44  ;;  %v3530_v28 = vmul.f32 0.7978846, %v9814_v49  ;;  %1645 = vst.msk [vmem:[%s11898_s9 + $0xb0] sm:$0xff] %vm1622_vm1, %v1598_v36  ;;  %v2416_v38 = vmul.f32 %v9858_v33, %v9858_v33  ;;  %v7478_v62 = vpop.eup %7477  ;;  %v3626_v5 = vadd.f32 1.0, %v3594_v39 }
 0x323   :  { %v2824_v12 = vmul.f32 0.7978846, %v9823_v43  ;;  %3895 = vmatmul.bf16.gmra.mxu1 %v3775_v59  ;;  %v9879_v29 = vadd.f32 %v9876_v3, %v2729_v13  ;;  %v3563_v52 = vmul.f32 %v9848_v16, %v9848_v16  ;;  %v7480_v27 = vpop.eup %7479  ;;  %v3531_v41 = vmul.f32 0.7978846, %v9848_v16 }
 0x324   :  { %v2511_v63 = vmul.f32 %v2479_v57, %v2383_v1  ;;  %v2448_v11 = vmul.f32 0.044715, %v2416_v38  ;;  %v2574_v32 = vadd.f32 1.0, %v7476_v26  ;;  %v2384_v25 = vmul.f32 0.7978846, %v9858_v33  ;;  %v4900_v57 = vld [vmem:[%s11890_s0 + $0x328] sm:$0xff] }
 0x325   :  { %v2952_v51 = vmul.f32 %v2920_v60, %v2824_v12  ;;  %v2857_v22 = vmul.f32 %v9879_v29, %v9879_v29  ;;  %v2605_v31 = vmul.f32 %v2573_v34, %v9790_v18  ;;  %v3595_v4 = vmul.f32 0.044715, %v3563_v52 }
 0x326   :  { %v3450_v6 = vpop.f32.mrf.mxu0  ;;  %v2480_v8 = vadd.f32 1.0, %v2448_v11  ;;  %v2606_v45 = vmul.f32 %v2574_v32, %v2350_v23  ;;  %v9888_v47 = vperm.slane %v3800_v48, 0  ;;  %v7482_v10 = vpop.eup %7481  ;;  %v3014_v35 = vadd.f32 1.0, %v7478_v62 }
 0x327   :  { %v2889_v46 = vmul.f32 0.044715, %v2857_v22  ;;  %v1599_v15 = vpop.f32.mrf.mxu3  ;;  %v3861_v40 = vpop.f32.mrf.mxu1  ;;  %v3015_v30 = vadd.f32 1.0, %v7480_v27  ;;  %v9891_v7 = vadd.f32 %v3450_v6, %v9247_v42  ;;  %v3627_v55 = vadd.f32 1.0, %v3595_v4 }
 0x328   :  { %v7484_v61 = vpop.eup %7483  ;;  %v2512_v2 = vmul.f32 %v2480_v8, %v2384_v25  ;;  %v1600_v58 = vadd.f32 %v9853_v19, %v1599_v15  ;;  %v2623_v18 = vpack.c.bf16 %v2606_v45, %v2605_v31  ;;  %v2825_v17 = vmul.f32 0.7978846, %v9879_v29 }
 0x329   :  { %v2921_v54 = vadd.f32 1.0, %v2889_v46  ;;  %v9896_v9 = vadd.f32 %v3861_v40, %v9888_v47  ;;  %v3047_v24 = vmul.f32 %v3015_v30, %v2791_v37  ;;  %v9899_v14 = vmul.f32 0.5, %v9811_v44  ;;  %v4899_v44 = vld [vmem:[%s11890_s0 + $0x320] sm:$0xff] }
 0x32a   :  { %7485 = vtanh.f32 %v2511_v63  ;;  %v3658_v23 = vmul.f32 %v3626_v5, %v3530_v28  ;;  %1646 = vst.msk [vmem:[%s11898_s9 + $0xb8] sm:$0xff] %vm1622_vm1, %v1600_v58  ;;  %v3046_v0 = vmul.f32 %v3014_v35, %v9792_v21  ;;  %v3659_v56 = vmul.f32 %v3627_v55, %v3531_v41 }
 0x32b   :  { %7487 = vtanh.f32 %v2512_v2  ;;  %v2953_v39 = vmul.f32 %v2921_v54, %v2825_v17  ;;  %v4005_v20 = vmul.f32 %v9896_v9, %v9896_v9  ;;  %2771 = vmatmul.bf16.gmra.mxu2 %v2623_v18  ;;  %v3564_v21 = vmul.f32 %v9891_v7, %v9891_v7 }
 0x32c   :  { %7489 = vtanh.f32 %v2952_v51  ;;  %v2732_v59 = vpop.f32.mrf.mxu2  ;;  %v3074_v36 = vpack.c.bf16 %v3047_v24, %v3046_v0  ;;  %v3720_v26 = vadd.f32 1.0, %v7482_v10  ;;  %v3721_v34 = vadd.f32 1.0, %v7484_v61 }
 0x32d   :  { %7491 = vtanh.f32 %v2953_v39  ;;  %v4037_v60 = vmul.f32 0.044715, %v4005_v20  ;;  %v9917_v13 = vadd.f32 %v9876_v3, %v2732_v59  ;;  %v2792_v1 = vmul.f32 0.5, %v9823_v43 }
 0x32e   :  { %v3452_v37 = vpop.f32.mrf.mxu0  ;;  %v9921_v28 = vmul.f32 0.5, %v9848_v16  ;;  %3182 = vmatmul.bf16.gmra.mxu3 %v3074_v36  ;;  %v3596_v38 = vmul.f32 0.044715, %v3564_v21  ;;  %v4929_v62 = vpack.c.bf16 %v4900_v57, %v4899_v44  ;;  %7493 = vtanh.f32 %v3659_v56 }
 0x32f   :  { %v4069_v48 = vadd.f32 1.0, %v4037_v60  ;;  %v2858_v12 = vmul.f32 %v9917_v13, %v9917_v13  ;;  %v1602_v5 = vpop.f32.mrf.mxu3  ;;  %v3863_v52 = vpop.f32.mrf.mxu1  ;;  %v9926_v6 = vadd.f32 %v3452_v37, %v9247_v42  ;;  %v3752_v63 = vmul.f32 %v3720_v26, %v9795_v53 }
 0x330   :  { %v7486_v27 = vpop.eup %7485  ;;  %v3753_v43 = vmul.f32 %v3721_v34, %v9818_v50  ;;  %v1603_v16 = vadd.f32 %v9853_v19, %v1602_v5  ;;  %6889 = vmatmul.msk.bf16.gmra.mxu0 %vm101_vm0, %v4929_v62  ;;  %v9933_v11 = vadd.f32 %v3863_v52, %v9888_v47  ;;  %7495 = vtanh.f32 %v3658_v23  ;;  %v4901_v34 = vld [vmem:[%s11890_s0 + $0x330] sm:$0xff]  ;;  %v7094_v62 = vld [vmem:[%s11894_s5 + $0x38] sm:$0xff]  ;;  %v7073_v5 = vld [vmem:[%s11896_s7 + $0x20] sm:$0xff] }
 0x331   :  { %v7488_v41 = vpop.eup %7487  ;;  %v2352_v32 = vmul.f32 0.5, %v9858_v33  ;;  %v3973_v51 = vmul.f32 0.7978846, %v9896_v9  ;;  %v2890_v25 = vmul.f32 0.044715, %v2858_v12  ;;  %v2793_v31 = vmul.f32 0.5, %v9879_v29  ;;  %5933 = vmatpush.bf16.msrb.mxu2 %v7094_v62  ;;  %4777 = vmatpush.bf16.msra.mxu3 %v7073_v5 }
 0x332   :  { %v7490_v22 = vpop.eup %7489  ;;  %v3532_v53 = vmul.f32 0.7978846, %v9891_v7  ;;  %v3628_v50 = vadd.f32 1.0, %v3596_v38  ;;  %v3776_v8 = vpack.c.bf16 %v3753_v43, %v3752_v63  ;;  %1647 = vst.msk [vmem:[%s11898_s9 + $0xc0] sm:$0xff] %vm1622_vm1, %v1603_v16  ;;  %v4006_v33 = vmul.f32 %v9933_v11, %v9933_v11  ;;  %v4902_v38 = vld [vmem:[%s11890_s0 + $0x338] sm:$0xff]  ;;  %v7081_v52 = vld [vmem:[%s11892_s3 + $0x10] sm:$0xff] }
 0x333   :  { %v7492_v4 = vpop.eup %7491  ;;  %v4101_v45 = vmul.f32 %v4069_v48, %v3973_v51  ;;  %v2922_v10 = vadd.f32 1.0, %v2890_v25  ;;  %v3565_v46 = vmul.f32 %v9926_v6, %v9926_v6  ;;  %v2826_v29 = vmul.f32 0.7978846, %v9917_v13  ;;  %5477 = vmatpush.bf16.msrb.mxu1 %v7081_v52 }
 0x334   :  { %3900 = vmatmul.bf16.gmra.mxu1 %v3776_v8  ;;  %v2734_v15 = vpop.f32.mrf.mxu2  ;;  %v3533_v40 = vmul.f32 0.7978846, %v9926_v6  ;;  %v2575_v35 = vadd.f32 1.0, %v7486_v27  ;;  %v2576_v30 = vadd.f32 1.0, %v7488_v41  ;;  %v7494_v61 = vpop.eup %7493  ;;  %v4038_v2 = vmul.f32 0.044715, %v4006_v33 }
 0x335   :  { %v9950_v55 = vadd.f32 %v9876_v3, %v2734_v15  ;;  %v3597_v58 = vmul.f32 0.044715, %v3565_v46  ;;  %v3016_v18 = vadd.f32 1.0, %v7490_v22  ;;  %v2954_v17 = vmul.f32 %v2922_v10, %v2826_v29 }
 0x336   :  { %v2607_v54 = vmul.f32 %v2575_v35, %v9899_v14  ;;  %v2608_v24 = vmul.f32 %v2576_v30, %v2352_v32  ;;  %v3017_v23 = vadd.f32 1.0, %v7492_v4  ;;  %v7496_v0 = vpop.eup %7495  ;;  %7497 = vtanh.f32 %v4101_v45 }
 0x337   :  { %v3660_v39 = vmul.f32 %v3628_v50, %v3532_v53  ;;  %v3974_v56 = vmul.f32 0.7978846, %v9933_v11  ;;  %v4070_v20 = vadd.f32 1.0, %v4038_v2  ;;  %v1604_v44 = vpop.f32.mrf.mxu3  ;;  %v2859_v57 = vmul.f32 %v9950_v55, %v9950_v55 }
 0x338   :  { %v3629_v59 = vadd.f32 1.0, %v3597_v58  ;;  %v1605_v36 = vadd.f32 %v9853_v19, %v1604_v44  ;;  %v2624_v21 = vpack.c.bf16 %v2608_v24, %v2607_v54  ;;  %v3048_v37 = vmul.f32 %v3016_v18, %v2792_v1 }
 0x339   :  { %v4102_v26 = vmul.f32 %v4070_v20, %v3974_v56  ;;  %v3049_v60 = vmul.f32 %v3017_v23, %v2793_v31  ;;  %v3723_v14 = vadd.f32 1.0, %v7494_v61  ;;  %7499 = vtanh.f32 %v2954_v17 }
 0x33a   :  { %v2891_v48 = vmul.f32 0.044715, %v2859_v57  ;;  %v3661_v12 = vmul.f32 %v3629_v59, %v3533_v40  ;;  %1648 = vst.msk [vmem:[%s11898_s9 + $0xc8] sm:$0xff] %vm1622_vm1, %v1605_v36  ;;  %v3722_v1 = vadd.f32 1.0, %v7496_v0  ;;  %v3498_v27 = vmul.f32 0.5, %v9814_v49  ;;  %v3455_v16 = vpop.f32.mrf.mxu0 }
 0x33b   :  { %7501 = vtanh.f32 %v4102_v26  ;;  %v2827_v63 = vmul.f32 0.7978846, %v9950_v55  ;;  %v3075_v43 = vpack.c.bf16 %v3049_v60, %v3048_v37  ;;  %2776 = vmatmul.bf16.gmra.mxu2 %v2624_v21  ;;  %v3866_v32 = vpop.f32.mrf.mxu1  ;;  %v9979_v25 = vadd.f32 %v3455_v16, %v9247_v42 }
 0x33c   :  { %v2923_v41 = vadd.f32 1.0, %v2891_v48  ;;  %v2737_v51 = vpop.f32.mrf.mxu2  ;;  %v3755_v22 = vmul.f32 %v3723_v14, %v9921_v28  ;;  %v4930_v31 = vpack.c.bf16 %v4902_v38, %v4901_v34  ;;  %v7498_v53 = vpop.eup %7497  ;;  %7503 = vtanh.f32 %v3661_v12  ;;  %v4903_v14 = vld [vmem:[%s11890_s0 + $0x340] sm:$0xff]  ;;  %v4904_v34 = vld [vmem:[%s11890_s0 + $0x348] sm:$0xff] }
 0x33d   :  { %v9983_v49 = vadd.f32 %v3866_v32, %v9888_v47  ;;  %v9986_v50 = vadd.f32 %v9876_v3, %v2737_v51  ;;  %7505 = vtanh.f32 %v3660_v39  ;;  %v3566_v4 = vmul.f32 %v9979_v25, %v9979_v25 }
 0x33e   :  { %v2955_v8 = vmul.f32 %v2923_v41, %v2827_v63  ;;  %3187 = vmatmul.bf16.gmra.mxu3 %v3075_v43  ;;  %v3754_v45 = vmul.f32 %v3722_v1, %v3498_v27  ;;  %v3941_v28 = vmul.f32 0.5, %v9896_v9  ;;  %v9992_v10 = vmul.f32 0.5, %v9891_v7 }
 0x33f   :  { %v4007_v33 = vmul.f32 %v9983_v49, %v9983_v49  ;;  %v1607_v46 = vpop.f32.mrf.mxu3  ;;  %v7500_v29 = vpop.eup %7499  ;;  %v2794_v15 = vmul.f32 0.5, %v9917_v13  ;;  %v2860_v40 = vmul.f32 %v9986_v50, %v9986_v50  ;;  %v3598_v35 = vmul.f32 0.044715, %v3566_v4 }
 0x340   :  { %v3777_v30 = vpack.c.bf16 %v3755_v22, %v3754_v45  ;;  %6890 = vmatmul.msk.bf16.gmra.mxu0 %vm101_vm0, %v4930_v31  ;;  %v3942_v9 = vmul.f32 0.5, %v9933_v11  ;;  %7507 = vtanh.f32 %v2955_v8  ;;  %v1608_v2 = vadd.f32 %v9853_v19, %v1607_v46 }
 0x341   :  { %v7502_v61 = vpop.eup %7501  ;;  %v4039_v7 = vmul.f32 0.044715, %v4007_v33  ;;  %v4165_v58 = vadd.f32 1.0, %v7498_v53  ;;  %v2892_v17 = vmul.f32 0.044715, %v2860_v40  ;;  %v3630_v54 = vadd.f32 1.0, %v3598_v35 }
 0x342   :  { %v4166_v18 = vadd.f32 1.0, %v7502_v61  ;;  %v7504_v24 = vpop.eup %7503  ;;  %v3975_v13 = vmul.f32 0.7978846, %v9983_v49  ;;  %v3534_v0 = vmul.f32 0.7978846, %v9979_v25  ;;  %1649 = vst.msk [vmem:[%s11898_s9 + $0xd0] sm:$0xff] %vm1622_vm1, %v1608_v2  ;;  %v3457_v11 = vpop.f32.mrf.mxu0  ;;  %v4931_v51 = vpack.c.bf16 %v4904_v34, %v4903_v14 }
 0x343   :  { %v4071_v23 = vadd.f32 1.0, %v4039_v7  ;;  %v7506_v39 = vpop.eup %7505  ;;  %v2828_v20 = vmul.f32 0.7978846, %v9986_v50  ;;  %v2924_v44 = vadd.f32 1.0, %v2892_v17  ;;  %v3868_v57 = vpop.f32.mrf.mxu1  ;;  %v3018_v36 = vadd.f32 1.0, %v7500_v29 }
 0x344   :  { %v4198_v56 = vmul.f32 %v4166_v18, %v3942_v9  ;;  %3905 = vmatmul.bf16.gmra.mxu1 %v3777_v30  ;;  %v2739_v59 = vpop.f32.mrf.mxu2  ;;  %v3662_v21 = vmul.f32 %v3630_v54, %v3534_v0  ;;  %v10010_v26 = vadd.f32 %v3868_v57, %v9888_v47  ;;  %v3458_v60 = vadd.f32 %v3457_v11, %v9247_v42 }
 0x345   :  { %v10013_v37 = vadd.f32 %v9876_v3, %v2739_v59  ;;  %v4197_v38 = vmul.f32 %v4165_v58, %v3941_v28  ;;  %v3501_v62 = vmul.f32 0.5, %v9926_v6  ;;  %v4103_v48 = vmul.f32 %v4071_v23, %v3975_v13 }
 0x346   :  { %v3725_v12 = vadd.f32 1.0, %v7504_v24  ;;  %v7508_v1 = vpop.eup %7507  ;;  %v2795_v5 = vmul.f32 0.5, %v9950_v55  ;;  %v2956_v52 = vmul.f32 %v2924_v44, %v2828_v20  ;;  %v4008_v27 = vmul.f32 %v10010_v26, %v10010_v26 }
 0x347   :  { %v1609_v63 = vpop.f32.mrf.mxu3  ;;  %v3724_v43 = vadd.f32 1.0, %v7506_v39  ;;  %v4229_v16 = vpack.c.bf16 %v4198_v56, %v4197_v38  ;;  %v2861_v41 = vmul.f32 %v10013_v37, %v10013_v37  ;;  %v3050_v32 = vmul.f32 %v3018_v36, %v2794_v15 }
 0x348   :  { %7509 = vtanh.f32 %v3662_v21  ;;  %v4040_v22 = vmul.f32 0.044715, %v4008_v27  ;;  %v3567_v6 = vmul.f32 %v3458_v60, %v3458_v60  ;;  %v1610_v31 = vadd.f32 %v9853_v19, %v1609_v63 }
 0x349   :  { %7511 = vtanh.f32 %v4103_v48  ;;  %v2893_v53 = vmul.f32 0.044715, %v2861_v41  ;;  %v3019_v55 = vadd.f32 1.0, %v7508_v1  ;;  %v3757_v8 = vmul.f32 %v3725_v12, %v3501_v62 }
 0x34a   :  { %7513 = vtanh.f32 %v2956_v52  ;;  %v3976_v4 = vmul.f32 0.7978846, %v10010_v26  ;;  %v4072_v45 = vadd.f32 1.0, %v4040_v22  ;;  %v3599_v28 = vmul.f32 0.044715, %v3567_v6  ;;  %1650 = vst.msk [vmem:[%s11898_s9 + $0xd8] sm:$0xff] %vm1622_vm1, %v1610_v31  ;;  %v3460_v33 = vpop.f32.mrf.mxu0 }
 0x34b   :  { %v2829_v46 = vmul.f32 0.7978846, %v10013_v37  ;;  %v2925_v29 = vadd.f32 1.0, %v2893_v53  ;;  %4321 = vmatmul.bf16.vlgmr.msra.gmra.mxu2 %v4229_v16  ;;  %v3051_v40 = vmul.f32 %v3019_v55, %v2795_v5  ;;  %v10036_v35 = vadd.f32 %v3460_v33, %v9247_v42 }
 0x34c   :  { %v2742_v15 = vpop.f32.mrf.mxu2  ;;  %v4104_v30 = vmul.f32 %v4072_v45, %v3976_v4  ;;  %v3535_v61 = vmul.f32 0.7978846, %v3458_v60  ;;  %v3631_v9 = vadd.f32 1.0, %v3599_v28  ;;  %v3756_v17 = vmul.f32 %v3724_v43, %v9992_v10 }
 0x34d   :  { %v10039_v7 = vadd.f32 %v9876_v3, %v2742_v15  ;;  %v2957_v2 = vmul.f32 %v2925_v29, %v2829_v46  ;;  %v3076_v18 = vpack.c.bf16 %v3051_v40, %v3050_v32  ;;  %v3943_v24 = vmul.f32 0.5, %v9983_v49 }
 0x34e   :  { %v3871_v58 = vpop.f32.mrf.mxu1  ;;  %v7510_v54 = vpop.eup %7509  ;;  %v3663_v13 = vmul.f32 %v3631_v9, %v3535_v61  ;;  %7515 = vtanh.f32 %v4104_v30  ;;  %v3568_v56 = vmul.f32 %v10036_v35, %v10036_v35  ;;  %v3778_v20 = vpack.c.bf16 %v3757_v8, %v3756_v17 }
 0x34f   :  { %v10044_v23 = vadd.f32 %v3871_v58, %v9888_v47  ;;  %v1612_v0 = vpop.f32.mrf.mxu3  ;;  %v7512_v11 = vpop.eup %7511  ;;  %v2862_v39 = vmul.f32 %v10039_v7, %v10039_v7  ;;  %3192 = vmatmul.bf16.gmra.mxu3 %v3076_v18  ;;  %v2796_v49 = vmul.f32 0.5, %v9986_v50  ;;  %7517 = vtanh.f32 %v2957_v2  ;;  %v10061_v50 = vld [vmem:[%s11890_s0 + $0x350] sm:$0xff] }
 0x350   :  { %6891 = vmatmul.msk.bf16.gmra.mxu0 %vm101_vm0, %v4931_v51  ;;  %v7514_v10 = vpop.eup %7513  ;;  %v10052_v44 = vmul.f32 0.5, %v3458_v60  ;;  %7519 = vtanh.f32 %v3663_v13  ;;  %v3600_v36 = vmul.f32 0.044715, %v3568_v56  ;;  %v1613_v21 = vadd.f32 %v9853_v19, %v1612_v0  ;;  %v10066_v60 = vld [vmem:[%s11890_s0 + $0x358] sm:$0xff] }
 0x351   :  { %v4009_v57 = vmul.f32 %v10044_v23, %v10044_v23  ;;  %v2894_v59 = vmul.f32 0.044715, %v2862_v39  ;;  %v3944_v14 = vmul.f32 0.5, %v10010_v26  ;;  %v4167_v62 = vadd.f32 1.0, %v7512_v11 }
 0x352   :  { %v3462_v38 = vpop.f32.mrf.mxu0  ;;  %v2830_v48 = vmul.f32 0.7978846, %v10039_v7  ;;  %1651 = vst.msk [vmem:[%s11898_s9 + $0xe0] sm:$0xff] %vm1622_vm1, %v1613_v21  ;;  %v3020_v5 = vadd.f32 1.0, %v7514_v10  ;;  %v3977_v52 = vmul.f32 0.7978846, %v10044_v23  ;;  %v4932_v6 = vpack.c.bf16 %v10066_v60, %v10061_v50 }
 0x353   :  { %v4041_v34 = vmul.f32 0.044715, %v4009_v57  ;;  %v2926_v12 = vadd.f32 1.0, %v2894_v59  ;;  %v10074_v1 = vadd.f32 %v3462_v38, %v9247_v42  ;;  %v3632_v63 = vadd.f32 1.0, %v3600_v36  ;;  %v7072_v10 = vld [vmem:[%s11896_s7 + $0x18] sm:$0xff] }
 0x354   :  { %3910 = vmatmul.bf16.gmra.mxu1 %v3778_v20  ;;  %v2744_v26 = vpop.f32.mrf.mxu2  ;;  %v7516_v16 = vpop.eup %7515  ;;  %v2797_v41 = vmul.f32 0.5, %v10013_v37  ;;  %v10081_v22 = vadd.f32 1.0, %v7510_v54  ;;  %v3536_v55 = vmul.f32 0.7978846, %v10036_v35  ;;  %v4199_v45 = vmul.f32 %v4167_v62, %v3943_v24  ;;  %v7093_v24 = vld [vmem:[%s11894_s5 + $0x30] sm:$0xff]  ;;  %4778 = vmatpush.bf16.msra.mxu3 %v7072_v10 }
 0x355   :  { %v4073_v27 = vadd.f32 1.0, %v4041_v34  ;;  %v10078_v43 = vadd.f32 %v9876_v3, %v2744_v26  ;;  %v2958_v32 = vmul.f32 %v2926_v12, %v2830_v48  ;;  %v7518_v31 = vpop.eup %7517  ;;  %v3569_v33 = vmul.f32 %v10074_v1, %v10074_v1  ;;  %5934 = vmatpush.bf16.msrb.mxu2 %v7093_v24 }
 0x356   :  { %v3873_v51 = vpop.f32.mrf.mxu1  ;;  %v7520_v28 = vpop.eup %7519  ;;  %v3052_v29 = vmul.f32 %v3020_v5, %v2796_v49  ;;  %v3664_v15 = vmul.f32 %v3632_v63, %v3536_v55  ;;  %v3537_v61 = vmul.f32 0.7978846, %v10074_v1  ;;  %v4168_v58 = vadd.f32 1.0, %v7516_v16  ;;  %v7080_v49 = vld [vmem:[%s11892_s3 + $0x8] sm:$0xff] }
 0x357   :  { %v4105_v53 = vmul.f32 %v4073_v27, %v3977_v52  ;;  %v10087_v8 = vadd.f32 %v3873_v51, %v9888_v47  ;;  %v1614_v4 = vpop.f32.mrf.mxu3  ;;  %v2863_v37 = vmul.f32 %v10078_v43, %v10078_v43  ;;  %v2831_v30 = vmul.f32 0.7978846, %v10078_v43  ;;  %5478 = vmatpush.bf16.msrb.mxu1 %v7080_v49  ;;  %v4907_v49 = vld [vmem:[%s11890_s0 + $0x360] sm:$0xff] }
 0x358   :  { %v1615_v46 = vadd.f32 %v9853_v19, %v1614_v4  ;;  %7521 = vtanh.f32 %v2958_v32  ;;  %v3601_v2 = vmul.f32 0.044715, %v3569_v33  ;;  %v3021_v17 = vadd.f32 1.0, %v7518_v31 }
 0x359   :  { %v4010_v40 = vmul.f32 %v10087_v8, %v10087_v8  ;;  %v2895_v9 = vmul.f32 0.044715, %v2863_v37  ;;  %7523 = vtanh.f32 %v4105_v53  ;;  %v3727_v54 = vadd.f32 1.0, %v7520_v28 }
 0x35a   :  { %1652 = vst.msk [vmem:[%s11898_s9 + $0xe8] sm:$0xff] %vm1622_vm1, %v1615_v46  ;;  %v3978_v13 = vmul.f32 0.7978846, %v10087_v8  ;;  %v3633_v11 = vadd.f32 1.0, %v3601_v2  ;;  %v4200_v39 = vmul.f32 %v4168_v58, %v3944_v14  ;;  %v3053_v36 = vmul.f32 %v3021_v17, %v2797_v41 }
 0x35b   :  { %v4042_v18 = vmul.f32 0.044715, %v4010_v40  ;;  %v2927_v0 = vadd.f32 1.0, %v2895_v9  ;;  %7525 = vtanh.f32 %v3664_v15  ;;  %v3502_v62 = vmul.f32 0.5, %v9979_v25 }
 0x35c   :  { %v2747_v56 = vpop.f32.mrf.mxu2  ;;  %v3465_v20 = vpop.f32.mrf.mxu0  ;;  %v3665_v34 = vmul.f32 %v3633_v11, %v3537_v61  ;;  %v4230_v38 = vpack.c.bf16 %v4200_v39, %v4199_v45  ;;  %v3759_v12 = vmul.f32 %v3727_v54, %v10052_v44  ;;  %v10119_v52 = vmul.f32 0.5, %v10036_v35 }
 0x35d   :  { %v4074_v57 = vadd.f32 1.0, %v4042_v18  ;;  %v2748_v59 = vadd.f32 %v9876_v3, %v2747_v56  ;;  %v10114_v21 = vadd.f32 %v3465_v20, %v9247_v42  ;;  %v2959_v14 = vmul.f32 %v2927_v0, %v2831_v30 }
 0x35e   :  { %v7522_v5 = vpop.eup %7521  ;;  %4326 = vmatmul.bf16.gmra.mxu2 %v4230_v38  ;;  %v3077_v63 = vpack.c.bf16 %v3053_v36, %v3052_v29  ;;  %v3758_v41 = vmul.f32 %v10081_v22, %v3502_v62  ;;  %v2798_v32 = vmul.f32 0.5, %v10039_v7  ;;  %v3945_v45 = vmul.f32 0.5, %v10044_v23 }
 0x35f   :  { %v4106_v50 = vmul.f32 %v4074_v57, %v3978_v13  ;;  %v3876_v60 = vpop.f32.mrf.mxu1  ;;  %v2864_v48 = vmul.f32 %v2748_v59, %v2748_v59  ;;  %v1617_v26 = vpop.f32.mrf.mxu3  ;;  %7527 = vtanh.f32 %v2959_v14  ;;  %v3570_v44 = vmul.f32 %v10114_v21, %v10114_v21  ;;  %v4908_v57 = vld [vmem:[%s11890_s0 + $0x368] sm:$0xff] }
 0x360   :  { %v10122_v27 = vadd.f32 %v3876_v60, %v9888_v47  ;;  %6892 = vmatmul.msk.bf16.gmra.mxu0 %vm101_vm0, %v4932_v6  ;;  %v7524_v25 = vpop.eup %7523  ;;  %v2832_v51 = vmul.f32 0.7978846, %v2748_v59  ;;  %3197 = vmatmul.bf16.gmra.mxu3 %v3077_v63  ;;  %v3779_v55 = vpack.c.bf16 %v3759_v12, %v3758_v41  ;;  %v1618_v6 = vadd.f32 %v9853_v19, %v1617_v26 }
 0x361   :  { %7529 = vtanh.f32 %v4106_v50  ;;  %v2896_v16 = vmul.f32 0.044715, %v2864_v48  ;;  %v3602_v53 = vmul.f32 0.044715, %v3570_v44  ;;  %v7526_v4 = vpop.eup %7525  ;;  %v3505_v28 = vmul.f32 0.5, %v10074_v1 }
 0x362   :  { %7531 = vtanh.f32 %v3665_v34  ;;  %v4011_v35 = vmul.f32 %v10122_v27, %v10122_v27  ;;  %v4169_v7 = vadd.f32 1.0, %v7524_v25  ;;  %1653 = vst.msk [vmem:[%s11898_s9 + $0xf0] sm:$0xff] %vm1622_vm1, %v1618_v6  ;;  %v3022_v23 = vadd.f32 1.0, %v7522_v5 }
 0x363   :  { %v2928_v31 = vadd.f32 1.0, %v2896_v16  ;;  %v2799_v1 = vmul.f32 0.5, %v10078_v43  ;;  %v3979_v30 = vmul.f32 0.7978846, %v10122_v27  ;;  %v3634_v9 = vadd.f32 1.0, %v3602_v53 }
 0x364   :  { %v4043_v37 = vmul.f32 0.044715, %v4011_v35  ;;  %v2749_v22 = vpop.f32.mrf.mxu2  ;;  %v3467_v33 = vpop.f32.mrf.mxu0  ;;  %3915 = vmatmul.bf16.gmra.mxu1 %v3779_v55  ;;  %v3946_v58 = vmul.f32 0.5, %v10087_v8  ;;  %v10147_v18 = vmul.f32 0.5, %v2748_v59  ;;  %v3538_v17 = vmul.f32 0.7978846, %v10114_v21 }
 0x365   :  { %v2960_v46 = vmul.f32 %v2928_v31, %v2832_v51  ;;  %v10139_v29 = vadd.f32 %v9876_v3, %v2749_v22  ;;  %v10142_v15 = vadd.f32 %v3467_v33, %v9247_v42  ;;  %v7528_v40 = vpop.eup %7527  ;;  %v3728_v13 = vadd.f32 1.0, %v7526_v4 }
 0x366   :  { %v4075_v61 = vadd.f32 1.0, %v4043_v37  ;;  %v4201_v56 = vmul.f32 %v4169_v7, %v3945_v45  ;;  %v3054_v10 = vmul.f32 %v3022_v23, %v2798_v32  ;;  %v3666_v59 = vmul.f32 %v3634_v9, %v3538_v17 }
 0x367   :  { %v7530_v2 = vpop.eup %7529  ;;  %v3878_v54 = vpop.f32.mrf.mxu1  ;;  %v2865_v43 = vmul.f32 %v10139_v29, %v10139_v29  ;;  %7533 = vtanh.f32 %v2960_v46  ;;  %v3571_v20 = vmul.f32 %v10142_v15, %v10142_v15  ;;  %v2833_v14 = vmul.f32 0.7978846, %v10139_v29  ;;  %v10177_v46 = vld [vmem:[%s11897_s8] ss:$0 sm:$0xff] }
 0x368   :  { %v1619_v24 = vpop.f32.mrf.mxu3  ;;  %v7532_v0 = vpop.eup %7531  ;;  %v4107_v11 = vmul.f32 %v4075_v61, %v3979_v30  ;;  %v3879_v39 = vadd.f32 %v3878_v54, %v9888_v47  ;;  %v3539_v34 = vmul.f32 0.7978846, %v10142_v15  ;;  %v3023_v60 = vadd.f32 1.0, %v7528_v40 }
 0x369   :  { %v1620_v8 = vadd.f32 %v9853_v19, %v1619_v24  ;;  %v2897_v38 = vmul.f32 0.044715, %v2865_v43  ;;  %v3603_v62 = vmul.f32 0.044715, %v3571_v20  ;;  %v4170_v19 = vadd.f32 1.0, %v7530_v2 }
 0x36a   :  { %v4012_v36 = vmul.f32 %v3879_v39, %v3879_v39  ;;  %7535 = vtanh.f32 %v4107_v11  ;;  %v3729_v12 = vadd.f32 1.0, %v7532_v0  ;;  %v4933_v26 = vpack.c.bf16 %v4908_v57, %v4907_v49 }
 0x36b   :  { %1654 = vst.msk [vmem:[%s11898_s9 + $0xf8] sm:$0xff] %vm1622_vm1, %v1620_v8  ;;  %v2929_v5 = vadd.f32 1.0, %v2897_v38  ;;  %v3635_v63 = vadd.f32 1.0, %v3603_v62  ;;  %v4202_v25 = vmul.f32 %v4170_v19, %v3946_v58  ;;  %v3980_v44 = vmul.f32 0.7978846, %v3879_v39 }
 0x36c   :  { %v4044_v50 = vmul.f32 0.044715, %v4012_v36  ;;  %v3470_v48 = vpop.f32.mrf.mxu0  ;;  %v3055_v32 = vmul.f32 %v3023_v60, %v2799_v1  ;;  %v3761_v35 = vmul.f32 %v3729_v12, %v3505_v28  ;;  %v3760_v45 = vmul.f32 %v3728_v13, %v10119_v52  ;;  %v4909_v60 = vld [vmem:[%s11890_s0 + $0x370] sm:$0xff] }
 0x36d   :  { %v3471_v16 = vadd.f32 %v3470_v48, %v9247_v42  ;;  %v7534_v51 = vpop.eup %7533  ;;  %v2961_v31 = vmul.f32 %v2929_v5, %v2833_v14  ;;  %v3667_v53 = vmul.f32 %v3635_v63, %v3539_v34  ;;  %v4231_v6 = vpack.c.bf16 %v4202_v25, %v4201_v56  ;;  %v4910_v48 = vld [vmem:[%s11890_s0 + $0x378] sm:$0xff] }
 0x36e   :  { %v4076_v41 = vadd.f32 1.0, %v4044_v50  ;;  %v2752_v4 = vpop.f32.mrf.mxu2  ;;  %v3078_v7 = vpack.c.bf16 %v3055_v32, %v3054_v10  ;;  %v10181_v40 = vmul.f32 0.5, %v10114_v21  ;;  %7537 = vtanh.f32 %v3666_v59 }
 0x36f   :  { %v3881_v55 = vpop.f32.mrf.mxu1  ;;  %v10172_v33 = vadd.f32 %v9876_v3, %v2752_v4  ;;  %4331 = vmatmul.bf16.gmra.mxu2 %v4231_v6  ;;  %v3572_v52 = vmul.f32 %v3471_v16, %v3471_v16  ;;  %v3780_v1 = vpack.c.bf16 %v3761_v35, %v3760_v45  ;;  %v3947_v30 = vmul.f32 0.5, %v10122_v27  ;;  %v7092_v6 = vld [vmem:[%s11894_s5 + $0x28] sm:$0xff] }
 0x370   :  { %v4108_v37 = vmul.f32 %v4076_v41, %v3980_v44  ;;  %v3882_v22 = vadd.f32 %v3881_v55, %v9888_v47  ;;  %v3163_v28 = vpop.f32.mrf.mxu3  ;;  %6893 = vmatmul.msk.bf16.gmra.mxu0 %vm101_vm0, %v4933_v26  ;;  %v7536_v23 = vpop.eup %7535  ;;  %v10185_v61 = vmul.f32 0.5, %v10139_v29  ;;  %3202 = vmatmul.bf16.gmra.mxu3 %v3078_v7  ;;  %v3948_v2 = vmul.f32 0.5, %v3879_v39 }
 0x371   :  { %v10188_v58 = vmul.f32 0.5, %v10142_v15  ;;  %v2866_v21 = vmul.f32 %v10172_v33, %v10172_v33  ;;  %v3604_v54 = vmul.f32 0.044715, %v3572_v52  ;;  %v3164_v24 = vadd.f32 %v10177_v46, %v3163_v28  ;;  %5935 = vmatpush.bf16.msrb.mxu2 %v7092_v6 }
 0x372   :  { %7539 = vtanh.f32 %v4108_v37  ;;  %v4013_v9 = vmul.f32 %v3882_v22, %v3882_v22  ;;  %v3540_v0 = vmul.f32 0.7978846, %v3471_v16  ;;  %v3024_v11 = vadd.f32 1.0, %v7534_v51  ;;  %v7071_v37 = vld [vmem:[%s11896_s7 + $0x10] sm:$0xff] }
 0x373   :  { %7541 = vtanh.f32 %v2961_v31  ;;  %v2898_v13 = vmul.f32 0.044715, %v2866_v21  ;;  %v3981_v39 = vmul.f32 0.7978846, %v3882_v22  ;;  %v10196_v15 = vmul.f32 0.5, %v3471_v16  ;;  %3243 = vst.msk [vmem:[%s11898_s9 + $0x100] sm:$0xff] %vm1622_vm1, %v3164_v24  ;;  %4779 = vmatpush.bf16.msra.mxu3 %v7071_v37 }
 0x374   :  { %7543 = vtanh.f32 %v3667_v53  ;;  %v4045_v17 = vmul.f32 0.044715, %v4013_v9  ;;  %v3472_v27 = vpop.f32.mrf.mxu0  ;;  %3920 = vmatmul.bf16.gmra.mxu1 %v3780_v1  ;;  %v4171_v56 = vadd.f32 1.0, %v7536_v23  ;;  %v7538_v20 = vpop.eup %7537  ;;  %v2834_v8 = vmul.f32 0.7978846, %v10172_v33 }
 0x375   :  { %v10194_v29 = vadd.f32 %v3472_v27, %v9247_v42  ;;  %v2930_v10 = vadd.f32 1.0, %v2898_v13  ;;  %v3636_v49 = vadd.f32 1.0, %v3604_v54  ;;  %v10205_v34 = vmul.f32 0.5, %v3882_v22 }
 0x376   :  { %v4077_v43 = vadd.f32 1.0, %v4045_v17  ;;  %v2754_v59 = vpop.f32.mrf.mxu2  ;;  %v4203_v41 = vmul.f32 %v4171_v56, %v3947_v30  ;;  %v3056_v32 = vmul.f32 %v3024_v11, %v10147_v18  ;;  %v3730_v35 = vadd.f32 1.0, %v7538_v20 }
 0x377   :  { %v3883_v57 = vpop.f32.mrf.mxu1  ;;  %v3573_v36 = vmul.f32 %v10194_v29, %v10194_v29  ;;  %v10209_v19 = vadd.f32 %v9876_v3, %v2754_v59  ;;  %v2962_v26 = vmul.f32 %v2930_v10, %v2834_v8  ;;  %v3668_v51 = vmul.f32 %v3636_v49, %v3540_v0 }
 0x378   :  { %v7540_v14 = vpop.eup %7539  ;;  %v4109_v38 = vmul.f32 %v4077_v43, %v3981_v39  ;;  %v3884_v62 = vadd.f32 %v3883_v57, %v9888_v47  ;;  %v3165_v50 = vpop.f32.mrf.mxu3  ;;  %v3541_v53 = vmul.f32 0.7978846, %v10194_v29  ;;  %v4934_v55 = vpack.c.bf16 %v4910_v48, %v4909_v60 }
 0x379   :  { %v7542_v12 = vpop.eup %7541  ;;  %v3605_v5 = vmul.f32 0.044715, %v3573_v36  ;;  %v3166_v63 = vadd.f32 %v10177_v46, %v3165_v50  ;;  %v4172_v25 = vadd.f32 1.0, %v7540_v14  ;;  %v2867_v31 = vmul.f32 %v10209_v19, %v10209_v19 }
 0x37a   :  { %v7544_v16 = vpop.eup %7543  ;;  %v4014_v44 = vmul.f32 %v3884_v62, %v3884_v62  ;;  %7545 = vtanh.f32 %v4109_v38  ;;  %v3025_v7 = vadd.f32 1.0, %v7542_v12  ;;  %v3982_v52 = vmul.f32 0.7978846, %v3884_v62 }
 0x37b   :  { %3244 = vst.msk [vmem:[%s11898_s9 + $0x108] sm:$0xff] %vm1622_vm1, %v3166_v63  ;;  %v3637_v18 = vadd.f32 1.0, %v3605_v5  ;;  %v4204_v45 = vmul.f32 %v4172_v25, %v3948_v2  ;;  %7547 = vtanh.f32 %v2962_v26  ;;  %v2899_v22 = vmul.f32 0.044715, %v2867_v31 }
 0x37c   :  { %v4046_v4 = vmul.f32 0.044715, %v4014_v44  ;;  %v3475_v28 = vpop.f32.mrf.mxu0  ;;  %v3731_v23 = vadd.f32 1.0, %v7544_v16  ;;  %7549 = vtanh.f32 %v3668_v51  ;;  %v2835_v21 = vmul.f32 0.7978846, %v10209_v19  ;;  %v4911_v51 = vld [vmem:[%s11890_s0 + $0x380] sm:$0xff] }
 0x37d   :  { %v3669_v30 = vmul.f32 %v3637_v18, %v3541_v53  ;;  %v4232_v9 = vpack.c.bf16 %v4204_v45, %v4203_v41  ;;  %v2931_v17 = vadd.f32 1.0, %v2899_v22  ;;  %v3057_v54 = vmul.f32 %v3025_v7, %v10185_v61  ;;  %v10287_v18 = vld [vmem:[%s11895_s6] ss:$0 sm:$0xff] }
 0x37e   :  { %v4078_v1 = vadd.f32 1.0, %v4046_v4  ;;  %v2757_v2 = vpop.f32.mrf.mxu2  ;;  %v10238_v0 = vadd.f32 %v3475_v28, %v9247_v42  ;;  %v3763_v11 = vmul.f32 %v3731_v23, %v10188_v58  ;;  %v2802_v8 = vmul.f32 0.5, %v10172_v33  ;;  %v4947_v33 = vld [vmem:[%s11891_s2] sm:$0x1] }
 0x37f   :  { %v10235_v13 = vadd.f32 %v9876_v3, %v2757_v2  ;;  %v2963_v43 = vmul.f32 %v2931_v17, %v2835_v21  ;;  %7551 = vtanh.f32 %v3669_v30  ;;  %4336 = vmatmul.bf16.gmra.mxu2 %v4232_v9  ;;  %v3079_v61 = vpack.c.bf16 %v3057_v54, %v3056_v32 }
 0x380   :  { %v4110_v24 = vmul.f32 %v4078_v1, %v3982_v52  ;;  %v3886_v27 = vpop.f32.mrf.mxu1  ;;  %v3168_v39 = vpop.f32.mrf.mxu3  ;;  %6894 = vmatmul.msk.bf16.gmra.mxu0 %vm101_vm0, %v4934_v55  ;;  %v3762_v10 = vmul.f32 %v3730_v35, %v10181_v40  ;;  %v10249_v49 = vmul.f32 0.5, %v3884_v62  ;;  %v10252_v57 = vmul.f32 0.5, %v10194_v29 }
 0x381   :  { %v10243_v56 = vadd.f32 %v3886_v27, %v9888_v47  ;;  %v7546_v20 = vpop.eup %7545  ;;  %v2868_v3 = vmul.f32 %v10235_v13, %v10235_v13  ;;  %3207 = vmatmul.bf16.gmra.mxu3 %v3079_v61  ;;  %v3574_v14 = vmul.f32 %v10238_v0, %v10238_v0  ;;  %v3169_v38 = vadd.f32 %v10177_v46, %v3168_v39 }
 0x382   :  { %7553 = vtanh.f32 %v4110_v24  ;;  %v7548_v58 = vpop.eup %7547  ;;  %v3781_v40 = vpack.c.bf16 %v3763_v11, %v3762_v10  ;;  %v2803_v50 = vmul.f32 0.5, %v10209_v19  ;;  %v2836_v60 = vmul.f32 0.7978846, %v10235_v13  ;;  %v7079_v19 = vld [vmem:[%s11892_s3] sm:$0xff] }
 0x383   :  { %7555 = vtanh.f32 %v2963_v43  ;;  %v4015_v59 = vmul.f32 %v10243_v56, %v10243_v56  ;;  %v2900_v36 = vmul.f32 0.044715, %v2868_v3  ;;  %v7550_v62 = vpop.eup %7549  ;;  %v4173_v12 = vadd.f32 1.0, %v7546_v20  ;;  %3245 = vst.msk [vmem:[%s11898_s9 + $0x110] sm:$0xff] %vm1622_vm1, %v3169_v38  ;;  %5479 = vmatpush.bf16.msrb.mxu1 %v7079_v19 }
 0x384   :  { %v3477_v48 = vpop.f32.mrf.mxu0  ;;  %v3606_v5 = vmul.f32 0.044715, %v3574_v14  ;;  %3925 = vmatmul.bf16.gmra.mxu1 %v3781_v40  ;;  %v3026_v25 = vadd.f32 1.0, %v7548_v58  ;;  %v3983_v44 = vmul.f32 0.7978846, %v10243_v56  ;;  %v10275_v35 = vperm.slane %v4947_v33, 0 }
 0x385   :  { %v4047_v29 = vmul.f32 0.044715, %v4015_v59  ;;  %v2932_v26 = vadd.f32 1.0, %v2900_v36  ;;  %v10269_v63 = vadd.f32 %v3477_v48, %v9247_v42  ;;  %v7552_v16 = vpop.eup %7551  ;;  %v4912_v42 = vld [vmem:[%s11890_s0 + $0x388] sm:$0xff]  ;;  %v3542_v55 = vmul.f32 0.7978846, %v10238_v0 }
 0x386   :  { %v2759_v32 = vpop.f32.mrf.mxu2  ;;  %v3638_v6 = vadd.f32 1.0, %v3606_v5  ;;  %v3732_v52 = vadd.f32 1.0, %v7550_v62  ;;  %v4205_v1 = vmul.f32 %v4173_v12, %v10205_v34  ;;  %v3058_v30 = vmul.f32 %v3026_v25, %v2802_v8 }
 0x387   :  { %v4079_v41 = vadd.f32 1.0, %v4047_v29  ;;  %v2964_v53 = vmul.f32 %v2932_v26, %v2836_v60  ;;  %v2760_v45 = vadd.f32 %v10287_v18, %v2759_v32  ;;  %v3575_v23 = vmul.f32 %v10269_v63, %v10269_v63 }
 0x388   :  { %v7554_v31 = vpop.eup %7553  ;;  %v3888_v4 = vpop.f32.mrf.mxu1  ;;  %v3733_v9 = vadd.f32 1.0, %v7552_v16  ;;  %v4935_v21 = vpack.c.bf16 %v4912_v42, %v4911_v51  ;;  %v3670_v17 = vmul.f32 %v3638_v6, %v3542_v55  ;;  %v3543_v54 = vmul.f32 0.7978846, %v10269_v63 }
 0x389   :  { %v3170_v37 = vpop.f32.mrf.mxu3  ;;  %v7556_v22 = vpop.eup %7555  ;;  %v4111_v7 = vmul.f32 %v4079_v41, %v3983_v44  ;;  %v10291_v28 = vadd.f32 %v3888_v4, %v9888_v47  ;;  %7557 = vtanh.f32 %v2964_v53  ;;  %v2837_v24 = vmul.f32 0.7978846, %v2760_v45 }
 0x38a   :  { %v2869_v27 = vmul.f32 %v2760_v45, %v2760_v45  ;;  %v3607_v11 = vmul.f32 0.044715, %v3575_v23  ;;  %v3171_v39 = vadd.f32 %v10177_v46, %v3170_v37  ;;  %v4174_v61 = vadd.f32 1.0, %v7554_v31 }
 0x38b   :  { %v4016_v2 = vmul.f32 %v10291_v28, %v10291_v28  ;;  %7559 = vtanh.f32 %v4111_v7  ;;  %v3027_v20 = vadd.f32 1.0, %v7556_v22  ;;  %v3984_v8 = vmul.f32 0.7978846, %v10291_v28 }
 0x38c   :  { %v2901_v3 = vmul.f32 0.044715, %v2869_v27  ;;  %v3639_v10 = vadd.f32 1.0, %v3607_v11  ;;  %3246 = vst.msk [vmem:[%s11898_s9 + $0x118] sm:$0xff] %vm1622_vm1, %v3171_v39  ;;  %v3765_v58 = vmul.f32 %v3733_v9, %v10252_v57  ;;  %7561 = vtanh.f32 %v3670_v17 }
 0x38d   :  { %v4048_v43 = vmul.f32 0.044715, %v4016_v2  ;;  %v5020_v34 = vpop.f32.mrf.mxu0  ;;  %v4206_v33 = vmul.f32 %v4174_v61, %v10249_v49  ;;  %v3059_v14 = vmul.f32 %v3027_v20, %v2803_v50  ;;  %v3764_v29 = vmul.f32 %v3732_v52, %v10196_v15 }
 0x38e   :  { %v2762_v36 = vpop.f32.mrf.mxu2  ;;  %v2933_v40 = vadd.f32 1.0, %v2901_v3  ;;  %v10312_v60 = vadd.f32 %v5020_v34, %v10275_v35  ;;  %v3671_v25 = vmul.f32 %v3639_v10, %v3543_v54  ;;  %v10319_v44 = vmul.f32 0.5, %v10235_v13 }
 0x38f   :  { %v4080_v59 = vadd.f32 1.0, %v4048_v43  ;;  %v10308_v62 = vadd.f32 %v10287_v18, %v2762_v36  ;;  %v7558_v57 = vpop.eup %7557  ;;  %v4233_v49 = vpack.c.bf16 %v4206_v33, %v4205_v1  ;;  %v3080_v50 = vpack.c.bf16 %v3059_v14, %v3058_v30 }
 0x390   :  { %v3891_v38 = vpop.f32.mrf.mxu1  ;;  %6895 = vmatmul.msk.bf16.gmra.mxu0 %vm101_vm0, %v4935_v21  ;;  %v2965_v5 = vmul.f32 %v2933_v40, %v2837_v24  ;;  %v3782_v19 = vpack.c.bf16 %v3765_v58, %v3764_v29  ;;  %v10322_v15 = vmul.f32 0.5, %v10238_v0  ;;  %v3951_v32 = vmul.f32 0.5, %v10243_v56  ;;  %v10338_v56 = vld [vmem:[%s11890_s0 + $0x390] sm:$0xff]  ;;  %v7091_v29 = vld [vmem:[%s11894_s5 + $0x20] sm:$0xff] }
 0x391   :  { %v3173_v48 = vpop.f32.mrf.mxu3  ;;  %v4112_v12 = vmul.f32 %v4080_v59, %v3984_v8  ;;  %v10316_v26 = vadd.f32 %v3891_v38, %v9888_v47  ;;  %v7560_v16 = vpop.eup %7559  ;;  %4341 = vmatmul.bf16.gmra.mxu2 %v4233_v49  ;;  %3212 = vmatmul.bf16.gmra.mxu3 %v3080_v50  ;;  %v10328_v51 = vmul.f32 0.5, %v10269_v63  ;;  %v2870_v42 = vmul.f32 %v10308_v62, %v10308_v62  ;;  %v10343_v63 = vld [vmem:[%s11890_s0 + $0x398] sm:$0xff] }
 0x392   :  { %v7562_v13 = vpop.eup %7561  ;;  %v2805_v31 = vmul.f32 0.5, %v2760_v45  ;;  %v5164_v0 = vmul.f32 %v10312_v60, %v10312_v60  ;;  %v3174_v55 = vadd.f32 %v10177_v46, %v3173_v48  ;;  %v3952_v22 = vmul.f32 0.5, %v10291_v28  ;;  %v7070_v48 = vld [vmem:[%s11896_s7 + $0x8] sm:$0xff]  ;;  %5936 = vmatpush.bf16.msrb.mxu2 %v7091_v29 }
 0x393   :  { %7563 = vtanh.f32 %v4112_v12  ;;  %v4017_v41 = vmul.f32 %v10316_v26, %v10316_v26  ;;  %v3985_v4 = vmul.f32 0.7978846, %v10316_v26  ;;  %v2902_v45 = vmul.f32 0.044715, %v2870_v42  ;;  %4780 = vmatpush.bf16.msra.mxu3 %v7070_v48 }
 0x394   :  { %7565 = vtanh.f32 %v2965_v5  ;;  %3930 = vmatmul.bf16.gmra.mxu1 %v3782_v19  ;;  %v5196_v23 = vmul.f32 0.044715, %v5164_v0  ;;  %3247 = vst.msk [vmem:[%s11898_s9 + $0x120] sm:$0xff] %vm1622_vm1, %v3174_v55  ;;  %v4175_v1 = vadd.f32 1.0, %v7560_v16  ;;  %v5132_v9 = vmul.f32 0.7978846, %v10312_v60 }
 0x395   :  { %v4049_v53 = vmul.f32 0.044715, %v4017_v41  ;;  %v5022_v6 = vpop.f32.mrf.mxu0  ;;  %7567 = vtanh.f32 %v3671_v25  ;;  %v2934_v30 = vadd.f32 1.0, %v2902_v45  ;;  %v4936_v28 = vpack.c.bf16 %v10343_v63, %v10338_v56 }
 0x396   :  { %v10347_v37 = vadd.f32 %v5022_v6, %v10275_v35  ;;  %v2764_v52 = vpop.f32.mrf.mxu2  ;;  %v5228_v27 = vadd.f32 1.0, %v5196_v23  ;;  %v2838_v61 = vmul.f32 0.7978846, %v10308_v62  ;;  %v3028_v34 = vadd.f32 1.0, %v7558_v57 }
 0x397   :  { %v4081_v7 = vadd.f32 1.0, %v4049_v53  ;;  %v10356_v17 = vadd.f32 %v10287_v18, %v2764_v52  ;;  %v3734_v8 = vadd.f32 1.0, %v7562_v13  ;;  %v4207_v59 = vmul.f32 %v4175_v1, %v3951_v32 }
 0x398   :  { %v3893_v21 = vpop.f32.mrf.mxu1  ;;  %v5165_v39 = vmul.f32 %v10347_v37, %v10347_v37  ;;  %v5260_v3 = vmul.f32 %v5228_v27, %v5132_v9  ;;  %v5133_v58 = vmul.f32 0.7978846, %v10347_v37  ;;  %v2966_v36 = vmul.f32 %v2934_v30, %v2838_v61 }
 0x399   :  { %v3175_v2 = vpop.f32.mrf.mxu3  ;;  %v7564_v54 = vpop.eup %7563  ;;  %v4113_v24 = vmul.f32 %v4081_v7, %v3985_v4  ;;  %v10361_v11 = vadd.f32 %v3893_v21, %v9888_v47  ;;  %v2871_v20 = vmul.f32 %v10356_v17, %v10356_v17  ;;  %v2839_v10 = vmul.f32 0.7978846, %v10356_v17 }
 0x39a   :  { %v7566_v43 = vpop.eup %7565  ;;  %v5197_v38 = vmul.f32 0.044715, %v5165_v39  ;;  %v3176_v57 = vadd.f32 %v10177_v46, %v3175_v2  ;;  %v4176_v12 = vadd.f32 1.0, %v7564_v54  ;;  %v3060_v32 = vmul.f32 %v3028_v34, %v10319_v44 }
 0x39b   :  { %v7568_v33 = vpop.eup %7567  ;;  %v4018_v14 = vmul.f32 %v10361_v11, %v10361_v11  ;;  %v2903_v40 = vmul.f32 0.044715, %v2871_v20  ;;  %7569 = vtanh.f32 %v4113_v24  ;;  %v3029_v49 = vadd.f32 1.0, %v7566_v43 }
 0x39c   :  { %7571 = vtanh.f32 %v5260_v3  ;;  %v5229_v19 = vadd.f32 1.0, %v5197_v38  ;;  %3248 = vst.msk [vmem:[%s11898_s9 + $0x128] sm:$0xff] %vm1622_vm1, %v3176_v57  ;;  %v4208_v16 = vmul.f32 %v4176_v12, %v3952_v22  ;;  %v3735_v13 = vadd.f32 1.0, %v7568_v33 }
 0x39d   :  { %v5025_v50 = vpop.f32.mrf.mxu0  ;;  %v4050_v5 = vmul.f32 0.044715, %v4018_v14  ;;  %v2935_v25 = vadd.f32 1.0, %v2903_v40  ;;  %v3061_v42 = vmul.f32 %v3029_v49, %v2805_v31  ;;  %v3986_v53 = vmul.f32 0.7978846, %v10361_v11 }
 0x39e   :  { %v2767_v41 = vpop.f32.mrf.mxu2  ;;  %v5261_v55 = vmul.f32 %v5229_v19, %v5133_v58  ;;  %v4234_v45 = vpack.c.bf16 %v4208_v16, %v4207_v59  ;;  %v3767_v44 = vmul.f32 %v3735_v13, %v10328_v51  ;;  %7573 = vtanh.f32 %v2966_v36 }
 0x39f   :  { %v4082_v0 = vadd.f32 1.0, %v4050_v5  ;;  %v10386_v56 = vadd.f32 %v10287_v18, %v2767_v41  ;;  %v3081_v22 = vpack.c.bf16 %v3061_v42, %v3060_v32  ;;  %v2967_v7 = vmul.f32 %v2935_v25, %v2839_v10 }
 0x3a0   :  { %v3896_v6 = vpop.f32.mrf.mxu1  ;;  %6896 = vmatmul.msk.bf16.gmra.mxu0 %vm101_vm0, %v4936_v28  ;;  %v3766_v23 = vmul.f32 %v3734_v8, %v10322_v15  ;;  %v10395_v1 = vmul.f32 0.5, %v10308_v62  ;;  %7575 = vtanh.f32 %v5261_v55  ;;  %v3953_v21 = vmul.f32 0.5, %v10316_v26 }
 0x3a1   :  { %v3178_v63 = vpop.f32.mrf.mxu3  ;;  %v10390_v4 = vadd.f32 %v3896_v6, %v9888_v47  ;;  %v4114_v31 = vmul.f32 %v4082_v0, %v3986_v53  ;;  %v7570_v52 = vpop.eup %7569  ;;  %4346 = vmatmul.bf16.gmra.mxu2 %v4234_v45  ;;  %3217 = vmatmul.bf16.gmra.mxu3 %v3081_v22  ;;  %v2872_v51 = vmul.f32 %v10386_v56, %v10386_v56  ;;  %v5100_v15 = vmul.f32 0.5, %v10312_v60 }
 0x3a2   :  { %v7572_v9 = vpop.eup %7571  ;;  %v3783_v2 = vpack.c.bf16 %v3767_v44, %v3766_v23  ;;  %v10404_v62 = vadd.f32 %v5025_v50, %v10275_v35  ;;  %v3179_v54 = vadd.f32 %v10177_v46, %v3178_v63  ;;  %v5101_v27 = vmul.f32 0.5, %v10347_v37 }
 0x3a3   :  { %v4019_v30 = vmul.f32 %v10390_v4, %v10390_v4  ;;  %7577 = vtanh.f32 %v4114_v31  ;;  %v2904_v39 = vmul.f32 0.044715, %v2872_v51  ;;  %v5324_v43 = vadd.f32 1.0, %v7572_v9 }
 0x3a4   :  { %7579 = vtanh.f32 %v2967_v7  ;;  %3935 = vmatmul.bf16.gmra.mxu1 %v3783_v2  ;;  %v3987_v61 = vmul.f32 0.7978846, %v10390_v4  ;;  %v5166_v60 = vmul.f32 %v10404_v62, %v10404_v62  ;;  %3249 = vst.msk [vmem:[%s11898_s9 + $0x130] sm:$0xff] %vm1622_vm1, %v3179_v54  ;;  %v7574_v8 = vpop.eup %7573  ;;  %v2807_v37 = vmul.f32 0.5, %v10356_v17 }
 0x3a5   :  { %v4051_v28 = vmul.f32 0.044715, %v4019_v30  ;;  %v5027_v24 = vpop.f32.mrf.mxu0  ;;  %v2840_v3 = vmul.f32 0.7978846, %v10386_v56  ;;  %v2936_v10 = vadd.f32 1.0, %v2904_v39  ;;  %v3954_v17 = vmul.f32 0.5, %v10361_v11 }
 0x3a6   :  { %v10409_v26 = vadd.f32 %v5027_v24, %v10275_v35  ;;  %v2769_v34 = vpop.f32.mrf.mxu2  ;;  %v7576_v36 = vpop.eup %7575  ;;  %v5198_v40 = vmul.f32 0.044715, %v5166_v60  ;;  %v4177_v49 = vadd.f32 1.0, %v7570_v52  ;;  %v5356_v50 = vmul.f32 %v5324_v43, %v5100_v15 }
 0x3a7   :  { %v4083_v20 = vadd.f32 1.0, %v4051_v28  ;;  %v10421_v59 = vadd.f32 %v10287_v18, %v2769_v34  ;;  %v5325_v57 = vadd.f32 1.0, %v7576_v36  ;;  %v2968_v12 = vmul.f32 %v2936_v10, %v2840_v3 }
 0x3a8   :  { %v3898_v58 = vpop.f32.mrf.mxu1  ;;  %v5167_v29 = vmul.f32 %v10409_v26, %v10409_v26  ;;  %v5134_v5 = vmul.f32 0.7978846, %v10404_v62  ;;  %v5230_v25 = vadd.f32 1.0, %v5198_v40  ;;  %v3030_v19 = vadd.f32 1.0, %v7574_v8 }
 0x3a9   :  { %v3180_v33 = vpop.f32.mrf.mxu3  ;;  %v4115_v14 = vmul.f32 %v4083_v20, %v3987_v61  ;;  %v10424_v38 = vadd.f32 %v3898_v58, %v9888_v47  ;;  %v7578_v48 = vpop.eup %7577  ;;  %v5357_v41 = vmul.f32 %v5325_v57, %v5101_v27  ;;  %v2841_v42 = vmul.f32 0.7978846, %v10421_v59 }
 0x3aa   :  { %v7580_v16 = vpop.eup %7579  ;;  %v2873_v13 = vmul.f32 %v10421_v59, %v10421_v59  ;;  %v5199_v11 = vmul.f32 0.044715, %v5167_v29  ;;  %v3181_v53 = vadd.f32 %v10177_v46, %v3180_v33  ;;  %v4178_v0 = vadd.f32 1.0, %v7578_v48 }
 0x3ab   :  { %v4020_v32 = vmul.f32 %v10424_v38, %v10424_v38  ;;  %7581 = vtanh.f32 %v4115_v14  ;;  %v3988_v6 = vmul.f32 0.7978846, %v10424_v38  ;;  %v5262_v22 = vmul.f32 %v5230_v25, %v5134_v5 }
 0x3ac   :  { %7583 = vtanh.f32 %v2968_v12  ;;  %v2905_v45 = vmul.f32 0.044715, %v2873_v13  ;;  %3250 = vst.msk [vmem:[%s11898_s9 + $0x138] sm:$0xff] %vm1622_vm1, %v3181_v53  ;;  %v4209_v44 = vmul.f32 %v4177_v49, %v3953_v21  ;;  %v4210_v31 = vmul.f32 %v4178_v0, %v3954_v17 }
 0x3ad   :  { %v5030_v55 = vpop.f32.mrf.mxu0  ;;  %v4052_v63 = vmul.f32 0.044715, %v4020_v32  ;;  %v3031_v23 = vadd.f32 1.0, %v7580_v16  ;;  %v5388_v52 = vpack.c.bf16 %v5357_v41, %v5356_v50  ;;  %v5231_v2 = vadd.f32 1.0, %v5199_v11 }
 0x3ae   :  { %v2772_v7 = vpop.f32.mrf.mxu2  ;;  %v2937_v9 = vadd.f32 1.0, %v2905_v45  ;;  %v4235_v28 = vpack.c.bf16 %v4210_v31, %v4209_v44  ;;  %v3062_v54 = vmul.f32 %v3030_v19, %v10395_v1  ;;  %v10445_v21 = vadd.f32 %v5030_v55, %v10275_v35  ;;  %v4915_v1 = vld [vmem:[%s11890_s0 + $0x3a0] sm:$0xff] }
 0x3af   :  { %v4084_v30 = vadd.f32 1.0, %v4052_v63  ;;  %v2773_v51 = vadd.f32 %v10287_v18, %v2772_v7  ;;  %v3063_v24 = vmul.f32 %v3031_v23, %v2807_v37  ;;  %7585 = vtanh.f32 %v5262_v22  ;;  %v4916_v37 = vld [vmem:[%s11890_s0 + $0x3a8] sm:$0xff] }
 0x3b0   :  { %v2969_v43 = vmul.f32 %v2937_v9, %v2841_v42  ;;  %v5135_v60 = vmul.f32 0.7978846, %v10409_v26  ;;  %v10455_v10 = vmul.f32 0.5, %v10390_v4  ;;  %v10458_v58 = vmul.f32 0.5, %v10386_v56 }
 0x3b1   :  { %v3901_v15 = vpop.f32.mrf.mxu1  ;;  %v3183_v27 = vpop.f32.mrf.mxu3  ;;  %v4116_v39 = vmul.f32 %v4084_v30, %v3988_v6  ;;  %4351 = vmatmul.bf16.gmra.mxu2 %v4235_v28  ;;  %v2874_v34 = vmul.f32 %v2773_v51, %v2773_v51  ;;  %v3082_v8 = vpack.c.bf16 %v3063_v24, %v3062_v54  ;;  %v10461_v36 = vmul.f32 0.5, %v10404_v62  ;;  %v7090_v30 = vld [vmem:[%s11894_s5 + $0x18] sm:$0xff] }
 0x3b2   :  { %v3902_v61 = vadd.f32 %v3901_v15, %v9888_v47  ;;  %v7582_v20 = vpop.eup %7581  ;;  %v5263_v14 = vmul.f32 %v5231_v2, %v5135_v60  ;;  %v5168_v17 = vmul.f32 %v10445_v21, %v10445_v21  ;;  %v3184_v4 = vadd.f32 %v10177_v46, %v3183_v27  ;;  %5937 = vmatpush.bf16.msrb.mxu2 %v7090_v30 }
 0x3b3   :  { %v7584_v3 = vpop.eup %7583  ;;  %7587 = vtanh.f32 %v4116_v39  ;;  %v2906_v40 = vmul.f32 0.044715, %v2874_v34  ;;  %3222 = vmatmul.bf16.gmra.mxu3 %v3082_v8  ;;  %v4937_v57 = vpack.c.bf16 %v4916_v37, %v4915_v1  ;;  %v2809_v56 = vmul.f32 0.5, %v10421_v59 }
 0x3b4   :  { %v4021_v33 = vmul.f32 %v3902_v61, %v3902_v61  ;;  %7589 = vtanh.f32 %v2969_v43  ;;  %5480 = vmatmul.bf16.vlgmr.msrb.gmra.mxu1 %v5388_v52  ;;  %v10468_v12 = vmul.f32 0.5, %v10409_v26  ;;  %v3956_v5 = vmul.f32 0.5, %v10424_v38  ;;  %3251 = vst.msk [vmem:[%s11898_s9 + $0x140] sm:$0xff] %vm1622_vm1, %v3184_v4 }
 0x3b5   :  { %v5032_v29 = vpop.f32.mrf.mxu0  ;;  %v2938_v62 = vadd.f32 1.0, %v2906_v40  ;;  %v10474_v19 = vmul.f32 0.5, %v2773_v51  ;;  %6897 = vmatmul.msk.bf16.gmra.mxu0 %vm101_vm0, %v4937_v57  ;;  %v7586_v59 = vpop.eup %7585  ;;  %7591 = vtanh.f32 %v5263_v14  ;;  %v2842_v16 = vmul.f32 0.7978846, %v2773_v51 }
 0x3b6   :  { %v4053_v48 = vmul.f32 0.044715, %v4021_v33  ;;  %v2774_v49 = vpop.f32.mrf.mxu2  ;;  %v10471_v50 = vadd.f32 %v5032_v29, %v10275_v35  ;;  %v5200_v41 = vmul.f32 0.044715, %v5168_v17  ;;  %v10486_v11 = vmul.f32 0.5, %v3902_v61 }
 0x3b7   :  { %v10482_v26 = vadd.f32 %v10287_v18, %v2774_v49  ;;  %v3989_v53 = vmul.f32 0.7978846, %v3902_v61  ;;  %v5136_v0 = vmul.f32 0.7978846, %v10445_v21  ;;  %v2970_v63 = vmul.f32 %v2938_v62, %v2842_v16  ;;  %v4917_v16 = vld [vmem:[%s11890_s0 + $0x3b0] sm:$0xff] }
 0x3b8   :  { %v4085_v25 = vadd.f32 1.0, %v4053_v48  ;;  %v5169_v38 = vmul.f32 %v10471_v50, %v10471_v50  ;;  %v4179_v44 = vadd.f32 1.0, %v7582_v20  ;;  %v5137_v7 = vmul.f32 0.7978846, %v10471_v50 }
 0x3b9   :  { %v3903_v32 = vpop.f32.mrf.mxu1  ;;  %v3185_v42 = vpop.f32.mrf.mxu3  ;;  %v2875_v45 = vmul.f32 %v10482_v26, %v10482_v26  ;;  %v3032_v23 = vadd.f32 1.0, %v7584_v3  ;;  %v5326_v52 = vadd.f32 1.0, %v7586_v59  ;;  %v5232_v9 = vadd.f32 1.0, %v5200_v41  ;;  %v4918_v41 = vld [vmem:[%s11890_s0 + $0x3b8] sm:$0xff] }
 0x3ba   :  { %v7588_v13 = vpop.eup %7587  ;;  %v10490_v55 = vadd.f32 %v3903_v32, %v9888_v47  ;;  %v5201_v22 = vmul.f32 0.044715, %v5169_v38  ;;  %v4117_v31 = vmul.f32 %v4085_v25, %v3989_v53  ;;  %v3186_v15 = vadd.f32 %v10177_v46, %v3185_v42 }
 0x3bb   :  { %v7590_v6 = vpop.eup %7589  ;;  %v2907_v2 = vmul.f32 0.044715, %v2875_v45  ;;  %v2843_v24 = vmul.f32 0.7978846, %v10482_v26  ;;  %v4180_v27 = vadd.f32 1.0, %v7588_v13  ;;  %7593 = vtanh.f32 %v2970_v63  ;;  %v7069_v63 = vld [vmem:[%s11896_s7] sm:$0xff] }
 0x3bc   :  { %v4022_v51 = vmul.f32 %v10490_v55, %v10490_v55  ;;  %v3990_v54 = vmul.f32 0.7978846, %v10490_v55  ;;  %v3033_v39 = vadd.f32 1.0, %v7590_v6  ;;  %v7592_v43 = vpop.eup %7591  ;;  %v5233_v60 = vadd.f32 1.0, %v5201_v22  ;;  %3252 = vst.msk [vmem:[%s11898_s9 + $0x148] sm:$0xff] %vm1622_vm1, %v3186_v15  ;;  %4781 = vmatpush.bf16.msra.mxu3 %v7069_v63 }
 0x3bd   :  { %v5035_v28 = vpop.f32.mrf.mxu0  ;;  %v2939_v20 = vadd.f32 1.0, %v2907_v2  ;;  %v4211_v8 = vmul.f32 %v4179_v44, %v10455_v10  ;;  %v4212_v1 = vmul.f32 %v4180_v27, %v3956_v5  ;;  %v3064_v29 = vmul.f32 %v3032_v23, %v10458_v58 }
 0x3be   :  { %v4054_v61 = vmul.f32 0.044715, %v4022_v51  ;;  %v2777_v34 = vpop.f32.mrf.mxu2  ;;  %v3065_v3 = vmul.f32 %v3033_v39, %v2809_v56  ;;  %v5036_v48 = vadd.f32 %v5035_v28, %v10275_v35  ;;  %7595 = vtanh.f32 %v4117_v31 }
 0x3bf   :  { %v2778_v37 = vadd.f32 %v10287_v18, %v2777_v34  ;;  %v2971_v14 = vmul.f32 %v2939_v20, %v2843_v24  ;;  %v4236_v57 = vpack.c.bf16 %v4212_v1, %v4211_v8  ;;  %v5327_v62 = vadd.f32 1.0, %v7592_v43  ;;  %v4261_v20 = vld [vmem:[%s11895_s6] sm:$0x1] }
 0x3c0   :  { %v4086_v33 = vadd.f32 1.0, %v4054_v61  ;;  %v5264_v49 = vmul.f32 %v5232_v9, %v5136_v0  ;;  %v3083_v5 = vpack.c.bf16 %v3065_v3, %v3064_v29  ;;  %v10513_v59 = vmul.f32 0.5, %v10445_v21 }
 0x3c1   :  { %v3906_v40 = vpop.f32.mrf.mxu1  ;;  %v3188_v17 = vpop.f32.mrf.mxu3  ;;  %v2876_v10 = vmul.f32 %v2778_v37, %v2778_v37  ;;  %7597 = vtanh.f32 %v2971_v14  ;;  %v10516_v56 = vmul.f32 0.5, %v10471_v50  ;;  %4356 = vmatmul.bf16.gmra.mxu2 %v4236_v57  ;;  %v5265_v38 = vmul.f32 %v5233_v60, %v5137_v7 }
 0x3c2   :  { %v3907_v4 = vadd.f32 %v3906_v40, %v9888_v47  ;;  %v4118_v25 = vmul.f32 %v4086_v33, %v3990_v54  ;;  %v7594_v32 = vpop.eup %7593  ;;  %v5170_v21 = vmul.f32 %v5036_v48, %v5036_v48  ;;  %v5358_v50 = vmul.f32 %v5326_v52, %v10461_v36 }
 0x3c3   :  { %v2908_v42 = vmul.f32 0.044715, %v2876_v10  ;;  %3227 = vmatmul.bf16.gmra.mxu3 %v3083_v5  ;;  %v5359_v0 = vmul.f32 %v5327_v62, %v10468_v12  ;;  %v3189_v6 = vadd.f32 %v10177_v46, %v3188_v17  ;;  %v2811_v45 = vmul.f32 0.5, %v10482_v26 }
 0x3c4   :  { %v4023_v58 = vmul.f32 %v3907_v4, %v3907_v4  ;;  %7599 = vtanh.f32 %v4118_v25  ;;  %v4938_v22 = vpack.c.bf16 %v4918_v41, %v4917_v16  ;;  %v7596_v7 = vpop.eup %7595  ;;  %v5202_v30 = vmul.f32 0.044715, %v5170_v21 }
 0x3c5   :  { %v5037_v13 = vpop.f32.mrf.mxu0  ;;  %7601 = vtanh.f32 %v5264_v49  ;;  %v2940_v23 = vadd.f32 1.0, %v2908_v42  ;;  %v5389_v36 = vpack.c.bf16 %v5359_v0, %v5358_v50  ;;  %3253 = vst.msk [vmem:[%s11898_s9 + $0x150] sm:$0xff] %vm1622_vm1, %v3189_v6  ;;  %v3958_v52 = vmul.f32 0.5, %v10490_v55 }
 0x3c6   :  { %v4055_v53 = vmul.f32 0.044715, %v4023_v58  ;;  %v2779_v44 = vpop.f32.mrf.mxu2  ;;  %v10532_v31 = vadd.f32 %v5037_v13, %v10275_v35  ;;  %7603 = vtanh.f32 %v5265_v38  ;;  %v10540_v9 = vmul.f32 0.5, %v2778_v37  ;;  %6898 = vmatmul.msk.bf16.gmra.mxu0 %vm101_vm0, %v4938_v22 }
 0x3c7   :  { %v2780_v12 = vadd.f32 %v10287_v18, %v2779_v44  ;;  %v7598_v15 = vpop.eup %7597  ;;  %v10543_v28 = vmul.f32 0.5, %v3907_v4  ;;  %v3991_v54 = vmul.f32 0.7978846, %v3907_v4  ;;  %v2844_v24 = vmul.f32 0.7978846, %v2778_v37  ;;  %5485 = vmatmul.bf16.gmra.mxu1 %v5389_v36 }
 0x3c8   :  { %v4087_v26 = vadd.f32 1.0, %v4055_v53  ;;  %v10548_v39 = vmul.f32 0.5, %v5036_v48  ;;  %v5138_v55 = vmul.f32 0.7978846, %v5036_v48  ;;  %v5171_v61 = vmul.f32 %v10532_v31, %v10532_v31 }
 0x3c9   :  { %v3908_v51 = vpop.f32.mrf.mxu1  ;;  %v3190_v2 = vpop.f32.mrf.mxu3  ;;  %v2877_v43 = vmul.f32 %v2780_v12, %v2780_v12  ;;  %v2972_v60 = vmul.f32 %v2940_v23, %v2844_v24  ;;  %v5234_v34 = vadd.f32 1.0, %v5202_v30  ;;  %v4181_v1 = vadd.f32 1.0, %v7596_v7  ;;  %v4919_v23 = vld [vmem:[%s11890_s0 + $0x3c0] sm:$0xff]  ;;  %v4920_v30 = vld [vmem:[%s11890_s0 + $0x3c8] sm:$0xff] }
 0x3ca   :  { %v10546_v27 = vadd.f32 %v3908_v51, %v9888_v47  ;;  %v7600_v18 = vpop.eup %7599  ;;  %v4119_v3 = vmul.f32 %v4087_v26, %v3991_v54  ;;  %v2845_v33 = vmul.f32 0.7978846, %v2780_v12  ;;  %v3191_v40 = vadd.f32 %v10177_v46, %v3190_v2 }
 0x3cb   :  { %v7602_v37 = vpop.eup %7601  ;;  %v2909_v14 = vmul.f32 0.044715, %v2877_v43  ;;  %v4182_v4 = vadd.f32 1.0, %v7600_v18  ;;  %v3034_v57 = vadd.f32 1.0, %v7594_v32  ;;  %v5203_v25 = vmul.f32 0.044715, %v5171_v61 }
 0x3cc   :  { %v4024_v8 = vmul.f32 %v10546_v27, %v10546_v27  ;;  %v3992_v48 = vmul.f32 0.7978846, %v10546_v27  ;;  %v7604_v62 = vpop.eup %7603  ;;  %3254 = vst.msk [vmem:[%s11898_s9 + $0x158] sm:$0xff] %vm1622_vm1, %v3191_v40  ;;  %v3035_v10 = vadd.f32 1.0, %v7598_v15  ;;  %v10563_v5 = vperm.slane %v4261_v20, 0 }
 0x3cd   :  { %v5040_v29 = vpop.f32.mrf.mxu0  ;;  %v2941_v49 = vadd.f32 1.0, %v2909_v14  ;;  %v4213_v46 = vmul.f32 %v4181_v1, %v10486_v11  ;;  %v4214_v41 = vmul.f32 %v4182_v4, %v3958_v52  ;;  %v3066_v38 = vmul.f32 %v3034_v57, %v10474_v19  ;;  %v10597_v15 = vld [vmem:[%s11897_s8] ss:$0 sm:$0xff] }
 0x3ce   :  { %v4056_v17 = vmul.f32 0.044715, %v4024_v8  ;;  %v4322_v58 = vpop.f32.mrf.mxu2  ;;  %v3067_v21 = vmul.f32 %v3035_v10, %v2811_v45  ;;  %v10571_v53 = vadd.f32 %v5040_v29, %v10275_v35  ;;  %7605 = vtanh.f32 %v2972_v60 }
 0x3cf   :  { %v2973_v42 = vmul.f32 %v2941_v49, %v2845_v33  ;;  %v10568_v13 = vadd.f32 %v4322_v58, %v10563_v5  ;;  %v4237_v6 = vpack.c.bf16 %v4214_v41, %v4213_v46  ;;  %7607 = vtanh.f32 %v4119_v3 }
 0x3d0   :  { %v4088_v16 = vadd.f32 1.0, %v4056_v17  ;;  %v10577_v11 = vmul.f32 0.5, %v10532_v31  ;;  %v5235_v19 = vadd.f32 1.0, %v5203_v25  ;;  %v3084_v63 = vpack.c.bf16 %v3067_v21, %v3066_v38 }
 0x3d1   :  { %v3911_v32 = vpop.f32.mrf.mxu1  ;;  %v10579_v45 = vmul.f32 0.5, %v2780_v12  ;;  %7609 = vtanh.f32 %v2973_v42  ;;  %v5139_v44 = vmul.f32 0.7978846, %v10532_v31  ;;  %4361 = vmatmul.bf16.gmra.mxu2 %v4237_v6  ;;  %v5266_v36 = vmul.f32 %v5234_v34, %v5138_v55 }
 0x3d2   :  { %v4120_v50 = vmul.f32 %v4088_v16, %v3992_v48  ;;  %v10574_v0 = vadd.f32 %v3911_v32, %v9888_v47  ;;  %v3193_v22 = vpop.f32.mrf.mxu3  ;;  %v4466_v12 = vmul.f32 %v10568_v13, %v10568_v13  ;;  %v5172_v31 = vmul.f32 %v10571_v53, %v10571_v53 }
 0x3d3   :  { %3232 = vmatmul.bf16.gmra.mxu3 %v3084_v63  ;;  %v5328_v51 = vadd.f32 1.0, %v7602_v37  ;;  %v5329_v2 = vadd.f32 1.0, %v7604_v62  ;;  %v3194_v54 = vadd.f32 %v10597_v15, %v3193_v22  ;;  %v3960_v24 = vmul.f32 0.5, %v10546_v27 }
 0x3d4   :  { %v4025_v7 = vmul.f32 %v10574_v0, %v10574_v0  ;;  %7611 = vtanh.f32 %v4120_v50  ;;  %v5267_v18 = vmul.f32 %v5235_v19, %v5139_v44  ;;  %v4498_v55 = vmul.f32 0.044715, %v4466_v12  ;;  %v7606_v20 = vpop.eup %7605  ;;  %v7089_v19 = vld [vmem:[%s11894_s5 + $0x10] sm:$0xff] }
 0x3d5   :  { %v5042_v52 = vpop.f32.mrf.mxu0  ;;  %v4939_v43 = vpack.c.bf16 %v4920_v30, %v4919_v23  ;;  %v5204_v60 = vmul.f32 0.044715, %v5172_v31  ;;  %v5360_v34 = vmul.f32 %v5328_v51, %v10513_v59  ;;  %v5361_v8 = vmul.f32 %v5329_v2, %v10516_v56  ;;  %3255 = vst.msk [vmem:[%s11898_s9 + $0x160] sm:$0xff] %vm1622_vm1, %v3194_v54  ;;  %v7608_v37 = vpop.eup %7607  ;;  %5938 = vmatpush.bf16.msrb.mxu2 %v7089_v19 }
 0x3d6   :  { %v4057_v26 = vmul.f32 0.044715, %v4025_v7  ;;  %v4324_v61 = vpop.f32.mrf.mxu2  ;;  %7613 = vtanh.f32 %v5266_v36  ;;  %v4434_v27 = vmul.f32 0.7978846, %v10568_v13  ;;  %v4530_v3 = vadd.f32 1.0, %v4498_v55 }
 0x3d7   :  { %v10608_v1 = vadd.f32 %v4324_v61, %v10563_v5  ;;  %6899 = vmatmul.msk.bf16.gmra.mxu0 %vm101_vm0, %v4939_v43  ;;  %v10613_v59 = vadd.f32 %v5042_v52, %v10275_v35  ;;  %v7610_v56 = vpop.eup %7609  ;;  %v3993_v14 = vmul.f32 0.7978846, %v10574_v0  ;;  %v5390_v29 = vpack.c.bf16 %v5361_v8, %v5360_v34  ;;  %v7102_v52 = vld [vmem:[%s11896_s7 + $0x38] sm:$0xff] }
 0x3d8   :  { %v4089_v40 = vadd.f32 1.0, %v4057_v26  ;;  %7615 = vtanh.f32 %v5267_v18  ;;  %v4562_v4 = vmul.f32 %v4530_v3, %v4434_v27  ;;  %v5140_v57 = vmul.f32 0.7978846, %v10571_v53  ;;  %6394 = vmatpush.bf16.msrb.mxu3 %v7102_v52 }
 0x3d9   :  { %v3913_v33 = vpop.f32.mrf.mxu1  ;;  %v4467_v62 = vmul.f32 %v10608_v1, %v10608_v1  ;;  %v5236_v25 = vadd.f32 1.0, %v5204_v60  ;;  %5490 = vmatmul.bf16.gmra.mxu1 %v5390_v29  ;;  %v4435_v16 = vmul.f32 0.7978846, %v10608_v1  ;;  %v5173_v41 = vmul.f32 %v10613_v59, %v10613_v59 }
 0x3da   :  { %v10617_v48 = vadd.f32 %v3913_v33, %v9888_v47  ;;  %v7612_v17 = vpop.eup %7611  ;;  %v3195_v49 = vpop.f32.mrf.mxu3  ;;  %7617 = vtanh.f32 %v4562_v4  ;;  %v4121_v32 = vmul.f32 %v4089_v40, %v3993_v14  ;;  %v4183_v50 = vadd.f32 1.0, %v7608_v37  ;;  %v4922_v14 = vld [vmem:[%s11890_s0 + $0x3d8] sm:$0xff] }
 0x3db   :  { %v4499_v46 = vmul.f32 0.044715, %v4467_v62  ;;  %v3196_v38 = vadd.f32 %v10597_v15, %v3195_v49  ;;  %v4184_v6 = vadd.f32 1.0, %v7612_v17  ;;  %v5205_v44 = vmul.f32 0.044715, %v5173_v41 }
 0x3dc   :  { %v3994_v10 = vmul.f32 0.7978846, %v10617_v48  ;;  %v4026_v58 = vmul.f32 %v10617_v48, %v10617_v48  ;;  %v7614_v63 = vpop.eup %7613  ;;  %v3036_v7 = vadd.f32 1.0, %v7606_v20  ;;  %v3037_v23 = vadd.f32 1.0, %v7610_v56  ;;  %v4921_v56 = vld [vmem:[%s11890_s0 + $0x3d0] sm:$0xff] }
 0x3dd   :  { %v5045_v42 = vpop.f32.mrf.mxu0  ;;  %v4531_v22 = vadd.f32 1.0, %v4499_v46  ;;  %3256 = vst.msk [vmem:[%s11898_s9 + $0x168] sm:$0xff] %vm1622_vm1, %v3196_v38  ;;  %v4215_v36 = vmul.f32 %v4183_v50, %v10543_v28  ;;  %v4216_v12 = vmul.f32 %v4184_v6, %v3960_v24  ;;  %v5268_v51 = vmul.f32 %v5236_v25, %v5140_v57 }
 0x3de   :  { %v4058_v21 = vmul.f32 0.044715, %v4026_v58  ;;  %v10638_v31 = vadd.f32 %v5045_v42, %v10275_v35  ;;  %v7616_v26 = vpop.eup %7615  ;;  %v3068_v54 = vmul.f32 %v3036_v7, %v10540_v9  ;;  %v3069_v18 = vmul.f32 %v3037_v23, %v10579_v45 }
 0x3df   :  { %v4563_v2 = vmul.f32 %v4531_v22, %v4435_v16  ;;  %v10646_v55 = vmul.f32 0.5, %v10571_v53  ;;  %v5237_v24 = vadd.f32 1.0, %v5205_v44  ;;  %v4238_v61 = vpack.c.bf16 %v4216_v12, %v4215_v36 }
 0x3e0   :  { %v4090_v30 = vadd.f32 1.0, %v4058_v21  ;;  %v7618_v20 = vpop.eup %7617  ;;  %v4402_v60 = vmul.f32 0.5, %v10568_v13  ;;  %v3085_v8 = vpack.c.bf16 %v3069_v18, %v3068_v54  ;;  %v5141_v9 = vmul.f32 0.7978846, %v10613_v59 }
 0x3e1   :  { %v3916_v43 = vpop.f32.mrf.mxu1  ;;  %7619 = vtanh.f32 %v4563_v2  ;;  %v4327_v37 = vpop.f32.mrf.mxu2  ;;  %4366 = vmatmul.bf16.gmra.mxu2 %v4238_v61  ;;  %v5174_v45 = vmul.f32 %v10638_v31, %v10638_v31  ;;  %v10659_v27 = vmul.f32 0.5, %v10574_v0  ;;  %v4403_v13 = vmul.f32 0.5, %v10608_v1 }
 0x3e2   :  { %v4122_v28 = vmul.f32 %v4090_v30, %v3994_v10  ;;  %v10650_v34 = vadd.f32 %v3916_v43, %v9888_v47  ;;  %7621 = vtanh.f32 %v4121_v32  ;;  %v10654_v53 = vadd.f32 %v4327_v37, %v10563_v5 }
 0x3e3   :  { %7623 = vtanh.f32 %v5268_v51  ;;  %3237 = vmatmul.bf16.gmra.mxu3 %v3085_v8  ;;  %v3198_v33 = vpop.f32.mrf.mxu3  ;;  %v4626_v29 = vadd.f32 1.0, %v7618_v20  ;;  %v5269_v0 = vmul.f32 %v5237_v24, %v5141_v9  ;;  %v5206_v4 = vmul.f32 0.044715, %v5174_v45 }
 0x3e4   :  { %v4027_v3 = vmul.f32 %v10650_v34, %v10650_v34  ;;  %7625 = vtanh.f32 %v4122_v28  ;;  %v4468_v1 = vmul.f32 %v10654_v53, %v10654_v53  ;;  %v5330_v57 = vadd.f32 1.0, %v7614_v63 }
 0x3e5   :  { %v5047_v40 = vpop.f32.mrf.mxu0  ;;  %v5331_v62 = vadd.f32 1.0, %v7616_v26  ;;  %v3199_v25 = vadd.f32 %v10597_v15, %v3198_v33  ;;  %v4940_v10 = vpack.c.bf16 %v4922_v14, %v4921_v56  ;;  %v3995_v46 = vmul.f32 0.7978846, %v10650_v34 }
 0x3e6   :  { %v4059_v17 = vmul.f32 0.044715, %v4027_v3  ;;  %v4500_v49 = vmul.f32 0.044715, %v4468_v1  ;;  %v10674_v58 = vadd.f32 %v5047_v40, %v10275_v35  ;;  %v5362_v38 = vmul.f32 %v5330_v57, %v10548_v39 }
 0x3e7   :  { %v7620_v16 = vpop.eup %7619  ;;  %v5363_v42 = vmul.f32 %v5331_v62, %v10577_v11  ;;  %7627 = vtanh.f32 %v5269_v0  ;;  %v5238_v6 = vadd.f32 1.0, %v5206_v4  ;;  %3257 = vst.msk [vmem:[%s11898_s9 + $0x170] sm:$0xff] %vm1622_vm1, %v3199_v25  ;;  %6900 = vmatmul.msk.bf16.gmra.mxu0 %vm101_vm0, %v4940_v10  ;;  %v4436_v44 = vmul.f32 0.7978846, %v10654_v53 }
 0x3e8   :  { %v4091_v41 = vadd.f32 1.0, %v4059_v17  ;;  %v7622_v32 = vpop.eup %7621  ;;  %v4627_v21 = vadd.f32 1.0, %v7620_v16  ;;  %v4532_v50 = vadd.f32 1.0, %v4500_v49  ;;  %v5109_v30 = vmul.f32 0.5, %v10613_v59 }
 0x3e9   :  { %v3918_v19 = vpop.f32.mrf.mxu1  ;;  %v7624_v63 = vpop.eup %7623  ;;  %v5391_v39 = vpack.c.bf16 %v5363_v42, %v5362_v38  ;;  %v5142_v36 = vmul.f32 0.7978846, %v10638_v31  ;;  %v5175_v52 = vmul.f32 %v10674_v58, %v10674_v58  ;;  %v3962_v26 = vmul.f32 0.5, %v10617_v48 }
 0x3ea   :  { %v4123_v22 = vmul.f32 %v4091_v41, %v3995_v46  ;;  %v10686_v11 = vadd.f32 %v3918_v19, %v9888_v47  ;;  %v4329_v7 = vpop.f32.mrf.mxu2  ;;  %v7626_v23 = vpop.eup %7625  ;;  %v4659_v51 = vmul.f32 %v4627_v21, %v4403_v13  ;;  %v4564_v2 = vmul.f32 %v4532_v50, %v4436_v44  ;;  %v4924_v41 = vld [vmem:[%s11890_s0 + $0x3e8] sm:$0xff] }
 0x3eb   :  { %v10691_v12 = vadd.f32 %v4329_v7, %v10563_v5  ;;  %5495 = vmatmul.bf16.gmra.mxu1 %v5391_v39  ;;  %v3200_v18 = vpop.f32.mrf.mxu3  ;;  %v4658_v24 = vmul.f32 %v4626_v29, %v4402_v60  ;;  %v5270_v59 = vmul.f32 %v5238_v6, %v5142_v36  ;;  %v5143_v43 = vmul.f32 0.7978846, %v10674_v58 }
 0x3ec   :  { %v4028_v54 = vmul.f32 %v10686_v11, %v10686_v11  ;;  %7629 = vtanh.f32 %v4123_v22  ;;  %v3996_v61 = vmul.f32 0.7978846, %v10686_v11  ;;  %v5207_v48 = vmul.f32 0.044715, %v5175_v52 }
 0x3ed   :  { %v5050_v28 = vpop.f32.mrf.mxu0  ;;  %v4469_v8 = vmul.f32 %v10691_v12, %v10691_v12  ;;  %v7628_v37 = vpop.eup %7627  ;;  %v3201_v9 = vadd.f32 %v10597_v15, %v3200_v18  ;;  %v4185_v45 = vadd.f32 1.0, %v7622_v32  ;;  %v4186_v13 = vadd.f32 1.0, %v7626_v23 }
 0x3ee   :  { %v4060_v20 = vmul.f32 0.044715, %v4028_v54  ;;  %v10704_v3 = vadd.f32 %v5050_v28, %v10275_v35  ;;  %v4690_v60 = vpack.c.bf16 %v4659_v51, %v4658_v24  ;;  %7631 = vtanh.f32 %v4564_v2 }
 0x3ef   :  { %v4501_v56 = vmul.f32 0.044715, %v4469_v8  ;;  %v5239_v14 = vadd.f32 1.0, %v5207_v48  ;;  %3258 = vst.msk [vmem:[%s11898_s9 + $0x178] sm:$0xff] %vm1622_vm1, %v3201_v9  ;;  %v4217_v29 = vmul.f32 %v4185_v45, %v10659_v27  ;;  %v4218_v0 = vmul.f32 %v4186_v13, %v3962_v26  ;;  %v4923_v27 = vld [vmem:[%s11890_s0 + $0x3e0] sm:$0xff] }
 0x3f0   :  { %v4092_v33 = vadd.f32 1.0, %v4060_v20  ;;  %v5332_v1 = vadd.f32 1.0, %v7624_v63  ;;  %v4437_v4 = vmul.f32 0.7978846, %v10691_v12  ;;  %7633 = vtanh.f32 %v5270_v59 }
 0x3f1   :  { %v3921_v40 = vpop.f32.mrf.mxu1  ;;  %v4533_v57 = vadd.f32 1.0, %v4501_v56  ;;  %v4239_v25 = vpack.c.bf16 %v4218_v0, %v4217_v29  ;;  %v5176_v16 = vmul.f32 %v10704_v3, %v10704_v3  ;;  %v5333_v46 = vadd.f32 1.0, %v7628_v37 }
 0x3f2   :  { %v4124_v17 = vmul.f32 %v4092_v33, %v3996_v61  ;;  %v10713_v62 = vadd.f32 %v3921_v40, %v9888_v47  ;;  %v7630_v49 = vpop.eup %7629  ;;  %v4332_v10 = vpop.f32.mrf.mxu2  ;;  %v10724_v38 = vmul.f32 0.5, %v10650_v34  ;;  %v10727_v42 = vmul.f32 0.5, %v10638_v31 }
 0x3f3   :  { %v4565_v32 = vmul.f32 %v4533_v57, %v4437_v4  ;;  %4782 = vmatmul.bf16.vlgmr.msra.gmra.mxu3 %v4690_v60  ;;  %v3203_v21 = vpop.f32.mrf.mxu3  ;;  %v5271_v6 = vmul.f32 %v5239_v14, %v5143_v43  ;;  %4371 = vmatmul.bf16.gmra.mxu2 %v4239_v25  ;;  %v10732_v63 = vadd.f32 %v4332_v10, %v10563_v5  ;;  %v5208_v44 = vmul.f32 0.044715, %v5176_v16 }
 0x3f4   :  { %7635 = vtanh.f32 %v4124_v17  ;;  %v4029_v19 = vmul.f32 %v10713_v62, %v10713_v62  ;;  %v5364_v22 = vmul.f32 %v5332_v1, %v10646_v55  ;;  %v7632_v34 = vpop.eup %7631  ;;  %v5365_v39 = vmul.f32 %v5333_v46, %v5109_v30  ;;  %v7088_v1 = vld [vmem:[%s11894_s5 + $0x8] sm:$0xff] }
 0x3f5   :  { %v5052_v50 = vpop.f32.mrf.mxu0  ;;  %v3204_v31 = vadd.f32 %v10597_v15, %v3203_v21  ;;  %v4941_v7 = vpack.c.bf16 %v4924_v41, %v4923_v27  ;;  %v4404_v23 = vmul.f32 0.5, %v10654_v53  ;;  %7637 = vtanh.f32 %v4565_v32  ;;  %5939 = vmatpush.bf16.msrb.mxu2 %v7088_v1  ;;  %v7101_v21 = vld [vmem:[%s11896_s7 + $0x30] sm:$0xff] }
 0x3f6   :  { %v4061_v36 = vmul.f32 0.044715, %v4029_v19  ;;  %v4470_v52 = vmul.f32 %v10732_v63, %v10732_v63  ;;  %v3964_v26 = vmul.f32 0.5, %v10686_v11  ;;  %v10741_v51 = vmul.f32 0.5, %v10674_v58  ;;  %v7634_v53 = vpop.eup %7633  ;;  %6395 = vmatpush.bf16.msrb.mxu3 %v7101_v21 }
 0x3f7   :  { %v5392_v2 = vpack.c.bf16 %v5365_v39, %v5364_v22  ;;  %3259 = vst.msk [vmem:[%s11898_s9 + $0x180] sm:$0xff] %vm1622_vm1, %v3204_v31  ;;  %v10748_v55 = vadd.f32 %v5052_v50, %v10275_v35  ;;  %v4405_v30 = vmul.f32 0.5, %v10691_v12  ;;  %v10752_v28 = vmul.f32 0.5, %v10704_v3  ;;  %6901 = vmatmul.msk.bf16.gmra.mxu0 %vm101_vm0, %v4941_v7 }
 0x3f8   :  { %v4093_v54 = vadd.f32 1.0, %v4061_v36  ;;  %v4502_v18 = vmul.f32 0.044715, %v4470_v52  ;;  %7639 = vtanh.f32 %v5271_v6  ;;  %v3997_v24 = vmul.f32 0.7978846, %v10713_v62 }
 0x3f9   :  { %v3923_v58 = vpop.f32.mrf.mxu1  ;;  %v5240_v59 = vadd.f32 1.0, %v5208_v44  ;;  %v5177_v12 = vmul.f32 %v10748_v55, %v10748_v55  ;;  %v4187_v8 = vadd.f32 1.0, %v7630_v49  ;;  %v4438_v9 = vmul.f32 0.7978846, %v10732_v63 }
 0x3fa   :  { %v7636_v11 = vpop.eup %7635  ;;  %v10757_v43 = vadd.f32 %v3923_v58, %v9888_v47  ;;  %v4534_v61 = vadd.f32 1.0, %v4502_v18  ;;  %v4334_v20 = vpop.f32.mrf.mxu2  ;;  %v4125_v37 = vmul.f32 %v4093_v54, %v3997_v24  ;;  %v5144_v45 = vmul.f32 0.7978846, %v10704_v3 }
 0x3fb   :  { %v4188_v48 = vadd.f32 1.0, %v7636_v11  ;;  %5500 = vmatmul.bf16.gmra.mxu1 %v5392_v2  ;;  %v3205_v60 = vpop.f32.mrf.mxu3  ;;  %v7638_v56 = vpop.eup %7637  ;;  %v10766_v14 = vadd.f32 %v4334_v20, %v10563_v5  ;;  %v5209_v40 = vmul.f32 0.044715, %v5177_v12  ;;  %v4628_v29 = vadd.f32 1.0, %v7632_v34 }
 0x3fc   :  { %v4030_v13 = vmul.f32 %v10757_v43, %v10757_v43  ;;  %v5334_v0 = vadd.f32 1.0, %v7634_v53  ;;  %v4566_v17 = vmul.f32 %v4534_v61, %v4438_v9  ;;  %v3206_v3 = vadd.f32 %v10597_v15, %v3205_v60  ;;  %v4926_v61 = vld [vmem:[%s11890_s0 + $0x3f8] sm:$0xff] }
 0x3fd   :  { %v5055_v33 = vpop.f32.mrf.mxu0  ;;  %v4220_v57 = vmul.f32 %v4188_v48, %v3964_v26  ;;  %v5272_v49 = vmul.f32 %v5240_v59, %v5144_v45  ;;  %v4471_v25 = vmul.f32 %v10766_v14, %v10766_v14  ;;  %v5145_v10 = vmul.f32 0.7978846, %v10748_v55  ;;  %v4925_v59 = vld [vmem:[%s11890_s0 + $0x3f0] sm:$0xff] }
 0x3fe   :  { %v4062_v4 = vmul.f32 0.044715, %v4030_v13  ;;  %v4219_v16 = vmul.f32 %v4187_v8, %v10724_v38  ;;  %v7640_v46 = vpop.eup %7639  ;;  %7641 = vtanh.f32 %v4125_v37  ;;  %v3998_v27 = vmul.f32 0.7978846, %v10757_v43  ;;  %3260 = vst.msk [vmem:[%s11898_s9 + $0x188] sm:$0xff] %vm1622_vm1, %v3206_v3 }
 0x3ff   :  { %v4629_v32 = vadd.f32 1.0, %v7638_v56  ;;  %v4503_v50 = vmul.f32 0.044715, %v4471_v25  ;;  %v5241_v6 = vadd.f32 1.0, %v5209_v40  ;;  %v10785_v38 = vadd.f32 %v5055_v33, %v10275_v35 }
 0x400   :  { %v4094_v41 = vadd.f32 1.0, %v4062_v4  ;;  %v4240_v19 = vpack.c.bf16 %v4220_v57, %v4219_v16  ;;  %7643 = vtanh.f32 %v4566_v17  ;;  %v4660_v44 = vmul.f32 %v4628_v29, %v4404_v23 }
 0x401   :  { %v3926_v34 = vpop.f32.mrf.mxu1  ;;  %v4661_v39 = vmul.f32 %v4629_v32, %v4405_v30  ;;  %v4439_v31 = vmul.f32 0.7978846, %v10766_v14  ;;  %v4535_v7 = vadd.f32 1.0, %v4503_v50  ;;  %v5335_v26 = vadd.f32 1.0, %v7640_v46 }
 0x402   :  { %v4126_v22 = vmul.f32 %v4094_v41, %v3998_v27  ;;  %v10789_v36 = vadd.f32 %v3926_v34, %v9888_v47  ;;  %v4337_v52 = vpop.f32.mrf.mxu2  ;;  %v5178_v54 = vmul.f32 %v10785_v38, %v10785_v38  ;;  %v3965_v23 = vmul.f32 0.5, %v10713_v62 }
 0x403   :  { %v10792_v2 = vadd.f32 %v4337_v52, %v10563_v5  ;;  %v4691_v53 = vpack.c.bf16 %v4661_v39, %v4660_v44  ;;  %v10798_v30 = vmul.f32 0.5, %v10732_v63  ;;  %v4567_v58 = vmul.f32 %v4535_v7, %v4439_v31  ;;  %4376 = vmatmul.bf16.gmra.mxu2 %v4240_v19 }
 0x404   :  { %7645 = vtanh.f32 %v4126_v22  ;;  %v5273_v11 = vmul.f32 %v5241_v6, %v5145_v10  ;;  %v3208_v24 = vpop.f32.mrf.mxu3  ;;  %v7642_v20 = vpop.eup %7641  ;;  %v4031_v62 = vmul.f32 %v10789_v36, %v10789_v36  ;;  %v5366_v12 = vmul.f32 %v5334_v0, %v10727_v42 }
 0x405   :  { %v5057_v18 = vpop.f32.mrf.mxu0  ;;  %7647 = vtanh.f32 %v5272_v49  ;;  %v4472_v63 = vmul.f32 %v10792_v2, %v10792_v2  ;;  %4787 = vmatmul.bf16.gmra.mxu3 %v4691_v53  ;;  %v5210_v8 = vmul.f32 0.044715, %v5178_v54  ;;  %v5367_v48 = vmul.f32 %v5335_v26, %v10741_v51 }
 0x406   :  { %7649 = vtanh.f32 %v4567_v58  ;;  %v3209_v37 = vadd.f32 %v10597_v15, %v3208_v24  ;;  %v7644_v9 = vpop.eup %7643  ;;  %v4063_v45 = vmul.f32 0.044715, %v4031_v62  ;;  %v4942_v60 = vpack.c.bf16 %v4926_v61, %v4925_v59 }
 0x407   :  { %v4504_v13 = vmul.f32 0.044715, %v4472_v63  ;;  %v10814_v33 = vadd.f32 %v5057_v18, %v10275_v35  ;;  %7651 = vtanh.f32 %v5273_v11  ;;  %v5146_v56 = vmul.f32 0.7978846, %v10785_v38 }
 0x408   :  { %v5242_v40 = vadd.f32 1.0, %v5210_v8  ;;  %v5393_v29 = vpack.c.bf16 %v5367_v48, %v5366_v12  ;;  %3261 = vst.msk [vmem:[%s11898_s9 + $0x190] sm:$0xff] %vm1622_vm1, %v3209_v37  ;;  %v3999_v51 = vmul.f32 0.7978846, %v10789_v36  ;;  %v4095_v0 = vadd.f32 1.0, %v4063_v45  ;;  %6902 = vmatmul.msk.bf16.gmra.mxu0 %vm101_vm0, %v4942_v60 }
 0x409   :  { %v4536_v1 = vadd.f32 1.0, %v4504_v13  ;;  %v3928_v17 = vpop.f32.mrf.mxu1  ;;  %v4189_v4 = vadd.f32 1.0, %v7642_v20  ;;  %v3966_v3 = vmul.f32 0.5, %v10757_v43  ;;  %v5179_v10 = vmul.f32 %v10814_v33, %v10814_v33 }
 0x40a   :  { %v7646_v42 = vpop.eup %7645  ;;  %v5274_v57 = vmul.f32 %v5242_v40, %v5146_v56  ;;  %v10825_v49 = vadd.f32 %v3928_v17, %v9888_v47  ;;  %v4339_v25 = vpop.f32.mrf.mxu2  ;;  %v4127_v46 = vmul.f32 %v4095_v0, %v3999_v51  ;;  %v4440_v27 = vmul.f32 0.7978846, %v10792_v2 }
 0x40b   :  { %v7648_v16 = vpop.eup %7647  ;;  %5505 = vmatmul.bf16.gmra.mxu1 %v5393_v29  ;;  %v10831_v41 = vadd.f32 %v4339_v25, %v10563_v5  ;;  %v4190_v32 = vadd.f32 1.0, %v7646_v42  ;;  %v4407_v43 = vmul.f32 0.5, %v10766_v14  ;;  %v5147_v19 = vmul.f32 0.7978846, %v10814_v33 }
 0x40c   :  { %v7650_v50 = vpop.eup %7649  ;;  %v4032_v6 = vmul.f32 %v10825_v49, %v10825_v49  ;;  %v3210_v22 = vpop.f32.mrf.mxu3  ;;  %v4630_v34 = vadd.f32 1.0, %v7644_v9  ;;  %v4568_v44 = vmul.f32 %v4536_v1, %v4440_v27  ;;  %7653 = vtanh.f32 %v5274_v57 }
 0x40d   :  { %v5060_v21 = vpop.f32.mrf.mxu0  ;;  %v4473_v39 = vmul.f32 %v10831_v41, %v10831_v41  ;;  %v4221_v31 = vmul.f32 %v4189_v4, %v3965_v23  ;;  %v7652_v7 = vpop.eup %7651  ;;  %v4000_v52 = vmul.f32 0.7978846, %v10825_v49  ;;  %v5211_v53 = vmul.f32 0.044715, %v5179_v10 }
 0x40e   :  { %v4064_v26 = vmul.f32 0.044715, %v4032_v6  ;;  %v3211_v14 = vadd.f32 %v10597_v15, %v3210_v22  ;;  %7655 = vtanh.f32 %v4127_v46  ;;  %v4222_v18 = vmul.f32 %v4190_v32, %v3966_v3 }
 0x40f   :  { %v4505_v54 = vmul.f32 0.044715, %v4473_v39  ;;  %v4631_v58 = vadd.f32 1.0, %v7650_v50  ;;  %v4441_v24 = vmul.f32 0.7978846, %v10831_v41  ;;  %v4662_v23 = vmul.f32 %v4630_v34, %v10798_v30 }
 0x410   :  { %v4096_v11 = vadd.f32 1.0, %v4064_v26  ;;  %3262 = vst.msk [vmem:[%s11898_s9 + $0x198] sm:$0xff] %vm1622_vm1, %v3211_v14  ;;  %v10848_v59 = vadd.f32 %v5060_v21, %v10275_v35  ;;  %v5243_v20 = vadd.f32 1.0, %v5211_v53  ;;  %v4241_v63 = vpack.c.bf16 %v4222_v18, %v4221_v31 }
 0x411   :  { %v4537_v61 = vadd.f32 1.0, %v4505_v54  ;;  %v3931_v62 = vpop.f32.mrf.mxu1  ;;  %v4663_v12 = vmul.f32 %v4631_v58, %v4407_v43  ;;  %v5336_v37 = vadd.f32 1.0, %v7648_v16  ;;  %v5337_v9 = vadd.f32 1.0, %v7652_v7 }
 0x412   :  { %v4128_v8 = vmul.f32 %v4096_v11, %v4000_v52  ;;  %v10851_v48 = vadd.f32 %v3931_v62, %v9888_v47  ;;  %v7654_v45 = vpop.eup %7653  ;;  %7657 = vtanh.f32 %v4568_v44  ;;  %v5180_v30 = vmul.f32 %v10848_v59, %v10848_v59 }
 0x413   :  { %v4569_v13 = vmul.f32 %v4537_v61, %v4441_v24  ;;  %v4692_v60 = vpack.c.bf16 %v4663_v12, %v4662_v23  ;;  %v5113_v40 = vmul.f32 0.5, %v10748_v55  ;;  %v10857_v29 = vmul.f32 0.5, %v10785_v38  ;;  %4381 = vmatmul.bf16.gmra.mxu2 %v4241_v63 }
 0x414   :  { %7659 = vtanh.f32 %v4128_v8  ;;  %v4033_v42 = vmul.f32 %v10851_v48, %v10851_v48  ;;  %v4342_v51 = vpop.f32.mrf.mxu2  ;;  %v3213_v0 = vpop.f32.mrf.mxu3  ;;  %v5275_v17 = vmul.f32 %v5243_v20, %v5147_v19  ;;  %v5212_v3 = vmul.f32 0.044715, %v5180_v30 }
 0x415   :  { %v5062_v56 = vpop.f32.mrf.mxu0  ;;  %v7656_v1 = vpop.eup %7655  ;;  %7661 = vtanh.f32 %v4569_v13  ;;  %v10862_v4 = vadd.f32 %v4342_v51, %v10563_v5  ;;  %4792 = vmatmul.bf16.gmra.mxu3 %v4692_v60  ;;  %v5368_v55 = vmul.f32 %v5336_v37, %v10752_v28  ;;  %v5369_v38 = vmul.f32 %v5337_v9, %v5113_v40 }
 0x416   :  { %v4065_v57 = vmul.f32 0.044715, %v4033_v42  ;;  %v3214_v25 = vadd.f32 %v10597_v15, %v3213_v0  ;;  %v3967_v10 = vmul.f32 0.5, %v10789_v36  ;;  %v4408_v16 = vmul.f32 0.5, %v10792_v2 }
 0x417   :  { %v10869_v46 = vmul.f32 0.5, %v10814_v33  ;;  %v4474_v27 = vmul.f32 %v10862_v4, %v10862_v4  ;;  %v5244_v21 = vadd.f32 1.0, %v5212_v3  ;;  %v5394_v50 = vpack.c.bf16 %v5369_v38, %v5368_v55 }
 0x418   :  { %v4097_v32 = vadd.f32 1.0, %v4065_v57  ;;  %3263 = vst.msk [vmem:[%s11898_s9 + $0x1a0] sm:$0xff] %vm1622_vm1, %v3214_v25  ;;  %v10878_v28 = vadd.f32 %v5062_v56, %v10275_v35  ;;  %v7658_v36 = vpop.eup %7657  ;;  %v3968_v2 = vmul.f32 0.5, %v10825_v49  ;;  %7663 = vtanh.f32 %v5275_v17 }
 0x419   :  { %v4001_v33 = vmul.f32 0.7978846, %v10851_v48  ;;  %v4506_v43 = vmul.f32 0.044715, %v4474_v27  ;;  %v3933_v6 = vpop.f32.mrf.mxu1  ;;  %v4409_v22 = vmul.f32 0.5, %v10831_v41  ;;  %v4191_v39 = vadd.f32 1.0, %v7656_v1 }
 0x41a   :  { %v7660_v19 = vpop.eup %7659  ;;  %v5148_v34 = vmul.f32 0.7978846, %v10848_v59  ;;  %v10885_v44 = vadd.f32 %v3933_v6, %v9888_v47  ;;  %v5181_v49 = vmul.f32 %v10878_v28, %v10878_v28  ;;  %v4442_v14 = vmul.f32 0.7978846, %v10862_v4 }
 0x41b   :  { %v7662_v31 = vpop.eup %7661  ;;  %v4129_v7 = vmul.f32 %v4097_v32, %v4001_v33  ;;  %v4538_v52 = vadd.f32 1.0, %v4506_v43  ;;  %5510 = vmatmul.bf16.gmra.mxu1 %v5394_v50  ;;  %v4192_v26 = vadd.f32 1.0, %v7660_v19  ;;  %v4632_v11 = vadd.f32 1.0, %v7658_v36  ;;  %v7087_v19 = vld [vmem:[%s11894_s5] sm:$0xff] }
 0x41c   :  { %v5276_v54 = vmul.f32 %v5244_v21, %v5148_v34  ;;  %v4034_v41 = vmul.f32 %v10885_v44, %v10885_v44  ;;  %v4344_v18 = vpop.f32.mrf.mxu2  ;;  %v3215_v58 = vpop.f32.mrf.mxu3  ;;  %v5213_v23 = vmul.f32 0.044715, %v5181_v49  ;;  %v5338_v20 = vadd.f32 1.0, %v7654_v45  ;;  %5940 = vmatpush.bf16.msrb.mxu2 %v7087_v19 }
 0x41d   :  { %v5065_v53 = vpop.f32.mrf.mxu0  ;;  %v10893_v24 = vadd.f32 %v4344_v18, %v10563_v5  ;;  %v3216_v61 = vadd.f32 %v10597_v15, %v3215_v58  ;;  %v4223_v63 = vmul.f32 %v4191_v39, %v3967_v10  ;;  %v4224_v12 = vmul.f32 %v4192_v26, %v3968_v2 }
 0x41e   :  { %v4066_v62 = vmul.f32 0.044715, %v4034_v41  ;;  %v4633_v8 = vadd.f32 1.0, %v7662_v31  ;;  %v7664_v37 = vpop.eup %7663  ;;  %7665 = vtanh.f32 %v4129_v7  ;;  %v4570_v9 = vmul.f32 %v4538_v52, %v4442_v14 }
 0x41f   :  { %v4475_v13 = vmul.f32 %v10893_v24, %v10893_v24  ;;  %v5149_v60 = vmul.f32 0.7978846, %v10878_v28  ;;  %3264 = vst.msk [vmem:[%s11898_s9 + $0x1a8] sm:$0xff] %vm1622_vm1, %v3216_v61  ;;  %v4002_v30 = vmul.f32 0.7978846, %v10885_v44  ;;  %v5245_v56 = vadd.f32 1.0, %v5213_v23 }
 0x420   :  { %v4098_v45 = vadd.f32 1.0, %v4066_v62  ;;  %v4242_v40 = vpack.c.bf16 %v4224_v12, %v4223_v63  ;;  %v4664_v0 = vmul.f32 %v4632_v11, %v4408_v16  ;;  %v4665_v1 = vmul.f32 %v4633_v8, %v4409_v22  ;;  %v7100_v22 = vld [vmem:[%s11896_s7 + $0x28] sm:$0xff]  ;;  %v5420_v61 = vld [vmem:[%s11893_s4] sm:$0x1] }
 0x421   :  { %v4507_v42 = vmul.f32 0.044715, %v4475_v13  ;;  %v3936_v51 = vpop.f32.mrf.mxu1  ;;  %v10905_v17 = vadd.f32 %v5065_v53, %v10275_v35  ;;  %7667 = vtanh.f32 %v5276_v54  ;;  %v5339_v55 = vadd.f32 1.0, %v7664_v37  ;;  %6396 = vmatpush.bf16.msrb.mxu3 %v7100_v22 }
 0x422   :  { %v4130_v3 = vmul.f32 %v4098_v45, %v4002_v30  ;;  %v10908_v57 = vadd.f32 %v3936_v51, %v9888_v47  ;;  %7669 = vtanh.f32 %v4570_v9  ;;  %v4443_v38 = vmul.f32 0.7978846, %v10893_v24 }
 0x423   :  { %v4539_v25 = vadd.f32 1.0, %v4507_v42  ;;  %v4693_v10 = vpack.c.bf16 %v4665_v1, %v4664_v0  ;;  %v10912_v32 = vmul.f32 0.5, %v10848_v59  ;;  %v5277_v16 = vmul.f32 %v5245_v56, %v5149_v60  ;;  %4386 = vmatmul.bf16.gmra.mxu2 %v4242_v40 }
 0x424   :  { %7671 = vtanh.f32 %v4130_v3  ;;  %v4035_v21 = vmul.f32 %v10908_v57, %v10908_v57  ;;  %v4347_v50 = vpop.f32.mrf.mxu2  ;;  %v3218_v36 = vpop.f32.mrf.mxu3  ;;  %v5182_v6 = vmul.f32 %v10905_v17, %v10905_v17  ;;  %v5370_v59 = vmul.f32 %v5338_v20, %v10857_v29 }
 0x425   :  { %v5067_v27 = vpop.f32.mrf.mxu0  ;;  %v7666_v2 = vpop.eup %7665  ;;  %v4571_v33 = vmul.f32 %v4539_v25, %v4443_v38  ;;  %v10917_v43 = vadd.f32 %v4347_v50, %v10563_v5  ;;  %4797 = vmatmul.bf16.gmra.mxu3 %v4693_v10  ;;  %v5371_v39 = vmul.f32 %v5339_v55, %v10869_v46  ;;  %v3219_v31 = vadd.f32 %v10597_v15, %v3218_v36 }
 0x426   :  { %v4067_v34 = vmul.f32 0.044715, %v4035_v21  ;;  %v10931_v7 = vadd.f32 %v5067_v27, %v10275_v35  ;;  %v3969_v52 = vmul.f32 0.5, %v10851_v48  ;;  %v4003_v29 = vmul.f32 0.7978846, %v10908_v57 }
 0x427   :  { %7673 = vtanh.f32 %v4571_v33  ;;  %v4476_v49 = vmul.f32 %v10917_v43, %v10917_v43  ;;  %v7668_v26 = vpop.eup %7667  ;;  %v5214_v14 = vmul.f32 0.044715, %v5182_v6  ;;  %v5395_v46 = vpack.c.bf16 %v5371_v39, %v5370_v59  ;;  %3265 = vst.msk [vmem:[%s11898_s9 + $0x1b0] sm:$0xff] %vm1622_vm1, %v3219_v31 }
 0x428   :  { %7675 = vtanh.f32 %v5277_v16  ;;  %v4099_v53 = vadd.f32 1.0, %v4067_v34  ;;  %v7670_v54 = vpop.eup %7669  ;;  %v4410_v48 = vmul.f32 0.5, %v10862_v4  ;;  %v5117_v41 = vmul.f32 0.5, %v10878_v28 }
 0x429   :  { %v4508_v18 = vmul.f32 0.044715, %v4476_v49  ;;  %v3938_v58 = vpop.f32.mrf.mxu1  ;;  %v5183_v11 = vmul.f32 %v10931_v7, %v10931_v7  ;;  %v4444_v62 = vmul.f32 0.7978846, %v10917_v43  ;;  %v4193_v12 = vadd.f32 1.0, %v7666_v2 }
 0x42a   :  { %v7672_v23 = vpop.eup %7671  ;;  %v4131_v20 = vmul.f32 %v4099_v53, %v4003_v29  ;;  %v10950_v63 = vadd.f32 %v3938_v58, %v9888_v47  ;;  %v5246_v8 = vadd.f32 1.0, %v5214_v14  ;;  %v3970_v9 = vmul.f32 0.5, %v10885_v44 }
 0x42b   :  { %v4540_v4 = vadd.f32 1.0, %v4508_v18  ;;  %5515 = vmatmul.bf16.gmra.mxu1 %v5395_v46  ;;  %v5215_v28 = vmul.f32 0.044715, %v5183_v11  ;;  %v4194_v37 = vadd.f32 1.0, %v7672_v23  ;;  %v4411_v13 = vmul.f32 0.5, %v10893_v24 }
 0x42c   :  { %v5150_v60 = vmul.f32 0.7978846, %v10905_v17  ;;  %v4349_v30 = vpop.f32.mrf.mxu2  ;;  %v5151_v45 = vmul.f32 0.7978846, %v10931_v7  ;;  %v3220_v56 = vpop.f32.mrf.mxu3  ;;  %v4036_v47 = vmul.f32 %v10950_v63, %v10950_v63  ;;  %v10961_v0 = vperm.slane %v5420_v61, 0 }
 0x42d   :  { %v7674_v40 = vpop.eup %7673  ;;  %v4572_v42 = vmul.f32 %v4540_v4, %v4444_v62  ;;  %v10959_v51 = vadd.f32 %v4349_v30, %v10563_v5  ;;  %v5247_v44 = vadd.f32 1.0, %v5215_v28  ;;  %v3221_v24 = vadd.f32 %v10597_v15, %v3220_v56  ;;  %v10992_v4 = vld [vmem:[%s11897_s8] ss:$0 sm:$0xff] }
 0x42e   :  { %v7676_v1 = vpop.eup %7675  ;;  %v4225_v3 = vmul.f32 %v4193_v12, %v3969_v52  ;;  %v4226_v55 = vmul.f32 %v4194_v37, %v3970_v9  ;;  %7677 = vtanh.f32 %v4131_v20  ;;  %v5278_v38 = vmul.f32 %v5246_v8, %v5150_v60 }
 0x42f   :  { %v4068_v25 = vmul.f32 0.044715, %v4036_v47  ;;  %v4634_v10 = vadd.f32 1.0, %v7670_v54  ;;  %v4004_v27 = vmul.f32 0.7978846, %v10950_v63  ;;  %v4477_v16 = vmul.f32 %v10959_v51, %v10959_v51  ;;  %3266 = vst.msk [vmem:[%s11898_s9 + $0x1b8] sm:$0xff] %vm1622_vm1, %v3221_v24 }
 0x430   :  { %v4243_v21 = vpack.c.bf16 %v4226_v55, %v4225_v3  ;;  %v4635_v50 = vadd.f32 1.0, %v7674_v40  ;;  %7679 = vtanh.f32 %v4572_v42  ;;  %v5340_v2 = vadd.f32 1.0, %v7668_v26 }
 0x431   :  { %v4100_v15 = vadd.f32 1.0, %v4068_v25  ;;  %v5481_v36 = vpop.f32.mrf.mxu1  ;;  %v5341_v33 = vadd.f32 1.0, %v7676_v1  ;;  %v4509_v6 = vmul.f32 0.044715, %v4477_v16  ;;  %v5279_v59 = vmul.f32 %v5247_v44, %v5151_v45 }
 0x432   :  { %v10972_v19 = vadd.f32 %v5481_v36, %v10961_v0  ;;  %v4667_v22 = vmul.f32 %v4635_v50, %v4411_v13  ;;  %7681 = vtanh.f32 %v5278_v38  ;;  %v4666_v39 = vmul.f32 %v4634_v10, %v4410_v48  ;;  %v5070_v31 = vpop.f32.mrf.mxu0 }
 0x433   :  { %v4132_v34 = vmul.f32 %v4100_v15, %v4004_v27  ;;  %v5373_v52 = vmul.f32 %v5341_v33, %v5117_v41  ;;  %v4445_v29 = vmul.f32 0.7978846, %v10959_v51  ;;  %v4541_v49 = vadd.f32 1.0, %v4509_v6  ;;  %4391 = vmatmul.bf16.gmra.mxu2 %v4243_v21 }
 0x434   :  { %v5625_v53 = vmul.f32 %v10972_v19, %v10972_v19  ;;  %v4352_v26 = vpop.f32.mrf.mxu2  ;;  %v5372_v14 = vmul.f32 %v5340_v2, %v10912_v32  ;;  %v7678_v46 = vpop.eup %7677  ;;  %v4694_v18 = vpack.c.bf16 %v4667_v22, %v4666_v39  ;;  %v10982_v48 = vadd.f32 %v5070_v31, %v10275_v35 }
 0x435   :  { %7683 = vtanh.f32 %v4132_v34  ;;  %v10979_v54 = vadd.f32 %v4352_v26, %v10563_v5  ;;  %v4573_v41 = vmul.f32 %v4541_v49, %v4445_v29  ;;  %v5118_v12 = vmul.f32 0.5, %v10905_v17 }
 0x436   :  { %7685 = vtanh.f32 %v5279_v59  ;;  %v5657_v58 = vmul.f32 0.044715, %v5625_v53  ;;  %v3223_v11 = vpop.f32.mrf.mxu3  ;;  %v7680_v23 = vpop.eup %7679  ;;  %4802 = vmatmul.bf16.gmra.mxu3 %v4694_v18  ;;  %v5396_v20 = vpack.c.bf16 %v5373_v52, %v5372_v14  ;;  %v5184_v32 = vmul.f32 %v10982_v48, %v10982_v48 }
 0x437   :  { %v4478_v61 = vmul.f32 %v10979_v54, %v10979_v54  ;;  %7687 = vtanh.f32 %v4573_v41  ;;  %v3224_v8 = vadd.f32 %v10992_v4, %v3223_v11  ;;  %v4195_v37 = vadd.f32 1.0, %v7678_v46  ;;  %v7099_v41 = vld [vmem:[%s11896_s7 + $0x20] sm:$0xff] }
 0x438   :  { %v7682_v62 = vpop.eup %7681  ;;  %v3971_v9 = vmul.f32 0.5, %v10908_v57  ;;  %v5689_v13 = vadd.f32 1.0, %v5657_v58  ;;  %v4412_v17 = vmul.f32 0.5, %v10917_v43  ;;  %v3972_v56 = vmul.f32 0.5, %v10950_v63  ;;  %6397 = vmatpush.bf16.msrb.mxu3 %v7099_v41 }
 0x439   :  { %v5483_v28 = vpop.f32.mrf.mxu1  ;;  %v4510_v60 = vmul.f32 0.044715, %v4478_v61  ;;  %v5119_v40 = vmul.f32 0.5, %v10931_v7  ;;  %3267 = vst.msk [vmem:[%s11898_s9 + $0x1c0] sm:$0xff] %vm1622_vm1, %v3224_v8  ;;  %v4636_v57 = vadd.f32 1.0, %v7680_v23  ;;  %v4413_v1 = vmul.f32 0.5, %v10959_v51 }
 0x43a   :  { %v10997_v30 = vadd.f32 %v5483_v28, %v10961_v0  ;;  %v5072_v42 = vpop.f32.mrf.mxu0  ;;  %v5593_v44 = vmul.f32 0.7978846, %v10972_v19  ;;  %v5216_v24 = vmul.f32 0.044715, %v5184_v32  ;;  %v5342_v43 = vadd.f32 1.0, %v7682_v62 }
 0x43b   :  { %v7684_v45 = vpop.eup %7683  ;;  %5520 = vmatmul.bf16.gmra.mxu1 %v5396_v20  ;;  %v11014_v55 = vadd.f32 %v5072_v42, %v10275_v35  ;;  %v4227_v38 = vmul.f32 %v4195_v37, %v3971_v9  ;;  %v4446_v10 = vmul.f32 0.7978846, %v10979_v54  ;;  %v4542_v27 = vadd.f32 1.0, %v4510_v60 }
 0x43c   :  { %v7686_v47 = vpop.eup %7685  ;;  %v4354_v3 = vpop.f32.mrf.mxu2  ;;  %v5626_v63 = vmul.f32 %v10997_v30, %v10997_v30  ;;  %v5721_v25 = vmul.f32 %v5689_v13, %v5593_v44  ;;  %v4196_v16 = vadd.f32 1.0, %v7684_v45  ;;  %v5152_v50 = vmul.f32 0.7978846, %v10982_v48 }
 0x43d   :  { %v11011_v7 = vadd.f32 %v4354_v3, %v10563_v5  ;;  %v7688_v21 = vpop.eup %7687  ;;  %v4668_v36 = vmul.f32 %v4636_v57, %v4412_v17  ;;  %v5343_v2 = vadd.f32 1.0, %v7686_v47  ;;  %v5248_v33 = vadd.f32 1.0, %v5216_v24 }
 0x43e   :  { %v3225_v51 = vpop.f32.mrf.mxu3  ;;  %v5658_v15 = vmul.f32 0.044715, %v5626_v63  ;;  %v5594_v6 = vmul.f32 0.7978846, %v10997_v30  ;;  %v5374_v22 = vmul.f32 %v5342_v43, %v5118_v12  ;;  %v5185_v39 = vmul.f32 %v11014_v55, %v11014_v55 }
 0x43f   :  { %v4479_v59 = vmul.f32 %v11011_v7, %v11011_v7  ;;  %v3226_v31 = vadd.f32 %v10992_v4, %v3225_v51  ;;  %v4228_v52 = vmul.f32 %v4196_v16, %v3972_v56  ;;  %7689 = vtanh.f32 %v5721_v25 }
 0x440   :  { %v5690_v34 = vadd.f32 1.0, %v5658_v15  ;;  %v4574_v29 = vmul.f32 %v4542_v27, %v4446_v10  ;;  %v4637_v53 = vadd.f32 1.0, %v7688_v21  ;;  %v5217_v14 = vmul.f32 0.044715, %v5185_v39 }
 0x441   :  { %v4511_v49 = vmul.f32 0.044715, %v4479_v59  ;;  %3268 = vst.msk [vmem:[%s11898_s9 + $0x1c8] sm:$0xff] %vm1622_vm1, %v3226_v31  ;;  %v4244_v46 = vpack.c.bf16 %v4228_v52, %v4227_v38  ;;  %v5375_v18 = vmul.f32 %v5343_v2, %v5119_v40  ;;  %v5280_v58 = vmul.f32 %v5248_v33, %v5152_v50 }
 0x442   :  { %v5722_v26 = vmul.f32 %v5690_v34, %v5594_v6  ;;  %v4447_v11 = vmul.f32 0.7978846, %v11011_v7  ;;  %v4669_v61 = vmul.f32 %v4637_v53, %v4413_v1  ;;  %v5153_v32 = vmul.f32 0.7978846, %v11014_v55 }
 0x443   :  { %v4543_v23 = vadd.f32 1.0, %v4511_v49  ;;  %v5075_v20 = vpop.f32.mrf.mxu0  ;;  %v5249_v62 = vadd.f32 1.0, %v5217_v14  ;;  %4396 = vmatmul.bf16.gmra.mxu2 %v4244_v46  ;;  %v5397_v40 = vpack.c.bf16 %v5375_v18, %v5374_v22  ;;  %v5561_v43 = vmul.f32 0.5, %v10972_v19 }
 0x444   :  { %7691 = vtanh.f32 %v5722_v26  ;;  %v5486_v12 = vpop.f32.mrf.mxu1  ;;  %v4357_v8 = vpop.f32.mrf.mxu2  ;;  %v11034_v28 = vadd.f32 %v5075_v20, %v10275_v35  ;;  %v4695_v60 = vpack.c.bf16 %v4669_v61, %v4668_v36  ;;  %v4414_v25 = vmul.f32 0.5, %v10979_v54 }
 0x445   :  { %v4575_v37 = vmul.f32 %v4543_v23, %v4447_v11  ;;  %v11037_v9 = vadd.f32 %v5486_v12, %v10961_v0  ;;  %v11040_v13 = vadd.f32 %v4357_v8, %v10563_v5  ;;  %7693 = vtanh.f32 %v4574_v29  ;;  %v7690_v42 = vpop.eup %7689 }
 0x446   :  { %v3228_v45 = vpop.f32.mrf.mxu3  ;;  %v5281_v17 = vmul.f32 %v5249_v62, %v5153_v32  ;;  %v5186_v56 = vmul.f32 %v11034_v28, %v11034_v28  ;;  %7695 = vtanh.f32 %v5280_v58  ;;  %4807 = vmatmul.bf16.gmra.mxu3 %v4695_v60  ;;  %v5785_v63 = vadd.f32 1.0, %v7690_v42 }
 0x447   :  { %v5627_v57 = vmul.f32 %v11037_v9, %v11037_v9  ;;  %7697 = vtanh.f32 %v4575_v37  ;;  %v4480_v47 = vmul.f32 %v11040_v13, %v11040_v13  ;;  %v3229_v24 = vadd.f32 %v10992_v4, %v3228_v45 }
 0x448   :  { %7699 = vtanh.f32 %v5281_v17  ;;  %v5218_v44 = vmul.f32 0.044715, %v5186_v56  ;;  %v5562_v10 = vmul.f32 0.5, %v10997_v30  ;;  %v11057_v50 = vmul.f32 0.5, %v10982_v48 }
 0x449   :  { %v5659_v1 = vmul.f32 0.044715, %v5627_v57  ;;  %v4512_v38 = vmul.f32 0.044715, %v4480_v47  ;;  %3269 = vst.msk [vmem:[%s11898_s9 + $0x1d0] sm:$0xff] %vm1622_vm1, %v3229_v24  ;;  %v5817_v48 = vmul.f32 %v5785_v63, %v5561_v43  ;;  %v4415_v53 = vmul.f32 0.5, %v11011_v7 }
 0x44a   :  { %v7692_v3 = vpop.eup %7691  ;;  %v5595_v19 = vmul.f32 0.7978846, %v11037_v9  ;;  %v5250_v36 = vadd.f32 1.0, %v5218_v44  ;;  %v4448_v6 = vmul.f32 0.7978846, %v11040_v13  ;;  %v5121_v26 = vmul.f32 0.5, %v11014_v55 }
 0x44b   :  { %5525 = vmatmul.bf16.gmra.mxu1 %v5397_v40  ;;  %v5786_v27 = vadd.f32 1.0, %v7692_v3  ;;  %v5691_v51 = vadd.f32 1.0, %v5659_v1  ;;  %v5077_v16 = vpop.f32.mrf.mxu0  ;;  %v7694_v21 = vpop.eup %7693  ;;  %v4544_v15 = vadd.f32 1.0, %v4512_v38  ;;  %v5154_v52 = vmul.f32 0.7978846, %v11034_v28 }
 0x44c   :  { %v5488_v2 = vpop.f32.mrf.mxu1  ;;  %v4359_v54 = vpop.f32.mrf.mxu2  ;;  %v11065_v22 = vadd.f32 %v5077_v16, %v10275_v35  ;;  %v4638_v46 = vadd.f32 1.0, %v7694_v21 }
 0x44d   :  { %v7696_v33 = vpop.eup %7695  ;;  %v5818_v30 = vmul.f32 %v5786_v27, %v5562_v10  ;;  %v11062_v59 = vadd.f32 %v5488_v2, %v10961_v0  ;;  %v5723_v31 = vmul.f32 %v5691_v51, %v5595_v19  ;;  %v11069_v29 = vadd.f32 %v4359_v54, %v10563_v5 }
 0x44e   :  { %v3230_v34 = vpop.f32.mrf.mxu3  ;;  %v7698_v39 = vpop.eup %7697  ;;  %v4576_v14 = vmul.f32 %v4544_v15, %v4448_v6  ;;  %v5282_v41 = vmul.f32 %v5250_v36, %v5154_v52  ;;  %v5344_v11 = vadd.f32 1.0, %v7696_v33  ;;  %v5155_v61 = vmul.f32 0.7978846, %v11065_v22 }
 0x44f   :  { %v7700_v49 = vpop.eup %7699  ;;  %v5849_v18 = vpack.c.bf16 %v5818_v30, %v5817_v48  ;;  %v5628_v58 = vmul.f32 %v11062_v59, %v11062_v59  ;;  %v4481_v23 = vmul.f32 %v11069_v29, %v11069_v29  ;;  %v5187_v20 = vmul.f32 %v11065_v22, %v11065_v22 }
 0x450   :  { %v3231_v7 = vadd.f32 %v10992_v4, %v3230_v34  ;;  %7701 = vtanh.f32 %v5723_v31  ;;  %v4639_v32 = vadd.f32 1.0, %v7698_v39  ;;  %v5345_v62 = vadd.f32 1.0, %v7700_v49 }
 0x451   :  { %v5660_v55 = vmul.f32 0.044715, %v5628_v58  ;;  %7703 = vtanh.f32 %v4576_v14  ;;  %v4513_v12 = vmul.f32 0.044715, %v4481_v23  ;;  %v5219_v8 = vmul.f32 0.044715, %v5187_v20 }
 0x452   :  { %3270 = vst.msk [vmem:[%s11898_s9 + $0x1d8] sm:$0xff] %vm1622_vm1, %v3231_v7  ;;  %v4670_v37 = vmul.f32 %v4638_v46, %v4414_v25  ;;  %v5596_v45 = vmul.f32 0.7978846, %v11062_v59  ;;  %v4671_v40 = vmul.f32 %v4639_v32, %v4415_v53  ;;  %v4449_v57 = vmul.f32 0.7978846, %v11069_v29 }
 0x453   :  { %v5692_v17 = vadd.f32 1.0, %v5660_v55  ;;  %5941 = vmatmul.bf16.vlgmr.msrb.gmra.mxu2 %v5849_v18  ;;  %v4545_v47 = vadd.f32 1.0, %v4513_v12  ;;  %v5251_v1 = vadd.f32 1.0, %v5219_v8  ;;  %7705 = vtanh.f32 %v5282_v41 }
 0x454   :  { %v5080_v60 = vpop.f32.mrf.mxu0  ;;  %v4362_v56 = vpop.f32.mrf.mxu2  ;;  %v4696_v63 = vpack.c.bf16 %v4671_v40, %v4670_v37  ;;  %v5377_v38 = vmul.f32 %v5345_v62, %v5121_v26  ;;  %v5376_v19 = vmul.f32 %v5344_v11, %v11057_v50  ;;  %v5563_v36 = vmul.f32 0.5, %v11037_v9 }
 0x455   :  { %v11087_v42 = vadd.f32 %v5080_v60, %v10275_v35  ;;  %v11091_v44 = vadd.f32 %v4362_v56, %v10563_v5  ;;  %v5724_v3 = vmul.f32 %v5692_v17, %v5596_v45  ;;  %v4577_v25 = vmul.f32 %v4545_v47, %v4449_v57 }
 0x456   :  { %v3233_v24 = vpop.f32.mrf.mxu3  ;;  %v5491_v43 = vpop.f32.mrf.mxu1  ;;  %v5283_v10 = vmul.f32 %v5251_v1, %v5155_v61  ;;  %4812 = vmatmul.bf16.gmra.mxu3 %v4696_v63  ;;  %v4416_v2 = vmul.f32 0.5, %v11040_v13  ;;  %v5398_v6 = vpack.c.bf16 %v5377_v38, %v5376_v19  ;;  %v11106_v34 = vmul.f32 0.5, %v11065_v22  ;;  %v7098_v38 = vld [vmem:[%s11896_s7 + $0x18] sm:$0xff] }
 0x457   :  { %v11094_v27 = vadd.f32 %v5491_v43, %v10961_v0  ;;  %v7702_v51 = vpop.eup %7701  ;;  %7707 = vtanh.f32 %v5724_v3  ;;  %v4482_v16 = vmul.f32 %v11091_v44, %v11091_v44  ;;  %v5188_v21 = vmul.f32 %v11087_v42, %v11087_v42  ;;  %6398 = vmatpush.bf16.msrb.mxu3 %v7098_v38 }
 0x458   :  { %v7704_v15 = vpop.eup %7703  ;;  %7709 = vtanh.f32 %v4577_v25  ;;  %v3234_v48 = vadd.f32 %v10992_v4, %v3233_v24  ;;  %v5787_v31 = vadd.f32 1.0, %v7702_v51  ;;  %v4450_v9 = vmul.f32 0.7978846, %v11091_v44 }
 0x459   :  { %v5629_v54 = vmul.f32 %v11094_v27, %v11094_v27  ;;  %7711 = vtanh.f32 %v5283_v10  ;;  %v4514_v33 = vmul.f32 0.044715, %v4482_v16  ;;  %v5220_v30 = vmul.f32 0.044715, %v5188_v21  ;;  %v7706_v52 = vpop.eup %7705 }
 0x45a   :  { %v4640_v26 = vadd.f32 1.0, %v7704_v15  ;;  %v5597_v14 = vmul.f32 0.7978846, %v11094_v27  ;;  %3271 = vst.msk [vmem:[%s11898_s9 + $0x1e0] sm:$0xff] %vm1622_vm1, %v3234_v48  ;;  %v5564_v11 = vmul.f32 0.5, %v11062_v59  ;;  %v4417_v23 = vmul.f32 0.5, %v11069_v29 }
 0x45b   :  { %v5661_v39 = vmul.f32 0.044715, %v5629_v54  ;;  %v4546_v13 = vadd.f32 1.0, %v4514_v33  ;;  %5530 = vmatmul.bf16.gmra.mxu1 %v5398_v6  ;;  %v5252_v22 = vadd.f32 1.0, %v5220_v30  ;;  %v5156_v20 = vmul.f32 0.7978846, %v11087_v42 }
 0x45c   :  { %v5082_v50 = vpop.f32.mrf.mxu0  ;;  %v4364_v49 = vpop.f32.mrf.mxu2  ;;  %v5819_v12 = vmul.f32 %v5787_v31, %v5563_v36  ;;  %v5346_v8 = vadd.f32 1.0, %v7706_v52  ;;  %v4672_v45 = vmul.f32 %v4640_v26, %v4416_v2  ;;  %v5122_v48 = vmul.f32 0.5, %v11034_v28 }
 0x45d   :  { %v11111_v53 = vadd.f32 %v5082_v50, %v10275_v35  ;;  %v5693_v46 = vadd.f32 1.0, %v5661_v39  ;;  %v11119_v18 = vadd.f32 %v4364_v49, %v10563_v5  ;;  %v7708_v58 = vpop.eup %7707  ;;  %v4578_v61 = vmul.f32 %v4546_v13, %v4450_v9 }
 0x45e   :  { %v3235_v41 = vpop.f32.mrf.mxu3  ;;  %v5493_v7 = vpop.f32.mrf.mxu1  ;;  %v5284_v17 = vmul.f32 %v5252_v22, %v5156_v20  ;;  %v5788_v24 = vadd.f32 1.0, %v7708_v58  ;;  %v11155_v49 = vmul.f32 0.5, %v11087_v42  ;;  %v4418_v58 = vmul.f32 0.5, %v11091_v44 }
 0x45f   :  { %v7710_v55 = vpop.eup %7709  ;;  %v5725_v32 = vmul.f32 %v5693_v46, %v5597_v14  ;;  %v11125_v62 = vadd.f32 %v5493_v7, %v10961_v0  ;;  %v4483_v60 = vmul.f32 %v11119_v18, %v11119_v18  ;;  %v5189_v59 = vmul.f32 %v11111_v53, %v11111_v53 }
 0x460   :  { %v7712_v37 = vpop.eup %7711  ;;  %v3236_v29 = vadd.f32 %v10992_v4, %v3235_v41  ;;  %v4451_v40 = vmul.f32 0.7978846, %v11119_v18  ;;  %v5157_v57 = vmul.f32 0.7978846, %v11111_v53  ;;  %7713 = vtanh.f32 %v4578_v61 }
 0x461   :  { %v5630_v56 = vmul.f32 %v11125_v62, %v11125_v62  ;;  %v4515_v47 = vmul.f32 0.044715, %v4483_v60  ;;  %v5221_v1 = vmul.f32 0.044715, %v5189_v59  ;;  %7715 = vtanh.f32 %v5725_v32 }
 0x462   :  { %3272 = vst.msk [vmem:[%s11898_s9 + $0x1e8] sm:$0xff] %vm1622_vm1, %v3236_v29  ;;  %v4641_v43 = vadd.f32 1.0, %v7710_v55  ;;  %v5347_v63 = vadd.f32 1.0, %v7712_v37  ;;  %v5598_v25 = vmul.f32 0.7978846, %v11125_v62  ;;  %v5820_v16 = vmul.f32 %v5788_v24, %v5564_v11 }
 0x463   :  { %v5662_v3 = vmul.f32 0.044715, %v5630_v56  ;;  %v4547_v10 = vadd.f32 1.0, %v4515_v47  ;;  %v5253_v51 = vadd.f32 1.0, %v5221_v1  ;;  %7717 = vtanh.f32 %v5284_v17 }
 0x464   :  { %v4367_v21 = vpop.f32.mrf.mxu2  ;;  %v5085_v19 = vpop.f32.mrf.mxu0  ;;  %v4673_v2 = vmul.f32 %v4641_v43, %v4417_v23  ;;  %v5850_v39 = vpack.c.bf16 %v5820_v16, %v5819_v12  ;;  %v5379_v9 = vmul.f32 %v5347_v63, %v11106_v34  ;;  %v5378_v41 = vmul.f32 %v5346_v8, %v5122_v48 }
 0x465   :  { %v5694_v15 = vadd.f32 1.0, %v5662_v3  ;;  %v11145_v36 = vadd.f32 %v4367_v21, %v10563_v5  ;;  %v11148_v54 = vadd.f32 %v5085_v19, %v10275_v35  ;;  %v4579_v30 = vmul.f32 %v4547_v10, %v4451_v40 }
 0x466   :  { %v3238_v33 = vpop.f32.mrf.mxu3  ;;  %v5285_v6 = vmul.f32 %v5253_v51, %v5157_v57  ;;  %v7714_v13 = vpop.eup %7713  ;;  %5946 = vmatmul.bf16.gmra.mxu2 %v5850_v39  ;;  %v4697_v14 = vpack.c.bf16 %v4673_v2, %v4672_v45  ;;  %v5399_v61 = vpack.c.bf16 %v5379_v9, %v5378_v41  ;;  %v5565_v55 = vmul.f32 0.5, %v11094_v27  ;;  %v11202_v2 = vld [vmem:[%s11897_s8] ss:$0 sm:$0xff] }
 0x467   :  { %v5726_v50 = vmul.f32 %v5694_v15, %v5598_v25  ;;  %v4484_v52 = vmul.f32 %v11145_v36, %v11145_v36  ;;  %7719 = vtanh.f32 %v4579_v30  ;;  %v7716_v46 = vpop.eup %7715  ;;  %v5190_v22 = vmul.f32 %v11148_v54, %v11148_v54 }
 0x468   :  { %v5496_v31 = vpop.f32.mrf.mxu1  ;;  %v4452_v34 = vmul.f32 0.7978846, %v11145_v36  ;;  %4817 = vmatmul.bf16.gmra.mxu3 %v4697_v14  ;;  %v3239_v20 = vadd.f32 %v10992_v4, %v3238_v33  ;;  %v5125_v32 = vmul.f32 0.5, %v11111_v53  ;;  %v5789_v37 = vadd.f32 1.0, %v7716_v46 }
 0x469   :  { %v11158_v26 = vadd.f32 %v5496_v31, %v10961_v0  ;;  %7721 = vtanh.f32 %v5726_v50  ;;  %v4516_v28 = vmul.f32 0.044715, %v4484_v52  ;;  %v5222_v23 = vmul.f32 0.044715, %v5190_v22  ;;  %v7718_v7 = vpop.eup %7717 }
 0x46a   :  { %7723 = vtanh.f32 %v5285_v6  ;;  %3273 = vst.msk [vmem:[%s11898_s9 + $0x1f0] sm:$0xff] %vm1622_vm1, %v3239_v20  ;;  %v4642_v45 = vadd.f32 1.0, %v7714_v13  ;;  %v4419_v17 = vmul.f32 0.5, %v11119_v18  ;;  %v5566_v1 = vmul.f32 0.5, %v11125_v62 }
 0x46b   :  { %v5631_v42 = vmul.f32 %v11158_v26, %v11158_v26  ;;  %v4548_v11 = vadd.f32 1.0, %v4516_v28  ;;  %5535 = vmatmul.bf16.gmra.mxu1 %v5399_v61  ;;  %v5599_v56 = vmul.f32 0.7978846, %v11158_v26  ;;  %v5158_v24 = vmul.f32 0.7978846, %v11148_v54 }
 0x46c   :  { %v4369_v8 = vpop.f32.mrf.mxu2  ;;  %v5087_v44 = vpop.f32.mrf.mxu0  ;;  %v5254_v3 = vadd.f32 1.0, %v5222_v23  ;;  %v5348_v63 = vadd.f32 1.0, %v7718_v7  ;;  %v4674_v16 = vmul.f32 %v4642_v45, %v4418_v58  ;;  %v11224_v45 = vmul.f32 0.5, %v11148_v54 }
 0x46d   :  { %v5663_v12 = vmul.f32 0.044715, %v5631_v42  ;;  %v4580_v60 = vmul.f32 %v4548_v11, %v4452_v34  ;;  %v11174_v59 = vadd.f32 %v4369_v8, %v10563_v5  ;;  %v11177_v29 = vadd.f32 %v5087_v44, %v10275_v35  ;;  %v7720_v53 = vpop.eup %7719 }
 0x46e   :  { %v3240_v27 = vpop.f32.mrf.mxu3  ;;  %v4643_v39 = vadd.f32 1.0, %v7720_v53  ;;  %v5286_v48 = vmul.f32 %v5254_v3, %v5158_v24 }
 0x46f   :  { %v5695_v40 = vadd.f32 1.0, %v5663_v12  ;;  %v3241_v57 = vadd.f32 %v10992_v4, %v3240_v27  ;;  %v7722_v47 = vpop.eup %7721  ;;  %v4485_v18 = vmul.f32 %v11174_v59, %v11174_v59  ;;  %v5821_v4 = vmul.f32 %v5789_v37, %v5565_v55 }
 0x470   :  { %v5498_v43 = vpop.f32.mrf.mxu1  ;;  %v7724_v38 = vpop.eup %7723  ;;  %7725 = vtanh.f32 %v4580_v60  ;;  %v5191_v62 = vmul.f32 %v11177_v29, %v11177_v29  ;;  %v5790_v51 = vadd.f32 1.0, %v7722_v47  ;;  %v4453_v19 = vmul.f32 0.7978846, %v11174_v59 }
 0x471   :  { %v5727_v25 = vmul.f32 %v5695_v40, %v5599_v56  ;;  %v11185_v10 = vadd.f32 %v5498_v43, %v10961_v0  ;;  %3274 = vst.msk [vmem:[%s11898_s9 + $0x1f8] sm:$0xff] %vm1622_vm1, %v3241_v57  ;;  %v5159_v15 = vmul.f32 0.7978846, %v11177_v29  ;;  %v4517_v33 = vmul.f32 0.044715, %v4485_v18 }
 0x472   :  { %v5223_v30 = vmul.f32 0.044715, %v5191_v62  ;;  %v5822_v6 = vmul.f32 %v5790_v51, %v5566_v1  ;;  %v5349_v9 = vadd.f32 1.0, %v7724_v38  ;;  %v4675_v28 = vmul.f32 %v4643_v39, %v4419_v17 }
 0x473   :  { %7727 = vtanh.f32 %v5727_v25  ;;  %v5632_v21 = vmul.f32 %v11185_v10, %v11185_v10  ;;  %v5600_v50 = vmul.f32 0.7978846, %v11185_v10  ;;  %v4549_v13 = vadd.f32 1.0, %v4517_v33 }
 0x474   :  { %v5090_v52 = vpop.f32.mrf.mxu0  ;;  %v5255_v14 = vadd.f32 1.0, %v5223_v30  ;;  %v5851_v46 = vpack.c.bf16 %v5822_v6, %v5821_v4  ;;  %v5381_v34 = vmul.f32 %v5349_v9, %v5125_v32  ;;  %v4698_v12 = vpack.c.bf16 %v4675_v28, %v4674_v16 }
 0x475   :  { %v5664_v31 = vmul.f32 0.044715, %v5632_v21  ;;  %v11206_v42 = vadd.f32 %v5090_v52, %v10275_v35  ;;  %v4581_v61 = vmul.f32 %v4549_v13, %v4453_v19  ;;  %7729 = vtanh.f32 %v5286_v48 }
 0x476   :  { %v4783_v22 = vpop.f32.mrf.mxu3  ;;  %v4372_v58 = vpop.f32.mrf.mxu2  ;;  %v5287_v20 = vmul.f32 %v5255_v14, %v5159_v15  ;;  %5951 = vmatmul.bf16.gmra.mxu2 %v5851_v46  ;;  %v5380_v60 = vmul.f32 %v5348_v63, %v11155_v49  ;;  %v4420_v27 = vmul.f32 0.5, %v11145_v36  ;;  %v5567_v57 = vmul.f32 0.5, %v11158_v26 }
 0x477   :  { %v5696_v41 = vadd.f32 1.0, %v5664_v31  ;;  %v4784_v11 = vadd.f32 %v11202_v2, %v4783_v22  ;;  %v7726_v23 = vpop.eup %7725  ;;  %v11210_v55 = vadd.f32 %v4372_v58, %v10563_v5  ;;  %7731 = vtanh.f32 %v4581_v61 }
 0x478   :  { %v5501_v7 = vpop.f32.mrf.mxu1  ;;  %4822 = vmatmul.bf16.gmra.mxu3 %v4698_v12  ;;  %v5192_v56 = vmul.f32 %v11206_v42, %v11206_v42  ;;  %v5400_v40 = vpack.c.bf16 %v5381_v34, %v5380_v60  ;;  %v4644_v63 = vadd.f32 1.0, %v7726_v23  ;;  %v4421_v25 = vmul.f32 0.5, %v11174_v59 }
 0x479   :  { %v7728_v8 = vpop.eup %7727  ;;  %v5728_v44 = vmul.f32 %v5696_v41, %v5600_v50  ;;  %v11213_v37 = vadd.f32 %v5501_v7, %v10961_v0  ;;  %4863 = vst.msk [vmem:[%s11898_s9 + $0x200] sm:$0xff] %vm1622_vm1, %v4784_v11  ;;  %v4486_v32 = vmul.f32 %v11210_v55, %v11210_v55  ;;  %v4454_v49 = vmul.f32 0.7978846, %v11210_v55 }
 0x47a   :  { %v5791_v1 = vadd.f32 1.0, %v7728_v8  ;;  %v5224_v24 = vmul.f32 0.044715, %v5192_v56  ;;  %v5127_v16 = vmul.f32 0.5, %v11177_v29  ;;  %v5160_v39 = vmul.f32 0.7978846, %v11206_v42 }
 0x47b   :  { %7733 = vtanh.f32 %v5728_v44  ;;  %v5633_v53 = vmul.f32 %v11213_v37, %v11213_v37  ;;  %v4518_v17 = vmul.f32 0.044715, %v4486_v32  ;;  %5540 = vmatmul.bf16.gmra.mxu1 %v5400_v40  ;;  %v7730_v38 = vpop.eup %7729  ;;  %v5601_v18 = vmul.f32 0.7978846, %v11213_v37 }
 0x47c   :  { %7735 = vtanh.f32 %v5287_v20  ;;  %v5092_v36 = vpop.f32.mrf.mxu0  ;;  %v5256_v19 = vadd.f32 1.0, %v5224_v24  ;;  %v5568_v50 = vmul.f32 0.5, %v11185_v10  ;;  %v5823_v31 = vmul.f32 %v5791_v1, %v5567_v57  ;;  %v7097_v10 = vld [vmem:[%s11896_s7 + $0x10] sm:$0xff] }
 0x47d   :  { %v5665_v47 = vmul.f32 0.044715, %v5633_v53  ;;  %v4550_v54 = vadd.f32 1.0, %v4518_v17  ;;  %v11233_v3 = vadd.f32 %v5092_v36, %v10275_v35  ;;  %v7732_v51 = vpop.eup %7731  ;;  %v4676_v52 = vmul.f32 %v4644_v63, %v4420_v27  ;;  %6399 = vmatpush.bf16.msrb.mxu3 %v7097_v10 }
 0x47e   :  { %v4785_v43 = vpop.f32.mrf.mxu3  ;;  %v4374_v26 = vpop.f32.mrf.mxu2  ;;  %v5350_v9 = vadd.f32 1.0, %v7730_v38  ;;  %v5288_v13 = vmul.f32 %v5256_v19, %v5160_v39  ;;  %v4645_v11 = vadd.f32 1.0, %v7732_v51  ;;  %v11274_v63 = vmul.f32 0.5, %v11206_v42 }
 0x47f   :  { %v5697_v4 = vadd.f32 1.0, %v5665_v47  ;;  %v4786_v62 = vadd.f32 %v11202_v2, %v4785_v43  ;;  %v4582_v21 = vmul.f32 %v4550_v54, %v4454_v49  ;;  %v11240_v33 = vadd.f32 %v4374_v26, %v10563_v5 }
 0x480   :  { %v5503_v15 = vpop.f32.mrf.mxu1  ;;  %v5193_v48 = vmul.f32 %v11233_v3, %v11233_v3  ;;  %v5161_v46 = vmul.f32 0.7978846, %v11233_v3  ;;  %v4677_v60 = vmul.f32 %v4645_v11, %v4421_v25  ;;  %v4422_v43 = vmul.f32 0.5, %v11210_v55 }
 0x481   :  { %v7734_v30 = vpop.eup %7733  ;;  %v5729_v6 = vmul.f32 %v5697_v4, %v5601_v18  ;;  %v11244_v59 = vadd.f32 %v5503_v15, %v10961_v0  ;;  %4864 = vst.msk [vmem:[%s11898_s9 + $0x208] sm:$0xff] %vm1622_vm1, %v4786_v62  ;;  %7737 = vtanh.f32 %v4582_v21  ;;  %v4455_v28 = vmul.f32 0.7978846, %v11240_v33 }
 0x482   :  { %v7736_v29 = vpop.eup %7735  ;;  %v4487_v22 = vmul.f32 %v11240_v33, %v11240_v33  ;;  %v5225_v41 = vmul.f32 0.044715, %v5193_v48  ;;  %v5792_v58 = vadd.f32 1.0, %v7734_v30  ;;  %v4699_v24 = vpack.c.bf16 %v4677_v60, %v4676_v52 }
 0x483   :  { %v5634_v14 = vmul.f32 %v11244_v59, %v11244_v59  ;;  %7739 = vtanh.f32 %v5729_v6  ;;  %v5351_v23 = vadd.f32 1.0, %v7736_v29  ;;  %v5602_v61 = vmul.f32 0.7978846, %v11244_v59 }
 0x484   :  { %v4519_v20 = vmul.f32 0.044715, %v4487_v22  ;;  %v5257_v7 = vadd.f32 1.0, %v5225_v41  ;;  %v5824_v12 = vmul.f32 %v5792_v58, %v5568_v50  ;;  %7741 = vtanh.f32 %v5288_v13 }
 0x485   :  { %v5666_v34 = vmul.f32 0.044715, %v5634_v14  ;;  %v5095_v8 = vpop.f32.mrf.mxu0  ;;  %v5383_v57 = vmul.f32 %v5351_v23, %v5127_v16  ;;  %v5569_v18 = vmul.f32 0.5, %v11213_v37  ;;  %v5382_v26 = vmul.f32 %v5350_v9, %v11224_v45 }
 0x486   :  { %v4377_v32 = vpop.f32.mrf.mxu2  ;;  %v11264_v27 = vadd.f32 %v5095_v8, %v10275_v35  ;;  %v4551_v53 = vadd.f32 1.0, %v4519_v20  ;;  %v5852_v56 = vpack.c.bf16 %v5824_v12, %v5823_v31  ;;  %v5289_v1 = vmul.f32 %v5257_v7, %v5161_v46 }
 0x487   :  { %v5698_v44 = vadd.f32 1.0, %v5666_v34  ;;  %v11267_v40 = vadd.f32 %v4377_v32, %v10563_v5  ;;  %v7738_v49 = vpop.eup %7737  ;;  %v11281_v62 = vmul.f32 0.5, %v11233_v3  ;;  %v5401_v16 = vpack.c.bf16 %v5383_v57, %v5382_v26 }
 0x488   :  { %v5506_v17 = vpop.f32.mrf.mxu1  ;;  %v4788_v47 = vpop.f32.mrf.mxu3  ;;  %v4583_v38 = vmul.f32 %v4551_v53, %v4455_v28  ;;  %5956 = vmatmul.bf16.gmra.mxu2 %v5852_v56  ;;  %4827 = vmatmul.bf16.gmra.mxu3 %v4699_v24  ;;  %v5194_v55 = vmul.f32 %v11264_v27, %v11264_v27  ;;  %v4646_v6 = vadd.f32 1.0, %v7738_v49  ;;  %v4423_v3 = vmul.f32 0.5, %v11240_v33 }
 0x489   :  { %v5730_v36 = vmul.f32 %v5698_v44, %v5602_v61  ;;  %v11270_v54 = vadd.f32 %v5506_v17, %v10961_v0  ;;  %v7740_v25 = vpop.eup %7739  ;;  %v4488_v42 = vmul.f32 %v11267_v40, %v11267_v40  ;;  %v4789_v21 = vadd.f32 %v11202_v2, %v4788_v47 }
 0x48a   :  { %v7742_v51 = vpop.eup %7741  ;;  %v5226_v15 = vmul.f32 0.044715, %v5194_v55  ;;  %v5793_v45 = vadd.f32 1.0, %v7740_v25  ;;  %v4456_v31 = vmul.f32 0.7978846, %v11267_v40  ;;  %v5570_v28 = vmul.f32 0.5, %v11244_v59 }
 0x48b   :  { %7743 = vtanh.f32 %v5730_v36  ;;  %v5635_v4 = vmul.f32 %v11270_v54, %v11270_v54  ;;  %v4520_v19 = vmul.f32 0.044715, %v4488_v42  ;;  %v5603_v39 = vmul.f32 0.7978846, %v11270_v54  ;;  %5545 = vmatmul.bf16.gmra.mxu1 %v5401_v16  ;;  %4865 = vst.msk [vmem:[%s11898_s9 + $0x210] sm:$0xff] %vm1622_vm1, %v4789_v21 }
 0x48c   :  { %7745 = vtanh.f32 %v4583_v38  ;;  %v5258_v9 = vadd.f32 1.0, %v5226_v15  ;;  %v5162_v41 = vmul.f32 0.7978846, %v11264_v27  ;;  %v5825_v34 = vmul.f32 %v5793_v45, %v5569_v18 }
 0x48d   :  { %7747 = vtanh.f32 %v5289_v1  ;;  %v5667_v37 = vmul.f32 0.044715, %v5635_v4  ;;  %v5097_v30 = vpop.f32.mrf.mxu0  ;;  %v4552_v52 = vadd.f32 1.0, %v4520_v19  ;;  %v4678_v11 = vmul.f32 %v4646_v6, %v4422_v43 }
 0x48e   :  { %v4379_v29 = vpop.f32.mrf.mxu2  ;;  %v11295_v50 = vadd.f32 %v5097_v30, %v10275_v35  ;;  %v5352_v23 = vadd.f32 1.0, %v7742_v51  ;;  %v5290_v20 = vmul.f32 %v5258_v9, %v5162_v41  ;;  %v5130_v9 = vmul.f32 0.5, %v11264_v27 }
 0x48f   :  { %v5699_v48 = vadd.f32 1.0, %v5667_v37  ;;  %v11299_v33 = vadd.f32 %v4379_v29, %v10563_v5  ;;  %v4584_v10 = vmul.f32 %v4552_v52, %v4456_v31  ;;  %v4424_v52 = vmul.f32 0.5, %v11267_v40 }
 0x490   :  { %v5508_v13 = vpop.f32.mrf.mxu1  ;;  %v4790_v14 = vpop.f32.mrf.mxu3  ;;  %v5163_v59 = vmul.f32 0.7978846, %v11295_v50  ;;  %v5195_v44 = vmul.f32 %v11295_v50, %v11295_v50  ;;  %v5384_v30 = vmul.f32 %v5352_v23, %v11274_v63  ;;  %v5571_v63 = vmul.f32 0.5, %v11270_v54 }
 0x491   :  { %v7744_v46 = vpop.eup %7743  ;;  %v5731_v22 = vmul.f32 %v5699_v48, %v5603_v39  ;;  %v11304_v58 = vadd.f32 %v5508_v13, %v10961_v0  ;;  %v4457_v12 = vmul.f32 0.7978846, %v11299_v33  ;;  %v4489_v8 = vmul.f32 %v11299_v33, %v11299_v33 }
 0x492   :  { %v7746_v35 = vpop.eup %7745  ;;  %v4791_v32 = vadd.f32 %v11202_v2, %v4790_v14  ;;  %v5794_v17 = vadd.f32 1.0, %v7744_v46  ;;  %v5227_v47 = vmul.f32 0.044715, %v5195_v44 }
 0x493   :  { %v7748_v61 = vpop.eup %7747  ;;  %v5636_v7 = vmul.f32 %v11304_v58, %v11304_v58  ;;  %7749 = vtanh.f32 %v5731_v22  ;;  %v5604_v60 = vmul.f32 0.7978846, %v11304_v58  ;;  %v4647_v56 = vadd.f32 1.0, %v7746_v35 }
 0x494   :  { %7751 = vtanh.f32 %v4584_v10  ;;  %v4521_v57 = vmul.f32 0.044715, %v4489_v8  ;;  %4866 = vst.msk [vmem:[%s11898_s9 + $0x218] sm:$0xff] %vm1622_vm1, %v4791_v32  ;;  %v5353_v49 = vadd.f32 1.0, %v7748_v61  ;;  %v5826_v1 = vmul.f32 %v5794_v17, %v5570_v28 }
 0x495   :  { %v5668_v53 = vmul.f32 0.044715, %v5636_v7  ;;  %7753 = vtanh.f32 %v5290_v20  ;;  %v4679_v43 = vmul.f32 %v4647_v56, %v4423_v3  ;;  %v5259_v25 = vadd.f32 1.0, %v5227_v47 }
 0x496   :  { %v4382_v24 = vpop.f32.mrf.mxu2  ;;  %v4553_v38 = vadd.f32 1.0, %v4521_v57  ;;  %v5385_v26 = vmul.f32 %v5353_v49, %v11281_v62  ;;  %v5853_v37 = vpack.c.bf16 %v5826_v1, %v5825_v34  ;;  %v5572_v61 = vmul.f32 0.5, %v11304_v58 }
 0x497   :  { %v5700_v36 = vadd.f32 1.0, %v5668_v53  ;;  %v11321_v4 = vadd.f32 %v4382_v24, %v10563_v5  ;;  %v4700_v16 = vpack.c.bf16 %v4679_v43, %v4678_v11  ;;  %v5291_v15 = vmul.f32 %v5259_v25, %v5163_v59 }
 0x498   :  { %v5511_v18 = vpop.f32.mrf.mxu1  ;;  %v4793_v42 = vpop.f32.mrf.mxu3  ;;  %v4585_v19 = vmul.f32 %v4553_v38, %v4457_v12  ;;  %5961 = vmatmul.bf16.gmra.mxu2 %v5853_v37  ;;  %v5402_v3 = vpack.c.bf16 %v5385_v26, %v5384_v30  ;;  %v4425_v20 = vmul.f32 0.5, %v11299_v33  ;;  %v5131_v7 = vmul.f32 0.5, %v11295_v50  ;;  %v7096_v50 = vld [vmem:[%s11896_s7 + $0x8] sm:$0xff] }
 0x499   :  { %v5732_v55 = vmul.f32 %v5700_v36, %v5604_v60  ;;  %v11325_v51 = vadd.f32 %v5511_v18, %v10961_v0  ;;  %v7750_v21 = vpop.eup %7749  ;;  %4832 = vmatmul.bf16.gmra.mxu3 %v4700_v16  ;;  %v4490_v62 = vmul.f32 %v11321_v4, %v11321_v4  ;;  %v4794_v39 = vadd.f32 %v11202_v2, %v4793_v42 }
 0x49a   :  { %v7752_v6 = vpop.eup %7751  ;;  %v5795_v14 = vadd.f32 1.0, %v7750_v21  ;;  %v4458_v46 = vmul.f32 0.7978846, %v11321_v4  ;;  %6400 = vmatpush.bf16.msrb.mxu3 %v7096_v50 }
 0x49b   :  { %7755 = vtanh.f32 %v5732_v55  ;;  %v5637_v45 = vmul.f32 %v11325_v51, %v11325_v51  ;;  %v7754_v48 = vpop.eup %7753  ;;  %v4522_v31 = vmul.f32 0.044715, %v4490_v62  ;;  %4867 = vst.msk [vmem:[%s11898_s9 + $0x220] sm:$0xff] %vm1622_vm1, %v4794_v39  ;;  %5550 = vmatmul.bf16.gmra.mxu1 %v5402_v3  ;;  %v4648_v10 = vadd.f32 1.0, %v7752_v6 }
 0x49c   :  { %7757 = vtanh.f32 %v4585_v19  ;;  %v5354_v27 = vadd.f32 1.0, %v7754_v48  ;;  %v5605_v8 = vmul.f32 0.7978846, %v11325_v51  ;;  %v5827_v58 = vmul.f32 %v5795_v14, %v5571_v63 }
 0x49d   :  { %7759 = vtanh.f32 %v5291_v15  ;;  %v5669_v29 = vmul.f32 0.044715, %v5637_v45  ;;  %v4554_v28 = vadd.f32 1.0, %v4522_v31  ;;  %v4680_v17 = vmul.f32 %v4648_v10, %v4424_v52 }
 0x49e   :  { %v4384_v13 = vpop.f32.mrf.mxu2  ;;  %v5386_v49 = vmul.f32 %v5354_v27, %v5130_v9 }
 0x49f   :  { %v11342_v41 = vadd.f32 %v4384_v13, %v10563_v5  ;;  %v5701_v11 = vadd.f32 1.0, %v5669_v29  ;;  %v4586_v44 = vmul.f32 %v4554_v28, %v4458_v46  ;;  %v4426_v13 = vmul.f32 0.5, %v11321_v4 }
 0x4a0   :  { %v5513_v22 = vpop.f32.mrf.mxu1  ;;  %v4795_v35 = vpop.f32.mrf.mxu3 }
 0x4a1   :  { %v7756_v34 = vpop.eup %7755  ;;  %v11345_v54 = vadd.f32 %v5513_v22, %v10961_v0  ;;  %v4796_v40 = vadd.f32 %v11202_v2, %v4795_v35  ;;  %v4491_v12 = vmul.f32 %v11342_v41, %v11342_v41  ;;  %v5733_v56 = vmul.f32 %v5701_v11, %v5605_v8 }
 0x4a2   :  { %v7758_v23 = vpop.eup %7757  ;;  %v5796_v60 = vadd.f32 1.0, %v7756_v34  ;;  %v4459_v36 = vmul.f32 0.7978846, %v11342_v41  ;;  %7761 = vtanh.f32 %v4586_v44 }
 0x4a3   :  { %v7760_v59 = vpop.eup %7759  ;;  %v5638_v32 = vmul.f32 %v11345_v54, %v11345_v54  ;;  %4868 = vst.msk [vmem:[%s11898_s9 + $0x228] sm:$0xff] %vm1622_vm1, %v4796_v40  ;;  %v4523_v33 = vmul.f32 0.044715, %v4491_v12  ;;  %v4649_v53 = vadd.f32 1.0, %v7758_v23  ;;  %v5606_v38 = vmul.f32 0.7978846, %v11345_v54 }
 0x4a4   :  { %v5355_v47 = vadd.f32 1.0, %v7760_v59  ;;  %v5828_v24 = vmul.f32 %v5796_v60, %v5572_v61  ;;  %7763 = vtanh.f32 %v5733_v56  ;;  %v4427_v23 = vmul.f32 0.5, %v11342_v41 }
 0x4a5   :  { %v5670_v57 = vmul.f32 0.044715, %v5638_v32  ;;  %v4555_v1 = vadd.f32 1.0, %v4523_v33  ;;  %v4681_v43 = vmul.f32 %v4649_v53, %v4425_v20  ;;  %v5574_v12 = vmul.f32 0.5, %v11345_v54 }
 0x4a6   :  { %v4387_v18 = vpop.f32.mrf.mxu2  ;;  %v5387_v26 = vmul.f32 %v5355_v47, %v5131_v7  ;;  %v5854_v37 = vpack.c.bf16 %v5828_v24, %v5827_v58  ;;  %v5573_v7 = vmul.f32 0.5, %v11325_v51 }
 0x4a7   :  { %v5702_v25 = vadd.f32 1.0, %v5670_v57  ;;  %v4587_v42 = vmul.f32 %v4555_v1, %v4459_v36  ;;  %v11366_v16 = vadd.f32 %v4387_v18, %v10563_v5  ;;  %v4701_v21 = vpack.c.bf16 %v4681_v43, %v4680_v17 }
 0x4a8   :  { %v5516_v55 = vpop.f32.mrf.mxu1  ;;  %v4798_v19 = vpop.f32.mrf.mxu3  ;;  %5966 = vmatmul.bf16.gmra.mxu2 %v5854_v37  ;;  %v5403_v3 = vpack.c.bf16 %v5387_v26, %v5386_v49 }
 0x4a9   :  { %v5734_v15 = vmul.f32 %v5702_v25, %v5606_v38  ;;  %v11369_v30 = vadd.f32 %v5516_v55, %v10961_v0  ;;  %v4799_v45 = vadd.f32 %v11202_v2, %v4798_v19  ;;  %7765 = vtanh.f32 %v4587_v42  ;;  %4837 = vmatmul.bf16.gmra.mxu3 %v4701_v21  ;;  %v7762_v48 = vpop.eup %7761 }
 0x4aa   :  { %v4492_v6 = vmul.f32 %v11366_v16, %v11366_v16  ;;  %v7764_v31 = vpop.eup %7763  ;;  %v4460_v46 = vmul.f32 0.7978846, %v11366_v16  ;;  %v4650_v40 = vadd.f32 1.0, %v7762_v48 }
 0x4ab   :  { %7767 = vtanh.f32 %v5734_v15  ;;  %v5639_v62 = vmul.f32 %v11369_v30, %v11369_v30  ;;  %4869 = vst.msk [vmem:[%s11898_s9 + $0x230] sm:$0xff] %vm1622_vm1, %v4799_v45  ;;  %5555 = vmatmul.bf16.gmra.mxu1 %v5403_v3  ;;  %v5607_v4 = vmul.f32 0.7978846, %v11369_v30  ;;  %v5797_v20 = vadd.f32 1.0, %v7764_v31 }
 0x4ac   :  { %v4524_v39 = vmul.f32 0.044715, %v4492_v6  ;;  %v4682_v33 = vmul.f32 %v4650_v40, %v4426_v13 }
 0x4ad   :  { %v5671_v29 = vmul.f32 0.044715, %v5639_v62  ;;  %v5829_v53 = vmul.f32 %v5797_v20, %v5573_v7 }
 0x4ae   :  { %v4556_v63 = vadd.f32 1.0, %v4524_v39  ;;  %v4389_v52 = vpop.f32.mrf.mxu2 }
 0x4af   :  { %v7766_v9 = vpop.eup %7765  ;;  %v5703_v14 = vadd.f32 1.0, %v5671_v29  ;;  %v11383_v22 = vadd.f32 %v4389_v52, %v10563_v5 }
 0x4b0   :  { %v5518_v28 = vpop.f32.mrf.mxu1  ;;  %v4800_v35 = vpop.f32.mrf.mxu3  ;;  %v4651_v27 = vadd.f32 1.0, %v7766_v9  ;;  %v4588_v59 = vmul.f32 %v4556_v63, %v4460_v46 }
 0x4b1   :  { %v7768_v10 = vpop.eup %7767  ;;  %v11386_v34 = vadd.f32 %v5518_v28, %v10961_v0  ;;  %v4801_v11 = vadd.f32 %v11202_v2, %v4800_v35  ;;  %v4493_v61 = vmul.f32 %v11383_v22, %v11383_v22  ;;  %v5735_v41 = vmul.f32 %v5703_v14, %v5607_v4 }
 0x4b2   :  { %v5798_v32 = vadd.f32 1.0, %v7768_v10  ;;  %v4683_v58 = vmul.f32 %v4651_v27, %v4427_v23  ;;  %v4461_v60 = vmul.f32 0.7978846, %v11383_v22  ;;  %7769 = vtanh.f32 %v4588_v59 }
 0x4b3   :  { %v5640_v8 = vmul.f32 %v11386_v34, %v11386_v34  ;;  %4870 = vst.msk [vmem:[%s11898_s9 + $0x238] sm:$0xff] %vm1622_vm1, %v4801_v11  ;;  %v4525_v44 = vmul.f32 0.044715, %v4493_v61  ;;  %v5608_v17 = vmul.f32 0.7978846, %v11386_v34  ;;  %7771 = vtanh.f32 %v5735_v41 }
 0x4b4   :  { %v5830_v54 = vmul.f32 %v5798_v32, %v5574_v12  ;;  %v4702_v47 = vpack.c.bf16 %v4683_v58, %v4682_v33  ;;  %v4428_v14 = vmul.f32 0.5, %v11366_v16  ;;  %v4429_v46 = vmul.f32 0.5, %v11383_v22 }
 0x4b5   :  { %v5672_v50 = vmul.f32 0.044715, %v5640_v8  ;;  %v4557_v51 = vadd.f32 1.0, %v4525_v44  ;;  %v5575_v11 = vmul.f32 0.5, %v11369_v30  ;;  %v5576_v40 = vmul.f32 0.5, %v11386_v34 }
 0x4b6   :  { %v4392_v57 = vpop.f32.mrf.mxu2  ;;  %v5855_v1 = vpack.c.bf16 %v5830_v54, %v5829_v53 }
 0x4b7   :  { %v5704_v56 = vadd.f32 1.0, %v5672_v50  ;;  %v4589_v49 = vmul.f32 %v4557_v51, %v4461_v60  ;;  %v11404_v24 = vadd.f32 %v4392_v57, %v10563_v5 }
 0x4b8   :  { %v5521_v36 = vpop.f32.mrf.mxu1  ;;  %5971 = vmatmul.bf16.gmra.mxu2 %v5855_v1  ;;  %v7770_v37 = vpop.eup %7769  ;;  %v7095_v1 = vld [vmem:[%s11896_s7] sm:$0xff] }
 0x4b9   :  { %v5736_v43 = vmul.f32 %v5704_v56, %v5608_v17  ;;  %v11407_v38 = vadd.f32 %v5521_v36, %v10961_v0  ;;  %7773 = vtanh.f32 %v4589_v49  ;;  %v4494_v25 = vmul.f32 %v11404_v24, %v11404_v24  ;;  %v4803_v18 = vpop.f32.mrf.mxu3  ;;  %4842 = vmatmul.bf16.gmra.mxu3 %v4702_v47  ;;  %v7772_v19 = vpop.eup %7771 }
 0x4ba   :  { %v4804_v55 = vadd.f32 %v11202_v2, %v4803_v18  ;;  %v4462_v3 = vmul.f32 0.7978846, %v11404_v24  ;;  %v4652_v29 = vadd.f32 1.0, %v7770_v37  ;;  %v5799_v9 = vadd.f32 1.0, %v7772_v19  ;;  %6401 = vmatpush.bf16.msrb.mxu3 %v7095_v1 }
 0x4bb   :  { %7775 = vtanh.f32 %v5736_v43  ;;  %v5641_v26 = vmul.f32 %v11407_v38, %v11407_v38  ;;  %v4526_v42 = vmul.f32 0.044715, %v4494_v25  ;;  %v5609_v63 = vmul.f32 0.7978846, %v11407_v38  ;;  %v5881_v25 = vld [vmem:[%s11895_s6] sm:$0x1] }
 0x4bc   :  { %4871 = vst.msk [vmem:[%s11898_s9 + $0x240] sm:$0xff] %vm1622_vm1, %v4804_v55  ;;  %v5831_v22 = vmul.f32 %v5799_v9, %v5575_v11  ;;  %v4684_v12 = vmul.f32 %v4652_v29, %v4428_v14  ;;  %v5577_v29 = vmul.f32 0.5, %v11407_v38 }
 0x4bd   :  { %v5673_v21 = vmul.f32 0.044715, %v5641_v26  ;;  %v4558_v15 = vadd.f32 1.0, %v4526_v42 }
 0x4be   :  { %v4394_v6 = vpop.f32.mrf.mxu2 }
 0x4bf   :  { %v5705_v45 = vadd.f32 1.0, %v5673_v21  ;;  %v7774_v62 = vpop.eup %7773  ;;  %v11420_v48 = vadd.f32 %v4394_v6, %v10563_v5  ;;  %v4590_v28 = vmul.f32 %v4558_v15, %v4462_v3  ;;  %v4430_v6 = vmul.f32 0.5, %v11404_v24 }
 0x4c0   :  { %v5523_v39 = vpop.f32.mrf.mxu1  ;;  %v4653_v13 = vadd.f32 1.0, %v7774_v62 }
 0x4c1   :  { %v7776_v31 = vpop.eup %7775  ;;  %v11424_v52 = vadd.f32 %v5523_v39, %v10961_v0  ;;  %v4495_v35 = vmul.f32 %v11420_v48, %v11420_v48  ;;  %v4805_v10 = vpop.f32.mrf.mxu3  ;;  %v5737_v27 = vmul.f32 %v5705_v45, %v5609_v63  ;;  %7777 = vtanh.f32 %v4590_v28 }
 0x4c2   :  { %v4806_v61 = vadd.f32 %v11202_v2, %v4805_v10  ;;  %v5800_v20 = vadd.f32 1.0, %v7776_v31  ;;  %v4685_v16 = vmul.f32 %v4653_v13, %v4429_v46  ;;  %v4463_v59 = vmul.f32 0.7978846, %v11420_v48 }
 0x4c3   :  { %v5642_v23 = vmul.f32 %v11424_v52, %v11424_v52  ;;  %v4527_v4 = vmul.f32 0.044715, %v4495_v35  ;;  %7779 = vtanh.f32 %v5737_v27  ;;  %v5610_v34 = vmul.f32 0.7978846, %v11424_v52 }
 0x4c4   :  { %4872 = vst.msk [vmem:[%s11898_s9 + $0x248] sm:$0xff] %vm1622_vm1, %v4806_v61  ;;  %v5832_v30 = vmul.f32 %v5800_v20, %v5576_v40  ;;  %v4703_v44 = vpack.c.bf16 %v4685_v16, %v4684_v12  ;;  %v5578_v13 = vmul.f32 0.5, %v11424_v52  ;;  %v4431_v14 = vmul.f32 0.5, %v11420_v48 }
 0x4c5   :  { %v5674_v7 = vmul.f32 0.044715, %v5642_v23  ;;  %v4559_v8 = vadd.f32 1.0, %v4527_v4  ;;  %v11470_v35 = vperm.slane %v5881_v25, 0 }
 0x4c6   :  { %v5856_v50 = vpack.c.bf16 %v5832_v30, %v5831_v22  ;;  %v4397_v33 = vpop.f32.mrf.mxu2 }
 0x4c7   :  { %v5706_v41 = vadd.f32 1.0, %v5674_v7  ;;  %v4591_v32 = vmul.f32 %v4559_v8, %v4463_v59  ;;  %v11445_v53 = vadd.f32 %v4397_v33, %v10563_v5  ;;  %v7778_v56 = vpop.eup %7777 }
 0x4c8   :  { %v5526_v58 = vpop.f32.mrf.mxu1  ;;  %5976 = vmatmul.bf16.gmra.mxu2 %v5856_v50  ;;  %v4654_v15 = vadd.f32 1.0, %v7778_v56 }
 0x4c9   :  { %v5738_v60 = vmul.f32 %v5706_v41, %v5610_v34  ;;  %v11442_v51 = vadd.f32 %v5526_v58, %v10961_v0  ;;  %7781 = vtanh.f32 %v4591_v32  ;;  %4847 = vmatmul.bf16.gmra.mxu3 %v4703_v44  ;;  %v4808_v17 = vpop.f32.mrf.mxu3  ;;  %v4496_v57 = vmul.f32 %v11445_v53, %v11445_v53  ;;  %v7780_v49 = vpop.eup %7779 }
 0x4ca   :  { %v4809_v47 = vadd.f32 %v11202_v2, %v4808_v17  ;;  %v5801_v19 = vadd.f32 1.0, %v7780_v49  ;;  %v4464_v63 = vmul.f32 0.7978846, %v11445_v53  ;;  %v4686_v40 = vmul.f32 %v4654_v15, %v4430_v6 }
 0x4cb   :  { %7783 = vtanh.f32 %v5738_v60  ;;  %v5643_v54 = vmul.f32 %v11442_v51, %v11442_v51  ;;  %v4528_v43 = vmul.f32 0.044715, %v4496_v57  ;;  %v5611_v42 = vmul.f32 0.7978846, %v11442_v51 }
 0x4cc   :  { %4873 = vst.msk [vmem:[%s11898_s9 + $0x250] sm:$0xff] %vm1622_vm1, %v4809_v47  ;;  %v5833_v11 = vmul.f32 %v5801_v19, %v5577_v29  ;;  %v5579_v25 = vmul.f32 0.5, %v11442_v51 }
 0x4cd   :  { %v5675_v36 = vmul.f32 0.044715, %v5643_v54  ;;  %v4560_v55 = vadd.f32 1.0, %v4528_v43 }
 0x4ce   :  { %v4399_v21 = vpop.f32.mrf.mxu2 }
 0x4cf   :  { %v5707_v18 = vadd.f32 1.0, %v5675_v36  ;;  %v7782_v26 = vpop.eup %7781  ;;  %v4400_v3 = vadd.f32 %v4399_v21, %v10563_v5  ;;  %v4592_v24 = vmul.f32 %v4560_v55, %v4464_v63 }
 0x4d0   :  { %v5528_v37 = vpop.f32.mrf.mxu1  ;;  %v4655_v39 = vadd.f32 1.0, %v7782_v26 }
 0x4d1   :  { %v7784_v45 = vpop.eup %7783  ;;  %v5529_v62 = vadd.f32 %v5528_v37, %v10961_v0  ;;  %v5739_v31 = vmul.f32 %v5707_v18, %v5611_v42  ;;  %v4810_v28 = vpop.f32.mrf.mxu3  ;;  %v4497_v10 = vmul.f32 %v4400_v3, %v4400_v3  ;;  %v4465_v16 = vmul.f32 0.7978846, %v4400_v3 }
 0x4d2   :  { %v5802_v9 = vadd.f32 1.0, %v7784_v45  ;;  %v4811_v27 = vadd.f32 %v11202_v2, %v4810_v28  ;;  %v4687_v23 = vmul.f32 %v4655_v39, %v4431_v14  ;;  %v4432_v37 = vmul.f32 0.5, %v11445_v53 }
 0x4d3   :  { %v5644_v46 = vmul.f32 %v5529_v62, %v5529_v62  ;;  %7785 = vtanh.f32 %v5739_v31  ;;  %v4529_v4 = vmul.f32 0.044715, %v4497_v10  ;;  %v5612_v61 = vmul.f32 0.7978846, %v5529_v62 }
 0x4d4   :  { %v5834_v38 = vmul.f32 %v5802_v9, %v5578_v13  ;;  %4874 = vst.msk [vmem:[%s11898_s9 + $0x258] sm:$0xff] %vm1622_vm1, %v4811_v27  ;;  %v4704_v52 = vpack.c.bf16 %v4687_v23, %v4686_v40  ;;  %7787 = vtanh.f32 %v4592_v24  ;;  %v5580_v18 = vmul.f32 0.5, %v5529_v62 }
 0x4d5   :  { %v5676_v5 = vmul.f32 0.044715, %v5644_v46  ;;  %v4561_v7 = vadd.f32 1.0, %v4529_v4  ;;  %v4433_v21 = vmul.f32 0.5, %v4400_v3 }
 0x4d6   :  { %v5857_v48 = vpack.c.bf16 %v5834_v38, %v5833_v11  ;;  %v5942_v22 = vpop.f32.mrf.mxu2 }
 0x4d7   :  { %v5708_v20 = vadd.f32 1.0, %v5676_v5  ;;  %v11478_v59 = vadd.f32 %v5942_v22, %v11470_v35  ;;  %v4593_v8 = vmul.f32 %v4561_v7, %v4465_v16  ;;  %v11521_v16 = vld [vmem:[%s11897_s8] ss:$0 sm:$0xff] }
 0x4d8   :  { %v5531_v30 = vpop.f32.mrf.mxu1  ;;  %5981 = vmatmul.bf16.gmra.mxu2 %v5857_v48 }
 0x4d9   :  { %v5740_v12 = vmul.f32 %v5708_v20, %v5612_v61  ;;  %v11481_v34 = vadd.f32 %v5531_v30, %v10961_v0  ;;  %4852 = vmatmul.bf16.gmra.mxu3 %v4704_v52  ;;  %v7786_v41 = vpop.eup %7785  ;;  %v6086_v44 = vmul.f32 %v11478_v59, %v11478_v59  ;;  %v4813_v32 = vpop.f32.mrf.mxu3  ;;  %v6054_v47 = vmul.f32 0.7978846, %v11478_v59 }
 0x4da   :  { %v4814_v50 = vadd.f32 %v11202_v2, %v4813_v32  ;;  %v7788_v33 = vpop.eup %7787  ;;  %v5803_v36 = vadd.f32 1.0, %v7786_v41 }
 0x4db   :  { %7789 = vtanh.f32 %v5740_v12  ;;  %v5645_v58 = vmul.f32 %v11481_v34, %v11481_v34  ;;  %v6118_v60 = vmul.f32 0.044715, %v6086_v44  ;;  %v4656_v1 = vadd.f32 1.0, %v7788_v33 }
 0x4dc   :  { %7791 = vtanh.f32 %v4593_v8  ;;  %4875 = vst.msk [vmem:[%s11898_s9 + $0x260] sm:$0xff] %vm1622_vm1, %v4814_v50  ;;  %v5613_v45 = vmul.f32 0.7978846, %v11481_v34  ;;  %v5835_v62 = vmul.f32 %v5803_v36, %v5579_v25  ;;  %v6022_v44 = vmul.f32 0.5, %v11478_v59 }
 0x4dd   :  { %v5677_v54 = vmul.f32 0.044715, %v5645_v58  ;;  %v6150_v17 = vadd.f32 1.0, %v6118_v60  ;;  %v4688_v63 = vmul.f32 %v4656_v1, %v4432_v37 }
 0x4de   :  { %v5944_v56 = vpop.f32.mrf.mxu2 }
 0x4df   :  { %v5945_v49 = vadd.f32 %v5944_v56, %v11470_v35  ;;  %v5709_v26 = vadd.f32 1.0, %v5677_v54  ;;  %v6182_v19 = vmul.f32 %v6150_v17, %v6054_v47 }
 0x4e0   :  { %v5533_v42 = vpop.f32.mrf.mxu1 }
 0x4e1   :  { %v7790_v57 = vpop.eup %7789  ;;  %v11497_v15 = vadd.f32 %v5533_v42, %v10961_v0  ;;  %v6087_v6 = vmul.f32 %v5945_v49, %v5945_v49  ;;  %v4815_v39 = vpop.f32.mrf.mxu3  ;;  %v5741_v9 = vmul.f32 %v5709_v26, %v5613_v45  ;;  %7793 = vtanh.f32 %v6182_v19 }
 0x4e2   :  { %v7792_v43 = vpop.eup %7791  ;;  %v5804_v55 = vadd.f32 1.0, %v7790_v57  ;;  %v4816_v53 = vadd.f32 %v11202_v2, %v4815_v39  ;;  %v6055_v28 = vmul.f32 0.7978846, %v5945_v49  ;;  %v6023_v32 = vmul.f32 0.5, %v5945_v49 }
 0x4e3   :  { %v4657_v31 = vadd.f32 1.0, %v7792_v43  ;;  %v5646_v51 = vmul.f32 %v11497_v15, %v11497_v15  ;;  %v6119_v13 = vmul.f32 0.044715, %v6087_v6  ;;  %v5614_v11 = vmul.f32 0.7978846, %v11497_v15 }
 0x4e4   :  { %v5836_v29 = vmul.f32 %v5804_v55, %v5580_v18  ;;  %4876 = vst.msk [vmem:[%s11898_s9 + $0x268] sm:$0xff] %vm1622_vm1, %v4816_v53  ;;  %7795 = vtanh.f32 %v5741_v9  ;;  %v5581_v57 = vmul.f32 0.5, %v11481_v34  ;;  %v5582_v26 = vmul.f32 0.5, %v11497_v15 }
 0x4e5   :  { %v4689_v3 = vmul.f32 %v4657_v31, %v4433_v21  ;;  %v5678_v14 = vmul.f32 0.044715, %v5646_v51  ;;  %v6151_v24 = vadd.f32 1.0, %v6119_v13 }
 0x4e6   :  { %v5858_v46 = vpack.c.bf16 %v5836_v29, %v5835_v62 }
 0x4e7   :  { %v4705_v10 = vpack.c.bf16 %v4689_v3, %v4688_v63  ;;  %v5710_v40 = vadd.f32 1.0, %v5678_v14  ;;  %v6183_v5 = vmul.f32 %v6151_v24, %v6055_v28  ;;  %v7794_v4 = vpop.eup %7793 }
 0x4e8   :  { %v5536_v38 = vpop.f32.mrf.mxu1  ;;  %5986 = vmatmul.bf16.gmra.mxu2 %v5858_v46  ;;  %v6246_v12 = vadd.f32 1.0, %v7794_v4 }
 0x4e9   :  { %v5742_v27 = vmul.f32 %v5710_v40, %v5614_v11  ;;  %4857 = vmatmul.bf16.gmra.mxu3 %v4705_v10  ;;  %7797 = vtanh.f32 %v6183_v5  ;;  %v11509_v2 = vadd.f32 %v5536_v38, %v10961_v0  ;;  %v5947_v23 = vpop.f32.mrf.mxu2 }
 0x4ea   :  { %v11512_v61 = vadd.f32 %v5947_v23, %v11470_v35  ;;  %v7796_v22 = vpop.eup %7795  ;;  %v6278_v47 = vmul.f32 %v6246_v12, %v6022_v44 }
 0x4eb   :  { %7799 = vtanh.f32 %v5742_v27  ;;  %v5647_v20 = vmul.f32 %v11509_v2, %v11509_v2  ;;  %v4818_v48 = vpop.f32.mrf.mxu3  ;;  %v5615_v60 = vmul.f32 0.7978846, %v11509_v2  ;;  %v5805_v56 = vadd.f32 1.0, %v7796_v22 }
 0x4ec   :  { %v6088_v52 = vmul.f32 %v11512_v61, %v11512_v61  ;;  %v4819_v7 = vadd.f32 %v11521_v16, %v4818_v48  ;;  %v6056_v59 = vmul.f32 0.7978846, %v11512_v61 }
 0x4ed   :  { %v5679_v8 = vmul.f32 0.044715, %v5647_v20  ;;  %v5837_v19 = vmul.f32 %v5805_v56, %v5581_v57 }
 0x4ee   :  { %v6120_v30 = vmul.f32 0.044715, %v6088_v52  ;;  %4877 = vst.msk [vmem:[%s11898_s9 + $0x270] sm:$0xff] %vm1622_vm1, %v4819_v7 }
 0x4ef   :  { %v7798_v41 = vpop.eup %7797  ;;  %v5711_v58 = vadd.f32 1.0, %v5679_v8 }
 0x4f0   :  { %v6247_v33 = vadd.f32 1.0, %v7798_v41  ;;  %v6152_v54 = vadd.f32 1.0, %v6120_v30  ;;  %v5538_v17 = vpop.f32.mrf.mxu1 }
 0x4f1   :  { %v7800_v50 = vpop.eup %7799  ;;  %v5539_v36 = vadd.f32 %v5538_v17, %v10961_v0  ;;  %v5949_v1 = vpop.f32.mrf.mxu2  ;;  %v5743_v18 = vmul.f32 %v5711_v58, %v5615_v60  ;;  %v5583_v58 = vmul.f32 0.5, %v11509_v2  ;;  %v6024_v17 = vmul.f32 0.5, %v11512_v61 }
 0x4f2   :  { %v5806_v43 = vadd.f32 1.0, %v7800_v50  ;;  %v6279_v25 = vmul.f32 %v6247_v33, %v6023_v32  ;;  %v11534_v49 = vadd.f32 %v5949_v1, %v11470_v35  ;;  %v6184_v21 = vmul.f32 %v6152_v54, %v6056_v59 }
 0x4f3   :  { %v5648_v42 = vmul.f32 %v5539_v36, %v5539_v36  ;;  %v4820_v55 = vpop.f32.mrf.mxu3  ;;  %7801 = vtanh.f32 %v5743_v18  ;;  %v5616_v29 = vmul.f32 0.7978846, %v5539_v36  ;;  %v5584_v50 = vmul.f32 0.5, %v5539_v36 }
 0x4f4   :  { %v6310_v37 = vpack.c.bf16 %v6279_v25, %v6278_v47  ;;  %v6089_v45 = vmul.f32 %v11534_v49, %v11534_v49  ;;  %v4821_v6 = vadd.f32 %v11521_v16, %v4820_v55  ;;  %v5838_v39 = vmul.f32 %v5806_v43, %v5582_v26 }
 0x4f5   :  { %v5680_v34 = vmul.f32 0.044715, %v5648_v42  ;;  %7803 = vtanh.f32 %v6184_v21  ;;  %v6057_v9 = vmul.f32 0.7978846, %v11534_v49  ;;  %v6025_v18 = vmul.f32 0.5, %v11534_v49 }
 0x4f6   :  { %v6121_v51 = vmul.f32 0.044715, %v6089_v45  ;;  %4878 = vst.msk [vmem:[%s11898_s9 + $0x278] sm:$0xff] %vm1622_vm1, %v4821_v6  ;;  %v5859_v15 = vpack.c.bf16 %v5838_v39, %v5837_v19 }
 0x4f7   :  { %v5712_v31 = vadd.f32 1.0, %v5680_v34 }
 0x4f8   :  { %v5541_v62 = vpop.f32.mrf.mxu1  ;;  %v6153_v13 = vadd.f32 1.0, %v6121_v51  ;;  %5991 = vmatmul.bf16.gmra.mxu2 %v5859_v15 }
 0x4f9   :  { %6402 = vmatmul.bf16.vlgmr.msrb.gmra.mxu3 %v6310_v37  ;;  %v5744_v63 = vmul.f32 %v5712_v31, %v5616_v29  ;;  %v11546_v53 = vadd.f32 %v5541_v62, %v10961_v0  ;;  %v5952_v3 = vpop.f32.mrf.mxu2  ;;  %v7802_v24 = vpop.eup %7801 }
 0x4fa   :  { %v11549_v14 = vadd.f32 %v5952_v3, %v11470_v35  ;;  %v6185_v46 = vmul.f32 %v6153_v13, %v6057_v9  ;;  %v5807_v12 = vadd.f32 1.0, %v7802_v24 }
 0x4fb   :  { %7805 = vtanh.f32 %v5744_v63  ;;  %v4823_v28 = vpop.f32.mrf.mxu3  ;;  %v5649_v10 = vmul.f32 %v11546_v53, %v11546_v53  ;;  %v7804_v5 = vpop.eup %7803  ;;  %v5617_v52 = vmul.f32 0.7978846, %v11546_v53 }
 0x4fc   :  { %v6090_v11 = vmul.f32 %v11549_v14, %v11549_v14  ;;  %7807 = vtanh.f32 %v6185_v46  ;;  %v4824_v40 = vadd.f32 %v11521_v16, %v4823_v28  ;;  %v6058_v8 = vmul.f32 0.7978846, %v11549_v14 }
 0x4fd   :  { %v5681_v27 = vmul.f32 0.044715, %v5649_v10  ;;  %v6248_v44 = vadd.f32 1.0, %v7804_v5  ;;  %v5839_v43 = vmul.f32 %v5807_v12, %v5583_v58 }
 0x4fe   :  { %v6122_v38 = vmul.f32 0.044715, %v6090_v11  ;;  %4879 = vst.msk [vmem:[%s11898_s9 + $0x280] sm:$0xff] %vm1622_vm1, %v4824_v40 }
 0x4ff   :  { %v5713_v23 = vadd.f32 1.0, %v5681_v27  ;;  %v6280_v59 = vmul.f32 %v6248_v44, %v6024_v17  ;;  %v5585_v27 = vmul.f32 0.5, %v11546_v53 }
 0x500   :  { %v6154_v4 = vadd.f32 1.0, %v6122_v38  ;;  %v5543_v20 = vpop.f32.mrf.mxu1  ;;  %v6026_v38 = vmul.f32 0.5, %v11549_v14 }
 0x501   :  { %v7806_v48 = vpop.eup %7805  ;;  %v11562_v7 = vadd.f32 %v5543_v20, %v10961_v0  ;;  %v5954_v22 = vpop.f32.mrf.mxu2  ;;  %v5745_v33 = vmul.f32 %v5713_v23, %v5617_v52 }
 0x502   :  { %v11566_v30 = vadd.f32 %v5954_v22, %v11470_v35  ;;  %v5808_v41 = vadd.f32 1.0, %v7806_v48  ;;  %v7808_v32 = vpop.eup %7807  ;;  %v6186_v56 = vmul.f32 %v6154_v4, %v6058_v8 }
 0x503   :  { %v5650_v60 = vmul.f32 %v11562_v7, %v11562_v7  ;;  %v4825_v54 = vpop.f32.mrf.mxu3  ;;  %v6249_v36 = vadd.f32 1.0, %v7808_v32  ;;  %7809 = vtanh.f32 %v5745_v33  ;;  %v5618_v26 = vmul.f32 0.7978846, %v11562_v7 }
 0x504   :  { %v6091_v57 = vmul.f32 %v11566_v30, %v11566_v30  ;;  %v4826_v1 = vadd.f32 %v11521_v16, %v4825_v54  ;;  %v5840_v25 = vmul.f32 %v5808_v41, %v5584_v50  ;;  %7811 = vtanh.f32 %v6186_v56 }
 0x505   :  { %v5682_v47 = vmul.f32 0.044715, %v5650_v60  ;;  %v6059_v55 = vmul.f32 0.7978846, %v11566_v30  ;;  %v6281_v21 = vmul.f32 %v6249_v36, %v6025_v18  ;;  %v5586_v41 = vmul.f32 0.5, %v11562_v7 }
 0x506   :  { %v6123_v2 = vmul.f32 0.044715, %v6091_v57  ;;  %4880 = vst.msk [vmem:[%s11898_s9 + $0x288] sm:$0xff] %vm1622_vm1, %v4826_v1  ;;  %v5860_v61 = vpack.c.bf16 %v5840_v25, %v5839_v43  ;;  %v6027_v44 = vmul.f32 0.5, %v11566_v30 }
 0x507   :  { %v5714_v42 = vadd.f32 1.0, %v5682_v47  ;;  %v6311_v39 = vpack.c.bf16 %v6281_v21, %v6280_v59 }
 0x508   :  { %v6155_v37 = vadd.f32 1.0, %v6123_v2  ;;  %v5546_v49 = vpop.f32.mrf.mxu1  ;;  %5996 = vmatmul.bf16.gmra.mxu2 %v5860_v61 }
 0x509   :  { %v5746_v19 = vmul.f32 %v5714_v42, %v5618_v26  ;;  %v11583_v45 = vadd.f32 %v5546_v49, %v10961_v0  ;;  %6407 = vmatmul.bf16.gmra.mxu3 %v6311_v39  ;;  %v7810_v15 = vpop.eup %7809 }
 0x50a   :  { %v6187_v34 = vmul.f32 %v6155_v37, %v6059_v55  ;;  %v7812_v9 = vpop.eup %7811  ;;  %v5809_v46 = vadd.f32 1.0, %v7810_v15 }
 0x50b   :  { %v5957_v6 = vpop.f32.mrf.mxu2  ;;  %7813 = vtanh.f32 %v5746_v19  ;;  %v4828_v31 = vpop.f32.mrf.mxu3  ;;  %v5651_v51 = vmul.f32 %v11583_v45, %v11583_v45  ;;  %v6250_v40 = vadd.f32 1.0, %v7812_v9  ;;  %v5619_v48 = vmul.f32 0.7978846, %v11583_v45 }
 0x50c   :  { %v11586_v29 = vadd.f32 %v5957_v6, %v11470_v35  ;;  %7815 = vtanh.f32 %v6187_v34  ;;  %v4829_v63 = vadd.f32 %v11521_v16, %v4828_v31  ;;  %v5841_v53 = vmul.f32 %v5809_v46, %v5585_v27 }
 0x50d   :  { %v5683_v13 = vmul.f32 0.044715, %v5651_v51  ;;  %v6282_v33 = vmul.f32 %v6250_v40, %v6026_v38  ;;  %v5587_v15 = vmul.f32 0.5, %v11583_v45 }
 0x50e   :  { %v6092_v62 = vmul.f32 %v11586_v29, %v11586_v29  ;;  %4881 = vst.msk [vmem:[%s11898_s9 + $0x290] sm:$0xff] %vm1622_vm1, %v4829_v63  ;;  %v6060_v52 = vmul.f32 0.7978846, %v11586_v29  ;;  %v6028_v40 = vmul.f32 0.5, %v11586_v29 }
 0x50f   :  { %v5715_v24 = vadd.f32 1.0, %v5683_v13 }
 0x510   :  { %v6124_v3 = vmul.f32 0.044715, %v6092_v62  ;;  %v5548_v11 = vpop.f32.mrf.mxu1 }
 0x511   :  { %v7814_v28 = vpop.eup %7813  ;;  %v5549_v23 = vadd.f32 %v5548_v11, %v10961_v0  ;;  %v5747_v58 = vmul.f32 %v5715_v24, %v5619_v48 }
 0x512   :  { %v6156_v10 = vadd.f32 1.0, %v6124_v3  ;;  %v7816_v5 = vpop.eup %7815  ;;  %v5810_v20 = vadd.f32 1.0, %v7814_v28 }
 0x513   :  { %v5959_v4 = vpop.f32.mrf.mxu2  ;;  %v4830_v12 = vpop.f32.mrf.mxu3  ;;  %v6251_v8 = vadd.f32 1.0, %v7816_v5  ;;  %v5652_v32 = vmul.f32 %v5549_v23, %v5549_v23  ;;  %v5620_v47 = vmul.f32 0.7978846, %v5549_v23  ;;  %7817 = vtanh.f32 %v5747_v58 }
 0x514   :  { %v5960_v22 = vadd.f32 %v5959_v4, %v11470_v35  ;;  %v6188_v14 = vmul.f32 %v6156_v10, %v6060_v52  ;;  %v4831_v54 = vadd.f32 %v11521_v16, %v4830_v12  ;;  %v5842_v17 = vmul.f32 %v5810_v20, %v5586_v41 }
 0x515   :  { %v5684_v60 = vmul.f32 0.044715, %v5652_v32  ;;  %v6283_v56 = vmul.f32 %v6251_v8, %v6027_v44  ;;  %v5588_v62 = vmul.f32 0.5, %v5549_v23 }
 0x516   :  { %v6093_v50 = vmul.f32 %v5960_v22, %v5960_v22  ;;  %4882 = vst.msk [vmem:[%s11898_s9 + $0x298] sm:$0xff] %vm1622_vm1, %v4831_v54  ;;  %v5861_v7 = vpack.c.bf16 %v5842_v17, %v5841_v53  ;;  %v6061_v43 = vmul.f32 0.7978846, %v5960_v22  ;;  %7819 = vtanh.f32 %v6188_v14 }
 0x517   :  { %v5716_v1 = vadd.f32 1.0, %v5684_v60  ;;  %v6312_v30 = vpack.c.bf16 %v6283_v56, %v6282_v33  ;;  %v6029_v5 = vmul.f32 0.5, %v5960_v22 }
 0x518   :  { %v6125_v57 = vmul.f32 0.044715, %v6093_v50  ;;  %v5551_v18 = vpop.f32.mrf.mxu1  ;;  %6001 = vmatmul.bf16.gmra.mxu2 %v5861_v7 }
 0x519   :  { %v5748_v2 = vmul.f32 %v5716_v1, %v5620_v47  ;;  %v11611_v36 = vadd.f32 %v5551_v18, %v10961_v0  ;;  %6412 = vmatmul.bf16.gmra.mxu3 %v6312_v30  ;;  %v7818_v19 = vpop.eup %7817 }
 0x51a   :  { %v6157_v25 = vadd.f32 1.0, %v6125_v57  ;;  %v5811_v9 = vadd.f32 1.0, %v7818_v19 }
 0x51b   :  { %v5962_v26 = vpop.f32.mrf.mxu2  ;;  %7821 = vtanh.f32 %v5748_v2  ;;  %v5653_v61 = vmul.f32 %v11611_v36, %v11611_v36  ;;  %v5621_v3 = vmul.f32 0.7978846, %v11611_v36 }
 0x51c   :  { %v6189_v59 = vmul.f32 %v6157_v25, %v6061_v43  ;;  %v4833_v42 = vpop.f32.mrf.mxu3  ;;  %v11616_v55 = vadd.f32 %v5962_v26, %v11470_v35  ;;  %v7820_v34 = vpop.eup %7819  ;;  %v5843_v12 = vmul.f32 %v5811_v9, %v5587_v15 }
 0x51d   :  { %v4834_v37 = vadd.f32 %v11521_v16, %v4833_v42  ;;  %v5685_v21 = vmul.f32 0.044715, %v5653_v61  ;;  %v6252_v11 = vadd.f32 1.0, %v7820_v34 }
 0x51e   :  { %7823 = vtanh.f32 %v6189_v59  ;;  %v6094_v49 = vmul.f32 %v11616_v55, %v11616_v55  ;;  %v6062_v27 = vmul.f32 0.7978846, %v11616_v55  ;;  %v6030_v9 = vmul.f32 0.5, %v11616_v55 }
 0x51f   :  { %4883 = vst.msk [vmem:[%s11898_s9 + $0x2a0] sm:$0xff] %vm1622_vm1, %v4834_v37  ;;  %v5717_v6 = vadd.f32 1.0, %v5685_v21  ;;  %v6284_v29 = vmul.f32 %v6252_v11, %v6028_v40 }
 0x520   :  { %v6126_v39 = vmul.f32 0.044715, %v6094_v49  ;;  %v5553_v31 = vpop.f32.mrf.mxu1 }
 0x521   :  { %v7822_v51 = vpop.eup %7821  ;;  %v5554_v63 = vadd.f32 %v5553_v31, %v10961_v0  ;;  %v5749_v4 = vmul.f32 %v5717_v6, %v5621_v3 }
 0x522   :  { %v6158_v46 = vadd.f32 1.0, %v6126_v39  ;;  %v5812_v10 = vadd.f32 1.0, %v7822_v51 }
 0x523   :  { %v5964_v28 = vpop.f32.mrf.mxu2  ;;  %v5654_v38 = vmul.f32 %v5554_v63, %v5554_v63  ;;  %v5622_v22 = vmul.f32 0.7978846, %v5554_v63  ;;  %7825 = vtanh.f32 %v5749_v4  ;;  %v5590_v21 = vmul.f32 0.5, %v5554_v63 }
 0x524   :  { %v7824_v13 = vpop.eup %7823  ;;  %v4835_v24 = vpop.f32.mrf.mxu3  ;;  %v5965_v45 = vadd.f32 %v5964_v28, %v11470_v35  ;;  %v5844_v20 = vmul.f32 %v5812_v10, %v5588_v62  ;;  %v6190_v48 = vmul.f32 %v6158_v46, %v6062_v27  ;;  %v5589_v62 = vmul.f32 0.5, %v11611_v36 }
 0x525   :  { %v4836_v23 = vadd.f32 %v11521_v16, %v4835_v24  ;;  %v5686_v52 = vmul.f32 0.044715, %v5654_v38  ;;  %v6253_v8 = vadd.f32 1.0, %v7824_v13 }
 0x526   :  { %v6095_v41 = vmul.f32 %v5965_v45, %v5965_v45  ;;  %v5862_v32 = vpack.c.bf16 %v5844_v20, %v5843_v12  ;;  %7827 = vtanh.f32 %v6190_v48  ;;  %v6063_v54 = vmul.f32 0.7978846, %v5965_v45 }
 0x527   :  { %4884 = vst.msk [vmem:[%s11898_s9 + $0x2a8] sm:$0xff] %vm1622_vm1, %v4836_v23  ;;  %v5718_v44 = vadd.f32 1.0, %v5686_v52  ;;  %v6285_v53 = vmul.f32 %v6253_v8, %v6029_v5  ;;  %v6031_v24 = vmul.f32 0.5, %v5965_v45 }
 0x528   :  { %v6127_v58 = vmul.f32 0.044715, %v6095_v41  ;;  %v5556_v14 = vpop.f32.mrf.mxu1  ;;  %6006 = vmatmul.bf16.gmra.mxu2 %v5862_v32 }
 0x529   :  { %v5750_v50 = vmul.f32 %v5718_v44, %v5622_v22  ;;  %v11637_v33 = vadd.f32 %v5556_v14, %v10961_v0  ;;  %v6313_v60 = vpack.c.bf16 %v6285_v53, %v6284_v29  ;;  %v7826_v25 = vpop.eup %7825 }
 0x52a   :  { %v6159_v17 = vadd.f32 1.0, %v6127_v58  ;;  %v5813_v49 = vadd.f32 1.0, %v7826_v25 }
 0x52b   :  { %v5967_v56 = vpop.f32.mrf.mxu2  ;;  %7829 = vtanh.f32 %v5750_v50  ;;  %v5655_v47 = vmul.f32 %v11637_v33, %v11637_v33  ;;  %6417 = vmatmul.bf16.gmra.mxu3 %v6313_v60  ;;  %v5623_v26 = vmul.f32 0.7978846, %v11637_v33 }
 0x52c   :  { %v4838_v57 = vpop.f32.mrf.mxu3  ;;  %v6191_v1 = vmul.f32 %v6159_v17, %v6063_v54  ;;  %v11642_v7 = vadd.f32 %v5967_v56, %v11470_v35  ;;  %v7828_v2 = vpop.eup %7827  ;;  %v5845_v11 = vmul.f32 %v5813_v49, %v5589_v62  ;;  %v5591_v17 = vmul.f32 0.5, %v11637_v33 }
 0x52d   :  { %v4839_v30 = vadd.f32 %v11521_v16, %v4838_v57  ;;  %v5687_v43 = vmul.f32 0.044715, %v5655_v47  ;;  %v6254_v15 = vadd.f32 1.0, %v7828_v2 }
 0x52e   :  { %7831 = vtanh.f32 %v6191_v1  ;;  %v6096_v18 = vmul.f32 %v11642_v7, %v11642_v7  ;;  %v6064_v46 = vmul.f32 0.7978846, %v11642_v7  ;;  %v6032_v33 = vmul.f32 0.5, %v11642_v7 }
 0x52f   :  { %4885 = vst.msk [vmem:[%s11898_s9 + $0x2b0] sm:$0xff] %vm1622_vm1, %v4839_v30  ;;  %v5719_v59 = vadd.f32 1.0, %v5687_v43  ;;  %v6286_v36 = vmul.f32 %v6254_v15, %v6030_v9 }
 0x530   :  { %v6128_v42 = vmul.f32 0.044715, %v6096_v18  ;;  %v5558_v61 = vpop.f32.mrf.mxu1 }
 0x531   :  { %v7830_v37 = vpop.eup %7829  ;;  %v5559_v19 = vadd.f32 %v5558_v61, %v10961_v0  ;;  %v5751_v34 = vmul.f32 %v5719_v59, %v5623_v26 }
 0x532   :  { %v6160_v6 = vadd.f32 1.0, %v6128_v42  ;;  %v5814_v51 = vadd.f32 1.0, %v7830_v37 }
 0x533   :  { %v5969_v39 = vpop.f32.mrf.mxu2  ;;  %v5656_v13 = vmul.f32 %v5559_v19, %v5559_v19  ;;  %7833 = vtanh.f32 %v5751_v34  ;;  %v5624_v55 = vmul.f32 0.7978846, %v5559_v19  ;;  %v5592_v56 = vmul.f32 0.5, %v5559_v19 }
 0x534   :  { %v4840_v31 = vpop.f32.mrf.mxu3  ;;  %v7832_v3 = vpop.eup %7831  ;;  %v5970_v28 = vadd.f32 %v5969_v39, %v11470_v35  ;;  %v5846_v0 = vmul.f32 %v5814_v51, %v5590_v21  ;;  %v6192_v5 = vmul.f32 %v6160_v6, %v6064_v46 }
 0x535   :  { %v4841_v63 = vadd.f32 %v11521_v16, %v4840_v31  ;;  %v5688_v10 = vmul.f32 0.044715, %v5656_v13  ;;  %v6255_v40 = vadd.f32 1.0, %v7832_v3 }
 0x536   :  { %v6097_v27 = vmul.f32 %v5970_v28, %v5970_v28  ;;  %v5863_v4 = vpack.c.bf16 %v5846_v0, %v5845_v11  ;;  %7835 = vtanh.f32 %v6192_v5  ;;  %v6065_v52 = vmul.f32 0.7978846, %v5970_v28 }
 0x537   :  { %4886 = vst.msk [vmem:[%s11898_s9 + $0x2b8] sm:$0xff] %vm1622_vm1, %v4841_v63  ;;  %v5720_v38 = vadd.f32 1.0, %v5688_v10  ;;  %v6287_v23 = vmul.f32 %v6255_v40, %v6031_v24  ;;  %v6033_v37 = vmul.f32 0.5, %v5970_v28 }
 0x538   :  { %v6129_v20 = vmul.f32 0.044715, %v6097_v27  ;;  %6011 = vmatmul.bf16.gmra.mxu2 %v5863_v4 }
 0x539   :  { %v5752_v48 = vmul.f32 %v5720_v38, %v5624_v55  ;;  %v6314_v45 = vpack.c.bf16 %v6287_v23, %v6286_v36  ;;  %v7834_v44 = vpop.eup %7833 }
 0x53a   :  { %v6161_v12 = vadd.f32 1.0, %v6129_v20  ;;  %v5815_v50 = vadd.f32 1.0, %v7834_v44 }
 0x53b   :  { %v5972_v8 = vpop.f32.mrf.mxu2  ;;  %7837 = vtanh.f32 %v5752_v48  ;;  %6422 = vmatmul.bf16.gmra.mxu3 %v6314_v45 }
 0x53c   :  { %v4843_v41 = vpop.f32.mrf.mxu3  ;;  %v5973_v29 = vadd.f32 %v5972_v8, %v11470_v35  ;;  %v6193_v32 = vmul.f32 %v6161_v12, %v6065_v52  ;;  %v7836_v14 = vpop.eup %7835  ;;  %v5847_v2 = vmul.f32 %v5815_v50, %v5591_v17 }
 0x53d   :  { %v4844_v22 = vadd.f32 %v11521_v16, %v4843_v41  ;;  %v6256_v26 = vadd.f32 1.0, %v7836_v14 }
 0x53e   :  { %v6098_v53 = vmul.f32 %v5973_v29, %v5973_v29  ;;  %7839 = vtanh.f32 %v6193_v32  ;;  %v6066_v30 = vmul.f32 0.7978846, %v5973_v29  ;;  %v6034_v36 = vmul.f32 0.5, %v5973_v29 }
 0x53f   :  { %4887 = vst.msk [vmem:[%s11898_s9 + $0x2c0] sm:$0xff] %vm1622_vm1, %v4844_v22  ;;  %v6288_v34 = vmul.f32 %v6256_v26, %v6032_v33 }
 0x540   :  { %v6130_v58 = vmul.f32 0.044715, %v6098_v53 }
 0x541   :  { %v7838_v60 = vpop.eup %7837 }
 0x542   :  { %v6162_v54 = vadd.f32 1.0, %v6130_v58  ;;  %v5816_v1 = vadd.f32 1.0, %v7838_v60 }
 0x543   :  { %v5974_v57 = vpop.f32.mrf.mxu2 }
 0x544   :  { %v4845_v47 = vpop.f32.mrf.mxu3  ;;  %v5975_v43 = vadd.f32 %v5974_v57, %v11470_v35  ;;  %v7840_v18 = vpop.eup %7839  ;;  %v5848_v59 = vmul.f32 %v5816_v1, %v5592_v56  ;;  %v6194_v42 = vmul.f32 %v6162_v54, %v6066_v30 }
 0x545   :  { %v4846_v25 = vadd.f32 %v11521_v16, %v4845_v47  ;;  %v6257_v19 = vadd.f32 1.0, %v7840_v18 }
 0x546   :  { %v6099_v61 = vmul.f32 %v5975_v43, %v5975_v43  ;;  %v5864_v21 = vpack.c.bf16 %v5848_v59, %v5847_v2  ;;  %7841 = vtanh.f32 %v6194_v42  ;;  %v6067_v39 = vmul.f32 0.7978846, %v5975_v43 }
 0x547   :  { %4888 = vst.msk [vmem:[%s11898_s9 + $0x2c8] sm:$0xff] %vm1622_vm1, %v4846_v25  ;;  %v6289_v6 = vmul.f32 %v6257_v19, %v6033_v37  ;;  %v6035_v55 = vmul.f32 0.5, %v5975_v43 }
 0x548   :  { %v6131_v49 = vmul.f32 0.044715, %v6099_v61  ;;  %6016 = vmatmul.bf16.gmra.mxu2 %v5864_v21 }
 0x549   :  { %v6315_v15 = vpack.c.bf16 %v6289_v6, %v6288_v34 }
 0x54a   :  { %v6163_v31 = vadd.f32 1.0, %v6131_v49 }
 0x54b   :  { %v5977_v51 = vpop.f32.mrf.mxu2  ;;  %6427 = vmatmul.bf16.gmra.mxu3 %v6315_v15 }
 0x54c   :  { %v4848_v62 = vpop.f32.mrf.mxu3  ;;  %v6195_v9 = vmul.f32 %v6163_v31, %v6067_v39  ;;  %v5978_v13 = vadd.f32 %v5977_v51, %v11470_v35  ;;  %v7842_v46 = vpop.eup %7841 }
 0x54d   :  { %v4849_v3 = vadd.f32 %v11521_v16, %v4848_v62  ;;  %v6258_v10 = vadd.f32 1.0, %v7842_v46 }
 0x54e   :  { %7843 = vtanh.f32 %v6195_v9  ;;  %v6100_v7 = vmul.f32 %v5978_v13, %v5978_v13  ;;  %v6068_v40 = vmul.f32 0.7978846, %v5978_v13  ;;  %v6036_v30 = vmul.f32 0.5, %v5978_v13 }
 0x54f   :  { %4889 = vst.msk [vmem:[%s11898_s9 + $0x2d0] sm:$0xff] %vm1622_vm1, %v4849_v3  ;;  %v6290_v20 = vmul.f32 %v6258_v10, %v6034_v36  ;;  %v11715_v36 = vld [vmem:[%s11897_s8] ss:$0 sm:$0xff] }
 0x550   :  { %v6132_v28 = vmul.f32 0.044715, %v6100_v7 }
 0x552   :  { %v6164_v63 = vadd.f32 1.0, %v6132_v28 }
 0x553   :  { %v5979_v0 = vpop.f32.mrf.mxu2 }
 0x554   :  { %v4850_v24 = vpop.f32.mrf.mxu3  ;;  %v7844_v11 = vpop.eup %7843  ;;  %v5980_v5 = vadd.f32 %v5979_v0, %v11470_v35  ;;  %v6196_v4 = vmul.f32 %v6164_v63, %v6068_v40 }
 0x555   :  { %v4851_v27 = vadd.f32 %v11521_v16, %v4850_v24  ;;  %v6259_v38 = vadd.f32 1.0, %v7844_v11 }
 0x556   :  { %v6101_v23 = vmul.f32 %v5980_v5, %v5980_v5  ;;  %7845 = vtanh.f32 %v6196_v4  ;;  %v6069_v12 = vmul.f32 0.7978846, %v5980_v5  ;;  %v6037_v43 = vmul.f32 0.5, %v5980_v5 }
 0x557   :  { %4890 = vst.msk [vmem:[%s11898_s9 + $0x2d8] sm:$0xff] %vm1622_vm1, %v4851_v27  ;;  %v6291_v48 = vmul.f32 %v6259_v38, %v6035_v55 }
 0x558   :  { %v6133_v45 = vmul.f32 0.044715, %v6101_v23 }
 0x559   :  { %v6316_v52 = vpack.c.bf16 %v6291_v48, %v6290_v20 }
 0x55a   :  { %v6165_v8 = vadd.f32 1.0, %v6133_v45 }
 0x55b   :  { %v5982_v41 = vpop.f32.mrf.mxu2  ;;  %6432 = vmatmul.bf16.gmra.mxu3 %v6316_v52 }
 0x55c   :  { %v4853_v22 = vpop.f32.mrf.mxu3  ;;  %v6197_v44 = vmul.f32 %v6165_v8, %v6069_v12  ;;  %v5983_v29 = vadd.f32 %v5982_v41, %v11470_v35  ;;  %v7846_v58 = vpop.eup %7845 }
 0x55d   :  { %v4854_v32 = vadd.f32 %v11521_v16, %v4853_v22  ;;  %v6260_v17 = vadd.f32 1.0, %v7846_v58 }
 0x55e   :  { %7847 = vtanh.f32 %v6197_v44  ;;  %v6102_v53 = vmul.f32 %v5983_v29, %v5983_v29  ;;  %v6070_v57 = vmul.f32 0.7978846, %v5983_v29  ;;  %v6038_v28 = vmul.f32 0.5, %v5983_v29 }
 0x55f   :  { %4891 = vst.msk [vmem:[%s11898_s9 + $0x2e0] sm:$0xff] %vm1622_vm1, %v4854_v32  ;;  %v6292_v59 = vmul.f32 %v6260_v17, %v6036_v30 }
 0x560   :  { %v6134_v14 = vmul.f32 0.044715, %v6102_v53 }
 0x562   :  { %v6166_v50 = vadd.f32 1.0, %v6134_v14 }
 0x563   :  { %v5984_v60 = vpop.f32.mrf.mxu2 }
 0x564   :  { %v4855_v54 = vpop.f32.mrf.mxu3  ;;  %v7848_v56 = vpop.eup %7847  ;;  %v5985_v47 = vadd.f32 %v5984_v60, %v11470_v35  ;;  %v6198_v18 = vmul.f32 %v6166_v50, %v6070_v57 }
 0x565   :  { %v4856_v1 = vadd.f32 %v11521_v16, %v4855_v54  ;;  %v6261_v25 = vadd.f32 1.0, %v7848_v56 }
 0x566   :  { %v6103_v2 = vmul.f32 %v5985_v47, %v5985_v47  ;;  %7849 = vtanh.f32 %v6198_v18  ;;  %v6071_v33 = vmul.f32 0.7978846, %v5985_v47  ;;  %v6039_v63 = vmul.f32 0.5, %v5985_v47 }
 0x567   :  { %4892 = vst.msk [vmem:[%s11898_s9 + $0x2e8] sm:$0xff] %vm1622_vm1, %v4856_v1  ;;  %v6293_v26 = vmul.f32 %v6261_v25, %v6037_v43 }
 0x568   :  { %v6135_v42 = vmul.f32 0.044715, %v6103_v2 }
 0x569   :  { %v6317_v61 = vpack.c.bf16 %v6293_v26, %v6292_v59 }
 0x56a   :  { %v6167_v37 = vadd.f32 1.0, %v6135_v42 }
 0x56b   :  { %v5987_v21 = vpop.f32.mrf.mxu2  ;;  %6437 = vmatmul.bf16.gmra.mxu3 %v6317_v61 }
 0x56c   :  { %v4858_v19 = vpop.f32.mrf.mxu3  ;;  %v6199_v49 = vmul.f32 %v6167_v37, %v6071_v33  ;;  %v5988_v34 = vadd.f32 %v5987_v21, %v11470_v35  ;;  %v7850_v31 = vpop.eup %7849 }
 0x56d   :  { %v4859_v6 = vadd.f32 %v11521_v16, %v4858_v19  ;;  %v6262_v13 = vadd.f32 1.0, %v7850_v31 }
 0x56e   :  { %7851 = vtanh.f32 %v6199_v49  ;;  %v6104_v39 = vmul.f32 %v5988_v34, %v5988_v34  ;;  %v6072_v0 = vmul.f32 0.7978846, %v5988_v34  ;;  %v6040_v60 = vmul.f32 0.5, %v5988_v34 }
 0x56f   :  { %4893 = vst.msk [vmem:[%s11898_s9 + $0x2f0] sm:$0xff] %vm1622_vm1, %v4859_v6  ;;  %v6294_v40 = vmul.f32 %v6262_v13, %v6038_v28 }
 0x570   :  { %v6136_v51 = vmul.f32 0.044715, %v6104_v39 }
 0x572   :  { %v6168_v15 = vadd.f32 1.0, %v6136_v51 }
 0x573   :  { %v5989_v62 = vpop.f32.mrf.mxu2 }
 0x574   :  { %v4860_v9 = vpop.f32.mrf.mxu3  ;;  %v7852_v3 = vpop.eup %7851  ;;  %v5990_v7 = vadd.f32 %v5989_v62, %v11470_v35  ;;  %v6200_v11 = vmul.f32 %v6168_v15, %v6072_v0 }
 0x575   :  { %v4861_v46 = vadd.f32 %v11521_v16, %v4860_v9  ;;  %v6263_v24 = vadd.f32 1.0, %v7852_v3 }
 0x576   :  { %v6105_v10 = vmul.f32 %v5990_v7, %v5990_v7  ;;  %v6073_v55 = vmul.f32 0.7978846, %v5990_v7  ;;  %7853 = vtanh.f32 %v6200_v11  ;;  %v6041_v54 = vmul.f32 0.5, %v5990_v7 }
 0x577   :  { %4894 = vst.msk [vmem:[%s11898_s9 + $0x2f8] sm:$0xff] %vm1622_vm1, %v4861_v46  ;;  %v6295_v5 = vmul.f32 %v6263_v24, %v6039_v63 }
 0x578   :  { %v6137_v27 = vmul.f32 0.044715, %v6105_v10 }
 0x579   :  { %v6318_v16 = vpack.c.bf16 %v6295_v5, %v6294_v40 }
 0x57a   :  { %v6169_v38 = vadd.f32 1.0, %v6137_v27 }
 0x57b   :  { %v5992_v20 = vpop.f32.mrf.mxu2  ;;  %6442 = vmatmul.bf16.gmra.mxu3 %v6318_v16 }
 0x57c   :  { %v6403_v4 = vpop.f32.mrf.mxu3  ;;  %v6201_v23 = vmul.f32 %v6169_v38, %v6073_v55  ;;  %v5993_v45 = vadd.f32 %v5992_v20, %v11470_v35  ;;  %v7854_v12 = vpop.eup %7853 }
 0x57d   :  { %v6404_v48 = vadd.f32 %v11715_v36, %v6403_v4  ;;  %v6264_v53 = vadd.f32 1.0, %v7854_v12 }
 0x57e   :  { %7855 = vtanh.f32 %v6201_v23  ;;  %v6106_v52 = vmul.f32 %v5993_v45, %v5993_v45  ;;  %v6074_v58 = vmul.f32 0.7978846, %v5993_v45  ;;  %v6042_v39 = vmul.f32 0.5, %v5993_v45 }
 0x57f   :  { %6483 = vst.msk [vmem:[%s11898_s9 + $0x300] sm:$0xff] %vm1622_vm1, %v6404_v48  ;;  %v6296_v57 = vmul.f32 %v6264_v53, %v6040_v60 }
 0x580   :  { %v6138_v8 = vmul.f32 0.044715, %v6106_v52 }
 0x582   :  { %v6170_v41 = vadd.f32 1.0, %v6138_v8 }
 0x583   :  { %v5994_v29 = vpop.f32.mrf.mxu2 }
 0x584   :  { %v6405_v22 = vpop.f32.mrf.mxu3  ;;  %v7856_v44 = vpop.eup %7855  ;;  %v5995_v14 = vadd.f32 %v5994_v29, %v11470_v35  ;;  %v6202_v17 = vmul.f32 %v6170_v41, %v6074_v58 }
 0x585   :  { %v6406_v32 = vadd.f32 %v11715_v36, %v6405_v22  ;;  %v6265_v50 = vadd.f32 1.0, %v7856_v44 }
 0x586   :  { %v6107_v56 = vmul.f32 %v5995_v14, %v5995_v14  ;;  %7857 = vtanh.f32 %v6202_v17  ;;  %v6075_v43 = vmul.f32 0.7978846, %v5995_v14  ;;  %v6043_v31 = vmul.f32 0.5, %v5995_v14 }
 0x587   :  { %6484 = vst.msk [vmem:[%s11898_s9 + $0x308] sm:$0xff] %vm1622_vm1, %v6406_v32  ;;  %v6297_v47 = vmul.f32 %v6265_v50, %v6041_v54 }
 0x588   :  { %v6139_v1 = vmul.f32 0.044715, %v6107_v56 }
 0x589   :  { %v6319_v30 = vpack.c.bf16 %v6297_v47, %v6296_v57 }
 0x58a   :  { %v6171_v25 = vadd.f32 1.0, %v6139_v1 }
 0x58b   :  { %v5997_v18 = vpop.f32.mrf.mxu2  ;;  %6447 = vmatmul.bf16.gmra.mxu3 %v6319_v30 }
 0x58c   :  { %v6203_v2 = vmul.f32 %v6171_v25, %v6075_v43  ;;  %v5998_v59 = vadd.f32 %v5997_v18, %v11470_v35  ;;  %v6408_v42 = vpop.f32.mrf.mxu3  ;;  %v7858_v33 = vpop.eup %7857 }
 0x58d   :  { %v6409_v61 = vadd.f32 %v11715_v36, %v6408_v42  ;;  %v6266_v49 = vadd.f32 1.0, %v7858_v33 }
 0x58e   :  { %7859 = vtanh.f32 %v6203_v2  ;;  %v6108_v26 = vmul.f32 %v5998_v59, %v5998_v59  ;;  %v6076_v51 = vmul.f32 0.7978846, %v5998_v59  ;;  %v6044_v8 = vmul.f32 0.5, %v5998_v59 }
 0x58f   :  { %6485 = vst.msk [vmem:[%s11898_s9 + $0x310] sm:$0xff] %vm1622_vm1, %v6409_v61  ;;  %v6298_v7 = vmul.f32 %v6266_v49, %v6042_v39 }
 0x590   :  { %v6140_v37 = vmul.f32 0.044715, %v6108_v26 }
 0x592   :  { %v6172_v21 = vadd.f32 1.0, %v6140_v37 }
 0x593   :  { %v5999_v19 = vpop.f32.mrf.mxu2 }
 0x594   :  { %v7860_v34 = vpop.eup %7859  ;;  %v6000_v6 = vadd.f32 %v5999_v19, %v11470_v35  ;;  %v6410_v9 = vpop.f32.mrf.mxu3  ;;  %v6204_v13 = vmul.f32 %v6172_v21, %v6076_v51 }
 0x595   :  { %v6267_v15 = vadd.f32 1.0, %v7860_v34  ;;  %v6411_v3 = vadd.f32 %v11715_v36, %v6410_v9 }
 0x596   :  { %v6109_v62 = vmul.f32 %v6000_v6, %v6000_v6  ;;  %v6077_v0 = vmul.f32 0.7978846, %v6000_v6  ;;  %7861 = vtanh.f32 %v6204_v13  ;;  %v6045_v41 = vmul.f32 0.5, %v6000_v6 }
 0x597   :  { %v6299_v46 = vmul.f32 %v6267_v15, %v6043_v31  ;;  %6486 = vst.msk [vmem:[%s11898_s9 + $0x318] sm:$0xff] %vm1622_vm1, %v6411_v3 }
 0x598   :  { %v6141_v28 = vmul.f32 0.044715, %v6109_v62 }
 0x599   :  { %v6320_v63 = vpack.c.bf16 %v6299_v46, %v6298_v7 }
 0x59a   :  { %v6173_v24 = vadd.f32 1.0, %v6141_v28 }
 0x59b   :  { %v6002_v11 = vpop.f32.mrf.mxu2  ;;  %6452 = vmatmul.bf16.gmra.mxu3 %v6320_v63 }
 0x59c   :  { %v6205_v10 = vmul.f32 %v6173_v24, %v6077_v0  ;;  %v6003_v40 = vadd.f32 %v6002_v11, %v11470_v35  ;;  %v6413_v5 = vpop.f32.mrf.mxu3  ;;  %v7862_v55 = vpop.eup %7861 }
 0x59d   :  { %v6414_v16 = vadd.f32 %v11715_v36, %v6413_v5  ;;  %v6268_v48 = vadd.f32 1.0, %v7862_v55 }
 0x59e   :  { %7863 = vtanh.f32 %v6205_v10  ;;  %v6110_v27 = vmul.f32 %v6003_v40, %v6003_v40  ;;  %v6078_v45 = vmul.f32 0.7978846, %v6003_v40  ;;  %v6046_v33 = vmul.f32 0.5, %v6003_v40 }
 0x59f   :  { %6487 = vst.msk [vmem:[%s11898_s9 + $0x320] sm:$0xff] %vm1622_vm1, %v6414_v16  ;;  %v6300_v53 = vmul.f32 %v6268_v48, %v6044_v8 }
 0x5a0   :  { %v6142_v38 = vmul.f32 0.044715, %v6110_v27 }
 0x5a2   :  { %v6174_v4 = vadd.f32 1.0, %v6142_v38 }
 0x5a3   :  { %v6004_v20 = vpop.f32.mrf.mxu2 }
 0x5a4   :  { %v7864_v23 = vpop.eup %7863  ;;  %v6005_v52 = vadd.f32 %v6004_v20, %v11470_v35  ;;  %v6415_v22 = vpop.f32.mrf.mxu3  ;;  %v6206_v44 = vmul.f32 %v6174_v4, %v6078_v45 }
 0x5a5   :  { %v6269_v12 = vadd.f32 1.0, %v7864_v23  ;;  %v6416_v32 = vadd.f32 %v11715_v36, %v6415_v22 }
 0x5a6   :  { %v6111_v29 = vmul.f32 %v6005_v52, %v6005_v52  ;;  %7865 = vtanh.f32 %v6206_v44  ;;  %v6079_v60 = vmul.f32 0.7978846, %v6005_v52  ;;  %v6047_v37 = vmul.f32 0.5, %v6005_v52 }
 0x5a7   :  { %v6301_v58 = vmul.f32 %v6269_v12, %v6045_v41  ;;  %6488 = vst.msk [vmem:[%s11898_s9 + $0x328] sm:$0xff] %vm1622_vm1, %v6416_v32 }
 0x5a8   :  { %v6143_v14 = vmul.f32 0.044715, %v6111_v29 }
 0x5a9   :  { %v6321_v50 = vpack.c.bf16 %v6301_v58, %v6300_v53 }
 0x5aa   :  { %v6175_v54 = vadd.f32 1.0, %v6143_v14 }
 0x5ab   :  { %v6007_v17 = vpop.f32.mrf.mxu2  ;;  %6457 = vmatmul.bf16.gmra.mxu3 %v6321_v50 }
 0x5ac   :  { %v6207_v56 = vmul.f32 %v6175_v54, %v6079_v60  ;;  %v6008_v57 = vadd.f32 %v6007_v17, %v11470_v35  ;;  %v7866_v43 = vpop.eup %7865 }
 0x5ad   :  { %v6270_v59 = vadd.f32 1.0, %v7866_v43 }
 0x5ae   :  { %v6418_v47 = vpop.f32.mrf.mxu3  ;;  %7867 = vtanh.f32 %v6207_v56  ;;  %v6112_v1 = vmul.f32 %v6008_v57, %v6008_v57  ;;  %v6080_v42 = vmul.f32 0.7978846, %v6008_v57  ;;  %v6048_v55 = vmul.f32 0.5, %v6008_v57 }
 0x5af   :  { %v6419_v30 = vadd.f32 %v11715_v36, %v6418_v47  ;;  %v6302_v39 = vmul.f32 %v6270_v59, %v6046_v33 }
 0x5b0   :  { %v6144_v25 = vmul.f32 0.044715, %v6112_v1 }
 0x5b1   :  { %6489 = vst.msk [vmem:[%s11898_s9 + $0x330] sm:$0xff] %vm1622_vm1, %v6419_v30 }
 0x5b2   :  { %v6176_v18 = vadd.f32 1.0, %v6144_v25 }
 0x5b3   :  { %v6009_v2 = vpop.f32.mrf.mxu2 }
 0x5b4   :  { %v7868_v26 = vpop.eup %7867  ;;  %v6010_v61 = vadd.f32 %v6009_v2, %v11470_v35  ;;  %v6208_v49 = vmul.f32 %v6176_v18, %v6080_v42 }
 0x5b5   :  { %v6271_v19 = vadd.f32 1.0, %v7868_v26 }
 0x5b6   :  { %v6420_v21 = vpop.f32.mrf.mxu3  ;;  %v6113_v34 = vmul.f32 %v6010_v61, %v6010_v61  ;;  %7869 = vtanh.f32 %v6208_v49  ;;  %v6081_v62 = vmul.f32 0.7978846, %v6010_v61  ;;  %v6049_v38 = vmul.f32 0.5, %v6010_v61 }
 0x5b7   :  { %v6421_v6 = vadd.f32 %v11715_v36, %v6420_v21  ;;  %v6303_v31 = vmul.f32 %v6271_v19, %v6047_v37 }
 0x5b8   :  { %v6145_v51 = vmul.f32 0.044715, %v6113_v34 }
 0x5b9   :  { %6490 = vst.msk [vmem:[%s11898_s9 + $0x338] sm:$0xff] %vm1622_vm1, %v6421_v6  ;;  %v6322_v15 = vpack.c.bf16 %v6303_v31, %v6302_v39 }
 0x5ba   :  { %v6177_v9 = vadd.f32 1.0, %v6145_v51 }
 0x5bb   :  { %v6012_v13 = vpop.f32.mrf.mxu2  ;;  %6462 = vmatmul.bf16.gmra.mxu3 %v6322_v15 }
 0x5bc   :  { %v6209_v3 = vmul.f32 %v6177_v9, %v6081_v62  ;;  %v6013_v7 = vadd.f32 %v6012_v13, %v11470_v35  ;;  %v7870_v0 = vpop.eup %7869 }
 0x5bd   :  { %v6272_v40 = vadd.f32 1.0, %v7870_v0 }
 0x5be   :  { %v6423_v46 = vpop.f32.mrf.mxu3  ;;  %7871 = vtanh.f32 %v6209_v3  ;;  %v6114_v28 = vmul.f32 %v6013_v7, %v6013_v7  ;;  %v6082_v27 = vmul.f32 0.7978846, %v6013_v7  ;;  %v6050_v43 = vmul.f32 0.5, %v6013_v7 }
 0x5bf   :  { %v6424_v63 = vadd.f32 %v11715_v36, %v6423_v46  ;;  %v6304_v52 = vmul.f32 %v6272_v40, %v6048_v55 }
 0x5c0   :  { %v6146_v24 = vmul.f32 0.044715, %v6114_v28 }
 0x5c1   :  { %6491 = vst.msk [vmem:[%s11898_s9 + $0x340] sm:$0xff] %vm1622_vm1, %v6424_v63 }
 0x5c2   :  { %v6178_v10 = vadd.f32 1.0, %v6146_v24 }
 0x5c3   :  { %v6014_v11 = vpop.f32.mrf.mxu2 }
 0x5c4   :  { %v7872_v5 = vpop.eup %7871  ;;  %v6015_v16 = vadd.f32 %v6014_v11, %v11470_v35  ;;  %v6210_v20 = vmul.f32 %v6178_v10, %v6082_v27 }
 0x5c5   :  { %v6273_v23 = vadd.f32 1.0, %v7872_v5 }
 0x5c6   :  { %v6425_v4 = vpop.f32.mrf.mxu3  ;;  %v6115_v48 = vmul.f32 %v6015_v16, %v6015_v16  ;;  %7873 = vtanh.f32 %v6210_v20  ;;  %v6083_v22 = vmul.f32 0.7978846, %v6015_v16  ;;  %v6051_v25 = vmul.f32 0.5, %v6015_v16 }
 0x5c7   :  { %v6426_v45 = vadd.f32 %v11715_v36, %v6425_v4  ;;  %v6305_v12 = vmul.f32 %v6273_v23, %v6049_v38 }
 0x5c8   :  { %v6147_v8 = vmul.f32 0.044715, %v6115_v48 }
 0x5c9   :  { %6492 = vst.msk [vmem:[%s11898_s9 + $0x348] sm:$0xff] %vm1622_vm1, %v6426_v45  ;;  %v6323_v41 = vpack.c.bf16 %v6305_v12, %v6304_v52 }
 0x5ca   :  { %v6179_v44 = vadd.f32 1.0, %v6147_v8 }
 0x5cb   :  { %v6017_v29 = vpop.f32.mrf.mxu2  ;;  %6467 = vmatmul.bf16.gmra.mxu3 %v6323_v41 }
 0x5cc   :  { %v6211_v32 = vmul.f32 %v6179_v44, %v6083_v22  ;;  %v6018_v53 = vadd.f32 %v6017_v29, %v11470_v35  ;;  %v7874_v60 = vpop.eup %7873 }
 0x5cd   :  { %v6274_v57 = vadd.f32 1.0, %v7874_v60 }
 0x5ce   :  { %7875 = vtanh.f32 %v6211_v32  ;;  %v6116_v58 = vmul.f32 %v6018_v53, %v6018_v53  ;;  %v6428_v14 = vpop.f32.mrf.mxu3  ;;  %v6084_v1 = vmul.f32 0.7978846, %v6018_v53  ;;  %v6052_v15 = vmul.f32 0.5, %v6018_v53 }
 0x5cf   :  { %v6429_v50 = vadd.f32 %v11715_v36, %v6428_v14  ;;  %v6306_v61 = vmul.f32 %v6274_v57, %v6050_v43 }
 0x5d0   :  { %v6148_v54 = vmul.f32 0.044715, %v6116_v58 }
 0x5d1   :  { %6493 = vst.msk [vmem:[%s11898_s9 + $0x350] sm:$0xff] %vm1622_vm1, %v6429_v50 }
 0x5d2   :  { %v6180_v17 = vadd.f32 1.0, %v6148_v54 }
 0x5d3   :  { %v6019_v56 = vpop.f32.mrf.mxu2 }
 0x5d4   :  { %v7876_v47 = vpop.eup %7875  ;;  %v6020_v30 = vadd.f32 %v6019_v56, %v11470_v35  ;;  %v6212_v2 = vmul.f32 %v6180_v17, %v6084_v1 }
 0x5d5   :  { %v6275_v18 = vadd.f32 1.0, %v7876_v47 }
 0x5d6   :  { %v6117_v59 = vmul.f32 %v6020_v30, %v6020_v30  ;;  %v6430_v26 = vpop.f32.mrf.mxu3  ;;  %7877 = vtanh.f32 %v6212_v2  ;;  %v6085_v19 = vmul.f32 0.7978846, %v6020_v30  ;;  %v6053_v62 = vmul.f32 0.5, %v6020_v30 }
 0x5d7   :  { %v6431_v42 = vadd.f32 %v11715_v36, %v6430_v26  ;;  %v6307_v33 = vmul.f32 %v6275_v18, %v6051_v25 }
 0x5d8   :  { %v6149_v37 = vmul.f32 0.044715, %v6117_v59 }
 0x5d9   :  { %6494 = vst.msk [vmem:[%s11898_s9 + $0x358] sm:$0xff] %vm1622_vm1, %v6431_v42  ;;  %v6324_v21 = vpack.c.bf16 %v6307_v33, %v6306_v61 }
 0x5da   :  { %v6181_v35 = vadd.f32 1.0, %v6149_v37 }
 0x5db   :  { %6472 = vmatmul.bf16.gmra.mxu3 %v6324_v21 }
 0x5dc   :  { %v6213_v49 = vmul.f32 %v6181_v35, %v6085_v19  ;;  %v7878_v39 = vpop.eup %7877 }
 0x5dd   :  { %v6276_v31 = vadd.f32 1.0, %v7878_v39 }
 0x5de   :  { %7879 = vtanh.f32 %v6213_v49  ;;  %v6433_v34 = vpop.f32.mrf.mxu3 }
 0x5df   :  { %v6434_v6 = vadd.f32 %v11715_v36, %v6433_v34  ;;  %v6308_v7 = vmul.f32 %v6276_v31, %v6052_v15 }
 0x5e1   :  { %6495 = vst.msk [vmem:[%s11898_s9 + $0x360] sm:$0xff] %vm1622_vm1, %v6434_v6 }
 0x5e4   :  { %v7880_v51 = vpop.eup %7879 }
 0x5e5   :  { %v6277_v9 = vadd.f32 1.0, %v7880_v51 }
 0x5e6   :  { %v6435_v13 = vpop.f32.mrf.mxu3 }
 0x5e7   :  { %v6436_v3 = vadd.f32 %v11715_v36, %v6435_v13  ;;  %v6309_v46 = vmul.f32 %v6277_v9, %v6053_v62 }
 0x5e9   :  { %6496 = vst.msk [vmem:[%s11898_s9 + $0x368] sm:$0xff] %vm1622_vm1, %v6436_v3  ;;  %v6325_v28 = vpack.c.bf16 %v6309_v46, %v6308_v7 }
 0x5eb   :  { %6477 = vmatmul.bf16.gmra.mxu3 %v6325_v28 }
 0x5ee   :  { %v6438_v63 = vpop.f32.mrf.mxu3 }
 0x5ef   :  { %v6439_v0 = vadd.f32 %v11715_v36, %v6438_v63 }
 0x5f1   :  { %6497 = vst.msk [vmem:[%s11898_s9 + $0x370] sm:$0xff] %vm1622_vm1, %v6439_v0 }
 0x5f6   :  { %v6440_v24 = vpop.f32.mrf.mxu3 }
 0x5f7   :  { %v6441_v10 = vadd.f32 %v11715_v36, %v6440_v24 }
 0x5f9   :  { %6498 = vst.msk [vmem:[%s11898_s9 + $0x378] sm:$0xff] %vm1622_vm1, %v6441_v10 }
 0x5fe   :  { %v6443_v11 = vpop.f32.mrf.mxu3 }
 0x5ff   :  { %v6444_v40 = vadd.f32 %v11715_v36, %v6443_v11 }
 0x601   :  { %6499 = vst.msk [vmem:[%s11898_s9 + $0x380] sm:$0xff] %vm1622_vm1, %v6444_v40 }
 0x606   :  { %v6445_v5 = vpop.f32.mrf.mxu3 }
 0x607   :  { %v6446_v27 = vadd.f32 %v11715_v36, %v6445_v5 }
 0x609   :  { %6500 = vst.msk [vmem:[%s11898_s9 + $0x388] sm:$0xff] %vm1622_vm1, %v6446_v27 }
 0x60e   :  { %v6448_v16 = vpop.f32.mrf.mxu3 }
 0x60f   :  { %v6449_v55 = vadd.f32 %v11715_v36, %v6448_v16 }
 0x611   :  { %6501 = vst.msk [vmem:[%s11898_s9 + $0x390] sm:$0xff] %vm1622_vm1, %v6449_v55 }
 0x616   :  { %v6450_v38 = vpop.f32.mrf.mxu3 }
 0x617   :  { %v6451_v4 = vadd.f32 %v11715_v36, %v6450_v38 }
 0x619   :  { %6502 = vst.msk [vmem:[%s11898_s9 + $0x398] sm:$0xff] %vm1622_vm1, %v6451_v4 }
 0x61e   :  { %v6453_v23 = vpop.f32.mrf.mxu3 }
 0x61f   :  { %v6454_v20 = vadd.f32 %v11715_v36, %v6453_v23 }
 0x621   :  { %6503 = vst.msk [vmem:[%s11898_s9 + $0x3a0] sm:$0xff] %vm1622_vm1, %v6454_v20 }
 0x626   :  { %v6455_v48 = vpop.f32.mrf.mxu3 }
 0x627   :  { %v6456_v45 = vadd.f32 %v11715_v36, %v6455_v48 }
 0x629   :  { %6504 = vst.msk [vmem:[%s11898_s9 + $0x3a8] sm:$0xff] %vm1622_vm1, %v6456_v45 }
 0x62e   :  { %v6458_v52 = vpop.f32.mrf.mxu3 }
 0x62f   :  { %v6459_v12 = vadd.f32 %v11715_v36, %v6458_v52 }
 0x631   :  { %6505 = vst.msk [vmem:[%s11898_s9 + $0x3b0] sm:$0xff] %vm1622_vm1, %v6459_v12 }
 0x636   :  { %v6460_v8 = vpop.f32.mrf.mxu3 }
 0x637   :  { %v6461_v41 = vadd.f32 %v11715_v36, %v6460_v8 }
 0x639   :  { %6506 = vst.msk [vmem:[%s11898_s9 + $0x3b8] sm:$0xff] %vm1622_vm1, %v6461_v41 }
 0x63e   :  { %v6463_v22 = vpop.f32.mrf.mxu3 }
 0x63f   :  { %v6464_v44 = vadd.f32 %v11715_v36, %v6463_v22 }
 0x641   :  { %6507 = vst.msk [vmem:[%s11898_s9 + $0x3c0] sm:$0xff] %vm1622_vm1, %v6464_v44 }
 0x646   :  { %v6465_v29 = vpop.f32.mrf.mxu3 }
 0x647   :  { %v6466_v32 = vadd.f32 %v11715_v36, %v6465_v29 }
 0x649   :  { %6508 = vst.msk [vmem:[%s11898_s9 + $0x3c8] sm:$0xff] %vm1622_vm1, %v6466_v32 }
 0x64e   :  { %v6468_v53 = vpop.f32.mrf.mxu3 }
 0x64f   :  { %v6469_v58 = vadd.f32 %v11715_v36, %v6468_v53 }
 0x651   :  { %6509 = vst.msk [vmem:[%s11898_s9 + $0x3d0] sm:$0xff] %vm1622_vm1, %v6469_v58 }
 0x656   :  { %v6470_v14 = vpop.f32.mrf.mxu3 }
 0x657   :  { %v6471_v50 = vadd.f32 %v11715_v36, %v6470_v14 }
 0x659   :  { %6510 = vst.msk [vmem:[%s11898_s9 + $0x3d8] sm:$0xff] %vm1622_vm1, %v6471_v50 }
 0x65e   :  { %v6473_v60 = vpop.f32.mrf.mxu3 }
 0x65f   :  { %v6474_v54 = vadd.f32 %v11715_v36, %v6473_v60 }
 0x661   :  { %6511 = vst.msk [vmem:[%s11898_s9 + $0x3e0] sm:$0xff] %vm1622_vm1, %v6474_v54 }
 0x666   :  { %v6475_v17 = vpop.f32.mrf.mxu3 }
 0x667   :  { %v6476_v56 = vadd.f32 %v11715_v36, %v6475_v17 }
 0x669   :  { %6512 = vst.msk [vmem:[%s11898_s9 + $0x3e8] sm:$0xff] %vm1622_vm1, %v6476_v56 }
 0x66e   :  { %v6478_v57 = vpop.f32.mrf.mxu3 }
 0x66f   :  { %v6479_v47 = vadd.f32 %v11715_v36, %v6478_v57 }
 0x671   :  { %6513 = vst.msk [vmem:[%s11898_s9 + $0x3f0] sm:$0xff] %vm1622_vm1, %v6479_v47 }
 0x676   :  { %v6480_v1 = vpop.f32.mrf.mxu3 }
 0x677   :  { %v6481_v30 = vadd.f32 %v11715_v36, %v6480_v1 }
 0x679   :  { %6514 = vst.msk [vmem:[%s11898_s9 + $0x3f8] sm:$0xff] %vm1622_vm1, %v6481_v30 }

</bundles_post_ra>
